<compile_context>
chip_gen: v7x
topology: tpu7x:2x2x1
jax: 0.10.0
libtpu: 0.0.40
codegen_flags: <defaults>
</compile_context>

<pallas_src>
import functools
import math

import numpy as np
import jax
import jax.numpy as jnp
from jax import lax
from jax.experimental import pallas as pl
from jax.experimental.pallas import tpu as pltpu

LAYER_IDS = (1, 3, 5, 7, 9, 11)
LAYER_STATS = {
    1:  {'entropy': 6.77, 'cv': 0.596, 'coverage': 0.992, 'mean': 1055.54, 'std': 629.35},
    3:  {'entropy': 6.19, 'cv': 1.658, 'coverage': 0.984, 'mean': 1055.54, 'std': 1750.22},
    5:  {'entropy': 6.32, 'cv': 1.180, 'coverage': 0.977, 'mean': 1055.54, 'std': 1245.64},
    7:  {'entropy': 6.06, 'cv': 1.413, 'coverage': 0.969, 'mean': 1055.54, 'std': 1491.90},
    9:  {'entropy': 5.99, 'cv': 1.514, 'coverage': 0.969, 'mean': 1055.54, 'std': 1598.10},
    11: {'entropy': 5.40, 'cv': 2.227, 'coverage': 0.953, 'mean': 1055.54, 'std': 2350.47},
}

_GELU_C = math.sqrt(2.0 / math.pi)


# ----------------------------- in-kernel math helpers -----------------------------

def _matmul_wt(x, w):
    """x @ w.T for 2D operands (contract last dims, PyTorch Linear layout)."""
    return lax.dot_general(x, w, (((1,), (1,)), ((), ())),
                           preferred_element_type=jnp.float32)


def _relu(x):
    return jnp.maximum(x, 0.0)


def _gelu(x):
    # tanh-form GELU: transcendental goes to the EUP slot instead of ~10 VALU ops.
    return 0.5 * x * (1.0 + jnp.tanh(_GELU_C * (x + 0.044715 * x * x * x)))


def _sigmoid(x):
    return pl.reciprocal(1.0 + jnp.exp(-x), approx=True)


def _attend_row(x, wq, bq, wk, bk, wv, bv, wo, bo, num_heads, head_dim):
    """Multi-head self-attention on one [T, D] row.

    wq/wk/wv/wo: [D, D] (PyTorch [out, in]); b*: [1, D].
    QKV are full-D matmuls; heads are lane slices; the output projection is a
    single [T, D] @ [D, D] matmul over the lane-concatenated head contexts.
    """
    scale = 1.0 / math.sqrt(head_dim)
    q = _matmul_wt(x, wq) + bq                       # [T, D]
    k = _matmul_wt(x, wk) + bk                       # [T, D]
    v = _matmul_wt(x, wv) + bv                       # [T, D]
    ctxs = []
    for h in range(num_heads):                       # static unroll, H small
        lo = h * head_dim
        hi = lo + head_dim
        qh = q[:, lo:hi]
        kh = k[:, lo:hi]
        vh = v[:, lo:hi]
        s = _matmul_wt(qh, kh) * scale               # [T, T] = qh @ kh.T
        s = s - jnp.max(s, axis=-1, keepdims=True)
        e = jnp.exp(s)
        p = e * pl.reciprocal(jnp.sum(e, axis=-1, keepdims=True), approx=True)
        ctxs.append(jnp.dot(p, vh, preferred_element_type=jnp.float32))   # [T, hd]
    ctx = jnp.concatenate(ctxs, axis=-1)             # [T, D]
    return _matmul_wt(ctx, wo) + bo                  # [T, D]


# ----------------------------- fused attention-stack kernel -----------------------------

def _fused_stack_kernel(x_ref, st_ref, sew_ref, seb_ref,
                        spw1, spb1, spw2, spb2,
                        lwq, lwk, lwv, lwo, lbq, lbk, lbv, lbo,
                        le1w, le1b, le2w, le2b, lng, lnb,
                        cwq, cwk, cwv, cwo, cbq, cbk, cbv, cbo,
                        seq_ref, sf_ref, *, num_heads, head_dim, num_layers):
    """Stats pipeline + full entropy-attention stack + cross-attention + mean pool.

    Everything stays resident in VMEM; no grid (all B rows in one invocation).
    """
    B = x_ref.shape[0]
    st = st_ref[...]                                                  # [B, 5]

    # ---- per-row stats embedding (VPU) + stats_processor MLP ----
    emb = jnp.sum(st[:, None, :] * sew_ref[...], axis=-1) + seb_ref[...]   # [B, D/4]
    hsp = _relu(_matmul_wt(emb, spw1[...]) + spb1[...])                    # [B, D/2]
    stats_feat = _matmul_wt(hsp, spw2[...]) + spb2[...]                    # [B, D]
    sf_ref[...] = stats_feat

    # ---- per-layer entropy scales, batched over rows (VPU / EUP, no MXU) ----
    sig_all = []
    for l in range(num_layers):
        h1 = _relu(jnp.sum(st[:, None, :] * le1w[l], axis=-1) + le1b[l])   # [B, D/4]
        z = jnp.sum(h1 * le2w[l], axis=-1, keepdims=True) + le2b[l]        # [B, 1]
        sig_all.append(_sigmoid(z))

    # ---- entropy-aware attention stack + cross attention + mean pool ----
    rows = []
    for b in range(B):                                                # static unroll
        xb = x_ref[b] + stats_feat[b:b + 1, :]                        # [T, D]
        for l in range(num_layers):
            att = _attend_row(xb, lwq[l], lbq[l], lwk[l], lbk[l],
                              lwv[l], lbv[l], lwo[l], lbo[l],
                              num_heads, head_dim)
            # residual + entropy scaling + LayerNorm(eps=1e-5)
            y = xb + att * sig_all[l][b:b + 1, 0:1]
            mu = jnp.mean(y, axis=-1, keepdims=True)
            var = jnp.mean((y - mu) ** 2, axis=-1, keepdims=True)
            xb = (y - mu) * lax.rsqrt(var + 1e-5) * lng[l] + lnb[l]
        catt = _attend_row(xb, cwq[...], cbq[...], cwk[...], cbk[...],
                           cwv[...], cbv[...], cwo[...], cbo[...],
                           num_heads, head_dim)
        # mean over context then seq == mean over flattened (seq*context) axis
        rows.append(jnp.mean(catt, axis=0, keepdims=True))            # [1, D]
    seq_ref[...] = jnp.concatenate(rows, axis=0)                      # [B, D]


def fused_stack(x0, target_stats, se_w_rows, se_b_rows, params, cfg):
    B, T, D = x0.shape
    H = cfg['num_heads']
    hd = D // H
    L = cfg['num_attention_layers']
    sp = params['stats_processor']
    a = params['attn_stack']
    c = params['cross_attention']
    args = (x0, target_stats, se_w_rows, se_b_rows,
            sp['w1'], sp['b1'], sp['w2'], sp['b2'],
            a['wq'], a['wk'], a['wv'], a['wo'],
            a['bq'], a['bk'], a['bv'], a['bo'],
            a['e1w'], a['e1b'], a['e2w'], a['e2b'],
            a['ln_g'], a['ln_b'],
            c['wq'], c['wk'], c['wv'], c['wo'],
            c['bq'], c['bk'], c['bv'], c['bo'])
    return pl.pallas_call(
        functools.partial(_fused_stack_kernel,
                          num_heads=H, head_dim=hd, num_layers=L),
        out_shape=(jax.ShapeDtypeStruct((B, D), jnp.float32),
                   jax.ShapeDtypeStruct((B, D), jnp.float32)),
    )(*args)


# ----------------------------- fused, shape-stable tail kernel -----------------------------

def _tail_kernel(gidx_ref, is3_ref,                 # scalar-prefetch (SMEM)
                 sr_ref, sf_ref, st_ref,
                 p1w, p1b, p2w, p2b, p3w, p3b,
                 pr1w, pr1b, pr2w, pr2b,
                 a1wr, a1ws, a1b, a2w, a2b,
                 c1wr, c1ws, c1b, c2w, c2b,
                 out_ref):
    """Per-row heads: layer predictor (padded 3-stage template, depth selected by
    is3), stat prior, adaptive mixing, confidence.  One grid step per row; the
    row's layer-id weight blocks were already DMA'd in via the index_maps."""
    b = pl.program_id(0)
    sr = sr_ref[0]                                   # [1, D]
    sf = sf_ref[0]                                   # [1, D]
    stv = st_ref[0]                                  # [1, 5]

    # layer-specific predictor (GELU between stages, eval-mode dropout = id)
    h1 = _gelu(_matmul_wt(sr, p1w[0]) + p1b[0])      # [1, ff]
    h2 = _gelu(_matmul_wt(h1, p2w[0]) + p2b[0])      # [1, ff]
    f3 = is3_ref[b].astype(jnp.float32)              # 1.0 if 3-stage predictor
    hl = f3 * h2 + (1.0 - f3) * h1
    logits = _matmul_wt(hl, p3w[0]) + p3b[0]         # [1, E]

    # statistical prior network
    p = _relu(_matmul_wt(sf, pr1w[0]) + pr1b[0])
    priors = _matmul_wt(p, pr2w[0]) + pr2b[0]        # [1, E]

    # adaptive weights: softmax(Linear(ReLU(Linear([seq_repr, stats]))))
    a = _relu(_matmul_wt(sr, a1wr[0]) + _matmul_wt(stv, a1ws[0]) + a1b[0])
    alog = _matmul_wt(a, a2w[0]) + a2b[0]            # [1, 2]
    alog = alog - jnp.max(alog, axis=-1, keepdims=True)
    ae = jnp.exp(alog)
    aw = ae * pl.reciprocal(jnp.sum(ae, axis=-1, keepdims=True), approx=True)

    # confidence: sigmoid(Linear(ReLU(Linear([seq_repr, stats]))))  (shared weights)
    cc = _relu(_matmul_wt(sr, c1wr[...]) + _matmul_wt(stv, c1ws[...]) + c1b[...])
    conf = _sigmoid(_matmul_wt(cc, c2w[...]) + c2b[...])             # [1, 1]

    final = aw[:, 0:1] * logits + aw[:, 1:2] * priors
    # lane-dense packed output: [final_logits | priors | adaptive_w | confidence]
    out_ref[0] = jnp.concatenate([final, priors, aw, conf], axis=-1)


def tail_call(gidx, is3, seq_repr, stats_feat, target_stats, params, cfg):
    B, D = seq_repr.shape
    E = cfg['num_experts']
    ff = cfg['ff_dim']
    h2 = D // 2
    OUT = 2 * E + 3

    sr3 = seq_repr.reshape(B, 1, D)
    sf3 = stats_feat.reshape(B, 1, D)
    st3 = target_stats.reshape(B, 1, 5)

    t = params['tail']
    c = params['confidence']

    def row_spec(last):
        return pl.BlockSpec((1, 1, last), lambda b, g, f: (b, 0, 0))

    def sel_spec(shape):
        return pl.BlockSpec((1,) + shape, lambda b, g, f: (g[b], 0, 0))

    def const_spec(arr):
        nd = arr.ndim
        return pl.BlockSpec(arr.shape, lambda b, g, f, _nd=nd: (0,) * _nd)

    in_specs = [
        row_spec(D), row_spec(D), row_spec(5),
        # predictor (padded template)
        sel_spec((ff, D)), sel_spec((1, ff)),
        sel_spec((ff, ff)), sel_spec((1, ff)),
        sel_spec((E, ff)), sel_spec((1, E)),
        # stat-prior net
        sel_spec((h2, D)), sel_spec((1, h2)),
        sel_spec((E, h2)), sel_spec((1, E)),
        # adaptive-weight net (first weight split into repr / stats parts)
        sel_spec((h2, D)), sel_spec((h2, 5)), sel_spec((1, h2)),
        sel_spec((2, h2)), sel_spec((1, 2)),
        # confidence (shared)
        const_spec(c['w1r']), const_spec(c['w1s']), const_spec(c['b1']),
        const_spec(c['w2']), const_spec(c['b2']),
    ]
    args = [sr3, sf3, st3,
            t['p1w'], t['p1b'], t['p2w'], t['p2b'], t['p3w'], t['p3b'],
            t['pr1w'], t['pr1b'], t['pr2w'], t['pr2b'],
            t['a1wr'], t['a1ws'], t['a1b'], t['a2w'], t['a2b'],
            c['w1r'], c['w1s'], c['b1'], c['w2'], c['b2']]

    grid_spec = pltpu.PrefetchScalarGridSpec(
        num_scalar_prefetch=2,
        grid=(B,),
        in_specs=in_specs,
        out_specs=pl.BlockSpec((1, 1, OUT), lambda b, g, f: (b, 0, 0)),
    )
    packed = pl.pallas_call(
        _tail_kernel,
        grid_spec=grid_spec,
        out_shape=jax.ShapeDtypeStruct((B, 1, OUT), jnp.float32),
        compiler_params=pltpu.CompilerParams(dimension_semantics=("arbitrary",)),
    )(gidx, is3, *args)
    return packed.reshape(B, OUT)


# ----------------------------- parameter init (deterministic) -----------------------------

class _KeyGen:
    def __init__(self, seed):
        self._key = jax.random.PRNGKey(seed)

    def __call__(self):
        self._key, sub = jax.random.split(self._key)
        return sub


def _xavier(key, out_f, in_f):
    limit = math.sqrt(6.0 / (in_f + out_f))
    return jax.random.uniform(key, (out_f, in_f), jnp.float32, -limit, limit)


def _linear_params(kg, out_f, in_f):
    # matches _init_weights: xavier_uniform for 2D weights, zeros for biases
    return _xavier(kg(), out_f, in_f), jnp.zeros((out_f,), jnp.float32)


def init_params(cfg, seed=0):
    kg = _KeyGen(seed)
    md, E, ff = cfg['model_dim'], cfg['num_experts'], cfg['ff_dim']
    L = cfg['num_attention_layers']
    q = md // 4
    h2 = md // 2
    p = {}

    # stats embedding: one Linear(5, md//4) per layer id, stacked [6, md//4, 5]
    sw, sb = [], []
    for _ in LAYER_IDS:
        w, b = _linear_params(kg, q, 5)
        sw.append(w)
        sb.append(b)
    p['stats_embedding_w'] = jnp.stack(sw)
    p['stats_embedding_b'] = jnp.stack(sb)

    p['expert_embedding'] = _xavier(kg(), E, md)
    p['layer_embedding'] = _xavier(kg(), 12, md)
    p['position_embedding'] = _xavier(kg(), 1024, md)

    w1, b1 = _linear_params(kg, h2, q)
    w2, b2 = _linear_params(kg, md, h2)
    p['stats_processor'] = dict(w1=w1, b1=b1.reshape(1, -1), w2=w2, b2=b2.reshape(1, -1))

    def mha_full():
        in_w = _xavier(kg(), 3 * md, md)
        out_w = _xavier(kg(), md, md)
        z = jnp.zeros((1, md), jnp.float32)
        return dict(wq=in_w[:md], wk=in_w[md:2 * md], wv=in_w[2 * md:], wo=out_w,
                    bq=z, bk=z, bv=z, bo=z)

    keys = ('wq', 'wk', 'wv', 'wo', 'bq', 'bk', 'bv', 'bo',
            'e1w', 'e1b', 'e2w', 'e2b', 'ln_g', 'ln_b')
    stacks = {k: [] for k in keys}
    for _ in range(L):
        m = mha_full()
        e1w, e1b = _linear_params(kg, q, 5)
        e2w, e2b = _linear_params(kg, 1, q)
        vals = dict(m, e1w=e1w, e1b=e1b.reshape(1, -1), e2w=e2w, e2b=e2b.reshape(1, 1),
                    ln_g=jnp.ones((1, md), jnp.float32),
                    ln_b=jnp.zeros((1, md), jnp.float32))
        for k in keys:
            stacks[k].append(vals[k])
    p['attn_stack'] = {k: jnp.stack(v) for k, v in stacks.items()}

    p['cross_attention'] = mha_full()

    # tail: layer predictors padded to a fixed 3-stage (ff, ff, E) template,
    # stat-prior nets, adaptive nets — all stacked over the 6 layer ids.
    tail = {k: [] for k in ('p1w', 'p1b', 'p2w', 'p2b', 'p3w', 'p3b',
                            'pr1w', 'pr1b', 'pr2w', 'pr2b',
                            'a1wr', 'a1ws', 'a1b', 'a2w', 'a2b')}
    is3 = []

    def padw(w, o_t, i_t):
        return jnp.pad(w, ((0, o_t - w.shape[0]), (0, i_t - w.shape[1])))

    def padb(b, o_t):
        return jnp.pad(b, (0, o_t - b.shape[0])).reshape(1, -1)

    for lid in LAYER_IDS:
        st_ = LAYER_STATS[lid]
        if st_['entropy'] > 6.5:
            dims = [(ff, md), (ff, ff), (E, ff)]
        elif st_['cv'] > 2.0:
            dims = [(ff // 2, md), (E, ff // 2)]
        else:
            dims = [(ff, md), (ff // 2, ff), (E, ff // 2)]
        ws = [_linear_params(kg, o, i) for (o, i) in dims]

        w1_, b1_ = ws[0]
        tail['p1w'].append(padw(w1_, ff, md))
        tail['p1b'].append(padb(b1_, ff))
        if len(ws) == 3:
            w2_, b2_ = ws[1]
            w3_, b3_ = ws[2]
            tail['p2w'].append(padw(w2_, ff, ff))
            tail['p2b'].append(padb(b2_, ff))
            is3.append(1)
        else:
            w3_, b3_ = ws[1]
            tail['p2w'].append(jnp.zeros((ff, ff), jnp.float32))
            tail['p2b'].append(jnp.zeros((1, ff), jnp.float32))
            is3.append(0)
        tail['p3w'].append(padw(w3_, E, ff))
        tail['p3b'].append(b3_.reshape(1, -1))

        pw1, pb1 = _linear_params(kg, h2, md)
        pw2, pb2 = _linear_params(kg, E, h2)
        tail['pr1w'].append(pw1)
        tail['pr1b'].append(pb1.reshape(1, -1))
        tail['pr2w'].append(pw2)
        tail['pr2b'].append(pb2.reshape(1, -1))

        aw1, ab1 = _linear_params(kg, h2, md + 5)
        aw2, ab2 = _linear_params(kg, 2, h2)
        tail['a1wr'].append(aw1[:, :md])
        tail['a1ws'].append(aw1[:, md:])
        tail['a1b'].append(ab1.reshape(1, -1))
        tail['a2w'].append(aw2)
        tail['a2b'].append(ab2.reshape(1, -1))

    p['tail'] = {k: jnp.stack(v) for k, v in tail.items()}
    p['pred_is3'] = np.asarray(is3, np.int32)

    cw1, cb1 = _linear_params(kg, h2, md + 5)
    cw2, cb2 = _linear_params(kg, 1, h2)
    p['confidence'] = dict(w1r=cw1[:, :md], w1s=cw1[:, md:], b1=cb1.reshape(1, -1),
                           w2=cw2, b2=cb2.reshape(1, 1))
    return p


# ----------------------------- forward -----------------------------

def _stats_vector(layer_id):
    st = LAYER_STATS.get(int(layer_id), LAYER_STATS[1])
    return [st['entropy'], st['cv'], st['coverage'],
            st['mean'] / 10000.0, st['std'] / 10000.0]


def forward(params, context_experts, target_layer_id, context_layers, seq_lengths, cfg):
    del seq_lengths  # unused by the reference forward as well
    B, S, C = context_experts.shape
    md, E = cfg['model_dim'], cfg['num_experts']
    T = S * C

    # host-side layer-id dispatch (mirrors target_layer_id[i].item())
    layer_ids = [int(l) for l in np.asarray(target_layer_id)]
    gidx_np = np.asarray([LAYER_IDS.index(l) if l in LAYER_IDS else 0 for l in layer_ids],
                         np.int32)
    gidx = jnp.asarray(gidx_np)
    is3 = jnp.asarray(params['pred_is3'][gidx_np], jnp.int32)

    target_stats = jnp.asarray([_stats_vector(l) for l in layer_ids], jnp.float32)   # [B, 5]

    # per-row stats-embedding weights (gather from the stacked [6, ...] tensors)
    se_w_rows = jnp.take(params['stats_embedding_w'], gidx, axis=0)    # [B, md//4, 5]
    se_b_rows = jnp.take(params['stats_embedding_b'], gidx, axis=0)    # [B, md//4]

    # embedding lookups (XLA glue)
    expert_emb = jnp.take(params['expert_embedding'], context_experts, axis=0)   # [B,S,C,md]
    layer_emb = jnp.take(params['layer_embedding'], context_layers, axis=0)[:, None, :, :]
    pos_emb = params['position_embedding'][:S][None, :, None, :]
    x0 = (expert_emb + layer_emb + pos_emb).reshape(B, T, md)

    # ONE fused kernel: stats pipeline + entropy-attention stack + cross-attn + pool
    seq_repr, stats_feat = fused_stack(x0, target_stats, se_w_rows, se_b_rows, params, cfg)

    # ONE shape-stable tail kernel (layer-id weight selection via scalar prefetch)
    packed = tail_call(gidx, is3, seq_repr, stats_feat, target_stats, params, cfg)  # [B, 2E+3]
    final_rows = packed[:, :E]
    stat_priors = packed[:, E:2 * E]
    adaptive_w = packed[:, 2 * E:2 * E + 2]
    confidence = packed[:, 2 * E + 2:2 * E + 3]

    final_logits = jnp.broadcast_to(final_rows[:, None, :], (B, S, E))

    return {'expert_logits': final_logits,
            'confidence': confidence,
            'statistical_priors': stat_priors,
            'adaptive_weights': adaptive_w}


# ----------------------------- demo -----------------------------

if __name__ == "__main__":
    cfg = dict(num_experts=16, model_dim=64, num_heads=4, ff_dim=128,
               num_attention_layers=2, context_length=3)
    params = init_params(cfg, seed=0)

    B, S, C = 2, 4, cfg['context_length']
    key = jax.random.PRNGKey(0)
    k1, k2 = jax.random.split(key)
    context_experts = jax.random.randint(k1, (B, S, C), 0, cfg['num_experts'], dtype=jnp.int32)
    context_layers = jax.random.randint(k2, (B, C), 0, 12, dtype=jnp.int32)
    target_layer_id = np.array([1, 11], dtype=np.int32)   # exercises 3-stage and 2-stage heads
    seq_lengths = jnp.full((B,), S, dtype=jnp.int32)      # unused (matches reference)

    out = forward(params, context_experts, target_layer_id, context_layers, seq_lengths, cfg)
    out = jax.block_until_ready(out)

    assert out['expert_logits'].shape == (B, S, cfg['num_experts'])
    assert out['confidence'].shape == (B, 1)
    assert out['statistical_priors'].shape == (B, cfg['num_experts'])
    assert out['adaptive_weights'].shape == (B, 2)
    for v in out.values():
        assert bool(jnp.all(jnp.isfinite(v)))
    print("KERNEL_OK")
</pallas_src>

<mosaic_0001>
module attributes {stable_mosaic.version = 11 : i64} {
  func.func @_fused_stack_kernel(%arg0: memref<2x12x64xf32, #tpu.memory_space<vmem>>, %arg1: memref<2x5xf32, #tpu.memory_space<vmem>>, %arg2: memref<2x16x5xf32, #tpu.memory_space<vmem>>, %arg3: memref<2x16xf32, #tpu.memory_space<vmem>>, %arg4: memref<32x16xf32, #tpu.memory_space<vmem>>, %arg5: memref<1x32xf32, #tpu.memory_space<vmem>>, %arg6: memref<64x32xf32, #tpu.memory_space<vmem>>, %arg7: memref<1x64xf32, #tpu.memory_space<vmem>>, %arg8: memref<2x64x64xf32, #tpu.memory_space<vmem>>, %arg9: memref<2x64x64xf32, #tpu.memory_space<vmem>>, %arg10: memref<2x64x64xf32, #tpu.memory_space<vmem>>, %arg11: memref<2x64x64xf32, #tpu.memory_space<vmem>>, %arg12: memref<2x1x64xf32, #tpu.memory_space<vmem>>, %arg13: memref<2x1x64xf32, #tpu.memory_space<vmem>>, %arg14: memref<2x1x64xf32, #tpu.memory_space<vmem>>, %arg15: memref<2x1x64xf32, #tpu.memory_space<vmem>>, %arg16: memref<2x16x5xf32, #tpu.memory_space<vmem>>, %arg17: memref<2x1x16xf32, #tpu.memory_space<vmem>>, %arg18: memref<2x1x16xf32, #tpu.memory_space<vmem>>, %arg19: memref<2x1x1xf32, #tpu.memory_space<vmem>>, %arg20: memref<2x1x64xf32, #tpu.memory_space<vmem>>, %arg21: memref<2x1x64xf32, #tpu.memory_space<vmem>>, %arg22: memref<64x64xf32, #tpu.memory_space<vmem>>, %arg23: memref<64x64xf32, #tpu.memory_space<vmem>>, %arg24: memref<64x64xf32, #tpu.memory_space<vmem>>, %arg25: memref<64x64xf32, #tpu.memory_space<vmem>>, %arg26: memref<1x64xf32, #tpu.memory_space<vmem>>, %arg27: memref<1x64xf32, #tpu.memory_space<vmem>>, %arg28: memref<1x64xf32, #tpu.memory_space<vmem>>, %arg29: memref<1x64xf32, #tpu.memory_space<vmem>>, %arg30: memref<2x64xf32, #tpu.memory_space<vmem>>, %arg31: memref<2x64xf32, #tpu.memory_space<vmem>>) attributes {dimension_semantics = [], scalar_prefetch = 0 : i64, scratch_operands = 0 : i64, tpu.core_type = #tpu.core_type<tc>} {
    %c0 = arith.constant 0 : index
    %c0_0 = arith.constant 0 : index
    %0 = vector.load %arg1[%c0, %c0_0] : memref<2x5xf32, #tpu.memory_space<vmem>>, vector<2x5xf32>
    %1 = vector.shape_cast %0 : vector<2x5xf32> to vector<2x1x5xf32>
    %c0_1 = arith.constant 0 : index
    %c0_2 = arith.constant 0 : index
    %c0_3 = arith.constant 0 : index
    %2 = vector.load %arg2[%c0_1, %c0_2, %c0_3] : memref<2x16x5xf32, #tpu.memory_space<vmem>>, vector<2x16x5xf32>
    %3 = vector.broadcast %1 : vector<2x1x5xf32> to vector<2x16x5xf32>
    %4 = arith.mulf %3, %2 : vector<2x16x5xf32>
    %cst = arith.constant dense<0.000000e+00> : vector<2x16xf32>
    %5 = vector.multi_reduction <add>, %4, %cst [2] : vector<2x16x5xf32> to vector<2x16xf32>
    %c0_4 = arith.constant 0 : index
    %c0_5 = arith.constant 0 : index
    %6 = vector.load %arg3[%c0_4, %c0_5] : memref<2x16xf32, #tpu.memory_space<vmem>>, vector<2x16xf32>
    %7 = arith.addf %5, %6 : vector<2x16xf32>
    %c0_6 = arith.constant 0 : index
    %c0_7 = arith.constant 0 : index
    %8 = vector.load %arg4[%c0_6, %c0_7] : memref<32x16xf32, #tpu.memory_space<vmem>>, vector<32x16xf32>
    %cst_8 = arith.constant dense<0.000000e+00> : vector<2x32xf32>
    %9 = tpu.matmul %7, %8, %cst_8 {dimension_numbers = #tpu.dot_dimension_numbers<[1], [1], [0], [0], [0, 0, 1, 0], [], []>} : vector<2x16xf32>, vector<32x16xf32>, vector<2x32xf32> -> vector<2x32xf32>
    %c0_9 = arith.constant 0 : index
    %c0_10 = arith.constant 0 : index
    %10 = vector.load %arg5[%c0_9, %c0_10] : memref<1x32xf32, #tpu.memory_space<vmem>>, vector<1x32xf32>
    %11 = vector.broadcast %10 : vector<1x32xf32> to vector<2x32xf32>
    %12 = arith.addf %9, %11 : vector<2x32xf32>
    %cst_11 = arith.constant 0.000000e+00 : f32
    %13 = vector.broadcast %cst_11 : f32 to vector<2x32xf32>
    %14 = arith.maximumf %12, %13 : vector<2x32xf32>
    %c0_12 = arith.constant 0 : index
    %c0_13 = arith.constant 0 : index
    %15 = vector.load %arg6[%c0_12, %c0_13] : memref<64x32xf32, #tpu.memory_space<vmem>>, vector<64x32xf32>
    %cst_14 = arith.constant dense<0.000000e+00> : vector<2x64xf32>
    %16 = tpu.matmul %14, %15, %cst_14 {dimension_numbers = #tpu.dot_dimension_numbers<[1], [1], [0], [0], [0, 0, 1, 0], [], []>} : vector<2x32xf32>, vector<64x32xf32>, vector<2x64xf32> -> vector<2x64xf32>
    %c0_15 = arith.constant 0 : index
    %c0_16 = arith.constant 0 : index
    %17 = vector.load %arg7[%c0_15, %c0_16] : memref<1x64xf32, #tpu.memory_space<vmem>>, vector<1x64xf32>
    %18 = vector.broadcast %17 : vector<1x64xf32> to vector<2x64xf32>
    %19 = arith.addf %16, %18 : vector<2x64xf32>
    %c0_17 = arith.constant 0 : index
    %c0_18 = arith.constant 0 : index
    %20 = vector.load %arg31[%c0_17, %c0_18] : memref<2x64xf32, #tpu.memory_space<vmem>>, vector<2x64xf32>
    tpu.vector_store %arg31[%c0_17, %c0_18], %19 {strides = array<i32>} : memref<2x64xf32, #tpu.memory_space<vmem>>, vector<2x64xf32>,
    %21 = vector.shape_cast %0 : vector<2x5xf32> to vector<2x1x5xf32>
    %c0_19 = arith.constant 0 : index
    %c0_20 = arith.constant 0 : index
    %c0_21 = arith.constant 0 : index
    %22 = vector.load %arg16[%c0_19, %c0_20, %c0_21] : memref<2x16x5xf32, #tpu.memory_space<vmem>>, vector<1x16x5xf32>
    %23 = vector.shape_cast %22 : vector<1x16x5xf32> to vector<16x5xf32>
    %24 = vector.shape_cast %23 : vector<16x5xf32> to vector<1x16x5xf32>
    %25 = vector.broadcast %21 : vector<2x1x5xf32> to vector<2x16x5xf32>
    %26 = vector.broadcast %24 : vector<1x16x5xf32> to vector<2x16x5xf32>
    %27 = arith.mulf %25, %26 : vector<2x16x5xf32>
    %cst_22 = arith.constant dense<0.000000e+00> : vector<2x16xf32>
    %28 = vector.multi_reduction <add>, %27, %cst_22 [2] : vector<2x16x5xf32> to vector<2x16xf32>
    %c0_23 = arith.constant 0 : index
    %c0_24 = arith.constant 0 : index
    %c0_25 = arith.constant 0 : index
    %29 = vector.load %arg17[%c0_23, %c0_24, %c0_25] : memref<2x1x16xf32, #tpu.memory_space<vmem>>, vector<1x1x16xf32>
    %30 = vector.shape_cast %29 : vector<1x1x16xf32> to vector<1x16xf32>
    %31 = vector.broadcast %30 : vector<1x16xf32> to vector<2x16xf32>
    %32 = arith.addf %28, %31 : vector<2x16xf32>
    %cst_26 = arith.constant 0.000000e+00 : f32
    %33 = vector.broadcast %cst_26 : f32 to vector<2x16xf32>
    %34 = arith.maximumf %32, %33 : vector<2x16xf32>
    %c0_27 = arith.constant 0 : index
    %c0_28 = arith.constant 0 : index
    %c0_29 = arith.constant 0 : index
    %35 = vector.load %arg18[%c0_27, %c0_28, %c0_29] : memref<2x1x16xf32, #tpu.memory_space<vmem>>, vector<1x1x16xf32>
    %36 = vector.shape_cast %35 : vector<1x1x16xf32> to vector<1x16xf32>
    %37 = vector.broadcast %36 : vector<1x16xf32> to vector<2x16xf32>
    %38 = arith.mulf %34, %37 : vector<2x16xf32>
    %cst_30 = arith.constant dense<0.000000e+00> : vector<2xf32>
    %39 = vector.multi_reduction <add>, %38, %cst_30 [1] : vector<2x16xf32> to vector<2xf32>
    %40 = vector.shape_cast %39 : vector<2xf32> to vector<2x1xf32>
    %c0_31 = arith.constant 0 : index
    %c0_32 = arith.constant 0 : index
    %c0_33 = arith.constant 0 : index
    %41 = vector.load %arg19[%c0_31, %c0_32, %c0_33] : memref<2x1x1xf32, #tpu.memory_space<vmem>>, vector<1x1x1xf32>
    %42 = vector.shape_cast %41 : vector<1x1x1xf32> to vector<1x1xf32>
    %43 = vector.broadcast %42 : vector<1x1xf32> to vector<2x1xf32>
    %44 = arith.addf %40, %43 : vector<2x1xf32>
    %cst_34 = arith.constant 0.000000e+00 : f32
    %45 = vector.broadcast %cst_34 : f32 to vector<2x1xf32>
    %46 = arith.subf %45, %44 : vector<2x1xf32>
    %47 = math.exp %46 : vector<2x1xf32>
    %cst_35 = arith.constant 1.000000e+00 : f32
    %48 = vector.broadcast %cst_35 : f32 to vector<2x1xf32>
    %49 = arith.addf %48, %47 : vector<2x1xf32>
    %50 = tpu.reciprocal %49 {approx = true} : vector<2x1xf32> -> vector<2x1xf32>
    %51 = vector.shape_cast %0 : vector<2x5xf32> to vector<2x1x5xf32>
    %c1 = arith.constant 1 : index
    %c0_36 = arith.constant 0 : index
    %c0_37 = arith.constant 0 : index
    %52 = vector.load %arg16[%c1, %c0_36, %c0_37] : memref<2x16x5xf32, #tpu.memory_space<vmem>>, vector<1x16x5xf32>
    %53 = vector.shape_cast %52 : vector<1x16x5xf32> to vector<16x5xf32>
    %54 = vector.shape_cast %53 : vector<16x5xf32> to vector<1x16x5xf32>
    %55 = vector.broadcast %51 : vector<2x1x5xf32> to vector<2x16x5xf32>
    %56 = vector.broadcast %54 : vector<1x16x5xf32> to vector<2x16x5xf32>
    %57 = arith.mulf %55, %56 : vector<2x16x5xf32>
    %cst_38 = arith.constant dense<0.000000e+00> : vector<2x16xf32>
    %58 = vector.multi_reduction <add>, %57, %cst_38 [2] : vector<2x16x5xf32> to vector<2x16xf32>
    %c1_39 = arith.constant 1 : index
    %c0_40 = arith.constant 0 : index
    %c0_41 = arith.constant 0 : index
    %59 = vector.load %arg17[%c1_39, %c0_40, %c0_41] : memref<2x1x16xf32, #tpu.memory_space<vmem>>, vector<1x1x16xf32>
    %60 = vector.shape_cast %59 : vector<1x1x16xf32> to vector<1x16xf32>
    %61 = vector.broadcast %60 : vector<1x16xf32> to vector<2x16xf32>
    %62 = arith.addf %58, %61 : vector<2x16xf32>
    %cst_42 = arith.constant 0.000000e+00 : f32
    %63 = vector.broadcast %cst_42 : f32 to vector<2x16xf32>
    %64 = arith.maximumf %62, %63 : vector<2x16xf32>
    %c1_43 = arith.constant 1 : index
    %c0_44 = arith.constant 0 : index
    %c0_45 = arith.constant 0 : index
    %65 = vector.load %arg18[%c1_43, %c0_44, %c0_45] : memref<2x1x16xf32, #tpu.memory_space<vmem>>, vector<1x1x16xf32>
    %66 = vector.shape_cast %65 : vector<1x1x16xf32> to vector<1x16xf32>
    %67 = vector.broadcast %66 : vector<1x16xf32> to vector<2x16xf32>
    %68 = arith.mulf %64, %67 : vector<2x16xf32>
    %cst_46 = arith.constant dense<0.000000e+00> : vector<2xf32>
    %69 = vector.multi_reduction <add>, %68, %cst_46 [1] : vector<2x16xf32> to vector<2xf32>
    %70 = vector.shape_cast %69 : vector<2xf32> to vector<2x1xf32>
    %c1_47 = arith.constant 1 : index
    %c0_48 = arith.constant 0 : index
    %c0_49 = arith.constant 0 : index
    %71 = vector.load %arg19[%c1_47, %c0_48, %c0_49] : memref<2x1x1xf32, #tpu.memory_space<vmem>>, vector<1x1x1xf32>
    %72 = vector.shape_cast %71 : vector<1x1x1xf32> to vector<1x1xf32>
    %73 = vector.broadcast %72 : vector<1x1xf32> to vector<2x1xf32>
    %74 = arith.addf %70, %73 : vector<2x1xf32>
    %cst_50 = arith.constant 0.000000e+00 : f32
    %75 = vector.broadcast %cst_50 : f32 to vector<2x1xf32>
    %76 = arith.subf %75, %74 : vector<2x1xf32>
    %77 = math.exp %76 : vector<2x1xf32>
    %cst_51 = arith.constant 1.000000e+00 : f32
    %78 = vector.broadcast %cst_51 : f32 to vector<2x1xf32>
    %79 = arith.addf %78, %77 : vector<2x1xf32>
    %80 = tpu.reciprocal %79 {approx = true} : vector<2x1xf32> -> vector<2x1xf32>
    %c0_52 = arith.constant 0 : index
    %c0_53 = arith.constant 0 : index
    %c0_54 = arith.constant 0 : index
    %81 = vector.load %arg0[%c0_52, %c0_53, %c0_54] : memref<2x12x64xf32, #tpu.memory_space<vmem>>, vector<1x12x64xf32>
    %82 = vector.shape_cast %81 : vector<1x12x64xf32> to vector<12x64xf32>
    %83 = vector.extract_strided_slice %19 {offsets = [0, 0], sizes = [1, 64], strides = [1, 1]} : vector<2x64xf32> to vector<1x64xf32>
    %84 = vector.broadcast %83 : vector<1x64xf32> to vector<12x64xf32>
    %85 = arith.addf %82, %84 : vector<12x64xf32>
    %c0_55 = arith.constant 0 : index
    %c0_56 = arith.constant 0 : index
    %c0_57 = arith.constant 0 : index
    %86 = vector.load %arg8[%c0_55, %c0_56, %c0_57] : memref<2x64x64xf32, #tpu.memory_space<vmem>>, vector<1x64x64xf32>
    %87 = vector.shape_cast %86 : vector<1x64x64xf32> to vector<64x64xf32>
    %c0_58 = arith.constant 0 : index
    %c0_59 = arith.constant 0 : index
    %c0_60 = arith.constant 0 : index
    %88 = vector.load %arg12[%c0_58, %c0_59, %c0_60] : memref<2x1x64xf32, #tpu.memory_space<vmem>>, vector<1x1x64xf32>
    %89 = vector.shape_cast %88 : vector<1x1x64xf32> to vector<1x64xf32>
    %c0_61 = arith.constant 0 : index
    %c0_62 = arith.constant 0 : index
    %c0_63 = arith.constant 0 : index
    %90 = vector.load %arg9[%c0_61, %c0_62, %c0_63] : memref<2x64x64xf32, #tpu.memory_space<vmem>>, vector<1x64x64xf32>
    %91 = vector.shape_cast %90 : vector<1x64x64xf32> to vector<64x64xf32>
    %c0_64 = arith.constant 0 : index
    %c0_65 = arith.constant 0 : index
    %c0_66 = arith.constant 0 : index
    %92 = vector.load %arg13[%c0_64, %c0_65, %c0_66] : memref<2x1x64xf32, #tpu.memory_space<vmem>>, vector<1x1x64xf32>
    %93 = vector.shape_cast %92 : vector<1x1x64xf32> to vector<1x64xf32>
    %c0_67 = arith.constant 0 : index
    %c0_68 = arith.constant 0 : index
    %c0_69 = arith.constant 0 : index
    %94 = vector.load %arg10[%c0_67, %c0_68, %c0_69] : memref<2x64x64xf32, #tpu.memory_space<vmem>>, vector<1x64x64xf32>
    %95 = vector.shape_cast %94 : vector<1x64x64xf32> to vector<64x64xf32>
    %c0_70 = arith.constant 0 : index
    %c0_71 = arith.constant 0 : index
    %c0_72 = arith.constant 0 : index
    %96 = vector.load %arg14[%c0_70, %c0_71, %c0_72] : memref<2x1x64xf32, #tpu.memory_space<vmem>>, vector<1x1x64xf32>
    %97 = vector.shape_cast %96 : vector<1x1x64xf32> to vector<1x64xf32>
    %c0_73 = arith.constant 0 : index
    %c0_74 = arith.constant 0 : index
    %c0_75 = arith.constant 0 : index
    %98 = vector.load %arg11[%c0_73, %c0_74, %c0_75] : memref<2x64x64xf32, #tpu.memory_space<vmem>>, vector<1x64x64xf32>
    %99 = vector.shape_cast %98 : vector<1x64x64xf32> to vector<64x64xf32>
    %c0_76 = arith.constant 0 : index
    %c0_77 = arith.constant 0 : index
    %c0_78 = arith.constant 0 : index
    %100 = vector.load %arg15[%c0_76, %c0_77, %c0_78] : memref<2x1x64xf32, #tpu.memory_space<vmem>>, vector<1x1x64xf32>
    %101 = vector.shape_cast %100 : vector<1x1x64xf32> to vector<1x64xf32>
    %cst_79 = arith.constant dense<0.000000e+00> : vector<12x64xf32>
    %102 = tpu.matmul %85, %87, %cst_79 {dimension_numbers = #tpu.dot_dimension_numbers<[1], [1], [0], [0], [0, 0, 1, 0], [], []>} : vector<12x64xf32>, vector<64x64xf32>, vector<12x64xf32> -> vector<12x64xf32>
    %103 = vector.broadcast %89 : vector<1x64xf32> to vector<12x64xf32>
    %104 = arith.addf %102, %103 : vector<12x64xf32>
    %cst_80 = arith.constant dense<0.000000e+00> : vector<12x64xf32>
    %105 = tpu.matmul %85, %91, %cst_80 {dimension_numbers = #tpu.dot_dimension_numbers<[1], [1], [0], [0], [0, 0, 1, 0], [], []>} : vector<12x64xf32>, vector<64x64xf32>, vector<12x64xf32> -> vector<12x64xf32>
    %106 = vector.broadcast %93 : vector<1x64xf32> to vector<12x64xf32>
    %107 = arith.addf %105, %106 : vector<12x64xf32>
    %cst_81 = arith.constant dense<0.000000e+00> : vector<12x64xf32>
    %108 = tpu.matmul %85, %95, %cst_81 {dimension_numbers = #tpu.dot_dimension_numbers<[1], [1], [0], [0], [0, 0, 1, 0], [], []>} : vector<12x64xf32>, vector<64x64xf32>, vector<12x64xf32> -> vector<12x64xf32>
    %109 = vector.broadcast %97 : vector<1x64xf32> to vector<12x64xf32>
    %110 = arith.addf %108, %109 : vector<12x64xf32>
    %111 = vector.extract_strided_slice %104 {offsets = [0, 0], sizes = [12, 16], strides = [1, 1]} : vector<12x64xf32> to vector<12x16xf32>
    %112 = vector.extract_strided_slice %107 {offsets = [0, 0], sizes = [12, 16], strides = [1, 1]} : vector<12x64xf32> to vector<12x16xf32>
    %113 = vector.extract_strided_slice %110 {offsets = [0, 0], sizes = [12, 16], strides = [1, 1]} : vector<12x64xf32> to vector<12x16xf32>
    %cst_82 = arith.constant dense<0.000000e+00> : vector<12x12xf32>
    %114 = tpu.matmul %111, %112, %cst_82 {dimension_numbers = #tpu.dot_dimension_numbers<[1], [1], [0], [0], [0, 0, 1, 0], [], []>} : vector<12x16xf32>, vector<12x16xf32>, vector<12x12xf32> -> vector<12x12xf32>
    %cst_83 = arith.constant 2.500000e-01 : f32
    %115 = vector.broadcast %cst_83 : f32 to vector<12x12xf32>
    %116 = arith.mulf %114, %115 : vector<12x12xf32>
    %cst_84 = arith.constant dense<0xFF800000> : vector<12xf32>
    %117 = vector.multi_reduction <maximumf>, %116, %cst_84 [1] : vector<12x12xf32> to vector<12xf32>
    %118 = vector.shape_cast %117 : vector<12xf32> to vector<12x1xf32>
    %119 = vector.broadcast %118 : vector<12x1xf32> to vector<12x12xf32>
    %120 = arith.subf %116, %119 : vector<12x12xf32>
    %121 = math.exp %120 : vector<12x12xf32>
    %cst_85 = arith.constant dense<0.000000e+00> : vector<12xf32>
    %122 = vector.multi_reduction <add>, %121, %cst_85 [1] : vector<12x12xf32> to vector<12xf32>
    %123 = vector.shape_cast %122 : vector<12xf32> to vector<12x1xf32>
    %124 = tpu.reciprocal %123 {approx = true} : vector<12x1xf32> -> vector<12x1xf32>
    %125 = vector.broadcast %124 : vector<12x1xf32> to vector<12x12xf32>
    %126 = arith.mulf %121, %125 : vector<12x12xf32>
    %cst_86 = arith.constant dense<0.000000e+00> : vector<12x16xf32>
    %127 = tpu.matmul %126, %113, %cst_86 {dimension_numbers = #tpu.dot_dimension_numbers<[1], [0], [0], [1], [0, 0, 1, 1], [], []>} : vector<12x12xf32>, vector<12x16xf32>, vector<12x16xf32> -> vector<12x16xf32>
    %128 = vector.extract_strided_slice %104 {offsets = [0, 16], sizes = [12, 16], strides = [1, 1]} : vector<12x64xf32> to vector<12x16xf32>
    %129 = vector.extract_strided_slice %107 {offsets = [0, 16], sizes = [12, 16], strides = [1, 1]} : vector<12x64xf32> to vector<12x16xf32>
    %130 = vector.extract_strided_slice %110 {offsets = [0, 16], sizes = [12, 16], strides = [1, 1]} : vector<12x64xf32> to vector<12x16xf32>
    %cst_87 = arith.constant dense<0.000000e+00> : vector<12x12xf32>
    %131 = tpu.matmul %128, %129, %cst_87 {dimension_numbers = #tpu.dot_dimension_numbers<[1], [1], [0], [0], [0, 0, 1, 0], [], []>} : vector<12x16xf32>, vector<12x16xf32>, vector<12x12xf32> -> vector<12x12xf32>
    %cst_88 = arith.constant 2.500000e-01 : f32
    %132 = vector.broadcast %cst_88 : f32 to vector<12x12xf32>
    %133 = arith.mulf %131, %132 : vector<12x12xf32>
    %cst_89 = arith.constant dense<0xFF800000> : vector<12xf32>
    %134 = vector.multi_reduction <maximumf>, %133, %cst_89 [1] : vector<12x12xf32> to vector<12xf32>
    %135 = vector.shape_cast %134 : vector<12xf32> to vector<12x1xf32>
    %136 = vector.broadcast %135 : vector<12x1xf32> to vector<12x12xf32>
    %137 = arith.subf %133, %136 : vector<12x12xf32>
    %138 = math.exp %137 : vector<12x12xf32>
    %cst_90 = arith.constant dense<0.000000e+00> : vector<12xf32>
    %139 = vector.multi_reduction <add>, %138, %cst_90 [1] : vector<12x12xf32> to vector<12xf32>
    %140 = vector.shape_cast %139 : vector<12xf32> to vector<12x1xf32>
    %141 = tpu.reciprocal %140 {approx = true} : vector<12x1xf32> -> vector<12x1xf32>
    %142 = vector.broadcast %141 : vector<12x1xf32> to vector<12x12xf32>
    %143 = arith.mulf %138, %142 : vector<12x12xf32>
    %cst_91 = arith.constant dense<0.000000e+00> : vector<12x16xf32>
    %144 = tpu.matmul %143, %130, %cst_91 {dimension_numbers = #tpu.dot_dimension_numbers<[1], [0], [0], [1], [0, 0, 1, 1], [], []>} : vector<12x12xf32>, vector<12x16xf32>, vector<12x16xf32> -> vector<12x16xf32>
    %145 = vector.extract_strided_slice %104 {offsets = [0, 32], sizes = [12, 16], strides = [1, 1]} : vector<12x64xf32> to vector<12x16xf32>
    %146 = vector.extract_strided_slice %107 {offsets = [0, 32], sizes = [12, 16], strides = [1, 1]} : vector<12x64xf32> to vector<12x16xf32>
    %147 = vector.extract_strided_slice %110 {offsets = [0, 32], sizes = [12, 16], strides = [1, 1]} : vector<12x64xf32> to vector<12x16xf32>
    %cst_92 = arith.constant dense<0.000000e+00> : vector<12x12xf32>
    %148 = tpu.matmul %145, %146, %cst_92 {dimension_numbers = #tpu.dot_dimension_numbers<[1], [1], [0], [0], [0, 0, 1, 0], [], []>} : vector<12x16xf32>, vector<12x16xf32>, vector<12x12xf32> -> vector<12x12xf32>
    %cst_93 = arith.constant 2.500000e-01 : f32
    %149 = vector.broadcast %cst_93 : f32 to vector<12x12xf32>
    %150 = arith.mulf %148, %149 : vector<12x12xf32>
    %cst_94 = arith.constant dense<0xFF800000> : vector<12xf32>
    %151 = vector.multi_reduction <maximumf>, %150, %cst_94 [1] : vector<12x12xf32> to vector<12xf32>
    %152 = vector.shape_cast %151 : vector<12xf32> to vector<12x1xf32>
    %153 = vector.broadcast %152 : vector<12x1xf32> to vector<12x12xf32>
    %154 = arith.subf %150, %153 : vector<12x12xf32>
    %155 = math.exp %154 : vector<12x12xf32>
    %cst_95 = arith.constant dense<0.000000e+00> : vector<12xf32>
    %156 = vector.multi_reduction <add>, %155, %cst_95 [1] : vector<12x12xf32> to vector<12xf32>
    %157 = vector.shape_cast %156 : vector<12xf32> to vector<12x1xf32>
    %158 = tpu.reciprocal %157 {approx = true} : vector<12x1xf32> -> vector<12x1xf32>
    %159 = vector.broadcast %158 : vector<12x1xf32> to vector<12x12xf32>
    %160 = arith.mulf %155, %159 : vector<12x12xf32>
    %cst_96 = arith.constant dense<0.000000e+00> : vector<12x16xf32>
    %161 = tpu.matmul %160, %147, %cst_96 {dimension_numbers = #tpu.dot_dimension_numbers<[1], [0], [0], [1], [0, 0, 1, 1], [], []>} : vector<12x12xf32>, vector<12x16xf32>, vector<12x16xf32> -> vector<12x16xf32>
    %162 = vector.extract_strided_slice %104 {offsets = [0, 48], sizes = [12, 16], strides = [1, 1]} : vector<12x64xf32> to vector<12x16xf32>
    %163 = vector.extract_strided_slice %107 {offsets = [0, 48], sizes = [12, 16], strides = [1, 1]} : vector<12x64xf32> to vector<12x16xf32>
    %164 = vector.extract_strided_slice %110 {offsets = [0, 48], sizes = [12, 16], strides = [1, 1]} : vector<12x64xf32> to vector<12x16xf32>
    %cst_97 = arith.constant dense<0.000000e+00> : vector<12x12xf32>
    %165 = tpu.matmul %162, %163, %cst_97 {dimension_numbers = #tpu.dot_dimension_numbers<[1], [1], [0], [0], [0, 0, 1, 0], [], []>} : vector<12x16xf32>, vector<12x16xf32>, vector<12x12xf32> -> vector<12x12xf32>
    %cst_98 = arith.constant 2.500000e-01 : f32
    %166 = vector.broadcast %cst_98 : f32 to vector<12x12xf32>
    %167 = arith.mulf %165, %166 : vector<12x12xf32>
    %cst_99 = arith.constant dense<0xFF800000> : vector<12xf32>
    %168 = vector.multi_reduction <maximumf>, %167, %cst_99 [1] : vector<12x12xf32> to vector<12xf32>
    %169 = vector.shape_cast %168 : vector<12xf32> to vector<12x1xf32>
    %170 = vector.broadcast %169 : vector<12x1xf32> to vector<12x12xf32>
    %171 = arith.subf %167, %170 : vector<12x12xf32>
    %172 = math.exp %171 : vector<12x12xf32>
    %cst_100 = arith.constant dense<0.000000e+00> : vector<12xf32>
    %173 = vector.multi_reduction <add>, %172, %cst_100 [1] : vector<12x12xf32> to vector<12xf32>
    %174 = vector.shape_cast %173 : vector<12xf32> to vector<12x1xf32>
    %175 = tpu.reciprocal %174 {approx = true} : vector<12x1xf32> -> vector<12x1xf32>
    %176 = vector.broadcast %175 : vector<12x1xf32> to vector<12x12xf32>
    %177 = arith.mulf %172, %176 : vector<12x12xf32>
    %cst_101 = arith.constant dense<0.000000e+00> : vector<12x16xf32>
    %178 = tpu.matmul %177, %164, %cst_101 {dimension_numbers = #tpu.dot_dimension_numbers<[1], [0], [0], [1], [0, 0, 1, 1], [], []>} : vector<12x12xf32>, vector<12x16xf32>, vector<12x16xf32> -> vector<12x16xf32>
    %179 = tpu.concatenate %127, %144, %161, %178 in 1 : vector<12x16xf32>, vector<12x16xf32>, vector<12x16xf32>, vector<12x16xf32> -> vector<12x64xf32>
    %cst_102 = arith.constant dense<0.000000e+00> : vector<12x64xf32>
    %180 = tpu.matmul %179, %99, %cst_102 {dimension_numbers = #tpu.dot_dimension_numbers<[1], [1], [0], [0], [0, 0, 1, 0], [], []>} : vector<12x64xf32>, vector<64x64xf32>, vector<12x64xf32> -> vector<12x64xf32>
    %181 = vector.broadcast %101 : vector<1x64xf32> to vector<12x64xf32>
    %182 = arith.addf %180, %181 : vector<12x64xf32>
    %183 = vector.extract_strided_slice %50 {offsets = [0, 0], sizes = [1, 1], strides = [1, 1]} : vector<2x1xf32> to vector<1x1xf32>
    %184 = vector.broadcast %183 : vector<1x1xf32> to vector<12x64xf32>
    %185 = arith.mulf %182, %184 : vector<12x64xf32>
    %186 = arith.addf %85, %185 : vector<12x64xf32>
    %cst_103 = arith.constant dense<0.000000e+00> : vector<12xf32>
    %187 = vector.multi_reduction <add>, %186, %cst_103 [1] : vector<12x64xf32> to vector<12xf32>
    %188 = vector.shape_cast %187 : vector<12xf32> to vector<12x1xf32>
    %cst_104 = arith.constant 6.400000e+01 : f32
    %189 = vector.broadcast %cst_104 : f32 to vector<12x1xf32>
    %190 = arith.divf %188, %189 : vector<12x1xf32>
    %191 = vector.broadcast %190 : vector<12x1xf32> to vector<12x64xf32>
    %192 = arith.subf %186, %191 : vector<12x64xf32>
    %193 = arith.mulf %192, %192 : vector<12x64xf32>
    %cst_105 = arith.constant dense<0.000000e+00> : vector<12xf32>
    %194 = vector.multi_reduction <add>, %193, %cst_105 [1] : vector<12x64xf32> to vector<12xf32>
    %195 = vector.shape_cast %194 : vector<12xf32> to vector<12x1xf32>
    %cst_106 = arith.constant 6.400000e+01 : f32
    %196 = vector.broadcast %cst_106 : f32 to vector<12x1xf32>
    %197 = arith.divf %195, %196 : vector<12x1xf32>
    %198 = vector.broadcast %190 : vector<12x1xf32> to vector<12x64xf32>
    %199 = arith.subf %186, %198 : vector<12x64xf32>
    %cst_107 = arith.constant 9.99999974E-6 : f32
    %200 = vector.broadcast %cst_107 : f32 to vector<12x1xf32>
    %201 = arith.addf %197, %200 : vector<12x1xf32>
    %202 = math.rsqrt %201 : vector<12x1xf32>
    %203 = vector.broadcast %202 : vector<12x1xf32> to vector<12x64xf32>
    %204 = arith.mulf %199, %203 : vector<12x64xf32>
    %c0_108 = arith.constant 0 : index
    %c0_109 = arith.constant 0 : index
    %c0_110 = arith.constant 0 : index
    %205 = vector.load %arg20[%c0_108, %c0_109, %c0_110] : memref<2x1x64xf32, #tpu.memory_space<vmem>>, vector<1x1x64xf32>
    %206 = vector.shape_cast %205 : vector<1x1x64xf32> to vector<1x64xf32>
    %207 = vector.broadcast %206 : vector<1x64xf32> to vector<12x64xf32>
    %208 = arith.mulf %204, %207 : vector<12x64xf32>
    %c0_111 = arith.constant 0 : index
    %c0_112 = arith.constant 0 : index
    %c0_113 = arith.constant 0 : index
    %209 = vector.load %arg21[%c0_111, %c0_112, %c0_113] : memref<2x1x64xf32, #tpu.memory_space<vmem>>, vector<1x1x64xf32>
    %210 = vector.shape_cast %209 : vector<1x1x64xf32> to vector<1x64xf32>
    %211 = vector.broadcast %210 : vector<1x64xf32> to vector<12x64xf32>
    %212 = arith.addf %208, %211 : vector<12x64xf32>
    %c1_114 = arith.constant 1 : index
    %c0_115 = arith.constant 0 : index
    %c0_116 = arith.constant 0 : index
    %213 = vector.load %arg8[%c1_114, %c0_115, %c0_116] : memref<2x64x64xf32, #tpu.memory_space<vmem>>, vector<1x64x64xf32>
    %214 = vector.shape_cast %213 : vector<1x64x64xf32> to vector<64x64xf32>
    %c1_117 = arith.constant 1 : index
    %c0_118 = arith.constant 0 : index
    %c0_119 = arith.constant 0 : index
    %215 = vector.load %arg12[%c1_117, %c0_118, %c0_119] : memref<2x1x64xf32, #tpu.memory_space<vmem>>, vector<1x1x64xf32>
    %216 = vector.shape_cast %215 : vector<1x1x64xf32> to vector<1x64xf32>
    %c1_120 = arith.constant 1 : index
    %c0_121 = arith.constant 0 : index
    %c0_122 = arith.constant 0 : index
    %217 = vector.load %arg9[%c1_120, %c0_121, %c0_122] : memref<2x64x64xf32, #tpu.memory_space<vmem>>, vector<1x64x64xf32>
    %218 = vector.shape_cast %217 : vector<1x64x64xf32> to vector<64x64xf32>
    %c1_123 = arith.constant 1 : index
    %c0_124 = arith.constant 0 : index
    %c0_125 = arith.constant 0 : index
    %219 = vector.load %arg13[%c1_123, %c0_124, %c0_125] : memref<2x1x64xf32, #tpu.memory_space<vmem>>, vector<1x1x64xf32>
    %220 = vector.shape_cast %219 : vector<1x1x64xf32> to vector<1x64xf32>
    %c1_126 = arith.constant 1 : index
    %c0_127 = arith.constant 0 : index
    %c0_128 = arith.constant 0 : index
    %221 = vector.load %arg10[%c1_126, %c0_127, %c0_128] : memref<2x64x64xf32, #tpu.memory_space<vmem>>, vector<1x64x64xf32>
    %222 = vector.shape_cast %221 : vector<1x64x64xf32> to vector<64x64xf32>
    %c1_129 = arith.constant 1 : index
    %c0_130 = arith.constant 0 : index
    %c0_131 = arith.constant 0 : index
    %223 = vector.load %arg14[%c1_129, %c0_130, %c0_131] : memref<2x1x64xf32, #tpu.memory_space<vmem>>, vector<1x1x64xf32>
    %224 = vector.shape_cast %223 : vector<1x1x64xf32> to vector<1x64xf32>
    %c1_132 = arith.constant 1 : index
    %c0_133 = arith.constant 0 : index
    %c0_134 = arith.constant 0 : index
    %225 = vector.load %arg11[%c1_132, %c0_133, %c0_134] : memref<2x64x64xf32, #tpu.memory_space<vmem>>, vector<1x64x64xf32>
    %226 = vector.shape_cast %225 : vector<1x64x64xf32> to vector<64x64xf32>
    %c1_135 = arith.constant 1 : index
    %c0_136 = arith.constant 0 : index
    %c0_137 = arith.constant 0 : index
    %227 = vector.load %arg15[%c1_135, %c0_136, %c0_137] : memref<2x1x64xf32, #tpu.memory_space<vmem>>, vector<1x1x64xf32>
    %228 = vector.shape_cast %227 : vector<1x1x64xf32> to vector<1x64xf32>
    %cst_138 = arith.constant dense<0.000000e+00> : vector<12x64xf32>
    %229 = tpu.matmul %212, %214, %cst_138 {dimension_numbers = #tpu.dot_dimension_numbers<[1], [1], [0], [0], [0, 0, 1, 0], [], []>} : vector<12x64xf32>, vector<64x64xf32>, vector<12x64xf32> -> vector<12x64xf32>
    %230 = vector.broadcast %216 : vector<1x64xf32> to vector<12x64xf32>
    %231 = arith.addf %229, %230 : vector<12x64xf32>
    %cst_139 = arith.constant dense<0.000000e+00> : vector<12x64xf32>
    %232 = tpu.matmul %212, %218, %cst_139 {dimension_numbers = #tpu.dot_dimension_numbers<[1], [1], [0], [0], [0, 0, 1, 0], [], []>} : vector<12x64xf32>, vector<64x64xf32>, vector<12x64xf32> -> vector<12x64xf32>
    %233 = vector.broadcast %220 : vector<1x64xf32> to vector<12x64xf32>
    %234 = arith.addf %232, %233 : vector<12x64xf32>
    %cst_140 = arith.constant dense<0.000000e+00> : vector<12x64xf32>
    %235 = tpu.matmul %212, %222, %cst_140 {dimension_numbers = #tpu.dot_dimension_numbers<[1], [1], [0], [0], [0, 0, 1, 0], [], []>} : vector<12x64xf32>, vector<64x64xf32>, vector<12x64xf32> -> vector<12x64xf32>
    %236 = vector.broadcast %224 : vector<1x64xf32> to vector<12x64xf32>
    %237 = arith.addf %235, %236 : vector<12x64xf32>
    %238 = vector.extract_strided_slice %231 {offsets = [0, 0], sizes = [12, 16], strides = [1, 1]} : vector<12x64xf32> to vector<12x16xf32>
    %239 = vector.extract_strided_slice %234 {offsets = [0, 0], sizes = [12, 16], strides = [1, 1]} : vector<12x64xf32> to vector<12x16xf32>
    %240 = vector.extract_strided_slice %237 {offsets = [0, 0], sizes = [12, 16], strides = [1, 1]} : vector<12x64xf32> to vector<12x16xf32>
    %cst_141 = arith.constant dense<0.000000e+00> : vector<12x12xf32>
    %241 = tpu.matmul %238, %239, %cst_141 {dimension_numbers = #tpu.dot_dimension_numbers<[1], [1], [0], [0], [0, 0, 1, 0], [], []>} : vector<12x16xf32>, vector<12x16xf32>, vector<12x12xf32> -> vector<12x12xf32>
    %cst_142 = arith.constant 2.500000e-01 : f32
    %242 = vector.broadcast %cst_142 : f32 to vector<12x12xf32>
    %243 = arith.mulf %241, %242 : vector<12x12xf32>
    %cst_143 = arith.constant dense<0xFF800000> : vector<12xf32>
    %244 = vector.multi_reduction <maximumf>, %243, %cst_143 [1] : vector<12x12xf32> to vector<12xf32>
    %245 = vector.shape_cast %244 : vector<12xf32> to vector<12x1xf32>
    %246 = vector.broadcast %245 : vector<12x1xf32> to vector<12x12xf32>
    %247 = arith.subf %243, %246 : vector<12x12xf32>
    %248 = math.exp %247 : vector<12x12xf32>
    %cst_144 = arith.constant dense<0.000000e+00> : vector<12xf32>
    %249 = vector.multi_reduction <add>, %248, %cst_144 [1] : vector<12x12xf32> to vector<12xf32>
    %250 = vector.shape_cast %249 : vector<12xf32> to vector<12x1xf32>
    %251 = tpu.reciprocal %250 {approx = true} : vector<12x1xf32> -> vector<12x1xf32>
    %252 = vector.broadcast %251 : vector<12x1xf32> to vector<12x12xf32>
    %253 = arith.mulf %248, %252 : vector<12x12xf32>
    %cst_145 = arith.constant dense<0.000000e+00> : vector<12x16xf32>
    %254 = tpu.matmul %253, %240, %cst_145 {dimension_numbers = #tpu.dot_dimension_numbers<[1], [0], [0], [1], [0, 0, 1, 1], [], []>} : vector<12x12xf32>, vector<12x16xf32>, vector<12x16xf32> -> vector<12x16xf32>
    %255 = vector.extract_strided_slice %231 {offsets = [0, 16], sizes = [12, 16], strides = [1, 1]} : vector<12x64xf32> to vector<12x16xf32>
    %256 = vector.extract_strided_slice %234 {offsets = [0, 16], sizes = [12, 16], strides = [1, 1]} : vector<12x64xf32> to vector<12x16xf32>
    %257 = vector.extract_strided_slice %237 {offsets = [0, 16], sizes = [12, 16], strides = [1, 1]} : vector<12x64xf32> to vector<12x16xf32>
    %cst_146 = arith.constant dense<0.000000e+00> : vector<12x12xf32>
    %258 = tpu.matmul %255, %256, %cst_146 {dimension_numbers = #tpu.dot_dimension_numbers<[1], [1], [0], [0], [0, 0, 1, 0], [], []>} : vector<12x16xf32>, vector<12x16xf32>, vector<12x12xf32> -> vector<12x12xf32>
    %cst_147 = arith.constant 2.500000e-01 : f32
    %259 = vector.broadcast %cst_147 : f32 to vector<12x12xf32>
    %260 = arith.mulf %258, %259 : vector<12x12xf32>
    %cst_148 = arith.constant dense<0xFF800000> : vector<12xf32>
    %261 = vector.multi_reduction <maximumf>, %260, %cst_148 [1] : vector<12x12xf32> to vector<12xf32>
    %262 = vector.shape_cast %261 : vector<12xf32> to vector<12x1xf32>
    %263 = vector.broadcast %262 : vector<12x1xf32> to vector<12x12xf32>
    %264 = arith.subf %260, %263 : vector<12x12xf32>
    %265 = math.exp %264 : vector<12x12xf32>
    %cst_149 = arith.constant dense<0.000000e+00> : vector<12xf32>
    %266 = vector.multi_reduction <add>, %265, %cst_149 [1] : vector<12x12xf32> to vector<12xf32>
    %267 = vector.shape_cast %266 : vector<12xf32> to vector<12x1xf32>
    %268 = tpu.reciprocal %267 {approx = true} : vector<12x1xf32> -> vector<12x1xf32>
    %269 = vector.broadcast %268 : vector<12x1xf32> to vector<12x12xf32>
    %270 = arith.mulf %265, %269 : vector<12x12xf32>
    %cst_150 = arith.constant dense<0.000000e+00> : vector<12x16xf32>
    %271 = tpu.matmul %270, %257, %cst_150 {dimension_numbers = #tpu.dot_dimension_numbers<[1], [0], [0], [1], [0, 0, 1, 1], [], []>} : vector<12x12xf32>, vector<12x16xf32>, vector<12x16xf32> -> vector<12x16xf32>
    %272 = vector.extract_strided_slice %231 {offsets = [0, 32], sizes = [12, 16], strides = [1, 1]} : vector<12x64xf32> to vector<12x16xf32>
    %273 = vector.extract_strided_slice %234 {offsets = [0, 32], sizes = [12, 16], strides = [1, 1]} : vector<12x64xf32> to vector<12x16xf32>
    %274 = vector.extract_strided_slice %237 {offsets = [0, 32], sizes = [12, 16], strides = [1, 1]} : vector<12x64xf32> to vector<12x16xf32>
    %cst_151 = arith.constant dense<0.000000e+00> : vector<12x12xf32>
    %275 = tpu.matmul %272, %273, %cst_151 {dimension_numbers = #tpu.dot_dimension_numbers<[1], [1], [0], [0], [0, 0, 1, 0], [], []>} : vector<12x16xf32>, vector<12x16xf32>, vector<12x12xf32> -> vector<12x12xf32>
    %cst_152 = arith.constant 2.500000e-01 : f32
    %276 = vector.broadcast %cst_152 : f32 to vector<12x12xf32>
    %277 = arith.mulf %275, %276 : vector<12x12xf32>
    %cst_153 = arith.constant dense<0xFF800000> : vector<12xf32>
    %278 = vector.multi_reduction <maximumf>, %277, %cst_153 [1] : vector<12x12xf32> to vector<12xf32>
    %279 = vector.shape_cast %278 : vector<12xf32> to vector<12x1xf32>
    %280 = vector.broadcast %279 : vector<12x1xf32> to vector<12x12xf32>
    %281 = arith.subf %277, %280 : vector<12x12xf32>
    %282 = math.exp %281 : vector<12x12xf32>
    %cst_154 = arith.constant dense<0.000000e+00> : vector<12xf32>
    %283 = vector.multi_reduction <add>, %282, %cst_154 [1] : vector<12x12xf32> to vector<12xf32>
    %284 = vector.shape_cast %283 : vector<12xf32> to vector<12x1xf32>
    %285 = tpu.reciprocal %284 {approx = true} : vector<12x1xf32> -> vector<12x1xf32>
    %286 = vector.broadcast %285 : vector<12x1xf32> to vector<12x12xf32>
    %287 = arith.mulf %282, %286 : vector<12x12xf32>
    %cst_155 = arith.constant dense<0.000000e+00> : vector<12x16xf32>
    %288 = tpu.matmul %287, %274, %cst_155 {dimension_numbers = #tpu.dot_dimension_numbers<[1], [0], [0], [1], [0, 0, 1, 1], [], []>} : vector<12x12xf32>, vector<12x16xf32>, vector<12x16xf32> -> vector<12x16xf32>
    %289 = vector.extract_strided_slice %231 {offsets = [0, 48], sizes = [12, 16], strides = [1, 1]} : vector<12x64xf32> to vector<12x16xf32>
    %290 = vector.extract_strided_slice %234 {offsets = [0, 48], sizes = [12, 16], strides = [1, 1]} : vector<12x64xf32> to vector<12x16xf32>
    %291 = vector.extract_strided_slice %237 {offsets = [0, 48], sizes = [12, 16], strides = [1, 1]} : vector<12x64xf32> to vector<12x16xf32>
    %cst_156 = arith.constant dense<0.000000e+00> : vector<12x12xf32>
    %292 = tpu.matmul %289, %290, %cst_156 {dimension_numbers = #tpu.dot_dimension_numbers<[1], [1], [0], [0], [0, 0, 1, 0], [], []>} : vector<12x16xf32>, vector<12x16xf32>, vector<12x12xf32> -> vector<12x12xf32>
    %cst_157 = arith.constant 2.500000e-01 : f32
    %293 = vector.broadcast %cst_157 : f32 to vector<12x12xf32>
    %294 = arith.mulf %292, %293 : vector<12x12xf32>
    %cst_158 = arith.constant dense<0xFF800000> : vector<12xf32>
    %295 = vector.multi_reduction <maximumf>, %294, %cst_158 [1] : vector<12x12xf32> to vector<12xf32>
    %296 = vector.shape_cast %295 : vector<12xf32> to vector<12x1xf32>
    %297 = vector.broadcast %296 : vector<12x1xf32> to vector<12x12xf32>
    %298 = arith.subf %294, %297 : vector<12x12xf32>
    %299 = math.exp %298 : vector<12x12xf32>
    %cst_159 = arith.constant dense<0.000000e+00> : vector<12xf32>
    %300 = vector.multi_reduction <add>, %299, %cst_159 [1] : vector<12x12xf32> to vector<12xf32>
    %301 = vector.shape_cast %300 : vector<12xf32> to vector<12x1xf32>
    %302 = tpu.reciprocal %301 {approx = true} : vector<12x1xf32> -> vector<12x1xf32>
    %303 = vector.broadcast %302 : vector<12x1xf32> to vector<12x12xf32>
    %304 = arith.mulf %299, %303 : vector<12x12xf32>
    %cst_160 = arith.constant dense<0.000000e+00> : vector<12x16xf32>
    %305 = tpu.matmul %304, %291, %cst_160 {dimension_numbers = #tpu.dot_dimension_numbers<[1], [0], [0], [1], [0, 0, 1, 1], [], []>} : vector<12x12xf32>, vector<12x16xf32>, vector<12x16xf32> -> vector<12x16xf32>
    %306 = tpu.concatenate %254, %271, %288, %305 in 1 : vector<12x16xf32>, vector<12x16xf32>, vector<12x16xf32>, vector<12x16xf32> -> vector<12x64xf32>
    %cst_161 = arith.constant dense<0.000000e+00> : vector<12x64xf32>
    %307 = tpu.matmul %306, %226, %cst_161 {dimension_numbers = #tpu.dot_dimension_numbers<[1], [1], [0], [0], [0, 0, 1, 0], [], []>} : vector<12x64xf32>, vector<64x64xf32>, vector<12x64xf32> -> vector<12x64xf32>
    %308 = vector.broadcast %228 : vector<1x64xf32> to vector<12x64xf32>
    %309 = arith.addf %307, %308 : vector<12x64xf32>
    %310 = vector.extract_strided_slice %80 {offsets = [0, 0], sizes = [1, 1], strides = [1, 1]} : vector<2x1xf32> to vector<1x1xf32>
    %311 = vector.broadcast %310 : vector<1x1xf32> to vector<12x64xf32>
    %312 = arith.mulf %309, %311 : vector<12x64xf32>
    %313 = arith.addf %212, %312 : vector<12x64xf32>
    %cst_162 = arith.constant dense<0.000000e+00> : vector<12xf32>
    %314 = vector.multi_reduction <add>, %313, %cst_162 [1] : vector<12x64xf32> to vector<12xf32>
    %315 = vector.shape_cast %314 : vector<12xf32> to vector<12x1xf32>
    %cst_163 = arith.constant 6.400000e+01 : f32
    %316 = vector.broadcast %cst_163 : f32 to vector<12x1xf32>
    %317 = arith.divf %315, %316 : vector<12x1xf32>
    %318 = vector.broadcast %317 : vector<12x1xf32> to vector<12x64xf32>
    %319 = arith.subf %313, %318 : vector<12x64xf32>
    %320 = arith.mulf %319, %319 : vector<12x64xf32>
    %cst_164 = arith.constant dense<0.000000e+00> : vector<12xf32>
    %321 = vector.multi_reduction <add>, %320, %cst_164 [1] : vector<12x64xf32> to vector<12xf32>
    %322 = vector.shape_cast %321 : vector<12xf32> to vector<12x1xf32>
    %cst_165 = arith.constant 6.400000e+01 : f32
    %323 = vector.broadcast %cst_165 : f32 to vector<12x1xf32>
    %324 = arith.divf %322, %323 : vector<12x1xf32>
    %325 = vector.broadcast %317 : vector<12x1xf32> to vector<12x64xf32>
    %326 = arith.subf %313, %325 : vector<12x64xf32>
    %cst_166 = arith.constant 9.99999974E-6 : f32
    %327 = vector.broadcast %cst_166 : f32 to vector<12x1xf32>
    %328 = arith.addf %324, %327 : vector<12x1xf32>
    %329 = math.rsqrt %328 : vector<12x1xf32>
    %330 = vector.broadcast %329 : vector<12x1xf32> to vector<12x64xf32>
    %331 = arith.mulf %326, %330 : vector<12x64xf32>
    %c1_167 = arith.constant 1 : index
    %c0_168 = arith.constant 0 : index
    %c0_169 = arith.constant 0 : index
    %332 = vector.load %arg20[%c1_167, %c0_168, %c0_169] : memref<2x1x64xf32, #tpu.memory_space<vmem>>, vector<1x1x64xf32>
    %333 = vector.shape_cast %332 : vector<1x1x64xf32> to vector<1x64xf32>
    %334 = vector.broadcast %333 : vector<1x64xf32> to vector<12x64xf32>
    %335 = arith.mulf %331, %334 : vector<12x64xf32>
    %c1_170 = arith.constant 1 : index
    %c0_171 = arith.constant 0 : index
    %c0_172 = arith.constant 0 : index
    %336 = vector.load %arg21[%c1_170, %c0_171, %c0_172] : memref<2x1x64xf32, #tpu.memory_space<vmem>>, vector<1x1x64xf32>
    %337 = vector.shape_cast %336 : vector<1x1x64xf32> to vector<1x64xf32>
    %338 = vector.broadcast %337 : vector<1x64xf32> to vector<12x64xf32>
    %339 = arith.addf %335, %338 : vector<12x64xf32>
    %c0_173 = arith.constant 0 : index
    %c0_174 = arith.constant 0 : index
    %340 = vector.load %arg22[%c0_173, %c0_174] : memref<64x64xf32, #tpu.memory_space<vmem>>, vector<64x64xf32>
    %c0_175 = arith.constant 0 : index
    %c0_176 = arith.constant 0 : index
    %341 = vector.load %arg26[%c0_175, %c0_176] : memref<1x64xf32, #tpu.memory_space<vmem>>, vector<1x64xf32>
    %c0_177 = arith.constant 0 : index
    %c0_178 = arith.constant 0 : index
    %342 = vector.load %arg23[%c0_177, %c0_178] : memref<64x64xf32, #tpu.memory_space<vmem>>, vector<64x64xf32>
    %c0_179 = arith.constant 0 : index
    %c0_180 = arith.constant 0 : index
    %343 = vector.load %arg27[%c0_179, %c0_180] : memref<1x64xf32, #tpu.memory_space<vmem>>, vector<1x64xf32>
    %c0_181 = arith.constant 0 : index
    %c0_182 = arith.constant 0 : index
    %344 = vector.load %arg24[%c0_181, %c0_182] : memref<64x64xf32, #tpu.memory_space<vmem>>, vector<64x64xf32>
    %c0_183 = arith.constant 0 : index
    %c0_184 = arith.constant 0 : index
    %345 = vector.load %arg28[%c0_183, %c0_184] : memref<1x64xf32, #tpu.memory_space<vmem>>, vector<1x64xf32>
    %c0_185 = arith.constant 0 : index
    %c0_186 = arith.constant 0 : index
    %346 = vector.load %arg25[%c0_185, %c0_186] : memref<64x64xf32, #tpu.memory_space<vmem>>, vector<64x64xf32>
    %c0_187 = arith.constant 0 : index
    %c0_188 = arith.constant 0 : index
    %347 = vector.load %arg29[%c0_187, %c0_188] : memref<1x64xf32, #tpu.memory_space<vmem>>, vector<1x64xf32>
    %cst_189 = arith.constant dense<0.000000e+00> : vector<12x64xf32>
    %348 = tpu.matmul %339, %340, %cst_189 {dimension_numbers = #tpu.dot_dimension_numbers<[1], [1], [0], [0], [0, 0, 1, 0], [], []>} : vector<12x64xf32>, vector<64x64xf32>, vector<12x64xf32> -> vector<12x64xf32>
    %349 = vector.broadcast %341 : vector<1x64xf32> to vector<12x64xf32>
    %350 = arith.addf %348, %349 : vector<12x64xf32>
    %cst_190 = arith.constant dense<0.000000e+00> : vector<12x64xf32>
    %351 = tpu.matmul %339, %342, %cst_190 {dimension_numbers = #tpu.dot_dimension_numbers<[1], [1], [0], [0], [0, 0, 1, 0], [], []>} : vector<12x64xf32>, vector<64x64xf32>, vector<12x64xf32> -> vector<12x64xf32>
    %352 = vector.broadcast %343 : vector<1x64xf32> to vector<12x64xf32>
    %353 = arith.addf %351, %352 : vector<12x64xf32>
    %cst_191 = arith.constant dense<0.000000e+00> : vector<12x64xf32>
    %354 = tpu.matmul %339, %344, %cst_191 {dimension_numbers = #tpu.dot_dimension_numbers<[1], [1], [0], [0], [0, 0, 1, 0], [], []>} : vector<12x64xf32>, vector<64x64xf32>, vector<12x64xf32> -> vector<12x64xf32>
    %355 = vector.broadcast %345 : vector<1x64xf32> to vector<12x64xf32>
    %356 = arith.addf %354, %355 : vector<12x64xf32>
    %357 = vector.extract_strided_slice %350 {offsets = [0, 0], sizes = [12, 16], strides = [1, 1]} : vector<12x64xf32> to vector<12x16xf32>
    %358 = vector.extract_strided_slice %353 {offsets = [0, 0], sizes = [12, 16], strides = [1, 1]} : vector<12x64xf32> to vector<12x16xf32>
    %359 = vector.extract_strided_slice %356 {offsets = [0, 0], sizes = [12, 16], strides = [1, 1]} : vector<12x64xf32> to vector<12x16xf32>
    %cst_192 = arith.constant dense<0.000000e+00> : vector<12x12xf32>
    %360 = tpu.matmul %357, %358, %cst_192 {dimension_numbers = #tpu.dot_dimension_numbers<[1], [1], [0], [0], [0, 0, 1, 0], [], []>} : vector<12x16xf32>, vector<12x16xf32>, vector<12x12xf32> -> vector<12x12xf32>
    %cst_193 = arith.constant 2.500000e-01 : f32
    %361 = vector.broadcast %cst_193 : f32 to vector<12x12xf32>
    %362 = arith.mulf %360, %361 : vector<12x12xf32>
    %cst_194 = arith.constant dense<0xFF800000> : vector<12xf32>
    %363 = vector.multi_reduction <maximumf>, %362, %cst_194 [1] : vector<12x12xf32> to vector<12xf32>
    %364 = vector.shape_cast %363 : vector<12xf32> to vector<12x1xf32>
    %365 = vector.broadcast %364 : vector<12x1xf32> to vector<12x12xf32>
    %366 = arith.subf %362, %365 : vector<12x12xf32>
    %367 = math.exp %366 : vector<12x12xf32>
    %cst_195 = arith.constant dense<0.000000e+00> : vector<12xf32>
    %368 = vector.multi_reduction <add>, %367, %cst_195 [1] : vector<12x12xf32> to vector<12xf32>
    %369 = vector.shape_cast %368 : vector<12xf32> to vector<12x1xf32>
    %370 = tpu.reciprocal %369 {approx = true} : vector<12x1xf32> -> vector<12x1xf32>
    %371 = vector.broadcast %370 : vector<12x1xf32> to vector<12x12xf32>
    %372 = arith.mulf %367, %371 : vector<12x12xf32>
    %cst_196 = arith.constant dense<0.000000e+00> : vector<12x16xf32>
    %373 = tpu.matmul %372, %359, %cst_196 {dimension_numbers = #tpu.dot_dimension_numbers<[1], [0], [0], [1], [0, 0, 1, 1], [], []>} : vector<12x12xf32>, vector<12x16xf32>, vector<12x16xf32> -> vector<12x16xf32>
    %374 = vector.extract_strided_slice %350 {offsets = [0, 16], sizes = [12, 16], strides = [1, 1]} : vector<12x64xf32> to vector<12x16xf32>
    %375 = vector.extract_strided_slice %353 {offsets = [0, 16], sizes = [12, 16], strides = [1, 1]} : vector<12x64xf32> to vector<12x16xf32>
    %376 = vector.extract_strided_slice %356 {offsets = [0, 16], sizes = [12, 16], strides = [1, 1]} : vector<12x64xf32> to vector<12x16xf32>
    %cst_197 = arith.constant dense<0.000000e+00> : vector<12x12xf32>
    %377 = tpu.matmul %374, %375, %cst_197 {dimension_numbers = #tpu.dot_dimension_numbers<[1], [1], [0], [0], [0, 0, 1, 0], [], []>} : vector<12x16xf32>, vector<12x16xf32>, vector<12x12xf32> -> vector<12x12xf32>
    %cst_198 = arith.constant 2.500000e-01 : f32
    %378 = vector.broadcast %cst_198 : f32 to vector<12x12xf32>
    %379 = arith.mulf %377, %378 : vector<12x12xf32>
    %cst_199 = arith.constant dense<0xFF800000> : vector<12xf32>
    %380 = vector.multi_reduction <maximumf>, %379, %cst_199 [1] : vector<12x12xf32> to vector<12xf32>
    %381 = vector.shape_cast %380 : vector<12xf32> to vector<12x1xf32>
    %382 = vector.broadcast %381 : vector<12x1xf32> to vector<12x12xf32>
    %383 = arith.subf %379, %382 : vector<12x12xf32>
    %384 = math.exp %383 : vector<12x12xf32>
    %cst_200 = arith.constant dense<0.000000e+00> : vector<12xf32>
    %385 = vector.multi_reduction <add>, %384, %cst_200 [1] : vector<12x12xf32> to vector<12xf32>
    %386 = vector.shape_cast %385 : vector<12xf32> to vector<12x1xf32>
    %387 = tpu.reciprocal %386 {approx = true} : vector<12x1xf32> -> vector<12x1xf32>
    %388 = vector.broadcast %387 : vector<12x1xf32> to vector<12x12xf32>
    %389 = arith.mulf %384, %388 : vector<12x12xf32>
    %cst_201 = arith.constant dense<0.000000e+00> : vector<12x16xf32>
    %390 = tpu.matmul %389, %376, %cst_201 {dimension_numbers = #tpu.dot_dimension_numbers<[1], [0], [0], [1], [0, 0, 1, 1], [], []>} : vector<12x12xf32>, vector<12x16xf32>, vector<12x16xf32> -> vector<12x16xf32>
    %391 = vector.extract_strided_slice %350 {offsets = [0, 32], sizes = [12, 16], strides = [1, 1]} : vector<12x64xf32> to vector<12x16xf32>
    %392 = vector.extract_strided_slice %353 {offsets = [0, 32], sizes = [12, 16], strides = [1, 1]} : vector<12x64xf32> to vector<12x16xf32>
    %393 = vector.extract_strided_slice %356 {offsets = [0, 32], sizes = [12, 16], strides = [1, 1]} : vector<12x64xf32> to vector<12x16xf32>
    %cst_202 = arith.constant dense<0.000000e+00> : vector<12x12xf32>
    %394 = tpu.matmul %391, %392, %cst_202 {dimension_numbers = #tpu.dot_dimension_numbers<[1], [1], [0], [0], [0, 0, 1, 0], [], []>} : vector<12x16xf32>, vector<12x16xf32>, vector<12x12xf32> -> vector<12x12xf32>
    %cst_203 = arith.constant 2.500000e-01 : f32
    %395 = vector.broadcast %cst_203 : f32 to vector<12x12xf32>
    %396 = arith.mulf %394, %395 : vector<12x12xf32>
    %cst_204 = arith.constant dense<0xFF800000> : vector<12xf32>
    %397 = vector.multi_reduction <maximumf>, %396, %cst_204 [1] : vector<12x12xf32> to vector<12xf32>
    %398 = vector.shape_cast %397 : vector<12xf32> to vector<12x1xf32>
    %399 = vector.broadcast %398 : vector<12x1xf32> to vector<12x12xf32>
    %400 = arith.subf %396, %399 : vector<12x12xf32>
    %401 = math.exp %400 : vector<12x12xf32>
    %cst_205 = arith.constant dense<0.000000e+00> : vector<12xf32>
    %402 = vector.multi_reduction <add>, %401, %cst_205 [1] : vector<12x12xf32> to vector<12xf32>
    %403 = vector.shape_cast %402 : vector<12xf32> to vector<12x1xf32>
    %404 = tpu.reciprocal %403 {approx = true} : vector<12x1xf32> -> vector<12x1xf32>
    %405 = vector.broadcast %404 : vector<12x1xf32> to vector<12x12xf32>
    %406 = arith.mulf %401, %405 : vector<12x12xf32>
    %cst_206 = arith.constant dense<0.000000e+00> : vector<12x16xf32>
    %407 = tpu.matmul %406, %393, %cst_206 {dimension_numbers = #tpu.dot_dimension_numbers<[1], [0], [0], [1], [0, 0, 1, 1], [], []>} : vector<12x12xf32>, vector<12x16xf32>, vector<12x16xf32> -> vector<12x16xf32>
    %408 = vector.extract_strided_slice %350 {offsets = [0, 48], sizes = [12, 16], strides = [1, 1]} : vector<12x64xf32> to vector<12x16xf32>
    %409 = vector.extract_strided_slice %353 {offsets = [0, 48], sizes = [12, 16], strides = [1, 1]} : vector<12x64xf32> to vector<12x16xf32>
    %410 = vector.extract_strided_slice %356 {offsets = [0, 48], sizes = [12, 16], strides = [1, 1]} : vector<12x64xf32> to vector<12x16xf32>
    %cst_207 = arith.constant dense<0.000000e+00> : vector<12x12xf32>
    %411 = tpu.matmul %408, %409, %cst_207 {dimension_numbers = #tpu.dot_dimension_numbers<[1], [1], [0], [0], [0, 0, 1, 0], [], []>} : vector<12x16xf32>, vector<12x16xf32>, vector<12x12xf32> -> vector<12x12xf32>
    %cst_208 = arith.constant 2.500000e-01 : f32
    %412 = vector.broadcast %cst_208 : f32 to vector<12x12xf32>
    %413 = arith.mulf %411, %412 : vector<12x12xf32>
    %cst_209 = arith.constant dense<0xFF800000> : vector<12xf32>
    %414 = vector.multi_reduction <maximumf>, %413, %cst_209 [1] : vector<12x12xf32> to vector<12xf32>
    %415 = vector.shape_cast %414 : vector<12xf32> to vector<12x1xf32>
    %416 = vector.broadcast %415 : vector<12x1xf32> to vector<12x12xf32>
    %417 = arith.subf %413, %416 : vector<12x12xf32>
    %418 = math.exp %417 : vector<12x12xf32>
    %cst_210 = arith.constant dense<0.000000e+00> : vector<12xf32>
    %419 = vector.multi_reduction <add>, %418, %cst_210 [1] : vector<12x12xf32> to vector<12xf32>
    %420 = vector.shape_cast %419 : vector<12xf32> to vector<12x1xf32>
    %421 = tpu.reciprocal %420 {approx = true} : vector<12x1xf32> -> vector<12x1xf32>
    %422 = vector.broadcast %421 : vector<12x1xf32> to vector<12x12xf32>
    %423 = arith.mulf %418, %422 : vector<12x12xf32>
    %cst_211 = arith.constant dense<0.000000e+00> : vector<12x16xf32>
    %424 = tpu.matmul %423, %410, %cst_211 {dimension_numbers = #tpu.dot_dimension_numbers<[1], [0], [0], [1], [0, 0, 1, 1], [], []>} : vector<12x12xf32>, vector<12x16xf32>, vector<12x16xf32> -> vector<12x16xf32>
    %425 = tpu.concatenate %373, %390, %407, %424 in 1 : vector<12x16xf32>, vector<12x16xf32>, vector<12x16xf32>, vector<12x16xf32> -> vector<12x64xf32>
    %cst_212 = arith.constant dense<0.000000e+00> : vector<12x64xf32>
    %426 = tpu.matmul %425, %346, %cst_212 {dimension_numbers = #tpu.dot_dimension_numbers<[1], [1], [0], [0], [0, 0, 1, 0], [], []>} : vector<12x64xf32>, vector<64x64xf32>, vector<12x64xf32> -> vector<12x64xf32>
    %427 = vector.broadcast %347 : vector<1x64xf32> to vector<12x64xf32>
    %428 = arith.addf %426, %427 : vector<12x64xf32>
    %cst_213 = arith.constant dense<0.000000e+00> : vector<64xf32>
    %429 = vector.multi_reduction <add>, %428, %cst_213 [0] : vector<12x64xf32> to vector<64xf32>
    %430 = vector.shape_cast %429 : vector<64xf32> to vector<1x64xf32>
    %cst_214 = arith.constant 1.200000e+01 : f32
    %431 = vector.broadcast %cst_214 : f32 to vector<1x64xf32>
    %432 = arith.divf %430, %431 : vector<1x64xf32>
    %c1_215 = arith.constant 1 : index
    %c0_216 = arith.constant 0 : index
    %c0_217 = arith.constant 0 : index
    %433 = vector.load %arg0[%c1_215, %c0_216, %c0_217] : memref<2x12x64xf32, #tpu.memory_space<vmem>>, vector<1x12x64xf32>
    %434 = vector.shape_cast %433 : vector<1x12x64xf32> to vector<12x64xf32>
    %435 = vector.extract_strided_slice %19 {offsets = [1, 0], sizes = [1, 64], strides = [1, 1]} : vector<2x64xf32> to vector<1x64xf32>
    %436 = vector.broadcast %435 : vector<1x64xf32> to vector<12x64xf32>
    %437 = arith.addf %434, %436 : vector<12x64xf32>
    %c0_218 = arith.constant 0 : index
    %c0_219 = arith.constant 0 : index
    %c0_220 = arith.constant 0 : index
    %438 = vector.load %arg8[%c0_218, %c0_219, %c0_220] : memref<2x64x64xf32, #tpu.memory_space<vmem>>, vector<1x64x64xf32>
    %439 = vector.shape_cast %438 : vector<1x64x64xf32> to vector<64x64xf32>
    %c0_221 = arith.constant 0 : index
    %c0_222 = arith.constant 0 : index
    %c0_223 = arith.constant 0 : index
    %440 = vector.load %arg12[%c0_221, %c0_222, %c0_223] : memref<2x1x64xf32, #tpu.memory_space<vmem>>, vector<1x1x64xf32>
    %441 = vector.shape_cast %440 : vector<1x1x64xf32> to vector<1x64xf32>
    %c0_224 = arith.constant 0 : index
    %c0_225 = arith.constant 0 : index
    %c0_226 = arith.constant 0 : index
    %442 = vector.load %arg9[%c0_224, %c0_225, %c0_226] : memref<2x64x64xf32, #tpu.memory_space<vmem>>, vector<1x64x64xf32>
    %443 = vector.shape_cast %442 : vector<1x64x64xf32> to vector<64x64xf32>
    %c0_227 = arith.constant 0 : index
    %c0_228 = arith.constant 0 : index
    %c0_229 = arith.constant 0 : index
    %444 = vector.load %arg13[%c0_227, %c0_228, %c0_229] : memref<2x1x64xf32, #tpu.memory_space<vmem>>, vector<1x1x64xf32>
    %445 = vector.shape_cast %444 : vector<1x1x64xf32> to vector<1x64xf32>
    %c0_230 = arith.constant 0 : index
    %c0_231 = arith.constant 0 : index
    %c0_232 = arith.constant 0 : index
    %446 = vector.load %arg10[%c0_230, %c0_231, %c0_232] : memref<2x64x64xf32, #tpu.memory_space<vmem>>, vector<1x64x64xf32>
    %447 = vector.shape_cast %446 : vector<1x64x64xf32> to vector<64x64xf32>
    %c0_233 = arith.constant 0 : index
    %c0_234 = arith.constant 0 : index
    %c0_235 = arith.constant 0 : index
    %448 = vector.load %arg14[%c0_233, %c0_234, %c0_235] : memref<2x1x64xf32, #tpu.memory_space<vmem>>, vector<1x1x64xf32>
    %449 = vector.shape_cast %448 : vector<1x1x64xf32> to vector<1x64xf32>
    %c0_236 = arith.constant 0 : index
    %c0_237 = arith.constant 0 : index
    %c0_238 = arith.constant 0 : index
    %450 = vector.load %arg11[%c0_236, %c0_237, %c0_238] : memref<2x64x64xf32, #tpu.memory_space<vmem>>, vector<1x64x64xf32>
    %451 = vector.shape_cast %450 : vector<1x64x64xf32> to vector<64x64xf32>
    %c0_239 = arith.constant 0 : index
    %c0_240 = arith.constant 0 : index
    %c0_241 = arith.constant 0 : index
    %452 = vector.load %arg15[%c0_239, %c0_240, %c0_241] : memref<2x1x64xf32, #tpu.memory_space<vmem>>, vector<1x1x64xf32>
    %453 = vector.shape_cast %452 : vector<1x1x64xf32> to vector<1x64xf32>
    %cst_242 = arith.constant dense<0.000000e+00> : vector<12x64xf32>
    %454 = tpu.matmul %437, %439, %cst_242 {dimension_numbers = #tpu.dot_dimension_numbers<[1], [1], [0], [0], [0, 0, 1, 0], [], []>} : vector<12x64xf32>, vector<64x64xf32>, vector<12x64xf32> -> vector<12x64xf32>
    %455 = vector.broadcast %441 : vector<1x64xf32> to vector<12x64xf32>
    %456 = arith.addf %454, %455 : vector<12x64xf32>
    %cst_243 = arith.constant dense<0.000000e+00> : vector<12x64xf32>
    %457 = tpu.matmul %437, %443, %cst_243 {dimension_numbers = #tpu.dot_dimension_numbers<[1], [1], [0], [0], [0, 0, 1, 0], [], []>} : vector<12x64xf32>, vector<64x64xf32>, vector<12x64xf32> -> vector<12x64xf32>
    %458 = vector.broadcast %445 : vector<1x64xf32> to vector<12x64xf32>
    %459 = arith.addf %457, %458 : vector<12x64xf32>
    %cst_244 = arith.constant dense<0.000000e+00> : vector<12x64xf32>
    %460 = tpu.matmul %437, %447, %cst_244 {dimension_numbers = #tpu.dot_dimension_numbers<[1], [1], [0], [0], [0, 0, 1, 0], [], []>} : vector<12x64xf32>, vector<64x64xf32>, vector<12x64xf32> -> vector<12x64xf32>
    %461 = vector.broadcast %449 : vector<1x64xf32> to vector<12x64xf32>
    %462 = arith.addf %460, %461 : vector<12x64xf32>
    %463 = vector.extract_strided_slice %456 {offsets = [0, 0], sizes = [12, 16], strides = [1, 1]} : vector<12x64xf32> to vector<12x16xf32>
    %464 = vector.extract_strided_slice %459 {offsets = [0, 0], sizes = [12, 16], strides = [1, 1]} : vector<12x64xf32> to vector<12x16xf32>
    %465 = vector.extract_strided_slice %462 {offsets = [0, 0], sizes = [12, 16], strides = [1, 1]} : vector<12x64xf32> to vector<12x16xf32>
    %cst_245 = arith.constant dense<0.000000e+00> : vector<12x12xf32>
    %466 = tpu.matmul %463, %464, %cst_245 {dimension_numbers = #tpu.dot_dimension_numbers<[1], [1], [0], [0], [0, 0, 1, 0], [], []>} : vector<12x16xf32>, vector<12x16xf32>, vector<12x12xf32> -> vector<12x12xf32>
    %cst_246 = arith.constant 2.500000e-01 : f32
    %467 = vector.broadcast %cst_246 : f32 to vector<12x12xf32>
    %468 = arith.mulf %466, %467 : vector<12x12xf32>
    %cst_247 = arith.constant dense<0xFF800000> : vector<12xf32>
    %469 = vector.multi_reduction <maximumf>, %468, %cst_247 [1] : vector<12x12xf32> to vector<12xf32>
    %470 = vector.shape_cast %469 : vector<12xf32> to vector<12x1xf32>
    %471 = vector.broadcast %470 : vector<12x1xf32> to vector<12x12xf32>
    %472 = arith.subf %468, %471 : vector<12x12xf32>
    %473 = math.exp %472 : vector<12x12xf32>
    %cst_248 = arith.constant dense<0.000000e+00> : vector<12xf32>
    %474 = vector.multi_reduction <add>, %473, %cst_248 [1] : vector<12x12xf32> to vector<12xf32>
    %475 = vector.shape_cast %474 : vector<12xf32> to vector<12x1xf32>
    %476 = tpu.reciprocal %475 {approx = true} : vector<12x1xf32> -> vector<12x1xf32>
    %477 = vector.broadcast %476 : vector<12x1xf32> to vector<12x12xf32>
    %478 = arith.mulf %473, %477 : vector<12x12xf32>
    %cst_249 = arith.constant dense<0.000000e+00> : vector<12x16xf32>
    %479 = tpu.matmul %478, %465, %cst_249 {dimension_numbers = #tpu.dot_dimension_numbers<[1], [0], [0], [1], [0, 0, 1, 1], [], []>} : vector<12x12xf32>, vector<12x16xf32>, vector<12x16xf32> -> vector<12x16xf32>
    %480 = vector.extract_strided_slice %456 {offsets = [0, 16], sizes = [12, 16], strides = [1, 1]} : vector<12x64xf32> to vector<12x16xf32>
    %481 = vector.extract_strided_slice %459 {offsets = [0, 16], sizes = [12, 16], strides = [1, 1]} : vector<12x64xf32> to vector<12x16xf32>
    %482 = vector.extract_strided_slice %462 {offsets = [0, 16], sizes = [12, 16], strides = [1, 1]} : vector<12x64xf32> to vector<12x16xf32>
    %cst_250 = arith.constant dense<0.000000e+00> : vector<12x12xf32>
    %483 = tpu.matmul %480, %481, %cst_250 {dimension_numbers = #tpu.dot_dimension_numbers<[1], [1], [0], [0], [0, 0, 1, 0], [], []>} : vector<12x16xf32>, vector<12x16xf32>, vector<12x12xf32> -> vector<12x12xf32>
    %cst_251 = arith.constant 2.500000e-01 : f32
    %484 = vector.broadcast %cst_251 : f32 to vector<12x12xf32>
    %485 = arith.mulf %483, %484 : vector<12x12xf32>
    %cst_252 = arith.constant dense<0xFF800000> : vector<12xf32>
    %486 = vector.multi_reduction <maximumf>, %485, %cst_252 [1] : vector<12x12xf32> to vector<12xf32>
    %487 = vector.shape_cast %486 : vector<12xf32> to vector<12x1xf32>
    %488 = vector.broadcast %487 : vector<12x1xf32> to vector<12x12xf32>
    %489 = arith.subf %485, %488 : vector<12x12xf32>
    %490 = math.exp %489 : vector<12x12xf32>
    %cst_253 = arith.constant dense<0.000000e+00> : vector<12xf32>
    %491 = vector.multi_reduction <add>, %490, %cst_253 [1] : vector<12x12xf32> to vector<12xf32>
    %492 = vector.shape_cast %491 : vector<12xf32> to vector<12x1xf32>
    %493 = tpu.reciprocal %492 {approx = true} : vector<12x1xf32> -> vector<12x1xf32>
    %494 = vector.broadcast %493 : vector<12x1xf32> to vector<12x12xf32>
    %495 = arith.mulf %490, %494 : vector<12x12xf32>
    %cst_254 = arith.constant dense<0.000000e+00> : vector<12x16xf32>
    %496 = tpu.matmul %495, %482, %cst_254 {dimension_numbers = #tpu.dot_dimension_numbers<[1], [0], [0], [1], [0, 0, 1, 1], [], []>} : vector<12x12xf32>, vector<12x16xf32>, vector<12x16xf32> -> vector<12x16xf32>
    %497 = vector.extract_strided_slice %456 {offsets = [0, 32], sizes = [12, 16], strides = [1, 1]} : vector<12x64xf32> to vector<12x16xf32>
    %498 = vector.extract_strided_slice %459 {offsets = [0, 32], sizes = [12, 16], strides = [1, 1]} : vector<12x64xf32> to vector<12x16xf32>
    %499 = vector.extract_strided_slice %462 {offsets = [0, 32], sizes = [12, 16], strides = [1, 1]} : vector<12x64xf32> to vector<12x16xf32>
    %cst_255 = arith.constant dense<0.000000e+00> : vector<12x12xf32>
    %500 = tpu.matmul %497, %498, %cst_255 {dimension_numbers = #tpu.dot_dimension_numbers<[1], [1], [0], [0], [0, 0, 1, 0], [], []>} : vector<12x16xf32>, vector<12x16xf32>, vector<12x12xf32> -> vector<12x12xf32>
    %cst_256 = arith.constant 2.500000e-01 : f32
    %501 = vector.broadcast %cst_256 : f32 to vector<12x12xf32>
    %502 = arith.mulf %500, %501 : vector<12x12xf32>
    %cst_257 = arith.constant dense<0xFF800000> : vector<12xf32>
    %503 = vector.multi_reduction <maximumf>, %502, %cst_257 [1] : vector<12x12xf32> to vector<12xf32>
    %504 = vector.shape_cast %503 : vector<12xf32> to vector<12x1xf32>
    %505 = vector.broadcast %504 : vector<12x1xf32> to vector<12x12xf32>
    %506 = arith.subf %502, %505 : vector<12x12xf32>
    %507 = math.exp %506 : vector<12x12xf32>
    %cst_258 = arith.constant dense<0.000000e+00> : vector<12xf32>
    %508 = vector.multi_reduction <add>, %507, %cst_258 [1] : vector<12x12xf32> to vector<12xf32>
    %509 = vector.shape_cast %508 : vector<12xf32> to vector<12x1xf32>
    %510 = tpu.reciprocal %509 {approx = true} : vector<12x1xf32> -> vector<12x1xf32>
    %511 = vector.broadcast %510 : vector<12x1xf32> to vector<12x12xf32>
    %512 = arith.mulf %507, %511 : vector<12x12xf32>
    %cst_259 = arith.constant dense<0.000000e+00> : vector<12x16xf32>
    %513 = tpu.matmul %512, %499, %cst_259 {dimension_numbers = #tpu.dot_dimension_numbers<[1], [0], [0], [1], [0, 0, 1, 1], [], []>} : vector<12x12xf32>, vector<12x16xf32>, vector<12x16xf32> -> vector<12x16xf32>
    %514 = vector.extract_strided_slice %456 {offsets = [0, 48], sizes = [12, 16], strides = [1, 1]} : vector<12x64xf32> to vector<12x16xf32>
    %515 = vector.extract_strided_slice %459 {offsets = [0, 48], sizes = [12, 16], strides = [1, 1]} : vector<12x64xf32> to vector<12x16xf32>
    %516 = vector.extract_strided_slice %462 {offsets = [0, 48], sizes = [12, 16], strides = [1, 1]} : vector<12x64xf32> to vector<12x16xf32>
    %cst_260 = arith.constant dense<0.000000e+00> : vector<12x12xf32>
    %517 = tpu.matmul %514, %515, %cst_260 {dimension_numbers = #tpu.dot_dimension_numbers<[1], [1], [0], [0], [0, 0, 1, 0], [], []>} : vector<12x16xf32>, vector<12x16xf32>, vector<12x12xf32> -> vector<12x12xf32>
    %cst_261 = arith.constant 2.500000e-01 : f32
    %518 = vector.broadcast %cst_261 : f32 to vector<12x12xf32>
    %519 = arith.mulf %517, %518 : vector<12x12xf32>
    %cst_262 = arith.constant dense<0xFF800000> : vector<12xf32>
    %520 = vector.multi_reduction <maximumf>, %519, %cst_262 [1] : vector<12x12xf32> to vector<12xf32>
    %521 = vector.shape_cast %520 : vector<12xf32> to vector<12x1xf32>
    %522 = vector.broadcast %521 : vector<12x1xf32> to vector<12x12xf32>
    %523 = arith.subf %519, %522 : vector<12x12xf32>
    %524 = math.exp %523 : vector<12x12xf32>
    %cst_263 = arith.constant dense<0.000000e+00> : vector<12xf32>
    %525 = vector.multi_reduction <add>, %524, %cst_263 [1] : vector<12x12xf32> to vector<12xf32>
    %526 = vector.shape_cast %525 : vector<12xf32> to vector<12x1xf32>
    %527 = tpu.reciprocal %526 {approx = true} : vector<12x1xf32> -> vector<12x1xf32>
    %528 = vector.broadcast %527 : vector<12x1xf32> to vector<12x12xf32>
    %529 = arith.mulf %524, %528 : vector<12x12xf32>
    %cst_264 = arith.constant dense<0.000000e+00> : vector<12x16xf32>
    %530 = tpu.matmul %529, %516, %cst_264 {dimension_numbers = #tpu.dot_dimension_numbers<[1], [0], [0], [1], [0, 0, 1, 1], [], []>} : vector<12x12xf32>, vector<12x16xf32>, vector<12x16xf32> -> vector<12x16xf32>
    %531 = tpu.concatenate %479, %496, %513, %530 in 1 : vector<12x16xf32>, vector<12x16xf32>, vector<12x16xf32>, vector<12x16xf32> -> vector<12x64xf32>
    %cst_265 = arith.constant dense<0.000000e+00> : vector<12x64xf32>
    %532 = tpu.matmul %531, %451, %cst_265 {dimension_numbers = #tpu.dot_dimension_numbers<[1], [1], [0], [0], [0, 0, 1, 0], [], []>} : vector<12x64xf32>, vector<64x64xf32>, vector<12x64xf32> -> vector<12x64xf32>
    %533 = vector.broadcast %453 : vector<1x64xf32> to vector<12x64xf32>
    %534 = arith.addf %532, %533 : vector<12x64xf32>
    %535 = vector.extract_strided_slice %50 {offsets = [1, 0], sizes = [1, 1], strides = [1, 1]} : vector<2x1xf32> to vector<1x1xf32>
    %536 = vector.broadcast %535 : vector<1x1xf32> to vector<12x64xf32>
    %537 = arith.mulf %534, %536 : vector<12x64xf32>
    %538 = arith.addf %437, %537 : vector<12x64xf32>
    %cst_266 = arith.constant dense<0.000000e+00> : vector<12xf32>
    %539 = vector.multi_reduction <add>, %538, %cst_266 [1] : vector<12x64xf32> to vector<12xf32>
    %540 = vector.shape_cast %539 : vector<12xf32> to vector<12x1xf32>
    %cst_267 = arith.constant 6.400000e+01 : f32
    %541 = vector.broadcast %cst_267 : f32 to vector<12x1xf32>
    %542 = arith.divf %540, %541 : vector<12x1xf32>
    %543 = vector.broadcast %542 : vector<12x1xf32> to vector<12x64xf32>
    %544 = arith.subf %538, %543 : vector<12x64xf32>
    %545 = arith.mulf %544, %544 : vector<12x64xf32>
    %cst_268 = arith.constant dense<0.000000e+00> : vector<12xf32>
    %546 = vector.multi_reduction <add>, %545, %cst_268 [1] : vector<12x64xf32> to vector<12xf32>
    %547 = vector.shape_cast %546 : vector<12xf32> to vector<12x1xf32>
    %cst_269 = arith.constant 6.400000e+01 : f32
    %548 = vector.broadcast %cst_269 : f32 to vector<12x1xf32>
    %549 = arith.divf %547, %548 : vector<12x1xf32>
    %550 = vector.broadcast %542 : vector<12x1xf32> to vector<12x64xf32>
    %551 = arith.subf %538, %550 : vector<12x64xf32>
    %cst_270 = arith.constant 9.99999974E-6 : f32
    %552 = vector.broadcast %cst_270 : f32 to vector<12x1xf32>
    %553 = arith.addf %549, %552 : vector<12x1xf32>
    %554 = math.rsqrt %553 : vector<12x1xf32>
    %555 = vector.broadcast %554 : vector<12x1xf32> to vector<12x64xf32>
    %556 = arith.mulf %551, %555 : vector<12x64xf32>
    %c0_271 = arith.constant 0 : index
    %c0_272 = arith.constant 0 : index
    %c0_273 = arith.constant 0 : index
    %557 = vector.load %arg20[%c0_271, %c0_272, %c0_273] : memref<2x1x64xf32, #tpu.memory_space<vmem>>, vector<1x1x64xf32>
    %558 = vector.shape_cast %557 : vector<1x1x64xf32> to vector<1x64xf32>
    %559 = vector.broadcast %558 : vector<1x64xf32> to vector<12x64xf32>
    %560 = arith.mulf %556, %559 : vector<12x64xf32>
    %c0_274 = arith.constant 0 : index
    %c0_275 = arith.constant 0 : index
    %c0_276 = arith.constant 0 : index
    %561 = vector.load %arg21[%c0_274, %c0_275, %c0_276] : memref<2x1x64xf32, #tpu.memory_space<vmem>>, vector<1x1x64xf32>
    %562 = vector.shape_cast %561 : vector<1x1x64xf32> to vector<1x64xf32>
    %563 = vector.broadcast %562 : vector<1x64xf32> to vector<12x64xf32>
    %564 = arith.addf %560, %563 : vector<12x64xf32>
    %c1_277 = arith.constant 1 : index
    %c0_278 = arith.constant 0 : index
    %c0_279 = arith.constant 0 : index
    %565 = vector.load %arg8[%c1_277, %c0_278, %c0_279] : memref<2x64x64xf32, #tpu.memory_space<vmem>>, vector<1x64x64xf32>
    %566 = vector.shape_cast %565 : vector<1x64x64xf32> to vector<64x64xf32>
    %c1_280 = arith.constant 1 : index
    %c0_281 = arith.constant 0 : index
    %c0_282 = arith.constant 0 : index
    %567 = vector.load %arg12[%c1_280, %c0_281, %c0_282] : memref<2x1x64xf32, #tpu.memory_space<vmem>>, vector<1x1x64xf32>
    %568 = vector.shape_cast %567 : vector<1x1x64xf32> to vector<1x64xf32>
    %c1_283 = arith.constant 1 : index
    %c0_284 = arith.constant 0 : index
    %c0_285 = arith.constant 0 : index
    %569 = vector.load %arg9[%c1_283, %c0_284, %c0_285] : memref<2x64x64xf32, #tpu.memory_space<vmem>>, vector<1x64x64xf32>
    %570 = vector.shape_cast %569 : vector<1x64x64xf32> to vector<64x64xf32>
    %c1_286 = arith.constant 1 : index
    %c0_287 = arith.constant 0 : index
    %c0_288 = arith.constant 0 : index
    %571 = vector.load %arg13[%c1_286, %c0_287, %c0_288] : memref<2x1x64xf32, #tpu.memory_space<vmem>>, vector<1x1x64xf32>
    %572 = vector.shape_cast %571 : vector<1x1x64xf32> to vector<1x64xf32>
    %c1_289 = arith.constant 1 : index
    %c0_290 = arith.constant 0 : index
    %c0_291 = arith.constant 0 : index
    %573 = vector.load %arg10[%c1_289, %c0_290, %c0_291] : memref<2x64x64xf32, #tpu.memory_space<vmem>>, vector<1x64x64xf32>
    %574 = vector.shape_cast %573 : vector<1x64x64xf32> to vector<64x64xf32>
    %c1_292 = arith.constant 1 : index
    %c0_293 = arith.constant 0 : index
    %c0_294 = arith.constant 0 : index
    %575 = vector.load %arg14[%c1_292, %c0_293, %c0_294] : memref<2x1x64xf32, #tpu.memory_space<vmem>>, vector<1x1x64xf32>
    %576 = vector.shape_cast %575 : vector<1x1x64xf32> to vector<1x64xf32>
    %c1_295 = arith.constant 1 : index
    %c0_296 = arith.constant 0 : index
    %c0_297 = arith.constant 0 : index
    %577 = vector.load %arg11[%c1_295, %c0_296, %c0_297] : memref<2x64x64xf32, #tpu.memory_space<vmem>>, vector<1x64x64xf32>
    %578 = vector.shape_cast %577 : vector<1x64x64xf32> to vector<64x64xf32>
    %c1_298 = arith.constant 1 : index
    %c0_299 = arith.constant 0 : index
    %c0_300 = arith.constant 0 : index
    %579 = vector.load %arg15[%c1_298, %c0_299, %c0_300] : memref<2x1x64xf32, #tpu.memory_space<vmem>>, vector<1x1x64xf32>
    %580 = vector.shape_cast %579 : vector<1x1x64xf32> to vector<1x64xf32>
    %cst_301 = arith.constant dense<0.000000e+00> : vector<12x64xf32>
    %581 = tpu.matmul %564, %566, %cst_301 {dimension_numbers = #tpu.dot_dimension_numbers<[1], [1], [0], [0], [0, 0, 1, 0], [], []>} : vector<12x64xf32>, vector<64x64xf32>, vector<12x64xf32> -> vector<12x64xf32>
    %582 = vector.broadcast %568 : vector<1x64xf32> to vector<12x64xf32>
    %583 = arith.addf %581, %582 : vector<12x64xf32>
    %cst_302 = arith.constant dense<0.000000e+00> : vector<12x64xf32>
    %584 = tpu.matmul %564, %570, %cst_302 {dimension_numbers = #tpu.dot_dimension_numbers<[1], [1], [0], [0], [0, 0, 1, 0], [], []>} : vector<12x64xf32>, vector<64x64xf32>, vector<12x64xf32> -> vector<12x64xf32>
    %585 = vector.broadcast %572 : vector<1x64xf32> to vector<12x64xf32>
    %586 = arith.addf %584, %585 : vector<12x64xf32>
    %cst_303 = arith.constant dense<0.000000e+00> : vector<12x64xf32>
    %587 = tpu.matmul %564, %574, %cst_303 {dimension_numbers = #tpu.dot_dimension_numbers<[1], [1], [0], [0], [0, 0, 1, 0], [], []>} : vector<12x64xf32>, vector<64x64xf32>, vector<12x64xf32> -> vector<12x64xf32>
    %588 = vector.broadcast %576 : vector<1x64xf32> to vector<12x64xf32>
    %589 = arith.addf %587, %588 : vector<12x64xf32>
    %590 = vector.extract_strided_slice %583 {offsets = [0, 0], sizes = [12, 16], strides = [1, 1]} : vector<12x64xf32> to vector<12x16xf32>
    %591 = vector.extract_strided_slice %586 {offsets = [0, 0], sizes = [12, 16], strides = [1, 1]} : vector<12x64xf32> to vector<12x16xf32>
    %592 = vector.extract_strided_slice %589 {offsets = [0, 0], sizes = [12, 16], strides = [1, 1]} : vector<12x64xf32> to vector<12x16xf32>
    %cst_304 = arith.constant dense<0.000000e+00> : vector<12x12xf32>
    %593 = tpu.matmul %590, %591, %cst_304 {dimension_numbers = #tpu.dot_dimension_numbers<[1], [1], [0], [0], [0, 0, 1, 0], [], []>} : vector<12x16xf32>, vector<12x16xf32>, vector<12x12xf32> -> vector<12x12xf32>
    %cst_305 = arith.constant 2.500000e-01 : f32
    %594 = vector.broadcast %cst_305 : f32 to vector<12x12xf32>
    %595 = arith.mulf %593, %594 : vector<12x12xf32>
    %cst_306 = arith.constant dense<0xFF800000> : vector<12xf32>
    %596 = vector.multi_reduction <maximumf>, %595, %cst_306 [1] : vector<12x12xf32> to vector<12xf32>
    %597 = vector.shape_cast %596 : vector<12xf32> to vector<12x1xf32>
    %598 = vector.broadcast %597 : vector<12x1xf32> to vector<12x12xf32>
    %599 = arith.subf %595, %598 : vector<12x12xf32>
    %600 = math.exp %599 : vector<12x12xf32>
    %cst_307 = arith.constant dense<0.000000e+00> : vector<12xf32>
    %601 = vector.multi_reduction <add>, %600, %cst_307 [1] : vector<12x12xf32> to vector<12xf32>
    %602 = vector.shape_cast %601 : vector<12xf32> to vector<12x1xf32>
    %603 = tpu.reciprocal %602 {approx = true} : vector<12x1xf32> -> vector<12x1xf32>
    %604 = vector.broadcast %603 : vector<12x1xf32> to vector<12x12xf32>
    %605 = arith.mulf %600, %604 : vector<12x12xf32>
    %cst_308 = arith.constant dense<0.000000e+00> : vector<12x16xf32>
    %606 = tpu.matmul %605, %592, %cst_308 {dimension_numbers = #tpu.dot_dimension_numbers<[1], [0], [0], [1], [0, 0, 1, 1], [], []>} : vector<12x12xf32>, vector<12x16xf32>, vector<12x16xf32> -> vector<12x16xf32>
    %607 = vector.extract_strided_slice %583 {offsets = [0, 16], sizes = [12, 16], strides = [1, 1]} : vector<12x64xf32> to vector<12x16xf32>
    %608 = vector.extract_strided_slice %586 {offsets = [0, 16], sizes = [12, 16], strides = [1, 1]} : vector<12x64xf32> to vector<12x16xf32>
    %609 = vector.extract_strided_slice %589 {offsets = [0, 16], sizes = [12, 16], strides = [1, 1]} : vector<12x64xf32> to vector<12x16xf32>
    %cst_309 = arith.constant dense<0.000000e+00> : vector<12x12xf32>
    %610 = tpu.matmul %607, %608, %cst_309 {dimension_numbers = #tpu.dot_dimension_numbers<[1], [1], [0], [0], [0, 0, 1, 0], [], []>} : vector<12x16xf32>, vector<12x16xf32>, vector<12x12xf32> -> vector<12x12xf32>
    %cst_310 = arith.constant 2.500000e-01 : f32
    %611 = vector.broadcast %cst_310 : f32 to vector<12x12xf32>
    %612 = arith.mulf %610, %611 : vector<12x12xf32>
    %cst_311 = arith.constant dense<0xFF800000> : vector<12xf32>
    %613 = vector.multi_reduction <maximumf>, %612, %cst_311 [1] : vector<12x12xf32> to vector<12xf32>
    %614 = vector.shape_cast %613 : vector<12xf32> to vector<12x1xf32>
    %615 = vector.broadcast %614 : vector<12x1xf32> to vector<12x12xf32>
    %616 = arith.subf %612, %615 : vector<12x12xf32>
    %617 = math.exp %616 : vector<12x12xf32>
    %cst_312 = arith.constant dense<0.000000e+00> : vector<12xf32>
    %618 = vector.multi_reduction <add>, %617, %cst_312 [1] : vector<12x12xf32> to vector<12xf32>
    %619 = vector.shape_cast %618 : vector<12xf32> to vector<12x1xf32>
    %620 = tpu.reciprocal %619 {approx = true} : vector<12x1xf32> -> vector<12x1xf32>
    %621 = vector.broadcast %620 : vector<12x1xf32> to vector<12x12xf32>
    %622 = arith.mulf %617, %621 : vector<12x12xf32>
    %cst_313 = arith.constant dense<0.000000e+00> : vector<12x16xf32>
    %623 = tpu.matmul %622, %609, %cst_313 {dimension_numbers = #tpu.dot_dimension_numbers<[1], [0], [0], [1], [0, 0, 1, 1], [], []>} : vector<12x12xf32>, vector<12x16xf32>, vector<12x16xf32> -> vector<12x16xf32>
    %624 = vector.extract_strided_slice %583 {offsets = [0, 32], sizes = [12, 16], strides = [1, 1]} : vector<12x64xf32> to vector<12x16xf32>
    %625 = vector.extract_strided_slice %586 {offsets = [0, 32], sizes = [12, 16], strides = [1, 1]} : vector<12x64xf32> to vector<12x16xf32>
    %626 = vector.extract_strided_slice %589 {offsets = [0, 32], sizes = [12, 16], strides = [1, 1]} : vector<12x64xf32> to vector<12x16xf32>
    %cst_314 = arith.constant dense<0.000000e+00> : vector<12x12xf32>
    %627 = tpu.matmul %624, %625, %cst_314 {dimension_numbers = #tpu.dot_dimension_numbers<[1], [1], [0], [0], [0, 0, 1, 0], [], []>} : vector<12x16xf32>, vector<12x16xf32>, vector<12x12xf32> -> vector<12x12xf32>
    %cst_315 = arith.constant 2.500000e-01 : f32
    %628 = vector.broadcast %cst_315 : f32 to vector<12x12xf32>
    %629 = arith.mulf %627, %628 : vector<12x12xf32>
    %cst_316 = arith.constant dense<0xFF800000> : vector<12xf32>
    %630 = vector.multi_reduction <maximumf>, %629, %cst_316 [1] : vector<12x12xf32> to vector<12xf32>
    %631 = vector.shape_cast %630 : vector<12xf32> to vector<12x1xf32>
    %632 = vector.broadcast %631 : vector<12x1xf32> to vector<12x12xf32>
    %633 = arith.subf %629, %632 : vector<12x12xf32>
    %634 = math.exp %633 : vector<12x12xf32>
    %cst_317 = arith.constant dense<0.000000e+00> : vector<12xf32>
    %635 = vector.multi_reduction <add>, %634, %cst_317 [1] : vector<12x12xf32> to vector<12xf32>
    %636 = vector.shape_cast %635 : vector<12xf32> to vector<12x1xf32>
    %637 = tpu.reciprocal %636 {approx = true} : vector<12x1xf32> -> vector<12x1xf32>
    %638 = vector.broadcast %637 : vector<12x1xf32> to vector<12x12xf32>
    %639 = arith.mulf %634, %638 : vector<12x12xf32>
    %cst_318 = arith.constant dense<0.000000e+00> : vector<12x16xf32>
    %640 = tpu.matmul %639, %626, %cst_318 {dimension_numbers = #tpu.dot_dimension_numbers<[1], [0], [0], [1], [0, 0, 1, 1], [], []>} : vector<12x12xf32>, vector<12x16xf32>, vector<12x16xf32> -> vector<12x16xf32>
    %641 = vector.extract_strided_slice %583 {offsets = [0, 48], sizes = [12, 16], strides = [1, 1]} : vector<12x64xf32> to vector<12x16xf32>
    %642 = vector.extract_strided_slice %586 {offsets = [0, 48], sizes = [12, 16], strides = [1, 1]} : vector<12x64xf32> to vector<12x16xf32>
    %643 = vector.extract_strided_slice %589 {offsets = [0, 48], sizes = [12, 16], strides = [1, 1]} : vector<12x64xf32> to vector<12x16xf32>
    %cst_319 = arith.constant dense<0.000000e+00> : vector<12x12xf32>
    %644 = tpu.matmul %641, %642, %cst_319 {dimension_numbers = #tpu.dot_dimension_numbers<[1], [1], [0], [0], [0, 0, 1, 0], [], []>} : vector<12x16xf32>, vector<12x16xf32>, vector<12x12xf32> -> vector<12x12xf32>
    %cst_320 = arith.constant 2.500000e-01 : f32
    %645 = vector.broadcast %cst_320 : f32 to vector<12x12xf32>
    %646 = arith.mulf %644, %645 : vector<12x12xf32>
    %cst_321 = arith.constant dense<0xFF800000> : vector<12xf32>
    %647 = vector.multi_reduction <maximumf>, %646, %cst_321 [1] : vector<12x12xf32> to vector<12xf32>
    %648 = vector.shape_cast %647 : vector<12xf32> to vector<12x1xf32>
    %649 = vector.broadcast %648 : vector<12x1xf32> to vector<12x12xf32>
    %650 = arith.subf %646, %649 : vector<12x12xf32>
    %651 = math.exp %650 : vector<12x12xf32>
    %cst_322 = arith.constant dense<0.000000e+00> : vector<12xf32>
    %652 = vector.multi_reduction <add>, %651, %cst_322 [1] : vector<12x12xf32> to vector<12xf32>
    %653 = vector.shape_cast %652 : vector<12xf32> to vector<12x1xf32>
    %654 = tpu.reciprocal %653 {approx = true} : vector<12x1xf32> -> vector<12x1xf32>
    %655 = vector.broadcast %654 : vector<12x1xf32> to vector<12x12xf32>
    %656 = arith.mulf %651, %655 : vector<12x12xf32>
    %cst_323 = arith.constant dense<0.000000e+00> : vector<12x16xf32>
    %657 = tpu.matmul %656, %643, %cst_323 {dimension_numbers = #tpu.dot_dimension_numbers<[1], [0], [0], [1], [0, 0, 1, 1], [], []>} : vector<12x12xf32>, vector<12x16xf32>, vector<12x16xf32> -> vector<12x16xf32>
    %658 = tpu.concatenate %606, %623, %640, %657 in 1 : vector<12x16xf32>, vector<12x16xf32>, vector<12x16xf32>, vector<12x16xf32> -> vector<12x64xf32>
    %cst_324 = arith.constant dense<0.000000e+00> : vector<12x64xf32>
    %659 = tpu.matmul %658, %578, %cst_324 {dimension_numbers = #tpu.dot_dimension_numbers<[1], [1], [0], [0], [0, 0, 1, 0], [], []>} : vector<12x64xf32>, vector<64x64xf32>, vector<12x64xf32> -> vector<12x64xf32>
    %660 = vector.broadcast %580 : vector<1x64xf32> to vector<12x64xf32>
    %661 = arith.addf %659, %660 : vector<12x64xf32>
    %662 = vector.extract_strided_slice %80 {offsets = [1, 0], sizes = [1, 1], strides = [1, 1]} : vector<2x1xf32> to vector<1x1xf32>
    %663 = vector.broadcast %662 : vector<1x1xf32> to vector<12x64xf32>
    %664 = arith.mulf %661, %663 : vector<12x64xf32>
    %665 = arith.addf %564, %664 : vector<12x64xf32>
    %cst_325 = arith.constant dense<0.000000e+00> : vector<12xf32>
    %666 = vector.multi_reduction <add>, %665, %cst_325 [1] : vector<12x64xf32> to vector<12xf32>
    %667 = vector.shape_cast %666 : vector<12xf32> to vector<12x1xf32>
    %cst_326 = arith.constant 6.400000e+01 : f32
    %668 = vector.broadcast %cst_326 : f32 to vector<12x1xf32>
    %669 = arith.divf %667, %668 : vector<12x1xf32>
    %670 = vector.broadcast %669 : vector<12x1xf32> to vector<12x64xf32>
    %671 = arith.subf %665, %670 : vector<12x64xf32>
    %672 = arith.mulf %671, %671 : vector<12x64xf32>
    %cst_327 = arith.constant dense<0.000000e+00> : vector<12xf32>
    %673 = vector.multi_reduction <add>, %672, %cst_327 [1] : vector<12x64xf32> to vector<12xf32>
    %674 = vector.shape_cast %673 : vector<12xf32> to vector<12x1xf32>
    %cst_328 = arith.constant 6.400000e+01 : f32
    %675 = vector.broadcast %cst_328 : f32 to vector<12x1xf32>
    %676 = arith.divf %674, %675 : vector<12x1xf32>
    %677 = vector.broadcast %669 : vector<12x1xf32> to vector<12x64xf32>
    %678 = arith.subf %665, %677 : vector<12x64xf32>
    %cst_329 = arith.constant 9.99999974E-6 : f32
    %679 = vector.broadcast %cst_329 : f32 to vector<12x1xf32>
    %680 = arith.addf %676, %679 : vector<12x1xf32>
    %681 = math.rsqrt %680 : vector<12x1xf32>
    %682 = vector.broadcast %681 : vector<12x1xf32> to vector<12x64xf32>
    %683 = arith.mulf %678, %682 : vector<12x64xf32>
    %c1_330 = arith.constant 1 : index
    %c0_331 = arith.constant 0 : index
    %c0_332 = arith.constant 0 : index
    %684 = vector.load %arg20[%c1_330, %c0_331, %c0_332] : memref<2x1x64xf32, #tpu.memory_space<vmem>>, vector<1x1x64xf32>
    %685 = vector.shape_cast %684 : vector<1x1x64xf32> to vector<1x64xf32>
    %686 = vector.broadcast %685 : vector<1x64xf32> to vector<12x64xf32>
    %687 = arith.mulf %683, %686 : vector<12x64xf32>
    %c1_333 = arith.constant 1 : index
    %c0_334 = arith.constant 0 : index
    %c0_335 = arith.constant 0 : index
    %688 = vector.load %arg21[%c1_333, %c0_334, %c0_335] : memref<2x1x64xf32, #tpu.memory_space<vmem>>, vector<1x1x64xf32>
    %689 = vector.shape_cast %688 : vector<1x1x64xf32> to vector<1x64xf32>
    %690 = vector.broadcast %689 : vector<1x64xf32> to vector<12x64xf32>
    %691 = arith.addf %687, %690 : vector<12x64xf32>
    %c0_336 = arith.constant 0 : index
    %c0_337 = arith.constant 0 : index
    %692 = vector.load %arg22[%c0_336, %c0_337] : memref<64x64xf32, #tpu.memory_space<vmem>>, vector<64x64xf32>
    %c0_338 = arith.constant 0 : index
    %c0_339 = arith.constant 0 : index
    %693 = vector.load %arg26[%c0_338, %c0_339] : memref<1x64xf32, #tpu.memory_space<vmem>>, vector<1x64xf32>
    %c0_340 = arith.constant 0 : index
    %c0_341 = arith.constant 0 : index
    %694 = vector.load %arg23[%c0_340, %c0_341] : memref<64x64xf32, #tpu.memory_space<vmem>>, vector<64x64xf32>
    %c0_342 = arith.constant 0 : index
    %c0_343 = arith.constant 0 : index
    %695 = vector.load %arg27[%c0_342, %c0_343] : memref<1x64xf32, #tpu.memory_space<vmem>>, vector<1x64xf32>
    %c0_344 = arith.constant 0 : index
    %c0_345 = arith.constant 0 : index
    %696 = vector.load %arg24[%c0_344, %c0_345] : memref<64x64xf32, #tpu.memory_space<vmem>>, vector<64x64xf32>
    %c0_346 = arith.constant 0 : index
    %c0_347 = arith.constant 0 : index
    %697 = vector.load %arg28[%c0_346, %c0_347] : memref<1x64xf32, #tpu.memory_space<vmem>>, vector<1x64xf32>
    %c0_348 = arith.constant 0 : index
    %c0_349 = arith.constant 0 : index
    %698 = vector.load %arg25[%c0_348, %c0_349] : memref<64x64xf32, #tpu.memory_space<vmem>>, vector<64x64xf32>
    %c0_350 = arith.constant 0 : index
    %c0_351 = arith.constant 0 : index
    %699 = vector.load %arg29[%c0_350, %c0_351] : memref<1x64xf32, #tpu.memory_space<vmem>>, vector<1x64xf32>
    %cst_352 = arith.constant dense<0.000000e+00> : vector<12x64xf32>
    %700 = tpu.matmul %691, %692, %cst_352 {dimension_numbers = #tpu.dot_dimension_numbers<[1], [1], [0], [0], [0, 0, 1, 0], [], []>} : vector<12x64xf32>, vector<64x64xf32>, vector<12x64xf32> -> vector<12x64xf32>
    %701 = vector.broadcast %693 : vector<1x64xf32> to vector<12x64xf32>
    %702 = arith.addf %700, %701 : vector<12x64xf32>
    %cst_353 = arith.constant dense<0.000000e+00> : vector<12x64xf32>
    %703 = tpu.matmul %691, %694, %cst_353 {dimension_numbers = #tpu.dot_dimension_numbers<[1], [1], [0], [0], [0, 0, 1, 0], [], []>} : vector<12x64xf32>, vector<64x64xf32>, vector<12x64xf32> -> vector<12x64xf32>
    %704 = vector.broadcast %695 : vector<1x64xf32> to vector<12x64xf32>
    %705 = arith.addf %703, %704 : vector<12x64xf32>
    %cst_354 = arith.constant dense<0.000000e+00> : vector<12x64xf32>
    %706 = tpu.matmul %691, %696, %cst_354 {dimension_numbers = #tpu.dot_dimension_numbers<[1], [1], [0], [0], [0, 0, 1, 0], [], []>} : vector<12x64xf32>, vector<64x64xf32>, vector<12x64xf32> -> vector<12x64xf32>
    %707 = vector.broadcast %697 : vector<1x64xf32> to vector<12x64xf32>
    %708 = arith.addf %706, %707 : vector<12x64xf32>
    %709 = vector.extract_strided_slice %702 {offsets = [0, 0], sizes = [12, 16], strides = [1, 1]} : vector<12x64xf32> to vector<12x16xf32>
    %710 = vector.extract_strided_slice %705 {offsets = [0, 0], sizes = [12, 16], strides = [1, 1]} : vector<12x64xf32> to vector<12x16xf32>
    %711 = vector.extract_strided_slice %708 {offsets = [0, 0], sizes = [12, 16], strides = [1, 1]} : vector<12x64xf32> to vector<12x16xf32>
    %cst_355 = arith.constant dense<0.000000e+00> : vector<12x12xf32>
    %712 = tpu.matmul %709, %710, %cst_355 {dimension_numbers = #tpu.dot_dimension_numbers<[1], [1], [0], [0], [0, 0, 1, 0], [], []>} : vector<12x16xf32>, vector<12x16xf32>, vector<12x12xf32> -> vector<12x12xf32>
    %cst_356 = arith.constant 2.500000e-01 : f32
    %713 = vector.broadcast %cst_356 : f32 to vector<12x12xf32>
    %714 = arith.mulf %712, %713 : vector<12x12xf32>
    %cst_357 = arith.constant dense<0xFF800000> : vector<12xf32>
    %715 = vector.multi_reduction <maximumf>, %714, %cst_357 [1] : vector<12x12xf32> to vector<12xf32>
    %716 = vector.shape_cast %715 : vector<12xf32> to vector<12x1xf32>
    %717 = vector.broadcast %716 : vector<12x1xf32> to vector<12x12xf32>
    %718 = arith.subf %714, %717 : vector<12x12xf32>
    %719 = math.exp %718 : vector<12x12xf32>
    %cst_358 = arith.constant dense<0.000000e+00> : vector<12xf32>
    %720 = vector.multi_reduction <add>, %719, %cst_358 [1] : vector<12x12xf32> to vector<12xf32>
    %721 = vector.shape_cast %720 : vector<12xf32> to vector<12x1xf32>
    %722 = tpu.reciprocal %721 {approx = true} : vector<12x1xf32> -> vector<12x1xf32>
    %723 = vector.broadcast %722 : vector<12x1xf32> to vector<12x12xf32>
    %724 = arith.mulf %719, %723 : vector<12x12xf32>
    %cst_359 = arith.constant dense<0.000000e+00> : vector<12x16xf32>
    %725 = tpu.matmul %724, %711, %cst_359 {dimension_numbers = #tpu.dot_dimension_numbers<[1], [0], [0], [1], [0, 0, 1, 1], [], []>} : vector<12x12xf32>, vector<12x16xf32>, vector<12x16xf32> -> vector<12x16xf32>
    %726 = vector.extract_strided_slice %702 {offsets = [0, 16], sizes = [12, 16], strides = [1, 1]} : vector<12x64xf32> to vector<12x16xf32>
    %727 = vector.extract_strided_slice %705 {offsets = [0, 16], sizes = [12, 16], strides = [1, 1]} : vector<12x64xf32> to vector<12x16xf32>
    %728 = vector.extract_strided_slice %708 {offsets = [0, 16], sizes = [12, 16], strides = [1, 1]} : vector<12x64xf32> to vector<12x16xf32>
    %cst_360 = arith.constant dense<0.000000e+00> : vector<12x12xf32>
    %729 = tpu.matmul %726, %727, %cst_360 {dimension_numbers = #tpu.dot_dimension_numbers<[1], [1], [0], [0], [0, 0, 1, 0], [], []>} : vector<12x16xf32>, vector<12x16xf32>, vector<12x12xf32> -> vector<12x12xf32>
    %cst_361 = arith.constant 2.500000e-01 : f32
    %730 = vector.broadcast %cst_361 : f32 to vector<12x12xf32>
    %731 = arith.mulf %729, %730 : vector<12x12xf32>
    %cst_362 = arith.constant dense<0xFF800000> : vector<12xf32>
    %732 = vector.multi_reduction <maximumf>, %731, %cst_362 [1] : vector<12x12xf32> to vector<12xf32>
    %733 = vector.shape_cast %732 : vector<12xf32> to vector<12x1xf32>
    %734 = vector.broadcast %733 : vector<12x1xf32> to vector<12x12xf32>
    %735 = arith.subf %731, %734 : vector<12x12xf32>
    %736 = math.exp %735 : vector<12x12xf32>
    %cst_363 = arith.constant dense<0.000000e+00> : vector<12xf32>
    %737 = vector.multi_reduction <add>, %736, %cst_363 [1] : vector<12x12xf32> to vector<12xf32>
    %738 = vector.shape_cast %737 : vector<12xf32> to vector<12x1xf32>
    %739 = tpu.reciprocal %738 {approx = true} : vector<12x1xf32> -> vector<12x1xf32>
    %740 = vector.broadcast %739 : vector<12x1xf32> to vector<12x12xf32>
    %741 = arith.mulf %736, %740 : vector<12x12xf32>
    %cst_364 = arith.constant dense<0.000000e+00> : vector<12x16xf32>
    %742 = tpu.matmul %741, %728, %cst_364 {dimension_numbers = #tpu.dot_dimension_numbers<[1], [0], [0], [1], [0, 0, 1, 1], [], []>} : vector<12x12xf32>, vector<12x16xf32>, vector<12x16xf32> -> vector<12x16xf32>
    %743 = vector.extract_strided_slice %702 {offsets = [0, 32], sizes = [12, 16], strides = [1, 1]} : vector<12x64xf32> to vector<12x16xf32>
    %744 = vector.extract_strided_slice %705 {offsets = [0, 32], sizes = [12, 16], strides = [1, 1]} : vector<12x64xf32> to vector<12x16xf32>
    %745 = vector.extract_strided_slice %708 {offsets = [0, 32], sizes = [12, 16], strides = [1, 1]} : vector<12x64xf32> to vector<12x16xf32>
    %cst_365 = arith.constant dense<0.000000e+00> : vector<12x12xf32>
    %746 = tpu.matmul %743, %744, %cst_365 {dimension_numbers = #tpu.dot_dimension_numbers<[1], [1], [0], [0], [0, 0, 1, 0], [], []>} : vector<12x16xf32>, vector<12x16xf32>, vector<12x12xf32> -> vector<12x12xf32>
    %cst_366 = arith.constant 2.500000e-01 : f32
    %747 = vector.broadcast %cst_366 : f32 to vector<12x12xf32>
    %748 = arith.mulf %746, %747 : vector<12x12xf32>
    %cst_367 = arith.constant dense<0xFF800000> : vector<12xf32>
    %749 = vector.multi_reduction <maximumf>, %748, %cst_367 [1] : vector<12x12xf32> to vector<12xf32>
    %750 = vector.shape_cast %749 : vector<12xf32> to vector<12x1xf32>
    %751 = vector.broadcast %750 : vector<12x1xf32> to vector<12x12xf32>
    %752 = arith.subf %748, %751 : vector<12x12xf32>
    %753 = math.exp %752 : vector<12x12xf32>
    %cst_368 = arith.constant dense<0.000000e+00> : vector<12xf32>
    %754 = vector.multi_reduction <add>, %753, %cst_368 [1] : vector<12x12xf32> to vector<12xf32>
    %755 = vector.shape_cast %754 : vector<12xf32> to vector<12x1xf32>
    %756 = tpu.reciprocal %755 {approx = true} : vector<12x1xf32> -> vector<12x1xf32>
    %757 = vector.broadcast %756 : vector<12x1xf32> to vector<12x12xf32>
    %758 = arith.mulf %753, %757 : vector<12x12xf32>
    %cst_369 = arith.constant dense<0.000000e+00> : vector<12x16xf32>
    %759 = tpu.matmul %758, %745, %cst_369 {dimension_numbers = #tpu.dot_dimension_numbers<[1], [0], [0], [1], [0, 0, 1, 1], [], []>} : vector<12x12xf32>, vector<12x16xf32>, vector<12x16xf32> -> vector<12x16xf32>
    %760 = vector.extract_strided_slice %702 {offsets = [0, 48], sizes = [12, 16], strides = [1, 1]} : vector<12x64xf32> to vector<12x16xf32>
    %761 = vector.extract_strided_slice %705 {offsets = [0, 48], sizes = [12, 16], strides = [1, 1]} : vector<12x64xf32> to vector<12x16xf32>
    %762 = vector.extract_strided_slice %708 {offsets = [0, 48], sizes = [12, 16], strides = [1, 1]} : vector<12x64xf32> to vector<12x16xf32>
    %cst_370 = arith.constant dense<0.000000e+00> : vector<12x12xf32>
    %763 = tpu.matmul %760, %761, %cst_370 {dimension_numbers = #tpu.dot_dimension_numbers<[1], [1], [0], [0], [0, 0, 1, 0], [], []>} : vector<12x16xf32>, vector<12x16xf32>, vector<12x12xf32> -> vector<12x12xf32>
    %cst_371 = arith.constant 2.500000e-01 : f32
    %764 = vector.broadcast %cst_371 : f32 to vector<12x12xf32>
    %765 = arith.mulf %763, %764 : vector<12x12xf32>
    %cst_372 = arith.constant dense<0xFF800000> : vector<12xf32>
    %766 = vector.multi_reduction <maximumf>, %765, %cst_372 [1] : vector<12x12xf32> to vector<12xf32>
    %767 = vector.shape_cast %766 : vector<12xf32> to vector<12x1xf32>
    %768 = vector.broadcast %767 : vector<12x1xf32> to vector<12x12xf32>
    %769 = arith.subf %765, %768 : vector<12x12xf32>
    %770 = math.exp %769 : vector<12x12xf32>
    %cst_373 = arith.constant dense<0.000000e+00> : vector<12xf32>
    %771 = vector.multi_reduction <add>, %770, %cst_373 [1] : vector<12x12xf32> to vector<12xf32>
    %772 = vector.shape_cast %771 : vector<12xf32> to vector<12x1xf32>
    %773 = tpu.reciprocal %772 {approx = true} : vector<12x1xf32> -> vector<12x1xf32>
    %774 = vector.broadcast %773 : vector<12x1xf32> to vector<12x12xf32>
    %775 = arith.mulf %770, %774 : vector<12x12xf32>
    %cst_374 = arith.constant dense<0.000000e+00> : vector<12x16xf32>
    %776 = tpu.matmul %775, %762, %cst_374 {dimension_numbers = #tpu.dot_dimension_numbers<[1], [0], [0], [1], [0, 0, 1, 1], [], []>} : vector<12x12xf32>, vector<12x16xf32>, vector<12x16xf32> -> vector<12x16xf32>
    %777 = tpu.concatenate %725, %742, %759, %776 in 1 : vector<12x16xf32>, vector<12x16xf32>, vector<12x16xf32>, vector<12x16xf32> -> vector<12x64xf32>
    %cst_375 = arith.constant dense<0.000000e+00> : vector<12x64xf32>
    %778 = tpu.matmul %777, %698, %cst_375 {dimension_numbers = #tpu.dot_dimension_numbers<[1], [1], [0], [0], [0, 0, 1, 0], [], []>} : vector<12x64xf32>, vector<64x64xf32>, vector<12x64xf32> -> vector<12x64xf32>
    %779 = vector.broadcast %699 : vector<1x64xf32> to vector<12x64xf32>
    %780 = arith.addf %778, %779 : vector<12x64xf32>
    %cst_376 = arith.constant dense<0.000000e+00> : vector<64xf32>
    %781 = vector.multi_reduction <add>, %780, %cst_376 [0] : vector<12x64xf32> to vector<64xf32>
    %782 = vector.shape_cast %781 : vector<64xf32> to vector<1x64xf32>
    %cst_377 = arith.constant 1.200000e+01 : f32
    %783 = vector.broadcast %cst_377 : f32 to vector<1x64xf32>
    %784 = arith.divf %782, %783 : vector<1x64xf32>
    %785 = tpu.concatenate %432, %784 in 0 : vector<1x64xf32>, vector<1x64xf32> -> vector<2x64xf32>
    %c0_378 = arith.constant 0 : index
    %c0_379 = arith.constant 0 : index
    %786 = vector.load %arg30[%c0_378, %c0_379] : memref<2x64xf32, #tpu.memory_space<vmem>>, vector<2x64xf32>
    tpu.vector_store %arg30[%c0_378, %c0_379], %785 {strides = array<i32>} : memref<2x64xf32, #tpu.memory_space<vmem>>, vector<2x64xf32>,
    return
  }
}

</mosaic_0001>

<bundles_post_ra>
// kernel: tpu_custom_call.1
= control target key start
LH: loop header
LB: loop body
LE: loop exit
PB: predicated region body
PF: predicated region fallthrough
CT: control target
= control target key end

     0   :  { %s11831_s6 = smov 1   ;;  %s11832_s10 = smov 2   ;;  %s13883_s0 = inlined_call_operand.smem [shape: u32[32], index: -1, kind: input, shape index: {}] }
   0x1   :  { %s11895_s5 = sld [smem:[%s13883_s0]]   ;;  %s11833_s14 = smov 3  }
   0x2   :  { %s11900_s9 = sld [smem:[%s13883_s0 + %s11831_s6]]   ;;  %s11834_s18 = smov 4  }
   0x3   :  { %s11905_s13 = sld [smem:[%s13883_s0 + %s11832_s10]]   ;;  %s11835_s22 = smov 5  }
   0x4   :  { %s11910_s17 = sld [smem:[%s13883_s0 + %s11833_s14]]   ;;  %s11836_s26 = smov 6  }
   0x5   :  { %s11915_s21 = sld [smem:[%s13883_s0 + %s11834_s18]]   ;;  %s11837_s30 = smov 7  }
   0x6   :  { %s11920_s25 = sld [smem:[%s13883_s0 + %s11835_s22]]   ;;  %s11838_s4 = smov 8  }
   0x7   :  { %13909 = sst [smem:[#allocation27_spill]] %s11895_s5  ;;  %s11839_s10 = smov 9  }
   0x8   :  { %s11925_s29 = sld [smem:[%s13883_s0 + %s11836_s26]]   ;;  %s11840_s15 = smov 10  }
   0x9   :  { %s11930_s3 = sld [smem:[%s13883_s0 + %s11837_s30]]   ;;  %s11841_s20 = smov 11  }
   0xa   :  { %s11935_s8 = sld [smem:[%s13883_s0 + %s11838_s4]]   ;;  %s11842_s26 = smov 12  }
   0xb   :  { %s11940_s14 = sld [smem:[%s13883_s0 + %s11839_s10]]   ;;  %s11843_s1 = smov 13  }
   0xc   :  { %s11945_s19 = sld [smem:[%s13883_s0 + %s11840_s15]]   ;;  %s11844_s7 = smov 14  }
   0xd   :  { %s11950_s24 = sld [smem:[%s13883_s0 + %s11841_s20]]   ;;  %s11845_s15 = smov 15  }
   0xe   :  { %s11955_s30 = sld [smem:[%s13883_s0 + %s11842_s26]]   ;;  %s11846_s22 = smov 16  }
   0xf   :  { %s11960_s6 = sld [smem:[%s13883_s0 + %s11843_s1]]   ;;  %s11847_s28 = smov 17  }
  0x10   :  { %s11965_s12 = sld [smem:[%s13883_s0 + %s11844_s7]]   ;;  %s11848_s7 = smov 18  }
  0x11   :  { %s11970_s20 = sld [smem:[%s13883_s0 + %s11845_s15]]   ;;  %s11849_s15 = smov 19  }
  0x12   :  { %s11975_s27 = sld [smem:[%s13883_s0 + %s11846_s22]]   ;;  %s11850_s22 = smov 20  }
  0x13   :  { %s11980_s4 = sld [smem:[%s13883_s0 + %s11847_s28]]   ;;  %s11851_s28 = smov 21  }
  0x14   :  { %13910 = sst [smem:[#allocation28_spill]] %s11955_s30 }
  0x15   :  { %13911 = sst [smem:[#allocation29_spill]] %s11960_s6 }
  0x16   :  { %13912 = sst [smem:[#allocation30_spill]] %s11965_s12 }
  0x17   :  { %13913 = sst [smem:[#allocation31_spill]] %s11970_s20 }
  0x18   :  { %13914 = sst [smem:[#allocation32_spill]] %s11975_s27 }
  0x19   :  { %13915 = sst [smem:[#allocation33_spill]] %s11980_s4 }
  0x1a   :  { %s11985_s12 = sld [smem:[%s13883_s0 + %s11848_s7]]   ;;  %s11852_s7 = smov 22  }
  0x1b   :  { %s11990_s20 = sld [smem:[%s13883_s0 + %s11849_s15]]   ;;  %s11853_s15 = smov 23  }
  0x1c   :  { %s11995_s27 = sld [smem:[%s13883_s0 + %s11850_s22]]   ;;  %s11854_s22 = smov 24  }
  0x1d   :  { %s12000_s4 = sld [smem:[%s13883_s0 + %s11851_s28]]   ;;  %s11855_s28 = smov 25  }
  0x20   :  { %13916 = sst [smem:[#allocation34_spill]] %s11985_s12 }
  0x21   :  { %13917 = sst [smem:[#allocation35_spill]] %s11990_s20 }
  0x22   :  { %13918 = sst [smem:[#allocation36_spill]] %s11995_s27 }
  0x23   :  { %13919 = sst [smem:[#allocation37_spill]] %s12000_s4 }
  0x24   :  { %s12005_s12 = sld [smem:[%s13883_s0 + %s11852_s7]]   ;;  %s11856_s7 = smov 26  }
  0x25   :  { %s12010_s20 = sld [smem:[%s13883_s0 + %s11853_s15]]   ;;  %s11857_s15 = smov 27  }
  0x26   :  { %s12015_s27 = sld [smem:[%s13883_s0 + %s11854_s22]]   ;;  %s11858_s22 = smov 28  }
  0x27   :  { %s12020_s4 = sld [smem:[%s13883_s0 + %s11855_s28]]   ;;  %s11859_s28 = smov 29  }
  0x28   :  { %s12030_s30 = sld [smem:[%s13883_s0 + %s11857_s15]]   ;;  %s11861_s15 = smov 31  }
  0x29   :  { %s12035_s6 = sld [smem:[%s13883_s0 + %s11858_s22]]  }
  0x2a   :  { %13920 = sst [smem:[#allocation38_spill]] %s12005_s12 }
  0x2b   :  { %s12025_s12 = sld [smem:[%s13883_s0 + %s11856_s7]]   ;;  %s11860_s7 = smov 30  }
  0x2c   :  { %s12040_s5 = sld [smem:[%s13883_s0 + %s11859_s28]]  }
  0x2e   :  { %13922 = sst [smem:[#allocation40_spill]] %s12030_s30 }
  0x2f   :  { %s12050_s30 = sld [smem:[%s13883_s0 + %s11861_s15]]  }
  0x31   :  { %13921 = sst [smem:[#allocation39_spill]] %s12025_s12 }
  0x32   :  { %s12045_s12 = sld [smem:[%s13883_s0 + %s11860_s7]]  }
  0x33   :  { %69 = vsyncpa [#allocation3], 0 }
  0x34   :  { %70 = vsyncpa [#allocation6], 0 }
  0x35   :  { %71 = vsyncpa [#allocation9], 0 }
  0x36   :  { %72 = vsyncpa [#allocation12], 0 }
  0x37   :  { %73 = vsyncpa [#allocation15], 0 }
  0x38   :  { %74 = vsyncpa [#allocation4], 0 }
  0x39   :  { %75 = vsyncpa [#allocation19], 0  ;;  %s11862_s22 = smov [#allocation5]   ;;  %s11863_s26 = smov [#allocation8]  }
  0x3a   :  { %s96_s23 = sshll.u32 %s11862_s22, 4  ;;  %s120_s28 = sshll.u32 %s11863_s26, 4  ;;  %s97_s23 = int_to_ptr.vmem [resolvable:$true] %s96_s23  ;;  %s121_s28 = int_to_ptr.vmem [resolvable:$true] %s120_s28 }
  0x3b   :  { %s11575_s1 = scalar_lea.hbm %s11910_s17, 32 }
  0x3c   :  { %p11576_p0 = scmp.ne.s32.totalorder %s11910_s17, %s11575_s1  ;;  %p11579_p1 = scmp.lt.u32.totalorder %s11575_s1, %s11910_s17 }
  0x3e   :  { %p11581_p2 = pnand %p11579_p1, %p11576_p0 }
  0x40   :  { %11584 = shalt.err (!%p11581_p2)
}
  0x41   :  { %s11585_s0 = scalar_lea.vmem %s97_s23, 32  ;;  %p11590_p4 = scmp.lt.s32.totalorder %s97_s23, %s97_s23 }
  0x42   :  { %p11586_p3 = scmp.ne.s32.totalorder %s97_s23, %s11585_s0  ;;  %p11591_p5 = scmp.lt.s32.totalorder %s11585_s0, %s11585_s0 }
  0x44   :  { %p11592_p6 = por %p11591_p5, %p11590_p4 }
  0x46   :  { %p11593_p7 = pnand %p11592_p6, %p11586_p3 }
  0x48   :  { %11596 = shalt.err (!%p11593_p7)
}
  0x49   :  { %99 = dma.hbm_to_vmem [thread:$0]  %s11910_s17, 32, %s97_s23, [#allocation6]  }
  0x4a   :  { %s11597_s2 = scalar_lea.hbm %s11930_s3, 16 }
  0x4b   :  { %p11598_p8 = scmp.ne.s32.totalorder %s11930_s3, %s11597_s2  ;;  %p11601_p9 = scmp.lt.u32.totalorder %s11597_s2, %s11930_s3 }
  0x4d   :  { %p11603_p10 = pnand %p11601_p9, %p11598_p8 }
  0x4f   :  { %11606 = shalt.err (!%p11603_p10)
}
  0x50   :  { %s11607_s7 = scalar_lea.vmem %s121_s28, 16  ;;  %s11611_s10 = scalar_lea.vmem %s121_s28, 32 }
  0x51   :  { %p11608_p11 = scmp.ne.s32.totalorder %s121_s28, %s11607_s7  ;;  %p11612_p12 = scmp.lt.s32.totalorder %s121_s28, %s121_s28 }
  0x52   :  { %p11613_p13 = scmp.lt.s32.totalorder %s11611_s10, %s11607_s7 }
  0x54   :  { %p11614_p0 = por %p11613_p13, %p11612_p12 }
  0x56   :  { %p11615_p1 = pnand %p11614_p0, %p11608_p11 }
  0x58   :  { %11618 = shalt.err (!%p11615_p1)
}
  0x59   :  { %123 = dma.hbm_to_vmem [thread:$0]  %s11930_s3, 16, %s121_s28, [#allocation9]  }
  0x5a   :  { %s11864_s11 = smov [#allocation11]   ;;  %s11865_s15 = smov [#allocation14]  }
  0x5b   :  { %s145_s17 = sshll.u32 %s11864_s11, 4  ;;  %s191_s16 = sshll.u32 %s11865_s15, 4  ;;  %s146_s17 = int_to_ptr.vmem [resolvable:$true] %s145_s17  ;;  %s12060_s16 = int_to_ptr.vmem [resolvable:$true] %s191_s16 }
  0x5c   :  { %s11619_s18 = scalar_lea.hbm %s11950_s24, 2048 }
  0x5d   :  { %p11620_p2 = scmp.ne.s32.totalorder %s11950_s24, %s11619_s18  ;;  %p11623_p3 = scmp.lt.u32.totalorder %s11619_s18, %s11950_s24 }
  0x5f   :  { %p11625_p4 = pnand %p11623_p3, %p11620_p2 }
  0x61   :  { %11628 = shalt.err (!%p11625_p4)
}
  0x62   :  { %s11629_s22 = scalar_lea.vmem %s146_s17, 2048  ;;  %p11634_p6 = scmp.lt.s32.totalorder %s146_s17, %s146_s17 }
  0x63   :  { %p11630_p5 = scmp.ne.s32.totalorder %s146_s17, %s11629_s22  ;;  %p11635_p7 = scmp.lt.s32.totalorder %s11629_s22, %s11629_s22 }
  0x65   :  { %p11636_p8 = por %p11635_p7, %p11634_p6 }
  0x67   :  { %p11637_p9 = pnand %p11636_p8, %p11630_p5 }
  0x69   :  { %11640 = shalt.err (!%p11637_p9)
}
  0x6a   :  { %s11866_s3 = smov 128   ;;  %s11867_s23 = smov 8  }
  0x6b   :  { %151 = dma.hbm_to_vmem [thread:$0]  %s11950_s24, 2048, %s146_s17, [#allocation12], %s11866_s3, %s11866_s3, %s11867_s23  }
  0x6c   :  { %s11641_s26 = scalar_lea.hbm %s12015_s27, 1024 }
  0x6d   :  { %p11642_p10 = scmp.ne.s32.totalorder %s12015_s27, %s11641_s26  ;;  %p11645_p11 = scmp.lt.u32.totalorder %s11641_s26, %s12015_s27 }
  0x6f   :  { %p11647_p12 = pnand %p11645_p11, %p11642_p10 }
  0x71   :  { %11650 = shalt.err (!%p11647_p12)
}
  0x72   :  { %s11651_s28 = scalar_lea.vmem %s12060_s16, 1024  ;;  %p11656_p0 = scmp.lt.s32.totalorder %s12060_s16, %s12060_s16 }
  0x73   :  { %p11652_p13 = scmp.ne.s32.totalorder %s12060_s16, %s11651_s28  ;;  %p11657_p1 = scmp.lt.s32.totalorder %s11651_s28, %s11651_s28 }
  0x75   :  { %p11658_p2 = por %p11657_p1, %p11656_p0 }
  0x77   :  { %p11659_p3 = pnand %p11658_p2, %p11652_p13 }
  0x79   :  { %11662 = shalt.err (!%p11659_p3)
}
  0x7a   :  { %197 = dma.hbm_to_vmem [thread:$0]  %s12015_s27, 1024, %s12060_s16, [#allocation15], %s11866_s3, %s11866_s3, %s11867_s23  }
  0x7b   :  { %s11868_s24 = smov [#allocation2]   ;;  %s11869_s0 = smov [#allocation7]  }
  0x7c   :  { %s84_s1 = sshll.u32 %s11868_s24, 4  ;;  %s108_s2 = sshll.u32 %s11869_s0, 4  ;;  %s85_s1 = int_to_ptr.vmem [resolvable:$true] %s84_s1  ;;  %s109_s2 = int_to_ptr.vmem [resolvable:$true] %s108_s2 }
  0x7d   :  { %s11663_s7 = scalar_lea.hbm %s11900_s9, 32 }
  0x7e   :  { %p11664_p4 = scmp.ne.s32.totalorder %s11900_s9, %s11663_s7  ;;  %p11667_p5 = scmp.lt.u32.totalorder %s11663_s7, %s11900_s9 }
  0x80   :  { %p11669_p6 = pnand %p11667_p5, %p11664_p4 }
  0x82   :  { %11672 = shalt.err (!%p11669_p6)
}
  0x83   :  { %s11673_s10 = scalar_lea.vmem %s85_s1, 32  ;;  %p11678_p8 = scmp.lt.s32.totalorder %s85_s1, %s85_s1 }
  0x84   :  { %p11674_p7 = scmp.ne.s32.totalorder %s85_s1, %s11673_s10  ;;  %p11679_p9 = scmp.lt.s32.totalorder %s11673_s10, %s11673_s10 }
  0x86   :  { %p11680_p10 = por %p11679_p9, %p11678_p8 }
  0x88   :  { %p11681_p11 = pnand %p11680_p10, %p11674_p7 }
  0x8a   :  { %11684 = shalt.err (!%p11681_p11)
}
  0x8b   :  { %87 = dma.hbm_to_vmem [thread:$0]  %s11900_s9, 32, %s85_s1, [#allocation3]  }
  0x8c   :  { %s11685_s27 = scalar_lea.hbm %s11920_s25, 16 }
  0x8d   :  { %p11686_p12 = scmp.ne.s32.totalorder %s11920_s25, %s11685_s27  ;;  %p11689_p13 = scmp.lt.u32.totalorder %s11685_s27, %s11920_s25 }
  0x8f   :  { %p11691_p0 = pnand %p11689_p13, %p11686_p12 }
  0x91   :  { %11694 = shalt.err (!%p11691_p0)
}
  0x92   :  { %s11695_s11 = scalar_lea.vmem %s109_s2, 16  ;;  %s11699_s17 = scalar_lea.vmem %s109_s2, 32 }
  0x93   :  { %p11696_p1 = scmp.ne.s32.totalorder %s109_s2, %s11695_s11  ;;  %p11700_p2 = scmp.lt.s32.totalorder %s109_s2, %s109_s2 }
  0x94   :  { %p11701_p3 = scmp.lt.s32.totalorder %s11699_s17, %s11695_s11 }
  0x96   :  { %p11702_p4 = por %p11701_p3, %p11700_p2 }
  0x98   :  { %p11703_p5 = pnand %p11702_p4, %p11696_p1 }
  0x9a   :  { %11706 = shalt.err (!%p11703_p5)
}
  0x9b   :  { %111 = dma.hbm_to_vmem [thread:$0]  %s11920_s25, 16, %s109_s2, [#allocation6]  }
  0x9c   :  { %s11870_s15 = smov [#allocation10]   ;;  %s11871_s16 = smov [#allocation13]  }
  0x9d   :  { %s133_s9 = sshll.u32 %s11870_s15, 4  ;;  %s179_s18 = sshll.u32 %s11871_s16, 4  ;;  %s134_s9 = int_to_ptr.vmem [resolvable:$true] %s133_s9  ;;  %s12089_s18 = int_to_ptr.vmem [resolvable:$true] %s179_s18 }
  0x9e   :  { %s11707_s22 = scalar_lea.hbm %s11945_s19, 2048 }
  0x9f   :  { %p11708_p6 = scmp.ne.s32.totalorder %s11945_s19, %s11707_s22  ;;  %p11711_p7 = scmp.lt.u32.totalorder %s11707_s22, %s11945_s19 }
  0xa1   :  { %p11713_p8 = pnand %p11711_p7, %p11708_p6 }
  0xa3   :  { %11716 = shalt.err (!%p11713_p8)
}
  0xa4   :  { %s11717_s26 = scalar_lea.vmem %s134_s9, 2048  ;;  %p11722_p10 = scmp.lt.s32.totalorder %s134_s9, %s134_s9 }
  0xa5   :  { %p11718_p9 = scmp.ne.s32.totalorder %s134_s9, %s11717_s26  ;;  %p11723_p11 = scmp.lt.s32.totalorder %s11717_s26, %s11717_s26 }
  0xa7   :  { %p11724_p12 = por %p11723_p11, %p11722_p10 }
  0xa9   :  { %p11725_p13 = pnand %p11724_p12, %p11718_p9 }
  0xab   :  { %11728 = shalt.err (!%p11725_p13)
}
  0xac   :  { %139 = dma.hbm_to_vmem [thread:$0]  %s11945_s19, 2048, %s134_s9, [#allocation9], %s11866_s3, %s11866_s3, %s11867_s23  }
  0xad   :  { %s11729_s25 = scalar_lea.hbm %s12010_s20, 1024 }
  0xae   :  { %p11730_p0 = scmp.ne.s32.totalorder %s12010_s20, %s11729_s25  ;;  %p11733_p1 = scmp.lt.u32.totalorder %s11729_s25, %s12010_s20 }
  0xb0   :  { %p11735_p2 = pnand %p11733_p1, %p11730_p0 }
  0xb2   :  { %11738 = shalt.err (!%p11735_p2)
}
  0xb3   :  { %s11739_s28 = scalar_lea.vmem %s12089_s18, 1024  ;;  %p11744_p4 = scmp.lt.s32.totalorder %s12089_s18, %s12089_s18 }
  0xb4   :  { %p11740_p3 = scmp.ne.s32.totalorder %s12089_s18, %s11739_s28  ;;  %p11745_p5 = scmp.lt.s32.totalorder %s11739_s28, %s11739_s28 }
  0xb6   :  { %p11746_p6 = por %p11745_p5, %p11744_p4 }
  0xb8   :  { %p11747_p7 = pnand %p11746_p6, %p11740_p3 }
  0xba   :  { %11750 = shalt.err (!%p11747_p7)
}
  0xbb   :  { %185 = dma.hbm_to_vmem [thread:$0]  %s12010_s20, 1024, %s12089_s18, [#allocation12], %s11866_s3, %s11866_s3, %s11867_s23  }
  0xbc   :  { %s11872_s19 = smov [#allocation16]   ;;  %s11751_s1 = scalar_lea.hbm %s12020_s4, 1024 }
  0xbd   :  { %s203_s24 = sshll.u32 %s11872_s19, 4  ;;  %p11752_p8 = scmp.ne.s32.totalorder %s12020_s4, %s11751_s1  ;;  %s204_s24 = int_to_ptr.vmem [resolvable:$true] %s203_s24 }
  0xbe   :  { %p11755_p9 = scmp.lt.u32.totalorder %s11751_s1, %s12020_s4 }
  0xc0   :  { %p11757_p10 = pnand %p11755_p9, %p11752_p8 }
  0xc2   :  { %11760 = shalt.err (!%p11757_p10)
}
  0xc3   :  { %s11761_s0 = scalar_lea.vmem %s204_s24, 1024  ;;  %p11766_p12 = scmp.lt.s32.totalorder %s204_s24, %s204_s24 }
  0xc4   :  { %p11762_p11 = scmp.ne.s32.totalorder %s204_s24, %s11761_s0  ;;  %p11767_p13 = scmp.lt.s32.totalorder %s11761_s0, %s11761_s0 }
  0xc6   :  { %p11768_p0 = por %p11767_p13, %p11766_p12 }
  0xc8   :  { %p11769_p1 = pnand %p11768_p0, %p11762_p11 }
  0xca   :  { %11772 = shalt.err (!%p11769_p1)
}
  0xcb   :  { %209 = dma.hbm_to_vmem [thread:$0]  %s12020_s4, 1024, %s204_s24, [#allocation15], %s11866_s3, %s11866_s3, %s11867_s23  }
  0xcc   :  { %11817 = dma.done.wait [#allocation3], 32  }
  0xcd   :  { %11818 = vsyncadd [#allocation3], 4294967264 }
  0xce   :  { %11819 = dma.done.wait [#allocation6], 48  }
  0xcf   :  { %11820 = vsyncadd [#allocation6], 4294967248 }
  0xd0   :  { %11821 = dma.done.wait [#allocation9], 2064  }
  0xd1   :  { %11822 = vsyncadd [#allocation9], 4294965232 }
  0xd2   :  { %11823 = dma.done.wait [#allocation12], 3072  }
  0xd3   :  { %11824 = vsyncadd [#allocation12], 4294964224 }
  0xd4   :  { %11825 = dma.done.wait [#allocation15], 2048  }
  0xd5   :  { %11826 = vsyncadd [#allocation15], 4294965248  ;;  %v258_v0 = vlaneseq  ;;  %v11873_v1 = vmov 1966171168   ;;  %v269_v10 = vld [vmem:[%s11905_s13] sm:$0xff]  ;;  %v270_v11 = vld [vmem:[%s11905_s13 + $0x8] sm:$0xff] }
  0xd6   :  { %v256_v2 = vunpack.c.l.s4 %v11873_v1  ;;  %v8465_v7 = vld.sshfl [vmem:[#allocation2] sm:$0x11 pattern:$0x75316420]  ;;  %vm287_vm0 = vcmask 39936   ;;  %v271_v14 = vld [vmem:[%s11905_s13 + $0x10] sm:$0xff] }
  0xd7   :  { %v12118_v3 = vshrl.u32 %v258_v0, 7  ;;  %v254_v9 = vcombine.high %v8465_v7, %v8465_v7  ;;  %v272_v15 = vld [vmem:[%s11905_s13 + $0x18] sm:$0xff]  ;;  %v300_v25 = vld [vmem:[#allocation5] sm:$0x3]  ;;  %v11874_v29 = vmov 0   ;;  %v333_v31 = vld [vmem:[%s11915_s21 + $0x8] sm:$0xff] }
  0xd8   :  { %v257_v4 = vunpack.c.0.s8 %v256_v2  ;;  %11161 = vset.pattern.permute.xlu0 %v11874_v29  ;;  %11162 = vset.pattern.permute.xlu1 %v11874_v29  ;;  %v332_v30 = vld [vmem:[%s11915_s21] sm:$0xff]  ;;  %vm383_vm1 = vcmask 130048   ;;  %v11875_v32 = vmov 0.0|0.0   ;;  %v334_v45 = vld [vmem:[%s11915_s21 + $0x10] sm:$0xff]  ;;  %v335_v46 = vld [vmem:[%s11915_s21 + $0x18] sm:$0xff]  ;;  %vm11876_vm3 = vmmov 0  }
  0xd9   :  { %v12122_v6 = vsub.s32 0, %v12118_v3  ;;  %v13898_v26 = vsub.s32 1, %v12118_v3  ;;  %10209 = vmatprep.subr.bf16.mxu1 %v11875_v32  ;;  %v10210_v33 = vpack.c.bf16 %v333_v31, %v332_v30  ;;  %vm12151_vm2 = vmpackc.low %vm383_vm1, %vm383_vm1  ;;  %v10214_v47 = vpack.c.bf16 %v335_v46, %v334_v45  ;;  %v469_v59 = vld [vmem:[%s11925_s29] sm:$0xff]  ;;  %v470_v60 = vld [vmem:[%s11925_s29 + $0x8] sm:$0xff]  ;;  %s13929_s13 = sld [smem:[#allocation27_spill]]  ;;  %s13930_s21 = sld [smem:[#allocation29_spill]] }
  0xda   :  { %v260_v5 = vsub.s32 %v257_v4, %v12118_v3  ;;  %v11877_v50 = vmov 0.0   ;;  %v360_v51 = vand.u32 127, %v258_v0  ;;  %vm370_vm4 = vcmask 130112   ;;  %v825_v30 = vld [vmem:[%s11935_s8 + $0x20] sm:$0xff]  ;;  %v826_v31 = vld [vmem:[%s11935_s8 + $0x28] sm:$0xff]  ;;  %s13932_s20 = sld [smem:[#allocation30_spill]] }
  0xdb   :  { %v305_v27 = vrot.slane %v300_v25, %v12122_v6  ;;  %v316_v28 = vrot.slane %v300_v25, %v13898_v26  ;;  %10212 = vmatpush3.bf16.xpose.msk.msra.mxu1 %vm12151_vm2, %v10210_v33  ;;  %9395 = vmatprep.mubr.msk.f32.mxu1 %vm11876_vm3, %v11877_v50  ;;  %vm484_vm5 = vcmask 261120   ;;  %vm381_vm6 = vcmask 1041409   ;;  %v823_v25 = vld [vmem:[%s11935_s8 + $0x10] sm:$0xff]  ;;  %v834_v45 = vld [vmem:[%s11940_s14 + $0x20] sm:$0xff]  ;;  %v835_v46 = vld [vmem:[%s11940_s14 + $0x28] sm:$0xff]  ;;  %s11879_s4 = smov 112  }
  0xdc   :  { %v261_v8 = vrot.slane %v8465_v7, %v260_v5  ;;  %v268_v13 = vrot.slane %v254_v9, %v260_v5  ;;  %10213 = vmatprep.subr.bf16.mxu1 %v11875_v32  ;;  %v365_v52 = vadd.s32 4294967288, %v360_v51  ;;  %v12169_v56 = vsub.s32 %v360_v51, %v12118_v3  ;;  %vm12181_vm7 = vmpackc.low %vm484_vm5, %vm484_vm5  ;;  %v472_v9 = vld [vmem:[%s11925_s29 + $0x18] sm:$0xff]  ;;  %v827_v33 = vld [vmem:[%s11935_s8 + $0x30] sm:$0xff]  ;;  %s11880_s3 = smov 96   ;;  %s11881_s23 = smov 80  }
  0xdd   :  { %v10218_v1 = vpack.c.bf16 %v470_v60, %v469_v59  ;;  %vm863_vm8 = vcmask 523264   ;;  %v839_v51 = vld [vmem:[#allocation10] sm:$0xff]  ;;  %vm582_vm10 = vcmask 517120   ;;  %v844_v5 = vld [vmem:[#allocation10 + $0x28] sm:$0xff]  ;;  %vm1298_vm11 = vcmask 1043456   ;;  %s13935_s2 = sld [smem:[#allocation32_spill]] }
  0xde   :  { %v12127_v12 = vrot.slane %v261_v8, %v12122_v6  ;;  %v12133_v17 = vrot.slane %v268_v13, %v12122_v6  ;;  %v12166_v54 = vsub.s32 %v365_v52, %v12118_v3  ;;  %v471_v8 = vld [vmem:[%s11925_s29 + $0x10] sm:$0xff]  ;;  %v474_v13 = vld [vmem:[%s11925_s29 + $0x28] sm:$0xff]  ;;  %vm12212_vm9 = vmpackc.low %vm863_vm8, %vm863_vm8  ;;  %vm11878_vm12 = vmmov 1   ;;  %s13936_s7 = sld [smem:[#allocation33_spill]]  ;;  %s11882_s10 = smov 16  }
  0xdf   :  { %v840_v52 = vld [vmem:[#allocation10 + $0x8] sm:$0xff]  ;;  %v813_v60 = vld [vmem:[%s13929_s13] sm:$0xff]  ;;  %vm12365_vm13 = vmpackc.low %vm1298_vm11, %vm11878_vm12  ;;  %vm1272_vm14 = vcmask 93184   ;;  %vm1268_vm15 = vcmask 97280   ;;  %s11883_s27 = smov 32   ;;  %s13937_s11 = sld [smem:[#allocation34_spill]] }
  0xe0   :  { %v283_v16 = vmul.f32 %v12127_v12, %v269_v10  ;;  %v284_v18 = vmul.f32 %v12127_v12, %v270_v11  ;;  %v285_v20 = vmul.f32 %v12133_v17, %v271_v14  ;;  %v286_v21 = vmul.f32 %v12133_v17, %v272_v15  ;;  %v473_v11 = vld [vmem:[%s11925_s29 + $0x20] sm:$0xff]  ;;  %v475_v15 = vld [vmem:[%s11925_s29 + $0x30] sm:$0xff]  ;;  %s11884_s17 = smov 48   ;;  %s13938_s15 = sld [smem:[#allocation35_spill]] }
  0xe1   :  { %v10222_v10 = vpack.c.bf16 %v472_v9, %v471_v8  ;;  %v10226_v14 = vpack.c.bf16 %v474_v13, %v473_v11  ;;  %v845_v8 = vld [vmem:[#allocation10 + $0x30] sm:$0xff]  ;;  %v846_v9 = vld [vmem:[#allocation10 + $0x38] sm:$0xff]  ;;  %s13939_s9 = sld [smem:[#allocation31_spill]]  ;;  %vm2140_vm11 = vcmask 519168   ;;  %s13940_s18 = sld [smem:[#allocation36_spill]] }
  0xe2   :  { %v288_v19 = vsel %vm287_vm0, %v283_v16, 0.0  ;;  %v294_v22 = vsel %vm287_vm0, %v285_v20, 0.0  ;;  %v291_v23 = vsel %vm287_vm0, %v284_v18, 0.0  ;;  %v297_v24 = vsel %vm287_vm0, %v286_v21, 0.0  ;;  %v476_v16 = vld [vmem:[%s11925_s29 + $0x38] sm:$0xff]  ;;  %v822_v20 = vld [vmem:[%s11935_s8 + $0x8] sm:$0xff] }
  0xe3   :  { %289 = vadd.xlane.f32.xlu0 %v288_v19  ;;  %295 = vadd.xlane.f32.xlu1 %v294_v22  ;;  %v10230_v18 = vpack.c.bf16 %v476_v16, %v475_v15  ;;  %v821_v19 = vld [vmem:[%s11935_s8] sm:$0xff]  ;;  %s13931_s29 = sld [smem:[#allocation28_spill]]  ;;  %s13946_s26 = sld [smem:[#allocation40_spill]] }
  0xe4   :  { %10216 = vmatpush3.bf16.xpose.msk.msra.mxu1 %vm12151_vm2, %v10214_v47  ;;  %v830_v21 = vld [vmem:[%s11940_s14] sm:$0xff]  ;;  %v12208_v22 = vpack.c.bf16 %v822_v20, %v821_v19  ;;  %v12271_v47 = vpack.c.bf16 %v835_v46, %v834_v45  ;;  %s13947_s25 = sld [smem:[#allocation39_spill]] }
  0xe5   :  { %10217 = vmatprep.subr.bf16.mxu1 %v11875_v32  ;;  %v8504_v11 = vld [vmem:[%s13930_s21] ss:$0 sm:$0xff] }
  0xe6   :  { %10235 = vmatprep.subr.msk.bf16.mxu0 %vm12212_vm9, %v12208_v22 }
  0xe7   :  { %292 = vadd.xlane.f32.xlu0 %v291_v23  ;;  %298 = vadd.xlane.f32.xlu1 %v297_v24  ;;  %v831_v24 = vld [vmem:[%s11940_s14 + $0x8] sm:$0xff] }
  0xe8   :  { %10238 = vmatpush3.bf16.xpose.msk.msra.mxu0 %vm12212_vm9, %v12208_v22 }
  0xe9   :  { %v8493_v13 = vld [vmem:[%s13931_s29] ss:$0 sm:$0xff] }
  0xf8   :  { %311 = vbcast.lane.b32.xlu1 %v305_v27, 264 }
  0xfc   :  { %318 = vbcast.lane.b32.xlu1 %v316_v28, 256 }
  0xfd   :  { %307 = vbcast.lane.b32.xlu0 %v305_v27, 256  ;;  %v12218_v27 = vpack.c.bf16 %v831_v24, %v830_v21 }
 0x100   :  { %322 = vbcast.lane.b32.xlu1 %v316_v28, 264  ;;  %v824_v28 = vld [vmem:[%s11935_s8 + $0x18] sm:$0xff] }
 0x101   :  { %v12224_v29 = vpack.c.bf16 %v824_v28, %v823_v25 }
 0x103   :  { %10241 = vmatprep.subr.msk.bf16.mxu0 %vm12212_vm9, %v12224_v29 }
 0x104   :  { %10244 = vmatpush3.bf16.xpose.msk.msra.mxu0 %vm12212_vm9, %v12224_v29 }
 0x170   :  { %v290_v35 = vpop.xlane.xlu0 %289  ;;  %v296_v36 = vpop.xlane.xlu1 %295 }
 0x174   :  { %v293_v37 = vpop.xlane.xlu0 %292  ;;  %v299_v38 = vpop.xlane.xlu1 %298 }
 0x178   :  { %v308_v39 = vpop.permute.xlu0 %307  ;;  %v312_v41 = vpop.permute.xlu1 %311 }
 0x179   :  { %v328_v40 = vadd.f32 %v308_v39, %v290_v35  ;;  %v329_v42 = vadd.f32 %v312_v41, %v293_v37  ;;  %v828_v35 = vld [vmem:[%s11935_s8 + $0x38] sm:$0xff]  ;;  %v8466_v37 = vld [vmem:[#allocation7] ss:$0 sm:$0xff]  ;;  %v832_v39 = vld [vmem:[%s11940_s14 + $0x10] sm:$0xff] }
 0x17b   :  { %348 = vperm.xlu0 %11161, %v328_v40   ;;  %351 = vperm.xlu1 %11162, %v329_v42   ;;  %v833_v40 = vld [vmem:[%s11940_s14 + $0x18] sm:$0xff] }
 0x17c   :  { %v319_v43 = vpop.permute.xlu1 %318 }
 0x17d   :  { %v330_v44 = vadd.f32 %v319_v43, %v296_v36  ;;  %v12247_v36 = vpack.c.bf16 %v828_v35, %v827_v33 }
 0x17f   :  { %354 = vperm.xlu1 %11162, %v330_v44   ;;  %v12260_v44 = vpack.c.bf16 %v833_v40, %v832_v39 }
 0x180   :  { %v323_v48 = vpop.permute.xlu1 %322 }
 0x181   :  { %v331_v49 = vadd.f32 %v323_v48, %v299_v38  ;;  %v836_v48 = vld [vmem:[%s11940_s14 + $0x30] sm:$0xff] }
 0x183   :  { %357 = vperm.xlu0 %11161, %v331_v49   ;;  %v837_v49 = vld [vmem:[%s11940_s14 + $0x38] sm:$0xff] }
 0x1fa   :  { %v352_v53 = vpop.permute.xlu1 %351  ;;  %v349_v55 = vpop.permute.xlu0 %348 }
 0x1fb   :  { %v369_v58 = vrot.slane %v352_v53, %v12166_v54  ;;  %v364_v62 = vrot.slane %v349_v55, %v12169_v56  ;;  %v12292_v53 = vpack.c.bf16 %v840_v52, %v839_v51  ;;  %v8472_v55 = vld [vmem:[#allocation8] ss:$0 sm:$0xff] }
 0x1fd   :  { %v371_v2 = vsel %vm370_vm4, %v369_v58, %v364_v62 }
 0x1fe   :  { %v355_v57 = vpop.permute.xlu1 %354 }
 0x1ff   :  { %v375_v63 = vrot.slane %v355_v57, %v12169_v56 }
 0x202   :  { %v358_v61 = vpop.permute.xlu0 %357 }
 0x203   :  { %v379_v0 = vrot.slane %v358_v61, %v12166_v54  ;;  %v814_v61 = vld [vmem:[%s13929_s13 + $0x8] sm:$0xf] }
 0x205   :  { %v380_v4 = vsel %vm370_vm4, %v379_v0, %v375_v63  ;;  %v841_v63 = vld [vmem:[#allocation10 + $0x10] sm:$0xff]  ;;  %v842_v0 = vld [vmem:[#allocation10 + $0x18] sm:$0xff] }
 0x206   :  { %v382_v7 = vsel %vm381_vm6, %v380_v4, %v371_v2  ;;  %v12309_v4 = vpack.c.bf16 %v842_v0, %v841_v63 }
 0x207   :  { %9396 = vmatmul.mubr.msk.f32.vlgmr.msra.gmra.mrb[0].mxu1 %vm383_vm1, %v382_v7 }
 0x208   :  { %10220 = vmatpush3.bf16.xpose.msk.msra.mxu1 %vm12181_vm7, %v10218_v1  ;;  %9414 = vmatprep.mubr.msk.f32.mxu1 %vm11876_vm3, %v11877_v50  ;;  %v12284_v50 = vpack.c.bf16 %v837_v49, %v836_v48  ;;  %vm2015_vm3 = vcmask 392192  }
 0x209   :  { %10221 = vmatprep.subr.bf16.mxu1 %v11875_v32 }
 0x210   :  { %10224 = vmatpush3.bf16.xpose.msk.msra.mxu1 %vm12181_vm7, %v10222_v10  ;;  %v12335_v10 = vpack.c.bf16 %v846_v9, %v845_v8 }
 0x211   :  { %10225 = vmatprep.subr.bf16.mxu1 %v11875_v32 }
 0x218   :  { %10228 = vmatpush3.bf16.xpose.msk.msra.mxu1 %vm12181_vm7, %v10226_v14 }
 0x219   :  { %10229 = vmatprep.subr.bf16.mxu1 %v11875_v32  ;;  %v12237_v32 = vpack.c.bf16 %v826_v31, %v825_v30  ;;  %v8515_v30 = vld [vmem:[%s13932_s20] ss:$0 sm:$0xff] }
 0x21b   :  { %10247 = vmatprep.subr.msk.bf16.mxu0 %vm12212_vm9, %v12237_v32 }
 0x21c   :  { %10250 = vmatpush3.bf16.xpose.msk.msra.mxu0 %vm12212_vm9, %v12237_v32 }
 0x21d   :  { %10253 = vmatprep.subr.msk.bf16.mxu0 %vm12212_vm9, %v12247_v36 }
 0x220   :  { %10232 = vmatpush3.bf16.xpose.msk.msra.mxu1 %vm12181_vm7, %v10230_v18  ;;  %vm680_vm7 = vcmask 123904  }
 0x221   :  { %10259 = vmatprep.subr.msk.bf16.mxu1 %vm12212_vm9, %v12218_v27 }
 0x224   :  { %10256 = vmatpush3.bf16.xpose.msk.msra.mxu0 %vm12212_vm9, %v12247_v36 }
 0x225   :  { %10283 = vmatprep.subr.msk.bf16.mxu0 %vm12212_vm9, %v12292_v53 }
 0x2da   :  { %v464_v38 = vpop.f32.mrb[0].mxu1 }
 0x2db   :  { %v465_v41 = vadd.f32 %v8466_v37, %v464_v38  ;;  %v9397_v42 = vpop.f32.mrb[1].mxu1 }
 0x2dd   :  { %v468_v43 = vmax.f32 %v465_v41, 0.0 }
 0x2df   :  { %9415 = vmatmul.mubr.msk.f32.vlgmr.msra.gmra.mrb[2].mxu1 %vm484_vm5, %v468_v43 }
 0x2e0   :  { %10262 = vmatpush3.bf16.xpose.msk.msra.mxu1 %vm12212_vm9, %v12218_v27 }
 0x2e1   :  { %10265 = vmatprep.subr.msk.bf16.mxu1 %vm12212_vm9, %v12260_v44 }
 0x2e8   :  { %10268 = vmatpush3.bf16.xpose.msk.msra.mxu1 %vm12212_vm9, %v12260_v44 }
 0x2e9   :  { %10271 = vmatprep.subr.msk.bf16.mxu1 %vm12212_vm9, %v12271_v47 }
 0x2f0   :  { %10274 = vmatpush3.bf16.xpose.msk.msra.mxu1 %vm12212_vm9, %v12271_v47 }
 0x2f1   :  { %10277 = vmatprep.subr.msk.bf16.mxu1 %vm12212_vm9, %v12284_v50 }
 0x2f8   :  { %10280 = vmatpush3.bf16.xpose.msk.msra.mxu1 %vm12212_vm9, %v12284_v50 }
 0x3b2   :  { %v578_v57 = vpop.f32.mrb[2].mxu1 }
 0x3b3   :  { %v12297_v58 = vadd.f32 %v8472_v55, %v578_v57  ;;  %v9416_v59 = vpop.f32.mrb[3].mxu1 }
 0x3b5   :  { %v818_v62 = vrot.slane %v12297_v58, %v12122_v6  ;;  %583 = vst.msk [vmem:[#allocation18] sm:$0x3] %vm582_vm10, %v12297_v58  ;;  %v843_v6 = vld [vmem:[#allocation10 + $0x20] sm:$0xff] }
 0x3b6   :  { %v12327_v7 = vpack.c.bf16 %v844_v5, %v843_v6 }
 0x3b7   :  { %v12305_v1 = vadd.f32 %v818_v62, %v813_v60  ;;  %v12307_v2 = vadd.f32 %v818_v62, %v814_v61 }
 0x3b9   :  { %9433 = vmatprep.mubr.msk.f32.mxu0 %vm863_vm8, %v12305_v1  ;;  %9452 = vmatprep.mubr.msk.f32.mxu1 %vm863_vm8, %v12305_v1 }
 0x3ba   :  { %9434 = vmatmul.mubr.msk.f32.vlgmr.msra.gmra.mrb[0].mxu0 %vm863_vm8, %v12307_v2  ;;  %9453 = vmatmul.mubr.msk.f32.vlgmr.msra.gmra.mrb[4].mxu1 %vm863_vm8, %v12307_v2 }
 0x3bb   :  { %10286 = vmatpush3.bf16.xpose.msk.msra.mxu0 %vm12212_vm9, %v12292_v53  ;;  %9471 = vmatprep.mubr.msk.f32.mxu0 %vm863_vm8, %v12305_v1 }
 0x3bc   :  { %10289 = vmatprep.subr.msk.bf16.mxu0 %vm12212_vm9, %v12309_v4 }
 0x3c3   :  { %10292 = vmatpush3.bf16.xpose.msk.msra.mxu0 %vm12212_vm9, %v12309_v4 }
 0x3c4   :  { %10295 = vmatprep.subr.msk.bf16.mxu0 %vm12212_vm9, %v12327_v7 }
 0x3cb   :  { %10298 = vmatpush3.bf16.xpose.msk.msra.mxu0 %vm12212_vm9, %v12327_v7 }
 0x3cc   :  { %10301 = vmatprep.subr.msk.bf16.mxu0 %vm12212_vm9, %v12335_v10 }
 0x3d3   :  { %10304 = vmatpush3.bf16.xpose.msk.msra.mxu0 %vm12212_vm9, %v12335_v10 }
 0x3da   :  { %9472 = vmatmul.mubr.msk.f32.vlgmr.msra.gmra.mrb[2].mxu0 %vm863_vm8, %v12307_v2 }
 0x48d   :  { %v9435_v14 = vpop.f32.mrb[0].mxu0  ;;  %v9454_v15 = vpop.f32.mrb[4].mxu1 }
 0x48e   :  { %v1071_v16 = vadd.f32 %v9454_v15, %v8504_v11  ;;  %v960_v18 = vpop.f32.mrb[1].mxu0  ;;  %v1065_v19 = vpop.f32.mrb[5].mxu1  ;;  %v12360_v28 = vadd.f32 %v9435_v14, %v8493_v13 }
 0x48f   :  { %v12350_v20 = vadd.f32 %v8493_v13, %v960_v18  ;;  %v1066_v21 = vadd.f32 %v8504_v11, %v1065_v19 }
 0x491   :  { %9478 = vmatprep.mubr.msk.f32.mxu1 %vm383_vm1, %v12350_v20  ;;  %v10305_v24 = vpack.c.bf16 %v1071_v16, %v1066_v21  ;;  %v12354_v25 = vpack.i.bf16 %v1071_v16, %v1066_v21 }
 0x493   :  { %10307 = vmatprep.subr.msk.bf16.mxu1 %vm12151_vm2, %v10305_v24 }
 0x494   :  { %10310 = vmatpush3.bf16.xpose.msk.msra.mxu1 %vm12151_vm2, %v10305_v24 }
 0x49b   :  { %9479 = vmatmul.mubr.msk.f32.vlgmr.msra.gmra.mrb[6].mxu1 %vm383_vm1, %v12360_v28 }
 0x4ad   :  { %v9473_v31 = vpop.f32.mrb[2].mxu0 }
 0x4ae   :  { %v1176_v33 = vadd.f32 %v9473_v31, %v8515_v30  ;;  %v1170_v35 = vpop.f32.mrb[3].mxu0 }
 0x4af   :  { %v1171_v37 = vadd.f32 %v8515_v30, %v1170_v35 }
 0x4b1   :  { %v10311_v39 = vpack.c.bf16 %v1176_v33, %v1171_v37  ;;  %v12369_v40 = vpack.i.bf16 %v1176_v33, %v1171_v37 }
 0x4b3   :  { %10313 = vmatprep.subr.msk.bf16.mxu1 %vm12365_vm13, %v10311_v39 }
 0x4b4   :  { %10316 = vmatpush3.bf16.msk.msra.mxu1 %vm12365_vm13, %v10311_v39 }
 0x56e   :  { %v9480_v41 = vpop.f32.mrb[6].mxu1 }
 0x56f   :  { %v1267_v42 = vmul.f32 0.25, %v9480_v41  ;;  %v1257_v43 = vpop.f32.mrb[7].mxu1 }
 0x570   :  { %v1266_v45 = vmul.f32 0.25, %v1257_v43 }
 0x571   :  { %v1273_v46 = vsel %vm1272_vm14, %v1267_v42, -inf }
 0x572   :  { %1274 = vmax.xlane.f32.xlu0 %v1273_v46  ;;  %v1269_v48 = vsel %vm1268_vm15, %v1266_v45, -inf }
 0x573   :  { %1270 = vmax.xlane.f32.xlu1 %v1269_v48 }
 0x584   :  { %11164 = vrot.lane.b32.xlu1 %v12354_v25, %s11879_s4 }
 0x588   :  { %1379 = vrot.lane.b32.xlu1 %v12360_v28, %s11879_s4 }
 0x5ff   :  { %v1275_v49 = vpop.xlane.xlu0 %1274 }
 0x600   :  { %v1277_v51 = vsub.f32 %v1267_v42, %v1275_v49  ;;  %v1271_v52 = vpop.xlane.xlu1 %1270 }
 0x601   :  { %v1276_v55 = vsub.f32 %v1266_v45, %v1271_v52 }
 0x602   :  { %v1280_v57 = vmul.f32 1.442695, %v1277_v51 }
 0x603   :  { %v1278_v59 = vmul.f32 1.442695, %v1276_v55 }
 0x604   :  { %v11165_v60 = vpop.permute.xlu1 %11164 }
 0x605   :  { %11343 = vpow2.f32 %v1278_v59  ;;  %v11167_v61 = vunpack.i.h.bf16 %v11165_v60  ;;  %v11166_v62 = vunpack.i.l.bf16 %v11165_v60 }
 0x606   :  { %11345 = vpow2.f32 %v1280_v57 }
 0x607   :  { %v10317_v63 = vpack.c.bf16 %v11167_v61, %v11166_v62 }
 0x608   :  { %v1380_v19 = vpop.permute.xlu1 %1379 }
 0x609   :  { %10319 = vmatprep.subr.msk.bf16.mxu1 %vm12151_vm2, %v10317_v63 }
 0x60f   :  { %v11344_v0 = vpop.eup %11343 }
 0x610   :  { %v1282_v6 = vsel %vm1268_vm15, %v11344_v0, 0.0  ;;  %v11346_v5 = vpop.eup %11345 }
 0x611   :  { %1283 = vadd.xlane.f32.xlu0 %v1282_v6  ;;  %v1285_v8 = vsel %vm1272_vm14, %v11346_v5, 0.0 }
 0x615   :  { %1286 = vadd.xlane.f32.xlu0 %v1285_v8 }
 0x62b   :  { %1377 = vrot.lane.b32.xlu0 %v12350_v20, %s11879_s4 }
 0x69e   :  { %v1284_v9 = vpop.xlane.xlu0 %1283 }
 0x69f   :  { %11347 = vrcp.f32 %v1284_v9 }
 0x6a2   :  { %v1287_v11 = vpop.xlane.xlu0 %1286 }
 0x6a3   :  { %11349 = vrcp.f32 %v1287_v11 }
 0x6a6   :  { %v1378_v18 = vpop.permute.xlu0 %1377 }
 0x6a9   :  { %v11348_v13 = vpop.eup %11347 }
 0x6aa   :  { %v1290_v14 = vmul.f32 %v11348_v13, %v11344_v0 }
 0x6ac   :  { %9485 = vmatprep.mubr.msk.f32.mxu1 %vm1268_vm15, %v1290_v14 }
 0x6ad   :  { %v11350_v15 = vpop.eup %11349 }
 0x6ae   :  { %v1291_v16 = vmul.f32 %v11350_v15, %v11346_v5 }
 0x6b0   :  { %9486 = vmatmul.mubr.msk.f32.vlgmr.msra.gmra.mrb[8].mxu1 %vm1268_vm15, %v1291_v16 }
 0x6b1   :  { %10322 = vmatpush3.bf16.xpose.msk.msra.mxu1 %vm12151_vm2, %v10317_v63  ;;  %9492 = vmatprep.mubr.msk.f32.mxu1 %vm383_vm1, %v1378_v18 }
 0x6b8   :  { %9493 = vmatmul.mubr.msk.f32.vlgmr.msra.gmra.mrb[10].mxu1 %vm383_vm1, %v1380_v19 }
 0x783   :  { %v12393_v21 = vpop.f32.mrb[8].mxu1 }
 0x784   :  { %v12395_v24 = vpop.f32.mrb[9].mxu1 }
 0x78b   :  { %v9494_v30 = vpop.f32.mrb[10].mxu1 }
 0x78c   :  { %v1469_v31 = vmul.f32 0.25, %v9494_v30  ;;  %v1459_v33 = vpop.f32.mrb[11].mxu1 }
 0x78d   :  { %v1468_v35 = vmul.f32 0.25, %v1459_v33 }
 0x78e   :  { %v1473_v37 = vsel %vm1272_vm14, %v1469_v31, -inf }
 0x78f   :  { %1474 = vmax.xlane.f32.xlu0 %v1473_v37  ;;  %v1470_v39 = vsel %vm1268_vm15, %v1468_v35, -inf }
 0x790   :  { %1471 = vmax.xlane.f32.xlu1 %v1470_v39 }
 0x81c   :  { %v1475_v41 = vpop.xlane.xlu0 %1474 }
 0x81d   :  { %v1477_v42 = vsub.f32 %v1469_v31, %v1475_v41  ;;  %v1472_v43 = vpop.xlane.xlu1 %1471 }
 0x81e   :  { %v1476_v45 = vsub.f32 %v1468_v35, %v1472_v43 }
 0x81f   :  { %v1480_v46 = vmul.f32 1.442695, %v1477_v42 }
 0x820   :  { %v1478_v48 = vmul.f32 1.442695, %v1476_v45 }
 0x821   :  { %11351 = vpow2.f32 %v1480_v46 }
 0x822   :  { %11353 = vpow2.f32 %v1478_v48 }
 0x82b   :  { %v11352_v49 = vpop.eup %11351 }
 0x82c   :  { %v11354_v51 = vpop.eup %11353  ;;  %v1485_v52 = vsel %vm1272_vm14, %v11352_v49, 0.0 }
 0x82d   :  { %1486 = vadd.xlane.f32.xlu1 %v1485_v52  ;;  %v1482_v55 = vsel %vm1268_vm15, %v11354_v51, 0.0 }
 0x82e   :  { %1483 = vadd.xlane.f32.xlu0 %v1482_v55 }
 0x83e   :  { %11174 = vrot.lane.b32.xlu1 %v12354_v25, %s11880_s3 }
 0x842   :  { %1581 = vrot.lane.b32.xlu1 %v12350_v20, %s11880_s3 }
 0x844   :  { %11169 = vrot.lane.b32.xlu0 %v12369_v40, %s11879_s4 }
 0x846   :  { %1583 = vrot.lane.b32.xlu1 %v12360_v28, %s11880_s3 }
 0x8ba   :  { %v1487_v57 = vpop.xlane.xlu1 %1486 }
 0x8bb   :  { %11355 = vrcp.f32 %v1487_v57  ;;  %v1484_v59 = vpop.xlane.xlu0 %1483 }
 0x8bc   :  { %11357 = vrcp.f32 %v1484_v59 }
 0x8be   :  { %v11175_v60 = vpop.permute.xlu1 %11174 }
 0x8bf   :  { %v11170_v61 = vpop.permute.xlu0 %11169  ;;  %v11177_v62 = vunpack.i.h.bf16 %v11175_v60  ;;  %v11176_v63 = vunpack.i.l.bf16 %v11175_v60 }
 0x8c0   :  { %v11172_v0 = vunpack.i.h.bf16 %v11170_v61  ;;  %v11171_v6 = vunpack.i.l.bf16 %v11170_v61 }
 0x8c1   :  { %v10329_v8 = vpack.c.bf16 %v11177_v62, %v11176_v63 }
 0x8c2   :  { %v10323_v5 = vpack.c.bf16 %v11172_v0, %v11171_v6  ;;  %v1582_v15 = vpop.permute.xlu1 %1581 }
 0x8c4   :  { %10325 = vmatprep.subr.msk.bf16.mxu0 %vm12365_vm13, %v10323_v5 }
 0x8c5   :  { %v11356_v9 = vpop.eup %11355  ;;  %10328 = vmatpush3.bf16.msk.msra.mxu0 %vm12365_vm13, %v10323_v5 }
 0x8c6   :  { %v11358_v11 = vpop.eup %11357  ;;  %10331 = vmatprep.subr.msk.bf16.mxu0 %vm12151_vm2, %v10329_v8  ;;  %v1491_v14 = vmul.f32 %v11356_v9, %v11352_v49  ;;  %v1584_v16 = vpop.permute.xlu1 %1583 }
 0x8c7   :  { %v1490_v13 = vmul.f32 %v11358_v11, %v11354_v51 }
 0x8c9   :  { %9499 = vmatprep.mubr.msk.f32.mxu0 %vm1268_vm15, %v1490_v13 }
 0x8ca   :  { %9500 = vmatmul.mubr.msk.f32.vlgmr.msra.gmra.mrb[4].mxu0 %vm1268_vm15, %v1491_v14 }
 0x8cb   :  { %9506 = vmatprep.mubr.msk.f32.mxu0 %vm383_vm1, %v1582_v15 }
 0x8ce   :  { %10334 = vmatpush3.bf16.xpose.msk.msra.mxu0 %vm12151_vm2, %v10329_v8 }
 0x8d5   :  { %9507 = vmatmul.mubr.msk.f32.vlgmr.msra.gmra.mrb[6].mxu0 %vm383_vm1, %v1584_v16  ;;  %v584_v16 = vld [vmem:[%s13935_s2] sm:$0xff] }
 0x99d   :  { %v12421_v18 = vpop.f32.mrb[4].mxu0 }
 0x99e   :  { %v12423_v19 = vpop.f32.mrb[5].mxu0 }
 0x9a8   :  { %v9508_v30 = vpop.f32.mrb[6].mxu0 }
 0x9a9   :  { %v1673_v31 = vmul.f32 0.25, %v9508_v30  ;;  %v1663_v33 = vpop.f32.mrb[7].mxu0 }
 0x9aa   :  { %v1672_v35 = vmul.f32 0.25, %v1663_v33 }
 0x9ab   :  { %v1677_v37 = vsel %vm1272_vm14, %v1673_v31, -inf }
 0x9ac   :  { %1678 = vmax.xlane.f32.xlu1 %v1677_v37  ;;  %v1674_v39 = vsel %vm1268_vm15, %v1672_v35, -inf }
 0x9ad   :  { %1675 = vmax.xlane.f32.xlu0 %v1674_v39  ;;  %v585_v39 = vld [vmem:[%s13935_s2 + $0x8] sm:$0xff] }
 0x9bd   :  { %11184 = vrot.lane.b32.xlu1 %v12354_v25, %s11881_s23 }
 0x9c1   :  { %1784 = vrot.lane.b32.xlu1 %v12350_v20, %s11881_s23 }
 0x9c5   :  { %1786 = vrot.lane.b32.xlu1 %v12360_v28, %s11881_s23 }
 0xa39   :  { %v1679_v41 = vpop.xlane.xlu1 %1678 }
 0xa3a   :  { %v1681_v42 = vsub.f32 %v1673_v31, %v1679_v41  ;;  %v1676_v43 = vpop.xlane.xlu0 %1675 }
 0xa3b   :  { %v1680_v45 = vsub.f32 %v1672_v35, %v1676_v43  ;;  %v586_v35 = vmul.f32 %v584_v16, %v12127_v12 }
 0xa3c   :  { %v1684_v46 = vmul.f32 1.442695, %v1681_v42 }
 0xa3d   :  { %v1682_v48 = vmul.f32 1.442695, %v1680_v45  ;;  %v11185_v55 = vpop.permute.xlu1 %11184  ;;  %v590_v43 = vsel %vm287_vm0, %v586_v35, 0.0  ;;  %v587_v45 = vmul.f32 %v585_v39, %v12127_v12  ;;  %v851_v35 = vld [vmem:[#allocation11 + $0x18] sm:$0xff] }
 0xa3e   :  { %11359 = vpow2.f32 %v1684_v46  ;;  %v11187_v59 = vunpack.i.h.bf16 %v11185_v55  ;;  %v11186_v60 = vunpack.i.l.bf16 %v11185_v55 }
 0xa3f   :  { %11361 = vpow2.f32 %v1682_v48  ;;  %v593_v46 = vsel %vm287_vm0, %v587_v45, 0.0  ;;  %v588_v48 = vmul.f32 %v584_v16, %v12133_v17  ;;  %v855_v45 = vld [vmem:[#allocation11 + $0x38] sm:$0xff] }
 0xa40   :  { %v10341_v0 = vpack.c.bf16 %v11187_v59, %v11186_v60 }
 0xa41   :  { %v1785_v11 = vpop.permute.xlu1 %1784 }
 0xa45   :  { %v1787_v13 = vpop.permute.xlu1 %1786 }
 0xa48   :  { %v11360_v49 = vpop.eup %11359 }
 0xa49   :  { %v1689_v51 = vsel %vm1272_vm14, %v11360_v49, 0.0  ;;  %v11362_v52 = vpop.eup %11361 }
 0xa4a   :  { %1690 = vadd.xlane.f32.xlu0 %v1689_v51  ;;  %v1686_v25 = vsel %vm1268_vm15, %v11362_v52, 0.0  ;;  %v589_v51 = vmul.f32 %v585_v39, %v12133_v17  ;;  %v852_v39 = vld [vmem:[#allocation11 + $0x20] sm:$0xff] }
 0xa4e   :  { %1687 = vadd.xlane.f32.xlu0 %v1686_v25  ;;  %v8482_v25 = vld [vmem:[%s13936_s7] ss:$0 sm:$0xff] }
 0xa64   :  { %11179 = vrot.lane.b32.xlu0 %v12369_v40, %s11880_s3 }
 0xad7   :  { %v1691_v20 = vpop.xlane.xlu0 %1690 }
 0xad8   :  { %11363 = vrcp.f32 %v1691_v20 }
 0xadb   :  { %v1688_v28 = vpop.xlane.xlu0 %1687 }
 0xadc   :  { %11365 = vrcp.f32 %v1688_v28 }
 0xadf   :  { %v11180_v57 = vpop.permute.xlu0 %11179 }
 0xae0   :  { %v11182_v61 = vunpack.i.h.bf16 %v11180_v57  ;;  %v11181_v62 = vunpack.i.l.bf16 %v11180_v57 }
 0xae2   :  { %v10335_v63 = vpack.c.bf16 %v11182_v61, %v11181_v62  ;;  %v11364_v6 = vpop.eup %11363 }
 0xae3   :  { %v1695_v9 = vmul.f32 %v11364_v6, %v11360_v49  ;;  %v596_v49 = vsel %vm287_vm0, %v588_v48, 0.0 }
 0xae4   :  { %10337 = vmatprep.subr.msk.bf16.mxu1 %vm12365_vm13, %v10335_v63 }
 0xae5   :  { %10340 = vmatpush3.bf16.msk.msra.mxu1 %vm12365_vm13, %v10335_v63 }
 0xae6   :  { %v11366_v5 = vpop.eup %11365  ;;  %10343 = vmatprep.subr.msk.bf16.mxu1 %vm12151_vm2, %v10341_v0 }
 0xae7   :  { %v1694_v8 = vmul.f32 %v11366_v5, %v11362_v52  ;;  %v599_v52 = vsel %vm287_vm0, %v589_v51, 0.0 }
 0xae9   :  { %9513 = vmatprep.mubr.msk.f32.mxu1 %vm1268_vm15, %v1694_v8 }
 0xaea   :  { %9514 = vmatmul.mubr.msk.f32.vlgmr.msra.gmra.mrb[12].mxu1 %vm1268_vm15, %v1695_v9 }
 0xaeb   :  { %9520 = vmatprep.mubr.msk.f32.mxu1 %vm383_vm1, %v1785_v11 }
 0xaee   :  { %10346 = vmatpush3.bf16.xpose.msk.msra.mxu1 %vm12151_vm2, %v10341_v0 }
 0xaf5   :  { %9521 = vmatmul.mubr.msk.f32.vlgmr.msra.gmra.mrb[14].mxu1 %vm383_vm1, %v1787_v13 }
 0xbbd   :  { %v9515_v14 = vpop.f32.mrb[12].mxu1 }
 0xbbe   :  { %v1775_v15 = vpop.f32.mrb[13].mxu1 }
 0xbc8   :  { %v9522_v30 = vpop.f32.mrb[14].mxu1 }
 0xbc9   :  { %v1876_v31 = vmul.f32 0.25, %v9522_v30  ;;  %v1866_v33 = vpop.f32.mrb[15].mxu1  ;;  %v849_v30 = vld [vmem:[#allocation11 + $0x8] sm:$0xff] }
 0xbca   :  { %v1875_v37 = vmul.f32 0.25, %v1866_v33 }
 0xbcb   :  { %v1880_v41 = vsel %vm1272_vm14, %v1876_v31, -inf }
 0xbcc   :  { %1881 = vmax.xlane.f32.xlu1 %v1880_v41  ;;  %v1877_v42 = vsel %vm1268_vm15, %v1875_v37, -inf  ;;  %v853_v41 = vld [vmem:[#allocation11 + $0x28] sm:$0xff] }
 0xbcd   :  { %1878 = vmax.xlane.f32.xlu0 %v1877_v42  ;;  %v12492_v42 = vpack.c.bf16 %v853_v41, %v852_v39 }
 0xbd0   :  { %591 = vadd.xlane.f32.xlu1 %v590_v43  ;;  %v854_v43 = vld [vmem:[#allocation11 + $0x30] sm:$0xff] }
 0xbd4   :  { %594 = vadd.xlane.f32.xlu1 %v593_v46  ;;  %v12500_v46 = vpack.c.bf16 %v855_v45, %v854_v43 }
 0xbd8   :  { %597 = vadd.xlane.f32.xlu1 %v596_v49 }
 0xbdc   :  { %600 = vadd.xlane.f32.xlu1 %v599_v52 }
 0xbed   :  { %609 = vbcast.lane.b32.xlu1 %v8482_v25, 256 }
 0xbf1   :  { %1989 = vrot.lane.b32.xlu1 %v12423_v19, %s11882_s10  ;;  %v8483_v19 = vld [vmem:[%s13937_s11] ss:$0 sm:$0xff] }
 0xbf5   :  { %1997 = vrot.lane.b32.xlu1 %v1775_v15, %s11883_s27 }
 0xc59   :  { %v1882_v20 = vpop.xlane.xlu1 %1881 }
 0xc5a   :  { %v1884_v28 = vsub.f32 %v1876_v31, %v1882_v20  ;;  %v1879_v55 = vpop.xlane.xlu0 %1878  ;;  %v850_v31 = vld [vmem:[#allocation11 + $0x10] sm:$0xff] }
 0xc5b   :  { %v1883_v57 = vsub.f32 %v1875_v37, %v1879_v55  ;;  %v12481_v37 = vpack.c.bf16 %v851_v35, %v850_v31 }
 0xc5c   :  { %v1887_v59 = vmul.f32 1.442695, %v1884_v28 }
 0xc5d   :  { %v1885_v60 = vmul.f32 1.442695, %v1883_v57  ;;  %v592_v48 = vpop.xlane.xlu1 %591 }
 0xc5e   :  { %11367 = vpow2.f32 %v1887_v59 }
 0xc5f   :  { %11369 = vpow2.f32 %v1885_v60 }
 0xc61   :  { %v595_v49 = vpop.xlane.xlu1 %594 }
 0xc65   :  { %v598_v51 = vpop.xlane.xlu1 %597 }
 0xc68   :  { %v11368_v61 = vpop.eup %11367 }
 0xc69   :  { %v1892_v62 = vsel %vm1272_vm14, %v11368_v61, 0.0  ;;  %v11370_v63 = vpop.eup %11369  ;;  %v601_v52 = vpop.xlane.xlu1 %600 }
 0xc6a   :  { %1893 = vadd.xlane.f32.xlu0 %v1892_v62  ;;  %v1889_v0 = vsel %vm1268_vm15, %v11370_v63, 0.0 }
 0xc6d   :  { %v610_v20 = vpop.permute.xlu1 %609 }
 0xc6e   :  { %1890 = vadd.xlane.f32.xlu0 %v1889_v0  ;;  %v617_v55 = vadd.f32 %v610_v20, %v592_v48 }
 0xc70   :  { %v621_v62 = vmax.f32 %v617_v55, 0.0 }
 0xc84   :  { %11189 = vrot.lane.b32.xlu0 %v12369_v40, %s11881_s23 }
 0xc88   :  { %613 = vbcast.lane.b32.xlu0 %v8482_v25, 264 }
 0xc8c   :  { %632 = vbcast.lane.b32.xlu0 %v8483_v19, 256 }
 0xc90   :  { %636 = vbcast.lane.b32.xlu0 %v8483_v19, 264 }
 0xc94   :  { %1991 = vrot.lane.b32.xlu0 %v12421_v18, %s11882_s10 }
 0xc98   :  { %1999 = vrot.lane.b32.xlu0 %v9515_v14, %s11883_s27  ;;  %v848_v14 = vld [vmem:[#allocation11] sm:$0xff] }
 0xc99   :  { %v12479_v33 = vpack.c.bf16 %v849_v30, %v848_v14 }
 0xcf7   :  { %v1894_v6 = vpop.xlane.xlu0 %1893 }
 0xcf8   :  { %11371 = vrcp.f32 %v1894_v6 }
 0xcfb   :  { %v1891_v5 = vpop.xlane.xlu0 %1890 }
 0xcfc   :  { %11373 = vrcp.f32 %v1891_v5 }
 0xcff   :  { %v11190_v8 = vpop.permute.xlu0 %11189 }
 0xd00   :  { %v11192_v9 = vunpack.i.h.bf16 %v11190_v8  ;;  %v11191_v11 = vunpack.i.l.bf16 %v11190_v8 }
 0xd02   :  { %v10347_v13 = vpack.c.bf16 %v11192_v9, %v11191_v11  ;;  %v11372_v40 = vpop.eup %11371 }
 0xd03   :  { %v1898_v18 = vmul.f32 %v11372_v40, %v11368_v61  ;;  %v614_v25 = vpop.permute.xlu0 %613  ;;  %v619_v61 = vadd.f32 %v610_v20, %v598_v51 }
 0xd04   :  { %10349 = vmatprep.subr.msk.bf16.mxu0 %vm12365_vm13, %v10347_v13  ;;  %v618_v28 = vadd.f32 %v614_v25, %v595_v49  ;;  %v620_v59 = vadd.f32 %v614_v25, %v601_v52 }
 0xd05   :  { %10352 = vmatpush3.bf16.msk.msra.mxu0 %vm12365_vm13, %v10347_v13  ;;  %v623_v8 = vmax.f32 %v619_v61, 0.0 }
 0xd06   :  { %v11374_v15 = vpop.eup %11373  ;;  %10355 = vmatprep.subr.msk.bf16.mxu0 %vm12212_vm9, %v12479_v33  ;;  %v622_v60 = vmax.f32 %v618_v28, 0.0  ;;  %v624_v6 = vmax.f32 %v620_v59, 0.0 }
 0xd07   :  { %v1897_v16 = vmul.f32 %v11374_v15, %v11370_v63  ;;  %v633_v57 = vpop.permute.xlu0 %632  ;;  %v1990_v15 = vpop.permute.xlu1 %1989 }
 0xd08   :  { %v640_v9 = vmul.f32 %v633_v57, %v621_v62  ;;  %v642_v13 = vmul.f32 %v633_v57, %v623_v8  ;;  %v2011_v14 = vsel %vm383_vm1, %v12395_v24, %v1990_v15 }
 0xd09   :  { %9527 = vmatprep.mubr.msk.f32.mxu0 %vm1268_vm15, %v1897_v16 }
 0xd0a   :  { %9528 = vmatmul.mubr.msk.f32.vlgmr.msra.gmra.mrb[8].mxu0 %vm1268_vm15, %v1898_v18 }
 0xd0b   :  { %v637_v19 = vpop.permute.xlu0 %636  ;;  %v1998_v18 = vpop.permute.xlu1 %1997 }
 0xd0c   :  { %v641_v5 = vmul.f32 %v637_v19, %v622_v60  ;;  %v643_v11 = vmul.f32 %v637_v19, %v624_v6  ;;  %v2013_v31 = vsel %vm484_vm5, %v2011_v14, %v1998_v18  ;;  %v8484_v60 = vld [vmem:[%s13938_s15] ss:$0 sm:$0xff] }
 0xd0e   :  { %10358 = vmatpush3.bf16.xpose.msk.msra.mxu0 %vm12212_vm9, %v12479_v33 }
 0xd0f   :  { %10361 = vmatprep.subr.msk.bf16.mxu0 %vm12212_vm9, %v12481_v37  ;;  %v1992_v40 = vpop.permute.xlu0 %1991 }
 0xd10   :  { %v2012_v35 = vsel %vm383_vm1, %v12393_v21, %v1992_v40 }
 0xd13   :  { %v2000_v16 = vpop.permute.xlu0 %1999 }
 0xd14   :  { %v2014_v41 = vsel %vm484_vm5, %v2012_v35, %v2000_v16 }
 0xd16   :  { %10364 = vmatpush3.bf16.xpose.msk.msra.mxu0 %vm12212_vm9, %v12481_v37 }
 0xd17   :  { %10367 = vmatprep.subr.msk.bf16.mxu0 %vm12212_vm9, %v12492_v42 }
 0xd1e   :  { %10370 = vmatpush3.bf16.xpose.msk.msra.mxu0 %vm12212_vm9, %v12492_v42 }
 0xd1f   :  { %10373 = vmatprep.subr.msk.bf16.mxu0 %vm12212_vm9, %v12500_v46 }
 0xd26   :  { %10376 = vmatpush3.bf16.xpose.msk.msra.mxu0 %vm12212_vm9, %v12500_v46 }
 0xddd   :  { %v9529_v63 = vpop.f32.mrb[8].mxu0 }
 0xdde   :  { %2007 = vrot.lane.b32.xlu0 %v9529_v63, %s11884_s17  ;;  %v1978_v0 = vpop.f32.mrb[9].mxu0 }
 0xddf   :  { %2005 = vrot.lane.b32.xlu1 %v1978_v0, %s11884_s17 }
 0xde2   :  { %652 = vperm.xlu0 %11161, %v641_v5  }
 0xde3   :  { %649 = vperm.xlu1 %11162, %v640_v9  }
 0xde6   :  { %658 = vperm.xlu0 %11161, %v643_v11   ;;  %v8554_v11 = vld [vmem:[%s13939_s9] ss:$0 sm:$0xff] }
 0xde7   :  { %655 = vperm.xlu1 %11162, %v642_v13  }
 0xe50   :  { %v2008_v30 = vpop.permute.xlu0 %2007 }
 0xe51   :  { %v2006_v39 = vpop.permute.xlu1 %2005  ;;  %v2017_v45 = vsel %vm2015_vm3, %v2014_v41, %v2008_v30  ;;  %v8568_v41 = vld [vmem:[%s11935_s8 + $0x48] sm:$0xff] }
 0xe52   :  { %v2016_v43 = vsel %vm2015_vm3, %v2013_v31, %v2006_v39  ;;  %v8567_v39 = vld [vmem:[%s11935_s8 + $0x40] sm:$0xff] }
 0xe53   :  { %9546 = vmatprep.mubr.msk.f32.mxu0 %vm863_vm8, %v2016_v43  ;;  %v8576_v43 = vld [vmem:[%s11940_s14 + $0x40] sm:$0xff] }
 0xe54   :  { %9547 = vmatmul.mubr.msk.f32.vlgmr.msra.gmra.mrb[10].mxu0 %vm863_vm8, %v2017_v45  ;;  %v12543_v45 = vpack.c.bf16 %v8568_v41, %v8567_v39 }
 0xe56   :  { %10379 = vmatprep.subr.msk.bf16.mxu1 %vm12212_vm9, %v12543_v45 }
 0xe57   :  { %10382 = vmatpush3.bf16.xpose.msk.msra.mxu1 %vm12212_vm9, %v12543_v45 }
 0xe61   :  { %v653_v48 = vpop.permute.xlu0 %652 }
 0xe62   :  { %v650_v24 = vpop.permute.xlu1 %649  ;;  %v667_v49 = vrot.slane %v653_v48, %v12166_v54  ;;  %v8577_v48 = vld [vmem:[%s11940_s14 + $0x48] sm:$0xff] }
 0xe63   :  { %v663_v51 = vrot.slane %v650_v24, %v12169_v56  ;;  %v12546_v24 = vpack.c.bf16 %v8577_v48, %v8576_v43 }
 0xe65   :  { %v659_v52 = vpop.permute.xlu0 %658  ;;  %v668_v28 = vsel %vm370_vm4, %v667_v49, %v663_v51  ;;  %10403 = vmatprep.subr.msk.bf16.mxu0 %vm12212_vm9, %v12546_v24 }
 0xe66   :  { %v676_v21 = vrot.slane %v659_v52, %v12166_v54  ;;  %v656_v25 = vpop.permute.xlu1 %655  ;;  %10406 = vmatpush3.bf16.xpose.msk.msra.mxu0 %vm12212_vm9, %v12546_v24 }
 0xe67   :  { %v672_v20 = vrot.slane %v656_v25, %v12169_v56 }
 0xe69   :  { %v677_v55 = vsel %vm370_vm4, %v676_v21, %v672_v20 }
 0xe6a   :  { %v678_v57 = vsel %vm381_vm6, %v677_v55, %v668_v28 }
 0xe6b   :  { %v681_v59 = vsel %vm680_vm7, %v678_v57, 0.0  ;;  %v8569_v57 = vld [vmem:[%s11935_s8 + $0x50] sm:$0xff] }
 0xe6c   :  { %682 = vadd.xlane.f32.xlu1 %v681_v59  ;;  %v8570_v59 = vld [vmem:[%s11935_s8 + $0x58] sm:$0xff] }
 0xef9   :  { %v683_v61 = vpop.xlane.xlu1 %682 }
 0xefa   :  { %v691_v62 = vadd.f32 %v8484_v60, %v683_v61  ;;  %v12564_v60 = vpack.c.bf16 %v8570_v59, %v8569_v57  ;;  %v8578_v61 = vld [vmem:[%s11940_s14 + $0x50] sm:$0xff] }
 0xefc   :  { %v692_v63 = vsub.f32 0.0, %v691_v62  ;;  %v8579_v62 = vld [vmem:[%s11940_s14 + $0x58] sm:$0xff]  ;;  %10385 = vmatprep.subr.msk.bf16.mxu1 %vm12212_vm9, %v12564_v60 }
 0xefd   :  { %10388 = vmatpush3.bf16.xpose.msk.msra.mxu1 %vm12212_vm9, %v12564_v60 }
 0xefe   :  { %v693_v0 = vmul.f32 1.442695, %v692_v63  ;;  %v12568_v63 = vpack.c.bf16 %v8579_v62, %v8578_v61  ;;  %v2208_v61 = vld [vmem:[#allocation10 + $0x50] sm:$0xff]  ;;  %v2209_v62 = vld [vmem:[#allocation10 + $0x58] sm:$0xff] }
 0xf00   :  { %11375 = vpow2.f32 %v693_v0  ;;  %10409 = vmatprep.subr.msk.bf16.mxu0 %vm12212_vm9, %v12568_v63  ;;  %v8571_v0 = vld [vmem:[%s11935_s8 + $0x60] sm:$0xff] }
 0xf01   :  { %10412 = vmatpush3.bf16.xpose.msk.msra.mxu0 %vm12212_vm9, %v12568_v63 }
 0xf0a   :  { %v11376_v19 = vpop.eup %11375 }
 0xf0b   :  { %v695_v6 = vadd.f32 1.0, %v11376_v19  ;;  %v8572_v19 = vld [vmem:[%s11935_s8 + $0x68] sm:$0xff] }
 0xf0d   :  { %11377 = vrcp.f32 %v695_v6  ;;  %v12584_v6 = vpack.c.bf16 %v8572_v19, %v8571_v0 }
 0xf0f   :  { %10391 = vmatprep.subr.msk.bf16.mxu1 %vm12212_vm9, %v12584_v6 }
 0xf10   :  { %10394 = vmatpush3.bf16.xpose.msk.msra.mxu1 %vm12212_vm9, %v12584_v6 }
 0xf17   :  { %v12532_v5 = vpop.eup %11377 }
 0xf18   :  { %11097 = vpush %v12532_v5 }
 0xf27   :  { %v9548_v8 = vpop.f32.mrb[10].mxu0 }
 0xf28   :  { %v2120_v9 = vpop.f32.mrb[11].mxu0  ;;  %v2126_v13 = vadd.f32 %v9548_v8, %v8554_v11  ;;  %v8580_v8 = vld [vmem:[%s11940_s14 + $0x60] sm:$0xff] }
 0xf29   :  { %v2121_v40 = vadd.f32 %v8554_v11, %v2120_v9  ;;  %v8581_v9 = vld [vmem:[%s11940_s14 + $0x68] sm:$0xff] }
 0xf2a   :  { %v12588_v11 = vpack.c.bf16 %v8581_v9, %v8580_v8  ;;  %v12637_v8 = vpack.c.bf16 %v2209_v62, %v2208_v61 }
 0xf2c   :  { %10415 = vmatprep.subr.msk.bf16.mxu0 %vm12212_vm9, %v12588_v11 }
 0xf2d   :  { %10418 = vmatpush3.bf16.xpose.msk.msra.mxu0 %vm12212_vm9, %v12588_v11 }
 0xf49   :  { %s11098_s16 = spop %11097 }
 0xf4a   :  { %v2131_v15 = vstv %s11098_s16 }
 0xf4b   :  { %v2133_v16 = vmul.f32 %v2131_v15, %v2121_v40  ;;  %v2134_v18 = vmul.f32 %v2131_v15, %v2126_v13  ;;  %v8573_v13 = vld [vmem:[%s11935_s8 + $0x70] sm:$0xff]  ;;  %v8574_v40 = vld [vmem:[%s11935_s8 + $0x78] sm:$0xff]  ;;  %s13941_s8 = sld [smem:[#allocation37_spill]] }
 0xf4c   :  { %v12604_v15 = vpack.c.bf16 %v8574_v40, %v8573_v13  ;;  %v2212_v13 = vld [vmem:[#allocation10 + $0x70] sm:$0xff]  ;;  %v2213_v40 = vld [vmem:[#allocation10 + $0x78] sm:$0xff] }
 0xf4d   :  { %v2135_v14 = vadd.f32 %v2133_v16, %v12305_v1  ;;  %v2136_v31 = vadd.f32 %v2134_v18, %v12307_v2  ;;  %v8582_v16 = vld [vmem:[%s11940_s14 + $0x70] sm:$0xff]  ;;  %v8583_v18 = vld [vmem:[%s11940_s14 + $0x78] sm:$0xff]  ;;  %s13943_s14 = sld [smem:[#allocation38_spill]] }
 0xf4e   :  { %10397 = vmatprep.subr.msk.bf16.mxu1 %vm12212_vm9, %v12604_v15 }
 0xf4f   :  { %v2137_v30 = vsel %vm863_vm8, %v2135_v14, 0.0  ;;  %v2141_v35 = vsel %vm2140_vm11, %v2136_v31, 0.0  ;;  %10400 = vmatpush3.bf16.xpose.msk.msra.mxu1 %vm12212_vm9, %v12604_v15 }
 0xf50   :  { %2138 = vadd.xlane.f32.xlu0 %v2137_v30  ;;  %v2206_v30 = vld [vmem:[#allocation10 + $0x40] sm:$0xff] }
 0xf54   :  { %2142 = vadd.xlane.f32.xlu0 %v2141_v35 }
 0xfdd   :  { %v2139_v1 = vpop.xlane.xlu0 %2138 }
 0xfde   :  { %v2145_v2 = vmul.f32 0.015625, %v2139_v1 }
 0xfe0   :  { %v2147_v49 = vsub.f32 %v2135_v14, %v2145_v2  ;;  %v12608_v14 = vpack.c.bf16 %v8583_v18, %v8582_v16  ;;  %v12659_v16 = vpack.c.bf16 %v2213_v40, %v2212_v13  ;;  %v8598_v18 = vld [vmem:[%s13930_s21 + $0x1] ss:$0 sm:$0xff] }
 0xfe1   :  { %v2143_v51 = vpop.xlane.xlu0 %2142 }
 0xfe2   :  { %v2146_v52 = vmul.f32 0.015625, %v2143_v51  ;;  %v2149_v21 = vmul.f32 %v2147_v49, %v2147_v49  ;;  %10421 = vmatprep.subr.msk.bf16.mxu0 %vm12212_vm9, %v12608_v14 }
 0xfe3   :  { %10424 = vmatpush3.bf16.xpose.msk.msra.mxu0 %vm12212_vm9, %v12608_v14 }
 0xfe4   :  { %v2148_v25 = vsub.f32 %v2136_v31, %v2146_v52  ;;  %v2151_v20 = vsel %vm863_vm8, %v2149_v21, 0.0  ;;  %v2207_v31 = vld [vmem:[#allocation10 + $0x48] sm:$0xff]  ;;  %v8565_v52 = vld [vmem:[%s13940_s18] ss:$0 sm:$0xff] }
 0xfe5   :  { %2152 = vadd.xlane.f32.xlu0 %v2151_v20  ;;  %v12622_v35 = vpack.c.bf16 %v2207_v31, %v2206_v30  ;;  %v8566_v20 = vld [vmem:[%s13941_s8] ss:$0 sm:$0xff]  ;;  %v8587_v30 = vld [vmem:[%s13931_s29 + $0x1] ss:$0 sm:$0xff] }
 0xfe6   :  { %v2150_v28 = vmul.f32 %v2148_v25, %v2148_v25 }
 0xfe7   :  { %10427 = vmatprep.subr.msk.bf16.mxu1 %vm12212_vm9, %v12622_v35 }
 0xfe8   :  { %v2154_v55 = vsel %vm2140_vm11, %v2150_v28, 0.0 }
 0xfe9   :  { %2155 = vadd.xlane.f32.xlu1 %v2154_v55 }
0x1072   :  { %v2153_v39 = vpop.xlane.xlu0 %2152 }
0x1073   :  { %v2157_v41 = vmul.f32 0.015625, %v2153_v39 }
0x1075   :  { %v2159_v43 = vadd.f32 1e-05, %v2157_v41 }
0x1076   :  { %v2156_v48 = vpop.xlane.xlu1 %2155 }
0x1077   :  { %11379 = vrsqrt.f32 %v2159_v43  ;;  %v2158_v1 = vmul.f32 0.015625, %v2156_v48 }
0x1079   :  { %v2160_v2 = vadd.f32 1e-05, %v2158_v1 }
0x107b   :  { %11381 = vrsqrt.f32 %v2160_v2 }
0x1081   :  { %v11380_v51 = vpop.eup %11379 }
0x1082   :  { %v2163_v21 = vmul.f32 %v11380_v51, %v2147_v49  ;;  %v2210_v49 = vld [vmem:[#allocation10 + $0x60] sm:$0xff] }
0x1084   :  { %v2172_v28 = vmul.f32 %v8565_v52, %v2163_v21 }
0x1085   :  { %v11382_v55 = vpop.eup %11381 }
0x1086   :  { %v2164_v57 = vmul.f32 %v11382_v55, %v2148_v25  ;;  %v12629_v59 = vadd.f32 %v8566_v20, %v2172_v28  ;;  %v2211_v25 = vld [vmem:[#allocation10 + $0x68] sm:$0xff] }
0x1087   :  { %v12651_v9 = vpack.c.bf16 %v2211_v25, %v2210_v49 }
0x1088   :  { %9565 = vmatprep.mubr.msk.f32.mxu1 %vm863_vm8, %v12629_v59  ;;  %9584 = vmatprep.mubr.msk.f32.mxu0 %vm863_vm8, %v12629_v59  ;;  %v2173_v0 = vmul.f32 %v8565_v52, %v2164_v57 }
0x108a   :  { %v12635_v19 = vadd.f32 %v8566_v20, %v2173_v0  ;;  %v8609_v20 = vld [vmem:[%s13932_s20 + $0x1] ss:$0 sm:$0xff] }
0x108c   :  { %9566 = vmatmul.mubr.msk.f32.vlgmr.msra.gmra.mrb[16].mxu1 %vm863_vm8, %v12635_v19  ;;  %9585 = vmatmul.mubr.msk.f32.vlgmr.msra.gmra.mrb[12].mxu0 %vm863_vm8, %v12635_v19 }
0x108d   :  { %10430 = vmatpush3.bf16.xpose.msk.msra.mxu1 %vm12212_vm9, %v12622_v35  ;;  %9603 = vmatprep.mubr.msk.f32.mxu1 %vm863_vm8, %v12629_v59 }
0x108e   :  { %10433 = vmatprep.subr.msk.bf16.mxu1 %vm12212_vm9, %v12637_v8 }
0x1095   :  { %10436 = vmatpush3.bf16.xpose.msk.msra.mxu1 %vm12212_vm9, %v12637_v8 }
0x1096   :  { %10439 = vmatprep.subr.msk.bf16.mxu1 %vm12212_vm9, %v12651_v9 }
0x109d   :  { %10442 = vmatpush3.bf16.xpose.msk.msra.mxu1 %vm12212_vm9, %v12651_v9 }
0x109e   :  { %10445 = vmatprep.subr.msk.bf16.mxu1 %vm12212_vm9, %v12659_v16 }
0x10a5   :  { %10448 = vmatpush3.bf16.xpose.msk.msra.mxu1 %vm12212_vm9, %v12659_v16 }
0x10ac   :  { %9604 = vmatmul.mubr.msk.f32.vlgmr.msra.gmra.mrb[18].mxu1 %vm863_vm8, %v12635_v19 }
0x115f   :  { %v9567_v31 = vpop.f32.mrb[16].mxu1  ;;  %v9586_v39 = vpop.f32.mrb[12].mxu0 }
0x1160   :  { %v2440_v41 = vadd.f32 %v9586_v39, %v8598_v18  ;;  %v2329_v43 = vpop.f32.mrb[17].mxu1  ;;  %v2434_v48 = vpop.f32.mrb[13].mxu0  ;;  %v12684_v21 = vadd.f32 %v9567_v31, %v8587_v30 }
0x1161   :  { %v12674_v1 = vadd.f32 %v8587_v30, %v2329_v43  ;;  %v2435_v2 = vadd.f32 %v8598_v18, %v2434_v48 }
0x1163   :  { %9610 = vmatprep.mubr.msk.f32.mxu0 %vm383_vm1, %v12674_v1  ;;  %v10449_v51 = vpack.c.bf16 %v2440_v41, %v2435_v2  ;;  %v12678_v52 = vpack.i.bf16 %v2440_v41, %v2435_v2 }
0x1165   :  { %10451 = vmatprep.subr.msk.bf16.mxu0 %vm12151_vm2, %v10449_v51 }
0x1166   :  { %10454 = vmatpush3.bf16.xpose.msk.msra.mxu0 %vm12151_vm2, %v10449_v51 }
0x116d   :  { %9611 = vmatmul.mubr.msk.f32.vlgmr.msra.gmra.mrb[14].mxu0 %vm383_vm1, %v12684_v21 }
0x117f   :  { %v9605_v28 = vpop.f32.mrb[18].mxu1 }
0x1180   :  { %v2545_v55 = vadd.f32 %v9605_v28, %v8609_v20  ;;  %v2539_v57 = vpop.f32.mrb[19].mxu1 }
0x1181   :  { %v2540_v61 = vadd.f32 %v8609_v20, %v2539_v57 }
0x1183   :  { %v10455_v62 = vpack.c.bf16 %v2545_v55, %v2540_v61  ;;  %v12689_v0 = vpack.i.bf16 %v2545_v55, %v2540_v61 }
0x1185   :  { %10457 = vmatprep.subr.msk.bf16.mxu1 %vm12365_vm13, %v10455_v62 }
0x1186   :  { %10460 = vmatpush3.bf16.msk.msra.mxu1 %vm12365_vm13, %v10455_v62 }
0x1240   :  { %v9612_v49 = vpop.f32.mrb[14].mxu0 }
0x1241   :  { %v2636_v25 = vmul.f32 0.25, %v9612_v49  ;;  %v2626_v13 = vpop.f32.mrb[15].mxu0 }
0x1242   :  { %v2635_v40 = vmul.f32 0.25, %v2626_v13 }
0x1243   :  { %v2640_v18 = vsel %vm1272_vm14, %v2636_v25, -inf }
0x1244   :  { %2641 = vmax.xlane.f32.xlu1 %v2640_v18  ;;  %v2637_v30 = vsel %vm1268_vm15, %v2635_v40, -inf }
0x1245   :  { %2638 = vmax.xlane.f32.xlu0 %v2637_v30 }
0x12d1   :  { %v2642_v31 = vpop.xlane.xlu1 %2641 }
0x12d2   :  { %v2644_v39 = vsub.f32 %v2636_v25, %v2642_v31  ;;  %v2639_v41 = vpop.xlane.xlu0 %2638 }
0x12d3   :  { %v2643_v43 = vsub.f32 %v2635_v40, %v2639_v41 }
0x12d4   :  { %v2647_v48 = vmul.f32 1.442695, %v2644_v39 }
0x12d5   :  { %v2645_v2 = vmul.f32 1.442695, %v2643_v43 }
0x12d6   :  { %11383 = vpow2.f32 %v2647_v48 }
0x12d7   :  { %11385 = vpow2.f32 %v2645_v2 }
0x12e0   :  { %v11384_v51 = vpop.eup %11383 }
0x12e1   :  { %v11386_v20 = vpop.eup %11385  ;;  %v2652_v28 = vsel %vm1272_vm14, %v11384_v51, 0.0 }
0x12e2   :  { %2653 = vadd.xlane.f32.xlu1 %v2652_v28  ;;  %v2649_v55 = vsel %vm1268_vm15, %v11386_v20, 0.0 }
0x12e3   :  { %2650 = vadd.xlane.f32.xlu0 %v2649_v55 }
0x12f3   :  { %2743 = vrot.lane.b32.xlu1 %v12674_v1, %s11879_s4 }
0x12f7   :  { %2745 = vrot.lane.b32.xlu1 %v12684_v21, %s11879_s4 }
0x12f9   :  { %11194 = vrot.lane.b32.xlu0 %v12678_v52, %s11879_s4 }
0x136f   :  { %v2654_v57 = vpop.xlane.xlu1 %2653 }
0x1370   :  { %11387 = vrcp.f32 %v2654_v57  ;;  %v2651_v61 = vpop.xlane.xlu0 %2650 }
0x1371   :  { %11389 = vrcp.f32 %v2651_v61 }
0x1373   :  { %v2744_v39 = vpop.permute.xlu1 %2743 }
0x1374   :  { %v11195_v62 = vpop.permute.xlu0 %11194 }
0x1375   :  { %v11197_v49 = vunpack.i.h.bf16 %v11195_v62  ;;  %v11196_v25 = vunpack.i.l.bf16 %v11195_v62 }
0x1377   :  { %v10461_v13 = vpack.c.bf16 %v11197_v49, %v11196_v25  ;;  %v2746_v41 = vpop.permute.xlu1 %2745 }
0x1379   :  { %10463 = vmatprep.subr.msk.bf16.mxu1 %vm12151_vm2, %v10461_v13 }
0x137a   :  { %v11388_v40 = vpop.eup %11387 }
0x137b   :  { %v11390_v18 = vpop.eup %11389  ;;  %v2658_v31 = vmul.f32 %v11388_v40, %v11384_v51 }
0x137c   :  { %v2657_v30 = vmul.f32 %v11390_v18, %v11386_v20 }
0x137e   :  { %9617 = vmatprep.mubr.msk.f32.mxu1 %vm1268_vm15, %v2657_v30 }
0x137f   :  { %9618 = vmatmul.mubr.msk.f32.vlgmr.msra.gmra.mrb[20].mxu1 %vm1268_vm15, %v2658_v31 }
0x1380   :  { %10466 = vmatpush3.bf16.xpose.msk.msra.mxu1 %vm12151_vm2, %v10461_v13  ;;  %9624 = vmatprep.mubr.msk.f32.mxu1 %vm383_vm1, %v2744_v39 }
0x1387   :  { %9625 = vmatmul.mubr.msk.f32.vlgmr.msra.gmra.mrb[22].mxu1 %vm383_vm1, %v2746_v41 }
0x1452   :  { %v12713_v43 = vpop.f32.mrb[20].mxu1 }
0x1453   :  { %v12715_v48 = vpop.f32.mrb[21].mxu1 }
0x145a   :  { %v9626_v2 = vpop.f32.mrb[22].mxu1 }
0x145b   :  { %v2835_v20 = vmul.f32 0.25, %v9626_v2  ;;  %v2825_v51 = vpop.f32.mrb[23].mxu1 }
0x145c   :  { %v2834_v28 = vmul.f32 0.25, %v2825_v51 }
0x145d   :  { %v2839_v55 = vsel %vm1272_vm14, %v2835_v20, -inf }
0x145e   :  { %2840 = vmax.xlane.f32.xlu0 %v2839_v55  ;;  %v2836_v57 = vsel %vm1268_vm15, %v2834_v28, -inf }
0x145f   :  { %2837 = vmax.xlane.f32.xlu1 %v2836_v57 }
0x1470   :  { %11199 = vrot.lane.b32.xlu1 %v12689_v0, %s11879_s4 }
0x1474   :  { %2947 = vrot.lane.b32.xlu1 %v12674_v1, %s11880_s3 }
0x1478   :  { %2949 = vrot.lane.b32.xlu1 %v12684_v21, %s11880_s3 }
0x14eb   :  { %v2841_v61 = vpop.xlane.xlu0 %2840 }
0x14ec   :  { %v2843_v62 = vsub.f32 %v2835_v20, %v2841_v61  ;;  %v2838_v49 = vpop.xlane.xlu1 %2837 }
0x14ed   :  { %v2842_v25 = vsub.f32 %v2834_v28, %v2838_v49 }
0x14ee   :  { %v2846_v13 = vmul.f32 1.442695, %v2843_v62 }
0x14ef   :  { %v2844_v40 = vmul.f32 1.442695, %v2842_v25 }
0x14f0   :  { %11391 = vpow2.f32 %v2846_v13  ;;  %v11200_v18 = vpop.permute.xlu1 %11199 }
0x14f1   :  { %v11202_v30 = vunpack.i.h.bf16 %v11200_v18  ;;  %v11201_v31 = vunpack.i.l.bf16 %v11200_v18  ;;  %11393 = vpow2.f32 %v2844_v40 }
0x14f3   :  { %v10467_v39 = vpack.c.bf16 %v11202_v30, %v11201_v31 }
0x14f4   :  { %v2948_v30 = vpop.permute.xlu1 %2947 }
0x14f5   :  { %10469 = vmatprep.subr.msk.bf16.mxu0 %vm12365_vm13, %v10467_v39 }
0x14f6   :  { %10472 = vmatpush3.bf16.msk.msra.mxu0 %vm12365_vm13, %v10467_v39 }
0x14f8   :  { %v2950_v31 = vpop.permute.xlu1 %2949 }
0x14fa   :  { %v11392_v41 = vpop.eup %11391 }
0x14fb   :  { %v2851_v2 = vsel %vm1272_vm14, %v11392_v41, 0.0  ;;  %v11394_v20 = vpop.eup %11393 }
0x14fc   :  { %2852 = vadd.xlane.f32.xlu0 %v2851_v2  ;;  %v2848_v51 = vsel %vm1268_vm15, %v11394_v20, 0.0 }
0x1500   :  { %2849 = vadd.xlane.f32.xlu0 %v2848_v51 }
0x1516   :  { %11204 = vrot.lane.b32.xlu0 %v12678_v52, %s11880_s3 }
0x1589   :  { %v2853_v28 = vpop.xlane.xlu0 %2852 }
0x158a   :  { %11395 = vrcp.f32 %v2853_v28 }
0x158d   :  { %v2850_v55 = vpop.xlane.xlu0 %2849 }
0x158e   :  { %11397 = vrcp.f32 %v2850_v55 }
0x1591   :  { %v11205_v57 = vpop.permute.xlu0 %11204 }
0x1592   :  { %v11207_v61 = vunpack.i.h.bf16 %v11205_v57  ;;  %v11206_v62 = vunpack.i.l.bf16 %v11205_v57 }
0x1594   :  { %v10473_v49 = vpack.c.bf16 %v11207_v61, %v11206_v62  ;;  %v11396_v25 = vpop.eup %11395 }
0x1595   :  { %v2857_v18 = vmul.f32 %v11396_v25, %v11392_v41 }
0x1596   :  { %10475 = vmatprep.subr.msk.bf16.mxu0 %vm12151_vm2, %v10473_v49 }
0x1598   :  { %v11398_v13 = vpop.eup %11397 }
0x1599   :  { %v2856_v40 = vmul.f32 %v11398_v13, %v11394_v20 }
0x159b   :  { %9631 = vmatprep.mubr.msk.f32.mxu0 %vm1268_vm15, %v2856_v40 }
0x159c   :  { %9632 = vmatmul.mubr.msk.f32.vlgmr.msra.gmra.mrb[16].mxu0 %vm1268_vm15, %v2857_v18 }
0x159d   :  { %10478 = vmatpush3.bf16.xpose.msk.msra.mxu0 %vm12151_vm2, %v10473_v49  ;;  %9638 = vmatprep.mubr.msk.f32.mxu0 %vm383_vm1, %v2948_v30 }
0x15a4   :  { %9639 = vmatmul.mubr.msk.f32.vlgmr.msra.gmra.mrb[18].mxu0 %vm383_vm1, %v2950_v31 }
0x166f   :  { %v12741_v39 = vpop.f32.mrb[16].mxu0 }
0x1670   :  { %v12743_v2 = vpop.f32.mrb[17].mxu0 }
0x1677   :  { %v9640_v51 = vpop.f32.mrb[18].mxu0 }
0x1678   :  { %v3039_v20 = vmul.f32 0.25, %v9640_v51  ;;  %v3029_v41 = vpop.f32.mrb[19].mxu0 }
0x1679   :  { %v3038_v28 = vmul.f32 0.25, %v3029_v41 }
0x167a   :  { %v3043_v55 = vsel %vm1272_vm14, %v3039_v20, -inf }
0x167b   :  { %3044 = vmax.xlane.f32.xlu0 %v3043_v55  ;;  %v3040_v57 = vsel %vm1268_vm15, %v3038_v28, -inf }
0x167c   :  { %3041 = vmax.xlane.f32.xlu1 %v3040_v57 }
0x168d   :  { %11209 = vrot.lane.b32.xlu1 %v12689_v0, %s11880_s3 }
0x1691   :  { %3150 = vrot.lane.b32.xlu1 %v12674_v1, %s11881_s23 }
0x1695   :  { %3152 = vrot.lane.b32.xlu1 %v12684_v21, %s11881_s23 }
0x1708   :  { %v3045_v61 = vpop.xlane.xlu0 %3044 }
0x1709   :  { %v3047_v62 = vsub.f32 %v3039_v20, %v3045_v61  ;;  %v3042_v49 = vpop.xlane.xlu1 %3041 }
0x170a   :  { %v3046_v25 = vsub.f32 %v3038_v28, %v3042_v49 }
0x170b   :  { %v3050_v13 = vmul.f32 1.442695, %v3047_v62 }
0x170c   :  { %v3048_v40 = vmul.f32 1.442695, %v3046_v25 }
0x170d   :  { %11399 = vpow2.f32 %v3050_v13  ;;  %v11210_v18 = vpop.permute.xlu1 %11209 }
0x170e   :  { %v11212_v30 = vunpack.i.h.bf16 %v11210_v18  ;;  %v11211_v31 = vunpack.i.l.bf16 %v11210_v18  ;;  %11401 = vpow2.f32 %v3048_v40 }
0x1710   :  { %v10479_v51 = vpack.c.bf16 %v11212_v30, %v11211_v31 }
0x1711   :  { %v3151_v30 = vpop.permute.xlu1 %3150 }
0x1712   :  { %10481 = vmatprep.subr.msk.bf16.mxu1 %vm12365_vm13, %v10479_v51 }
0x1713   :  { %10484 = vmatpush3.bf16.msk.msra.mxu1 %vm12365_vm13, %v10479_v51 }
0x1717   :  { %v11400_v1 = vpop.eup %11399 }
0x1718   :  { %v3055_v21 = vsel %vm1272_vm14, %v11400_v1, 0.0  ;;  %v11402_v20 = vpop.eup %11401 }
0x1719   :  { %3056 = vadd.xlane.f32.xlu0 %v3055_v21  ;;  %v3052_v41 = vsel %vm1268_vm15, %v11402_v20, 0.0 }
0x171d   :  { %3053 = vadd.xlane.f32.xlu0 %v3052_v41 }
0x1733   :  { %11214 = vrot.lane.b32.xlu0 %v12678_v52, %s11881_s23  ;;  %v3153_v52 = vpop.permute.xlu1 %3152 }
0x17a6   :  { %v3057_v28 = vpop.xlane.xlu0 %3056 }
0x17a7   :  { %11403 = vrcp.f32 %v3057_v28 }
0x17aa   :  { %v3054_v55 = vpop.xlane.xlu0 %3053 }
0x17ab   :  { %11405 = vrcp.f32 %v3054_v55 }
0x17ae   :  { %v11215_v57 = vpop.permute.xlu0 %11214 }
0x17af   :  { %v11217_v61 = vunpack.i.h.bf16 %v11215_v57  ;;  %v11216_v62 = vunpack.i.l.bf16 %v11215_v57  ;;  %v8488_v57 = vld [vmem:[%s13936_s7 + $0x1] ss:$0 sm:$0xff] }
0x17b1   :  { %v10485_v49 = vpack.c.bf16 %v11217_v61, %v11216_v62  ;;  %v11404_v25 = vpop.eup %11403  ;;  %v8490_v61 = vld [vmem:[%s13937_s11 + $0x1] ss:$0 sm:$0xff] }
0x17b2   :  { %v3061_v18 = vmul.f32 %v11404_v25, %v11400_v1 }
0x17b3   :  { %10487 = vmatprep.subr.msk.bf16.mxu1 %vm12151_vm2, %v10485_v49 }
0x17b5   :  { %v11406_v13 = vpop.eup %11405 }
0x17b6   :  { %v3060_v40 = vmul.f32 %v11406_v13, %v11402_v20 }
0x17b8   :  { %9645 = vmatprep.mubr.msk.f32.mxu1 %vm1268_vm15, %v3060_v40 }
0x17b9   :  { %9646 = vmatmul.mubr.msk.f32.vlgmr.msra.gmra.mrb[24].mxu1 %vm1268_vm15, %v3061_v18 }
0x17ba   :  { %10490 = vmatpush3.bf16.xpose.msk.msra.mxu1 %vm12151_vm2, %v10485_v49  ;;  %9652 = vmatprep.mubr.msk.f32.mxu1 %vm383_vm1, %v3151_v30 }
0x17c1   :  { %9653 = vmatmul.mubr.msk.f32.vlgmr.msra.gmra.mrb[26].mxu1 %vm383_vm1, %v3153_v52 }
0x188c   :  { %v9647_v31 = vpop.f32.mrb[24].mxu1 }
0x188d   :  { %v3141_v51 = vpop.f32.mrb[25].mxu1 }
0x1894   :  { %v9654_v21 = vpop.f32.mrb[26].mxu1 }
0x1895   :  { %v3242_v20 = vmul.f32 0.25, %v9654_v21  ;;  %v3232_v1 = vpop.f32.mrb[27].mxu1 }
0x1896   :  { %v3241_v41 = vmul.f32 0.25, %v3232_v1  ;;  %v8486_v1 = vld [vmem:[%s13935_s2 + $0x18] sm:$0xff] }
0x1897   :  { %v3246_v28 = vsel %vm1272_vm14, %v3242_v20, -inf }
0x1898   :  { %3247 = vmax.xlane.f32.xlu0 %v3246_v28  ;;  %v3243_v55 = vsel %vm1268_vm15, %v3241_v41, -inf  ;;  %v701_v28 = vmul.f32 %v8486_v1, %v12127_v12 }
0x1899   :  { %3244 = vmax.xlane.f32.xlu1 %v3243_v55 }
0x18aa   :  { %11219 = vrot.lane.b32.xlu1 %v12689_v0, %s11881_s23 }
0x18ae   :  { %724 = vbcast.lane.b32.xlu1 %v8488_v57, 256 }
0x18b2   :  { %748 = vbcast.lane.b32.xlu1 %v8490_v61, 256 }
0x18b6   :  { %752 = vbcast.lane.b32.xlu1 %v8490_v61, 264  ;;  %v707_v61 = vsel %vm287_vm0, %v701_v28, 0.0  ;;  %v2224_v28 = vld [vmem:[#allocation11 + $0x78] sm:$0xff] }
0x18ba   :  { %3355 = vrot.lane.b32.xlu1 %v12743_v2, %s11882_s10 }
0x18be   :  { %3357 = vrot.lane.b32.xlu1 %v12741_v39, %s11882_s10 }
0x18c2   :  { %3363 = vrot.lane.b32.xlu1 %v3141_v51, %s11883_s27 }
0x18c6   :  { %3365 = vrot.lane.b32.xlu1 %v9647_v31, %s11883_s27 }
0x1925   :  { %v3248_v62 = vpop.xlane.xlu0 %3247 }
0x1926   :  { %v3250_v49 = vsub.f32 %v3242_v20, %v3248_v62  ;;  %v3245_v25 = vpop.xlane.xlu1 %3244  ;;  %v8485_v20 = vld [vmem:[%s13935_s2 + $0x10] sm:$0xff] }
0x1927   :  { %v3249_v13 = vsub.f32 %v3241_v41, %v3245_v25  ;;  %v700_v41 = vmul.f32 %v8485_v20, %v12127_v12  ;;  %v702_v62 = vmul.f32 %v8485_v20, %v12133_v17  ;;  %v703_v25 = vmul.f32 %v8486_v1, %v12133_v17  ;;  %v2219_v17 = vld [vmem:[#allocation11 + $0x50] sm:$0xff]  ;;  %v2220_v20 = vld [vmem:[#allocation11 + $0x58] sm:$0xff] }
0x1928   :  { %v3253_v0 = vmul.f32 1.442695, %v3250_v49  ;;  %v12801_v1 = vpack.c.bf16 %v2220_v20, %v2219_v17 }
0x1929   :  { %v3251_v40 = vmul.f32 1.442695, %v3249_v13  ;;  %v704_v55 = vsel %vm287_vm0, %v700_v41, 0.0  ;;  %v710_v49 = vsel %vm287_vm0, %v702_v62, 0.0  ;;  %v713_v13 = vsel %vm287_vm0, %v703_v25, 0.0  ;;  %v2223_v41 = vld [vmem:[#allocation11 + $0x70] sm:$0xff] }
0x192a   :  { %v11220_v18 = vpop.permute.xlu1 %11219 }
0x192b   :  { %11407 = vpow2.f32 %v3251_v40  ;;  %v11222_v30 = vunpack.i.h.bf16 %v11220_v18  ;;  %v11221_v52 = vunpack.i.l.bf16 %v11220_v18 }
0x192c   :  { %11409 = vpow2.f32 %v3253_v0 }
0x192d   :  { %v10491_v2 = vpack.c.bf16 %v11222_v30, %v11221_v52 }
0x192f   :  { %10493 = vmatprep.subr.msk.bf16.mxu0 %vm12365_vm13, %v10491_v2 }
0x1930   :  { %10496 = vmatpush3.bf16.msk.msra.mxu0 %vm12365_vm13, %v10491_v2  ;;  %v2217_v2 = vld [vmem:[#allocation11 + $0x40] sm:$0xff] }
0x1935   :  { %v11408_v39 = vpop.eup %11407 }
0x1936   :  { %v3255_v31 = vsel %vm1268_vm15, %v11408_v39, 0.0  ;;  %v11410_v51 = vpop.eup %11409 }
0x1937   :  { %3256 = vadd.xlane.f32.xlu0 %v3255_v31  ;;  %v3258_v21 = vsel %vm1272_vm14, %v11410_v51, 0.0  ;;  %v2218_v31 = vld [vmem:[#allocation11 + $0x48] sm:$0xff] }
0x193b   :  { %3259 = vadd.xlane.f32.xlu0 %v3258_v21  ;;  %v12799_v21 = vpack.c.bf16 %v2218_v31, %v2217_v2 }
0x193d   :  { %10499 = vmatprep.subr.msk.bf16.mxu0 %vm12212_vm9, %v12799_v21 }
0x193f   :  { %705 = vadd.xlane.f32.xlu0 %v704_v55  ;;  %v12820_v55 = vpack.c.bf16 %v2224_v28, %v2223_v41 }
0x1941   :  { %13942 = vst [vmem:[#allocation41_spill] sm:$0xff] %v12820_v55 }
0x1943   :  { %708 = vadd.xlane.f32.xlu0 %v707_v61 }
0x1947   :  { %711 = vadd.xlane.f32.xlu0 %v710_v49 }
0x194b   :  { %714 = vadd.xlane.f32.xlu0 %v713_v13  ;;  %v725_v13 = vpop.permute.xlu1 %724 }
0x1961   :  { %728 = vbcast.lane.b32.xlu0 %v8488_v57, 264  ;;  %v2221_v57 = vld [vmem:[#allocation11 + $0x60] sm:$0xff] }
0x19c4   :  { %v3257_v0 = vpop.xlane.xlu0 %3256 }
0x19c5   :  { %11411 = vrcp.f32 %v3257_v0 }
0x19c8   :  { %v3260_v12 = vpop.xlane.xlu0 %3259 }
0x19c9   :  { %11413 = vrcp.f32 %v3260_v12 }
0x19cc   :  { %v706_v61 = vpop.xlane.xlu0 %705 }
0x19cf   :  { %v11412_v40 = vpop.eup %11411 }
0x19d0   :  { %v3263_v18 = vmul.f32 %v11412_v40, %v11408_v39  ;;  %v2222_v39 = vld [vmem:[#allocation11 + $0x68] sm:$0xff]  ;;  %v709_v62 = vpop.xlane.xlu0 %708  ;;  %v749_v40 = vpop.permute.xlu1 %748 }
0x19d2   :  { %9659 = vmatprep.mubr.msk.f32.mxu0 %vm1268_vm15, %v3263_v18  ;;  %v732_v18 = vadd.f32 %v725_v13, %v706_v61 }
0x19d3   :  { %v11414_v30 = vpop.eup %11413 }
0x19d4   :  { %v3264_v52 = vmul.f32 %v11414_v30, %v11410_v51  ;;  %v12812_v51 = vpack.c.bf16 %v2222_v39, %v2221_v57  ;;  %v712_v49 = vpop.xlane.xlu0 %711  ;;  %v736_v2 = vmax.f32 %v732_v18, 0.0  ;;  %v753_v57 = vpop.permute.xlu1 %752 }
0x19d5   :  { %v734_v31 = vadd.f32 %v725_v13, %v712_v49 }
0x19d6   :  { %9660 = vmatmul.mubr.msk.f32.vlgmr.msra.gmra.mrb[20].mxu0 %vm1268_vm15, %v3264_v52  ;;  %v756_v28 = vmul.f32 %v749_v40, %v736_v2 }
0x19d7   :  { %10502 = vmatpush3.bf16.xpose.msk.msra.mxu0 %vm12212_vm9, %v12799_v21  ;;  %v738_v26 = vmax.f32 %v734_v31, 0.0 }
0x19d8   :  { %10505 = vmatprep.subr.msk.bf16.mxu0 %vm12212_vm9, %v12801_v1  ;;  %v715_v25 = vpop.xlane.xlu0 %714  ;;  %v3356_v61 = vpop.permute.xlu1 %3355 }
0x19dc   :  { %v729_v0 = vpop.permute.xlu0 %728 }
0x19dd   :  { %v733_v12 = vadd.f32 %v729_v0, %v709_v62  ;;  %v735_v30 = vadd.f32 %v729_v0, %v715_v25  ;;  %v3358_v25 = vpop.permute.xlu1 %3357  ;;  %v3377_v0 = vsel %vm383_vm1, %v12715_v48, %v3356_v61 }
0x19de   :  { %v3378_v18 = vsel %vm383_vm1, %v12713_v43, %v3358_v25  ;;  %v8492_v25 = vld [vmem:[%s13938_s15 + $0x1] ss:$0 sm:$0xff] }
0x19df   :  { %10508 = vmatpush3.bf16.xpose.msk.msra.mxu0 %vm12212_vm9, %v12801_v1  ;;  %v737_v52 = vmax.f32 %v733_v12, 0.0  ;;  %v739_v39 = vmax.f32 %v735_v30, 0.0 }
0x19e0   :  { %10511 = vmatprep.subr.msk.bf16.mxu0 %vm12212_vm9, %v12812_v51 }
0x19e1   :  { %v757_v41 = vmul.f32 %v753_v57, %v737_v52  ;;  %v759_v62 = vmul.f32 %v753_v57, %v739_v39  ;;  %v3364_v49 = vpop.permute.xlu1 %3363 }
0x19e2   :  { %v3379_v30 = vsel %vm484_vm5, %v3377_v0, %v3364_v49 }
0x19e5   :  { %v3366_v13 = vpop.permute.xlu1 %3365 }
0x19e6   :  { %v3380_v2 = vsel %vm484_vm5, %v3378_v18, %v3366_v13 }
0x19e7   :  { %10514 = vmatpush3.bf16.xpose.msk.msra.mxu0 %vm12212_vm9, %v12812_v51 }
0x19e8   :  { %10517 = vmatprep.subr.msk.bf16.mxu0 %vm12212_vm9, %v12820_v55 }
0x19ef   :  { %10520 = vmatpush3.bf16.xpose.msk.msra.mxu0 %vm12212_vm9, %v12820_v55  ;;  %v758_v55 = vmul.f32 %v749_v40, %v738_v26 }
0x1aa9   :  { %v9661_v17 = vpop.f32.mrb[20].mxu0 }
0x1aaa   :  { %3373 = vrot.lane.b32.xlu1 %v9661_v17, %s11884_s17  ;;  %v3344_v20 = vpop.f32.mrb[21].mxu0 }
0x1aab   :  { %3371 = vrot.lane.b32.xlu0 %v3344_v20, %s11884_s17 }
0x1aae   :  { %768 = vperm.xlu1 %11162, %v757_v41  }
0x1aaf   :  { %765 = vperm.xlu0 %11161, %v756_v28  }
0x1ab2   :  { %774 = vperm.xlu1 %11162, %v759_v62  }
0x1ab3   :  { %771 = vperm.xlu0 %11161, %v758_v55  }
0x1b1c   :  { %v3374_v12 = vpop.permute.xlu1 %3373 }
0x1b1d   :  { %v3372_v52 = vpop.permute.xlu0 %3371  ;;  %v3382_v55 = vsel %vm2015_vm3, %v3380_v2, %v3374_v12 }
0x1b1e   :  { %v3381_v26 = vsel %vm2015_vm3, %v3379_v30, %v3372_v52  ;;  %v6018_v30 = vrot.slane %v12532_v5, 1 }
0x1b1f   :  { %9678 = vmatprep.mubr.msk.f32.mxu0 %vm863_vm8, %v3381_v26 }
0x1b20   :  { %9679 = vmatmul.mubr.msk.f32.vlgmr.msra.gmra.mrb[22].mxu0 %vm863_vm8, %v3382_v55  ;;  %v8648_v55 = vld [vmem:[%s13939_s9 + $0x1] ss:$0 sm:$0xff] }
0x1b2d   :  { %v769_v40 = vpop.permute.xlu1 %768 }
0x1b2e   :  { %v766_v48 = vpop.permute.xlu0 %765  ;;  %v783_v31 = vrot.slane %v769_v40, %v12166_v54 }
0x1b2f   :  { %v779_v43 = vrot.slane %v766_v48, %v12169_v56 }
0x1b31   :  { %v775_v17 = vpop.permute.xlu1 %774  ;;  %v784_v41 = vsel %vm370_vm4, %v783_v31, %v779_v43 }
0x1b32   :  { %v792_v20 = vrot.slane %v775_v17, %v12166_v54  ;;  %v772_v57 = vpop.permute.xlu0 %771 }
0x1b33   :  { %v788_v39 = vrot.slane %v772_v57, %v12169_v56 }
0x1b35   :  { %v793_v28 = vsel %vm370_vm4, %v792_v20, %v788_v39 }
0x1b36   :  { %v794_v62 = vsel %vm381_vm6, %v793_v28, %v784_v41  ;;  %v3548_v41 = vld [vmem:[%s13943_s14] sm:$0xff]  ;;  %v3549_v28 = vld [vmem:[%s13943_s14 + $0x8] sm:$0xff] }
0x1b37   :  { %v796_v61 = vsel %vm680_vm7, %v794_v62, 0.0  ;;  %v3557_v62 = vld [vmem:[#allocation13] sm:$0xff] }
0x1b38   :  { %797 = vadd.xlane.f32.xlu0 %v796_v61  ;;  %v12860_v61 = vpack.c.bf16 %v3549_v28, %v3548_v41  ;;  %v3554_v41 = vld [vmem:[%s13943_s14 + $0x30] sm:$0xff]  ;;  %v3555_v28 = vld [vmem:[%s13943_s14 + $0x38] sm:$0xff] }
0x1b3a   :  { %10523 = vmatprep.subr.msk.bf16.mxu1 %vm12212_vm9, %v12860_v61 }
0x1b3b   :  { %10526 = vmatpush3.bf16.xpose.msk.msra.mxu1 %vm12212_vm9, %v12860_v61 }
0x1bc5   :  { %v798_v49 = vpop.xlane.xlu0 %797 }
0x1bc6   :  { %v807_v13 = vadd.f32 %v8492_v25, %v798_v49  ;;  %v3558_v25 = vld [vmem:[#allocation13 + $0x8] sm:$0xff] }
0x1bc7   :  { %v12862_v49 = vpack.c.bf16 %v3558_v25, %v3557_v62  ;;  %v12916_v62 = vpack.c.bf16 %v3555_v28, %v3554_v41  ;;  %v3563_v25 = vld [vmem:[#allocation13 + $0x30] sm:$0xff] }
0x1bc8   :  { %v808_v0 = vsub.f32 0.0, %v807_v13 }
0x1bc9   :  { %10547 = vmatprep.subr.msk.bf16.mxu0 %vm12212_vm9, %v12862_v49 }
0x1bca   :  { %v809_v12 = vmul.f32 1.442695, %v808_v0  ;;  %10550 = vmatpush3.bf16.xpose.msk.msra.mxu0 %vm12212_vm9, %v12862_v49 }
0x1bcc   :  { %11415 = vpow2.f32 %v809_v12 }
0x1bd6   :  { %v11416_v54 = vpop.eup %11415 }
0x1bd7   :  { %v811_v18 = vadd.f32 1.0, %v11416_v54 }
0x1bd9   :  { %11417 = vrcp.f32 %v811_v18 }
0x1be3   :  { %v11418_v56 = vpop.eup %11417 }
0x1be4   :  { %11099 = vpush %v11418_v56  ;;  %v7203_v52 = vrot.slane %v11418_v56, 1 }
0x1be5   :  { %11101 = vpush %v6018_v30 }
0x1be6   :  { %11103 = vpush %v7203_v52 }
0x1bf3   :  { %v9680_v2 = vpop.f32.mrb[22].mxu0 }
0x1bf4   :  { %v3485_v26 = vpop.f32.mrb[23].mxu0  ;;  %v3491_v40 = vadd.f32 %v9680_v2, %v8648_v55  ;;  %v3550_v2 = vld [vmem:[%s13943_s14 + $0x10] sm:$0xff] }
0x1bf5   :  { %v3486_v48 = vadd.f32 %v8648_v55, %v3485_v26  ;;  %v3551_v26 = vld [vmem:[%s13943_s14 + $0x18] sm:$0xff] }
0x1bf6   :  { %v12880_v55 = vpack.c.bf16 %v3551_v26, %v3550_v2 }
0x1bf8   :  { %10529 = vmatprep.subr.msk.bf16.mxu1 %vm12212_vm9, %v12880_v55 }
0x1bf9   :  { %10532 = vmatpush3.bf16.xpose.msk.msra.mxu1 %vm12212_vm9, %v12880_v55 }
0x1c15   :  { %s11100_s22 = spop %11099 }
0x1c16   :  { %v3496_v31 = vstv %s11100_s22  ;;  %s11102_s28 = spop %11101 }
0x1c17   :  { %v3498_v43 = vmul.f32 %v3496_v31, %v3486_v48  ;;  %v3499_v17 = vmul.f32 %v3496_v31, %v3491_v40  ;;  %v3559_v40 = vld [vmem:[#allocation13 + $0x10] sm:$0xff]  ;;  %v3560_v48 = vld [vmem:[#allocation13 + $0x18] sm:$0xff]  ;;  %s11104_s19 = spop %11103 }
0x1c18   :  { %v12882_v31 = vpack.c.bf16 %v3560_v48, %v3559_v40 }
0x1c19   :  { %v3500_v20 = vadd.f32 %v3498_v43, %v12629_v59  ;;  %v3501_v57 = vadd.f32 %v3499_v17, %v12635_v19  ;;  %v3552_v43 = vld [vmem:[%s13943_s14 + $0x20] sm:$0xff]  ;;  %v3553_v17 = vld [vmem:[%s13943_s14 + $0x28] sm:$0xff] }
0x1c1a   :  { %10553 = vmatprep.subr.msk.bf16.mxu0 %vm12212_vm9, %v12882_v31 }
0x1c1b   :  { %v3505_v5 = vsel %vm2140_vm11, %v3501_v57, 0.0  ;;  %v3502_v39 = vsel %vm863_vm8, %v3500_v20, 0.0  ;;  %10556 = vmatpush3.bf16.xpose.msk.msra.mxu0 %vm12212_vm9, %v12882_v31 }
0x1c1c   :  { %3506 = vadd.xlane.f32.xlu0 %v3505_v5  ;;  %3503 = vadd.xlane.f32.xlu1 %v3502_v39  ;;  %v3562_v5 = vld [vmem:[#allocation13 + $0x28] sm:$0xff] }
0x1ca9   :  { %v3507_v59 = vpop.xlane.xlu0 %3506  ;;  %v3504_v19 = vpop.xlane.xlu1 %3503 }
0x1caa   :  { %v3509_v13 = vmul.f32 0.015625, %v3507_v59  ;;  %v3508_v0 = vmul.f32 0.015625, %v3504_v19  ;;  %v3564_v59 = vld [vmem:[#allocation13 + $0x38] sm:$0xff] }
0x1cab   :  { %v12918_v19 = vpack.c.bf16 %v3564_v59, %v3563_v25  ;;  %v3568_v59 = vld [vmem:[#allocation14 + $0x10] sm:$0xff] }
0x1cac   :  { %v3511_v12 = vsub.f32 %v3501_v57, %v3509_v13  ;;  %v3510_v54 = vsub.f32 %v3500_v20, %v3508_v0  ;;  %v12898_v20 = vpack.c.bf16 %v3553_v17, %v3552_v43  ;;  %v3561_v57 = vld [vmem:[#allocation13 + $0x20] sm:$0xff]  ;;  %v3567_v0 = vld [vmem:[#allocation14 + $0x8] sm:$0xff]  ;;  %v8660_v43 = vld [vmem:[%s13940_s18 + $0x1] ss:$0 sm:$0xff] }
0x1cad   :  { %v12900_v39 = vpack.c.bf16 %v3562_v5, %v3561_v57  ;;  %13944 = vst [vmem:[#allocation42_spill] sm:$0xff] %v12918_v19  ;;  %v3566_v13 = vld [vmem:[#allocation14] sm:$0xff]  ;;  %v8662_v57 = vld [vmem:[%s13941_s8 + $0x1] ss:$0 sm:$0xff] }
0x1cae   :  { %v3512_v18 = vmul.f32 %v3510_v54, %v3510_v54  ;;  %v3513_v30 = vmul.f32 %v3511_v12, %v3511_v12  ;;  %10535 = vmatprep.subr.msk.bf16.mxu1 %vm12212_vm9, %v12898_v20 }
0x1caf   :  { %10538 = vmatpush3.bf16.xpose.msk.msra.mxu1 %vm12212_vm9, %v12898_v20  ;;  %10559 = vmatprep.subr.msk.bf16.mxu0 %vm12212_vm9, %v12900_v39 }
0x1cb0   :  { %v3514_v56 = vsel %vm863_vm8, %v3512_v18, 0.0  ;;  %v3517_v52 = vsel %vm2140_vm11, %v3513_v30, 0.0  ;;  %10562 = vmatpush3.bf16.xpose.msk.msra.mxu0 %vm12212_vm9, %v12900_v39  ;;  %10541 = vmatprep.subr.msk.bf16.mxu1 %vm12212_vm9, %v12916_v62  ;;  %v12932_v18 = vpack.c.bf16 %v3567_v0, %v3566_v13  ;;  %v3569_v13 = vld [vmem:[#allocation14 + $0x18] sm:$0xff] }
0x1cb1   :  { %3515 = vadd.xlane.f32.xlu0 %v3514_v56  ;;  %10565 = vmatprep.subr.msk.bf16.mxu0 %vm12212_vm9, %v12918_v19 }
0x1cb5   :  { %3518 = vadd.xlane.f32.xlu0 %v3517_v52 }
0x1cb7   :  { %10544 = vmatpush3.bf16.xpose.msk.msra.mxu1 %vm12212_vm9, %v12916_v62 }
0x1cb8   :  { %10568 = vmatpush3.bf16.xpose.msk.msra.mxu0 %vm12212_vm9, %v12918_v19  ;;  %10571 = vmatprep.subr.msk.bf16.mxu1 %vm12212_vm9, %v12932_v18 }
0x1d3e   :  { %v3516_v56 = vpop.xlane.xlu0 %3515 }
0x1d3f   :  { %v3520_v30 = vmul.f32 0.015625, %v3516_v56 }
0x1d41   :  { %v3522_v52 = vadd.f32 1e-05, %v3520_v30  ;;  %v12941_v30 = vpack.c.bf16 %v3569_v13, %v3568_v59 }
0x1d42   :  { %v3519_v2 = vpop.xlane.xlu0 %3518 }
0x1d43   :  { %11419 = vrsqrt.f32 %v3522_v52  ;;  %v3521_v26 = vmul.f32 0.015625, %v3519_v2  ;;  %13945 = vst [vmem:[#allocation43_spill] sm:$0xff] %v12941_v30  ;;  %v3572_v2 = vld [vmem:[#allocation14 + $0x30] sm:$0xff] }
0x1d45   :  { %v3523_v40 = vadd.f32 1e-05, %v3521_v26  ;;  %v3573_v26 = vld [vmem:[#allocation14 + $0x38] sm:$0xff] }
0x1d47   :  { %11421 = vrsqrt.f32 %v3523_v40  ;;  %v12960_v40 = vpack.c.bf16 %v3573_v26, %v3572_v2 }
0x1d49   :  { %13949 = vst [vmem:[#allocation45_spill] sm:$0xff] %v12960_v40 }
0x1d4d   :  { %v11420_v48 = vpop.eup %11419 }
0x1d4e   :  { %v3526_v17 = vmul.f32 %v11420_v48, %v3510_v54  ;;  %v3571_v54 = vld [vmem:[#allocation14 + $0x28] sm:$0xff]  ;;  %v8674_v48 = vld [vmem:[%s13946_s26] ss:$0 sm:$0xff] }
0x1d50   :  { %v3536_v5 = vmul.f32 %v8660_v43, %v3526_v17 }
0x1d51   :  { %v11422_v41 = vpop.eup %11421 }
0x1d52   :  { %v3527_v28 = vmul.f32 %v11422_v41, %v3511_v12  ;;  %v3546_v25 = vadd.f32 %v8662_v57, %v3536_v5  ;;  %v3570_v12 = vld [vmem:[#allocation14 + $0x20] sm:$0xff] }
0x1d53   :  { %v12952_v52 = vpack.c.bf16 %v3571_v54, %v3570_v12  ;;  %v8685_v12 = vld [vmem:[%s12035_s6] ss:$0 sm:$0xff] }
0x1d54   :  { %9697 = vmatprep.mubr.msk.f32.mxu1 %vm863_vm8, %v3546_v25  ;;  %9716 = vmatprep.mubr.msk.f32.mxu0 %vm863_vm8, %v3546_v25  ;;  %v3537_v0 = vmul.f32 %v8660_v43, %v3527_v28  ;;  %v8663_v43 = vld [vmem:[%s13947_s25] ss:$0 sm:$0xff] }
0x1d55   :  { %13948 = vst [vmem:[#allocation44_spill] sm:$0xff] %v12952_v52 }
0x1d56   :  { %v3547_v56 = vadd.f32 %v8662_v57, %v3537_v0 }
0x1d58   :  { %9698 = vmatmul.mubr.msk.f32.vlgmr.msra.gmra.mrb[28].mxu1 %vm863_vm8, %v3547_v56  ;;  %9717 = vmatmul.mubr.msk.f32.vlgmr.msra.gmra.mrb[24].mxu0 %vm863_vm8, %v3547_v56 }
0x1d59   :  { %10574 = vmatpush3.bf16.xpose.msk.msra.mxu1 %vm12212_vm9, %v12932_v18  ;;  %9735 = vmatprep.mubr.msk.f32.mxu1 %vm863_vm8, %v3546_v25 }
0x1d5a   :  { %10577 = vmatprep.subr.msk.bf16.mxu1 %vm12212_vm9, %v12941_v30 }
0x1d61   :  { %10580 = vmatpush3.bf16.xpose.msk.msra.mxu1 %vm12212_vm9, %v12941_v30 }
0x1d62   :  { %10583 = vmatprep.subr.msk.bf16.mxu1 %vm12212_vm9, %v12952_v52 }
0x1d69   :  { %10586 = vmatpush3.bf16.xpose.msk.msra.mxu1 %vm12212_vm9, %v12952_v52 }
0x1d6a   :  { %10589 = vmatprep.subr.msk.bf16.mxu1 %vm12212_vm9, %v12960_v40 }
0x1d71   :  { %10592 = vmatpush3.bf16.xpose.msk.msra.mxu1 %vm12212_vm9, %v12960_v40 }
0x1d78   :  { %9736 = vmatmul.mubr.msk.f32.vlgmr.msra.gmra.mrb[30].mxu1 %vm863_vm8, %v3547_v56 }
0x1e2b   :  { %v9699_v17 = vpop.f32.mrb[28].mxu1  ;;  %v9718_v57 = vpop.f32.mrb[24].mxu0 }
0x1e2c   :  { %v3797_v5 = vadd.f32 %v9718_v57, %v8674_v48  ;;  %v3686_v41 = vpop.f32.mrb[29].mxu1  ;;  %v3791_v28 = vpop.f32.mrb[25].mxu0  ;;  %v12984_v56 = vadd.f32 %v9699_v17, %v8663_v43 }
0x1e2d   :  { %v12974_v25 = vadd.f32 %v8663_v43, %v3686_v41  ;;  %v3792_v59 = vadd.f32 %v8674_v48, %v3791_v28 }
0x1e2f   :  { %9742 = vmatprep.mubr.msk.f32.mxu0 %vm383_vm1, %v12974_v25  ;;  %v10593_v13 = vpack.c.bf16 %v3797_v5, %v3792_v59  ;;  %v12978_v0 = vpack.i.bf16 %v3797_v5, %v3792_v59 }
0x1e31   :  { %10595 = vmatprep.subr.msk.bf16.mxu0 %vm12151_vm2, %v10593_v13 }
0x1e32   :  { %10598 = vmatpush3.bf16.xpose.msk.msra.mxu0 %vm12151_vm2, %v10593_v13 }
0x1e39   :  { %9743 = vmatmul.mubr.msk.f32.vlgmr.msra.gmra.mrb[26].mxu0 %vm383_vm1, %v12984_v56 }
0x1e4b   :  { %v9737_v54 = vpop.f32.mrb[30].mxu1 }
0x1e4c   :  { %v3902_v2 = vadd.f32 %v9737_v54, %v8685_v12  ;;  %v3896_v26 = vpop.f32.mrb[31].mxu1 }
0x1e4d   :  { %v3897_v48 = vadd.f32 %v8685_v12, %v3896_v26 }
0x1e4f   :  { %v10599_v57 = vpack.c.bf16 %v3902_v2, %v3897_v48  ;;  %v12989_v41 = vpack.i.bf16 %v3902_v2, %v3897_v48 }
0x1e51   :  { %10601 = vmatprep.subr.msk.bf16.mxu1 %vm12365_vm13, %v10599_v57 }
0x1e52   :  { %10604 = vmatpush3.bf16.msk.msra.mxu1 %vm12365_vm13, %v10599_v57 }
0x1f0c   :  { %v9744_v5 = vpop.f32.mrb[26].mxu0 }
0x1f0d   :  { %v3993_v43 = vmul.f32 0.25, %v9744_v5  ;;  %v3983_v17 = vpop.f32.mrb[27].mxu0 }
0x1f0e   :  { %v3992_v28 = vmul.f32 0.25, %v3983_v17 }
0x1f0f   :  { %v3997_v59 = vsel %vm1272_vm14, %v3993_v43, -inf }
0x1f10   :  { %3998 = vmax.xlane.f32.xlu0 %v3997_v59  ;;  %v3994_v13 = vsel %vm1268_vm15, %v3992_v28, -inf }
0x1f11   :  { %3995 = vmax.xlane.f32.xlu1 %v3994_v13 }
0x1f22   :  { %11224 = vrot.lane.b32.xlu1 %v12978_v0, %s11879_s4 }
0x1f9d   :  { %v3999_v12 = vpop.xlane.xlu0 %3998 }
0x1f9e   :  { %v4001_v54 = vsub.f32 %v3993_v43, %v3999_v12  ;;  %v3996_v2 = vpop.xlane.xlu1 %3995 }
0x1f9f   :  { %v4000_v26 = vsub.f32 %v3992_v28, %v3996_v2 }
0x1fa0   :  { %v4004_v48 = vmul.f32 1.442695, %v4001_v54 }
0x1fa1   :  { %v4002_v40 = vmul.f32 1.442695, %v4000_v26 }
0x1fa2   :  { %11423 = vpow2.f32 %v4004_v48  ;;  %v11225_v57 = vpop.permute.xlu1 %11224 }
0x1fa3   :  { %11425 = vpow2.f32 %v4002_v40  ;;  %v11227_v5 = vunpack.i.h.bf16 %v11225_v57  ;;  %v11226_v17 = vunpack.i.l.bf16 %v11225_v57 }
0x1fa5   :  { %v10605_v52 = vpack.c.bf16 %v11227_v5, %v11226_v17 }
0x1fa7   :  { %10607 = vmatprep.subr.msk.bf16.mxu1 %vm12151_vm2, %v10605_v52 }
0x1fac   :  { %v11424_v59 = vpop.eup %11423 }
0x1fad   :  { %v11426_v13 = vpop.eup %11425  ;;  %v4009_v30 = vsel %vm1272_vm14, %v11424_v59, 0.0 }
0x1fae   :  { %4010 = vadd.xlane.f32.xlu0 %v4009_v30  ;;  %v4006_v43 = vsel %vm1268_vm15, %v11426_v13, 0.0 }
0x1faf   :  { %4007 = vadd.xlane.f32.xlu1 %v4006_v43 }
0x1fc0   :  { %4102 = vrot.lane.b32.xlu1 %v12984_v56, %s11879_s4 }
0x1fc4   :  { %4100 = vrot.lane.b32.xlu0 %v12974_v25, %s11879_s4 }
0x203b   :  { %v4011_v40 = vpop.xlane.xlu0 %4010 }
0x203c   :  { %11427 = vrcp.f32 %v4011_v40  ;;  %v4008_v28 = vpop.xlane.xlu1 %4007 }
0x203d   :  { %11429 = vrcp.f32 %v4008_v28 }
0x203f   :  { %v4101_v30 = vpop.permute.xlu0 %4100 }
0x2040   :  { %v4103_v48 = vpop.permute.xlu1 %4102 }
0x2046   :  { %v11428_v12 = vpop.eup %11427 }
0x2047   :  { %v11430_v54 = vpop.eup %11429  ;;  %v4015_v26 = vmul.f32 %v11428_v12, %v11424_v59 }
0x2048   :  { %v4014_v2 = vmul.f32 %v11430_v54, %v11426_v13 }
0x204a   :  { %9749 = vmatprep.mubr.msk.f32.mxu1 %vm1268_vm15, %v4014_v2 }
0x204b   :  { %9750 = vmatmul.mubr.msk.f32.vlgmr.msra.gmra.mrb[32].mxu1 %vm1268_vm15, %v4015_v26 }
0x204c   :  { %10610 = vmatpush3.bf16.xpose.msk.msra.mxu1 %vm12151_vm2, %v10605_v52  ;;  %9756 = vmatprep.mubr.msk.f32.mxu1 %vm383_vm1, %v4101_v30 }
0x2053   :  { %9757 = vmatmul.mubr.msk.f32.vlgmr.msra.gmra.mrb[34].mxu1 %vm383_vm1, %v4103_v48 }
0x211e   :  { %v13013_v57 = vpop.f32.mrb[32].mxu1 }
0x211f   :  { %v13015_v5 = vpop.f32.mrb[33].mxu1 }
0x2126   :  { %v9758_v17 = vpop.f32.mrb[34].mxu1 }
0x2127   :  { %v4192_v13 = vmul.f32 0.25, %v9758_v17  ;;  %v4182_v59 = vpop.f32.mrb[35].mxu1 }
0x2128   :  { %v4191_v43 = vmul.f32 0.25, %v4182_v59 }
0x2129   :  { %v4196_v40 = vsel %vm1272_vm14, %v4192_v13, -inf }
0x212a   :  { %4197 = vmax.xlane.f32.xlu0 %v4196_v40  ;;  %v4193_v28 = vsel %vm1268_vm15, %v4191_v43, -inf }
0x212b   :  { %4194 = vmax.xlane.f32.xlu1 %v4193_v28 }
0x21b7   :  { %v4198_v52 = vpop.xlane.xlu0 %4197 }
0x21b8   :  { %v4200_v12 = vsub.f32 %v4192_v13, %v4198_v52  ;;  %v4195_v54 = vpop.xlane.xlu1 %4194 }
0x21b9   :  { %v4199_v2 = vsub.f32 %v4191_v43, %v4195_v54 }
0x21ba   :  { %v4203_v26 = vmul.f32 1.442695, %v4200_v12 }
0x21bb   :  { %v4201_v30 = vmul.f32 1.442695, %v4199_v2 }
0x21bc   :  { %11431 = vpow2.f32 %v4203_v26 }
0x21bd   :  { %11433 = vpow2.f32 %v4201_v30 }
0x21c6   :  { %v11432_v48 = vpop.eup %11431 }
0x21c7   :  { %v11434_v19 = vpop.eup %11433  ;;  %v4208_v17 = vsel %vm1272_vm14, %v11432_v48, 0.0 }
0x21c8   :  { %4209 = vadd.xlane.f32.xlu1 %v4208_v17  ;;  %v4205_v59 = vsel %vm1268_vm15, %v11434_v19, 0.0 }
0x21c9   :  { %4206 = vadd.xlane.f32.xlu0 %v4205_v59 }
0x21d9   :  { %11234 = vrot.lane.b32.xlu1 %v12978_v0, %s11880_s3 }
0x21dd   :  { %4304 = vrot.lane.b32.xlu1 %v12974_v25, %s11880_s3 }
0x21df   :  { %11229 = vrot.lane.b32.xlu0 %v12989_v41, %s11879_s4 }
0x21e1   :  { %4306 = vrot.lane.b32.xlu1 %v12984_v56, %s11880_s3 }
0x2255   :  { %v4210_v13 = vpop.xlane.xlu1 %4209 }
0x2256   :  { %11435 = vrcp.f32 %v4210_v13  ;;  %v4207_v43 = vpop.xlane.xlu0 %4206 }
0x2257   :  { %11437 = vrcp.f32 %v4207_v43 }
0x2259   :  { %v11235_v40 = vpop.permute.xlu1 %11234 }
0x225a   :  { %v11230_v28 = vpop.permute.xlu0 %11229  ;;  %v11237_v52 = vunpack.i.h.bf16 %v11235_v40  ;;  %v11236_v12 = vunpack.i.l.bf16 %v11235_v40 }
0x225b   :  { %v11232_v54 = vunpack.i.h.bf16 %v11230_v28  ;;  %v11231_v2 = vunpack.i.l.bf16 %v11230_v28 }
0x225c   :  { %v10617_v30 = vpack.c.bf16 %v11237_v52, %v11236_v12 }
0x225d   :  { %v10611_v26 = vpack.c.bf16 %v11232_v54, %v11231_v2  ;;  %v4305_v40 = vpop.permute.xlu1 %4304 }
0x225f   :  { %10613 = vmatprep.subr.msk.bf16.mxu0 %vm12365_vm13, %v10611_v26 }
0x2260   :  { %v11436_v17 = vpop.eup %11435  ;;  %10616 = vmatpush3.bf16.msk.msra.mxu0 %vm12365_vm13, %v10611_v26 }
0x2261   :  { %v11438_v59 = vpop.eup %11437  ;;  %10619 = vmatprep.subr.msk.bf16.mxu0 %vm12151_vm2, %v10617_v30  ;;  %v4214_v43 = vmul.f32 %v11436_v17, %v11432_v48  ;;  %v4307_v28 = vpop.permute.xlu1 %4306 }
0x2262   :  { %v4213_v13 = vmul.f32 %v11438_v59, %v11434_v19 }
0x2264   :  { %9763 = vmatprep.mubr.msk.f32.mxu0 %vm1268_vm15, %v4213_v13 }
0x2265   :  { %9764 = vmatmul.mubr.msk.f32.vlgmr.msra.gmra.mrb[28].mxu0 %vm1268_vm15, %v4214_v43 }
0x2266   :  { %9770 = vmatprep.mubr.msk.f32.mxu0 %vm383_vm1, %v4305_v40 }
0x2269   :  { %10622 = vmatpush3.bf16.xpose.msk.msra.mxu0 %vm12151_vm2, %v10617_v30 }
0x2270   :  { %9771 = vmatmul.mubr.msk.f32.vlgmr.msra.gmra.mrb[30].mxu0 %vm383_vm1, %v4307_v28 }
0x2338   :  { %v13041_v52 = vpop.f32.mrb[28].mxu0 }
0x2339   :  { %v13043_v12 = vpop.f32.mrb[29].mxu0 }
0x2343   :  { %v9772_v54 = vpop.f32.mrb[30].mxu0 }
0x2344   :  { %v4396_v19 = vmul.f32 0.25, %v9772_v54  ;;  %v4386_v48 = vpop.f32.mrb[31].mxu0 }
0x2345   :  { %v4395_v2 = vmul.f32 0.25, %v4386_v48 }
0x2346   :  { %v4400_v26 = vsel %vm1272_vm14, %v4396_v19, -inf }
0x2347   :  { %4401 = vmax.xlane.f32.xlu1 %v4400_v26  ;;  %v4397_v17 = vsel %vm1268_vm15, %v4395_v2, -inf }
0x2348   :  { %4398 = vmax.xlane.f32.xlu0 %v4397_v17 }
0x2358   :  { %11244 = vrot.lane.b32.xlu1 %v12978_v0, %s11881_s23 }
0x235c   :  { %4507 = vrot.lane.b32.xlu1 %v12974_v25, %s11881_s23 }
0x2360   :  { %4509 = vrot.lane.b32.xlu1 %v12984_v56, %s11881_s23 }
0x23d4   :  { %v4402_v30 = vpop.xlane.xlu1 %4401 }
0x23d5   :  { %v4404_v59 = vsub.f32 %v4396_v19, %v4402_v30  ;;  %v4399_v13 = vpop.xlane.xlu0 %4398 }
0x23d6   :  { %v4403_v43 = vsub.f32 %v4395_v2, %v4399_v13 }
0x23d7   :  { %v4407_v40 = vmul.f32 1.442695, %v4404_v59 }
0x23d8   :  { %v4405_v28 = vmul.f32 1.442695, %v4403_v43  ;;  %v11245_v19 = vpop.permute.xlu1 %11244 }
0x23d9   :  { %11439 = vpow2.f32 %v4407_v40  ;;  %v11247_v17 = vunpack.i.h.bf16 %v11245_v19  ;;  %v11246_v30 = vunpack.i.l.bf16 %v11245_v19  ;;  %v13950_v19 = vsub.s32 1, %v12118_v3  ;;  %v8736_v3 = vld [vmem:[%s13929_s13 + $0x18] sm:$0xf] }
0x23da   :  { %11441 = vpow2.f32 %v4405_v28 }
0x23db   :  { %v10629_v40 = vpack.c.bf16 %v11247_v17, %v11246_v30 }
0x23e3   :  { %v11440_v54 = vpop.eup %11439 }
0x23e4   :  { %v4412_v48 = vsel %vm1272_vm14, %v11440_v54, 0.0  ;;  %v11442_v26 = vpop.eup %11441 }
0x23e5   :  { %4413 = vadd.xlane.f32.xlu0 %v4412_v48  ;;  %v4409_v0 = vsel %vm1268_vm15, %v11442_v26, 0.0 }
0x23e9   :  { %4410 = vadd.xlane.f32.xlu0 %v4409_v0 }
0x23ff   :  { %11239 = vrot.lane.b32.xlu0 %v12989_v41, %s11880_s3 }
0x2472   :  { %v4414_v25 = vpop.xlane.xlu0 %4413 }
0x2473   :  { %11443 = vrcp.f32 %v4414_v25 }
0x2476   :  { %v4411_v56 = vpop.xlane.xlu0 %4410 }
0x2477   :  { %11445 = vrcp.f32 %v4411_v56  ;;  %v4508_v56 = vpop.permute.xlu1 %4507 }
0x247a   :  { %v11240_v2 = vpop.permute.xlu0 %11239 }
0x247b   :  { %v11242_v59 = vunpack.i.h.bf16 %v11240_v2  ;;  %v11241_v13 = vunpack.i.l.bf16 %v11240_v2  ;;  %v4510_v17 = vpop.permute.xlu1 %4509 }
0x247d   :  { %v10623_v43 = vpack.c.bf16 %v11242_v59, %v11241_v13  ;;  %v11444_v28 = vpop.eup %11443 }
0x247e   :  { %v4418_v25 = vmul.f32 %v11444_v28, %v11440_v54  ;;  %v8735_v54 = vld [vmem:[%s13929_s13 + $0x10] sm:$0xff] }
0x247f   :  { %10625 = vmatprep.subr.msk.bf16.mxu1 %vm12365_vm13, %v10623_v43 }
0x2480   :  { %10628 = vmatpush3.bf16.msk.msra.mxu1 %vm12365_vm13, %v10623_v43  ;;  %v11559_v43 = vld [vmem:[%s13932_s20] ss:$0 sm:$0xff] }
0x2481   :  { %v11446_v48 = vpop.eup %11445  ;;  %10631 = vmatprep.subr.msk.bf16.mxu1 %vm12151_vm2, %v10629_v40 }
0x2482   :  { %v4417_v0 = vmul.f32 %v11446_v48, %v11442_v26  ;;  %v4868_v26 = vrot.slane %v12297_v58, %v13950_v19 }
0x2484   :  { %9777 = vmatprep.mubr.msk.f32.mxu1 %vm1268_vm15, %v4417_v0  ;;  %v13075_v2 = vadd.f32 %v8735_v54, %v4868_v26 }
0x2485   :  { %9778 = vmatmul.mubr.msk.f32.vlgmr.msra.gmra.mrb[36].mxu1 %vm1268_vm15, %v4418_v25 }
0x2486   :  { %9784 = vmatprep.mubr.msk.f32.mxu1 %vm383_vm1, %v4508_v56 }
0x2489   :  { %10634 = vmatpush3.bf16.xpose.msk.msra.mxu1 %vm12151_vm2, %v10629_v40 }
0x248a   :  { %10667 = vmatprep.subr.msk.bf16.mxu1 %vm12212_vm9, %v12208_v22 }
0x2490   :  { %9785 = vmatmul.mubr.msk.f32.vlgmr.msra.gmra.mrb[38].mxu1 %vm383_vm1, %v4510_v17 }
0x2491   :  { %10670 = vmatpush3.bf16.xpose.msk.msra.mxu1 %vm12212_vm9, %v12208_v22  ;;  %9829 = vmatprep.mubr.msk.f32.mxu1 %vm863_vm8, %v13075_v2  ;;  %v13105_v22 = vadd.f32 %v8736_v3, %v4868_v26 }
0x2492   :  { %10673 = vmatprep.subr.msk.bf16.mxu1 %vm12212_vm9, %v12224_v29 }
0x2499   :  { %10676 = vmatpush3.bf16.xpose.msk.msra.mxu1 %vm12212_vm9, %v12224_v29 }
0x249a   :  { %10679 = vmatprep.subr.msk.bf16.mxu1 %vm12212_vm9, %v12237_v32 }
0x24a1   :  { %10682 = vmatpush3.bf16.xpose.msk.msra.mxu1 %vm12212_vm9, %v12237_v32 }
0x24a2   :  { %10685 = vmatprep.subr.msk.bf16.mxu1 %vm12212_vm9, %v12247_v36 }
0x24a9   :  { %10688 = vmatpush3.bf16.xpose.msk.msra.mxu1 %vm12212_vm9, %v12247_v36 }
0x24aa   :  { %10715 = vmatprep.subr.msk.bf16.mxu1 %vm12212_vm9, %v12292_v53 }
0x24b0   :  { %9830 = vmatmul.mubr.msk.f32.vlgmr.msra.gmra.mrb[40].mxu1 %vm863_vm8, %v13105_v22 }
0x24b1   :  { %10718 = vmatpush3.bf16.xpose.msk.msra.mxu1 %vm12212_vm9, %v12292_v53  ;;  %9867 = vmatprep.mubr.msk.f32.mxu1 %vm863_vm8, %v13075_v2 }
0x24b2   :  { %10721 = vmatprep.subr.msk.bf16.mxu1 %vm12212_vm9, %v12309_v4 }
0x24b9   :  { %10724 = vmatpush3.bf16.xpose.msk.msra.mxu1 %vm12212_vm9, %v12309_v4 }
0x24ba   :  { %10727 = vmatprep.subr.msk.bf16.mxu1 %vm12212_vm9, %v12327_v7 }
0x24c1   :  { %10730 = vmatpush3.bf16.xpose.msk.msra.mxu1 %vm12212_vm9, %v12327_v7 }
0x24c2   :  { %10733 = vmatprep.subr.msk.bf16.mxu1 %vm12212_vm9, %v12335_v10 }
0x24c9   :  { %10736 = vmatpush3.bf16.xpose.msk.msra.mxu1 %vm12212_vm9, %v12335_v10 }
0x24d0   :  { %9868 = vmatmul.mubr.msk.f32.vlgmr.msra.gmra.mrb[42].mxu1 %vm863_vm8, %v13105_v22 }
0x2558   :  { %v9779_v29 = vpop.f32.mrb[36].mxu1 }
0x2559   :  { %v4498_v32 = vpop.f32.mrb[37].mxu1 }
0x2563   :  { %v9786_v36 = vpop.f32.mrb[38].mxu1 }
0x2564   :  { %v4599_v53 = vmul.f32 0.25, %v9786_v36  ;;  %v4589_v58 = vpop.f32.mrb[39].mxu1 }
0x2565   :  { %v4598_v4 = vmul.f32 0.25, %v4589_v58 }
0x2566   :  { %v4603_v7 = vsel %vm1272_vm14, %v4599_v53, -inf }
0x2567   :  { %4604 = vmax.xlane.f32.xlu1 %v4603_v7  ;;  %v4600_v30 = vsel %vm1268_vm15, %v4598_v4, -inf }
0x2568   :  { %4601 = vmax.xlane.f32.xlu0 %v4600_v30 }
0x2578   :  { %4712 = vrot.lane.b32.xlu1 %v13043_v12, %s11882_s10 }
0x257c   :  { %4714 = vrot.lane.b32.xlu1 %v13041_v52, %s11882_s10 }
0x2580   :  { %4720 = vrot.lane.b32.xlu1 %v4498_v32, %s11883_s27 }
0x2583   :  { %v13141_v10 = vpop.f32.mrb[40].mxu1 }
0x2584   :  { %v13143_v59 = vpop.f32.mrb[41].mxu1 }
0x25a3   :  { %v9869_v13 = vpop.f32.mrb[42].mxu1 }
0x25a4   :  { %v5099_v40 = vadd.f32 %v11559_v43, %v9869_v13  ;;  %v5093_v28 = vpop.f32.mrb[43].mxu1 }
0x25a5   :  { %v5094_v48 = vadd.f32 %v11559_v43, %v5093_v28 }
0x25a7   :  { %v10743_v0 = vpack.c.bf16 %v5099_v40, %v5094_v48  ;;  %v13146_v25 = vpack.i.bf16 %v5099_v40, %v5094_v48  ;;  %v3576_v48 = vld [vmem:[#allocation16 + $0x8] sm:$0xff] }
0x25a9   :  { %10745 = vmatprep.subr.msk.bf16.mxu1 %vm12365_vm13, %v10743_v0 }
0x25aa   :  { %10748 = vmatpush3.bf16.msk.msra.mxu1 %vm12365_vm13, %v10743_v0  ;;  %v3577_v0 = vld [vmem:[#allocation16 + $0x10] sm:$0xff] }
0x25f4   :  { %v4605_v52 = vpop.xlane.xlu1 %4604 }
0x25f5   :  { %v4607_v12 = vsub.f32 %v4599_v53, %v4605_v52  ;;  %v4602_v56 = vpop.xlane.xlu0 %4601 }
0x25f6   :  { %v4606_v19 = vsub.f32 %v4598_v4, %v4602_v56 }
0x25f7   :  { %v4610_v26 = vmul.f32 1.442695, %v4607_v12  ;;  %v3578_v12 = vld [vmem:[#allocation16 + $0x18] sm:$0xff] }
0x25f8   :  { %v4608_v54 = vmul.f32 1.442695, %v4606_v19  ;;  %v13165_v56 = vpack.c.bf16 %v3578_v12, %v3577_v0  ;;  %v3579_v19 = vld [vmem:[#allocation16 + $0x20] sm:$0xff] }
0x25f9   :  { %11447 = vpow2.f32 %v4610_v26  ;;  %v3580_v26 = vld [vmem:[#allocation16 + $0x28] sm:$0xff] }
0x25fa   :  { %11449 = vpow2.f32 %v4608_v54  ;;  %v13176_v54 = vpack.c.bf16 %v3580_v26, %v3579_v19 }
0x2603   :  { %v11448_v17 = vpop.eup %11447 }
0x2604   :  { %v4615_v3 = vsel %vm1272_vm14, %v11448_v17, 0.0  ;;  %v11450_v32 = vpop.eup %11449 }
0x2605   :  { %4616 = vadd.xlane.f32.xlu0 %v4615_v3  ;;  %v4612_v36 = vsel %vm1268_vm15, %v11450_v32, 0.0  ;;  %v3582_v3 = vld [vmem:[#allocation16 + $0x38] sm:$0xff] }
0x2609   :  { %4613 = vadd.xlane.f32.xlu0 %v4612_v36 }
0x261f   :  { %11249 = vrot.lane.b32.xlu0 %v12989_v41, %s11881_s23 }
0x2623   :  { %4722 = vrot.lane.b32.xlu0 %v9779_v29, %s11883_s27  ;;  %v3575_v29 = vld [vmem:[#allocation16] sm:$0xff] }
0x2624   :  { %v13163_v52 = vpack.c.bf16 %v3576_v48, %v3575_v29 }
0x2692   :  { %v4617_v53 = vpop.xlane.xlu0 %4616 }
0x2693   :  { %11451 = vrcp.f32 %v4617_v53 }
0x2696   :  { %v4614_v58 = vpop.xlane.xlu0 %4613 }
0x2697   :  { %11453 = vrcp.f32 %v4614_v58  ;;  %v4713_v58 = vpop.permute.xlu1 %4712 }
0x269a   :  { %v11250_v4 = vpop.permute.xlu0 %11249 }
0x269b   :  { %v11252_v7 = vunpack.i.h.bf16 %v11250_v4  ;;  %v11251_v30 = vunpack.i.l.bf16 %v11250_v4  ;;  %v4715_v4 = vpop.permute.xlu1 %4714 }
0x269d   :  { %v10635_v13 = vpack.c.bf16 %v11252_v7, %v11251_v30  ;;  %v11452_v43 = vpop.eup %11451 }
0x269e   :  { %v4621_v41 = vmul.f32 %v11452_v43, %v11448_v17  ;;  %v3581_v17 = vld [vmem:[#allocation16 + $0x30] sm:$0xff]  ;;  %v4723_v7 = vpop.permute.xlu0 %4722 }
0x269f   :  { %10637 = vmatprep.subr.msk.bf16.mxu0 %vm12365_vm13, %v10635_v13  ;;  %v4721_v30 = vpop.permute.xlu1 %4720 }
0x26a0   :  { %10640 = vmatpush3.bf16.msk.msra.mxu0 %vm12365_vm13, %v10635_v13  ;;  %v4734_v13 = vsel %vm383_vm1, %v13015_v5, %v4713_v58 }
0x26a1   :  { %v11454_v40 = vpop.eup %11453  ;;  %10643 = vmatprep.subr.msk.bf16.mxu0 %vm12212_vm9, %v13163_v52 }
0x26a2   :  { %v4620_v28 = vmul.f32 %v11454_v40, %v11450_v32  ;;  %v13184_v32 = vpack.c.bf16 %v3582_v3, %v3581_v17  ;;  %v4735_v40 = vsel %vm383_vm1, %v13013_v57, %v4715_v4 }
0x26a3   :  { %v4737_v29 = vsel %vm484_vm5, %v4735_v40, %v4723_v7 }
0x26a4   :  { %9791 = vmatprep.mubr.msk.f32.mxu0 %vm1268_vm15, %v4620_v28  ;;  %v4736_v28 = vsel %vm484_vm5, %v4734_v13, %v4721_v30 }
0x26a5   :  { %9792 = vmatmul.mubr.msk.f32.vlgmr.msra.gmra.mrb[32].mxu0 %vm1268_vm15, %v4621_v41 }
0x26a9   :  { %10646 = vmatpush3.bf16.xpose.msk.msra.mxu0 %vm12212_vm9, %v13163_v52 }
0x26aa   :  { %10649 = vmatprep.subr.msk.bf16.mxu0 %vm12212_vm9, %v13165_v56 }
0x26b1   :  { %10652 = vmatpush3.bf16.xpose.msk.msra.mxu0 %vm12212_vm9, %v13165_v56 }
0x26b2   :  { %10655 = vmatprep.subr.msk.bf16.mxu0 %vm12212_vm9, %v13176_v54 }
0x26b9   :  { %10658 = vmatpush3.bf16.xpose.msk.msra.mxu0 %vm12212_vm9, %v13176_v54 }
0x26ba   :  { %10661 = vmatprep.subr.msk.bf16.mxu0 %vm12212_vm9, %v13184_v32 }
0x26c1   :  { %10664 = vmatpush3.bf16.xpose.msk.msra.mxu0 %vm12212_vm9, %v13184_v32 }
0x26c2   :  { %10691 = vmatprep.subr.msk.bf16.mxu0 %vm12212_vm9, %v12218_v27 }
0x2778   :  { %v9793_v36 = vpop.f32.mrb[32].mxu0 }
0x2779   :  { %4730 = vrot.lane.b32.xlu0 %v9793_v36, %s11884_s17  ;;  %v4701_v53 = vpop.f32.mrb[33].mxu0 }
0x277a   :  { %4728 = vrot.lane.b32.xlu1 %v4701_v53, %s11884_s17 }
0x27eb   :  { %v4731_v43 = vpop.permute.xlu0 %4730 }
0x27ec   :  { %v4729_v41 = vpop.permute.xlu1 %4728  ;;  %v4739_v0 = vsel %vm2015_vm3, %v4737_v29, %v4731_v43 }
0x27ed   :  { %v4738_v48 = vsel %vm2015_vm3, %v4736_v28, %v4729_v41 }
0x27ee   :  { %9810 = vmatprep.mubr.msk.f32.mxu0 %vm863_vm8, %v4738_v48 }
0x27ef   :  { %9811 = vmatmul.mubr.msk.f32.vlgmr.msra.gmra.mrb[34].mxu0 %vm863_vm8, %v4739_v0 }
0x27f0   :  { %10694 = vmatpush3.bf16.xpose.msk.msra.mxu0 %vm12212_vm9, %v12218_v27  ;;  %9848 = vmatprep.mubr.msk.f32.mxu0 %vm863_vm8, %v13075_v2  ;;  %v11560_v27 = vld [vmem:[%s13931_s29] ss:$0 sm:$0xff] }
0x27f1   :  { %10697 = vmatprep.subr.msk.bf16.mxu0 %vm12212_vm9, %v12260_v44  ;;  %v13254_v30 = vadd.f32 %v11560_v27, %v13141_v10 }
0x27f8   :  { %10700 = vmatpush3.bf16.xpose.msk.msra.mxu0 %vm12212_vm9, %v12260_v44  ;;  %v13235_v44 = vadd.f32 %v11560_v27, %v13143_v59  ;;  %v11561_v59 = vld [vmem:[%s13930_s21] ss:$0 sm:$0xff] }
0x27f9   :  { %10703 = vmatprep.subr.msk.bf16.mxu0 %vm12212_vm9, %v12271_v47 }
0x2800   :  { %10706 = vmatpush3.bf16.xpose.msk.msra.mxu0 %vm12212_vm9, %v12271_v47  ;;  %v8724_v47 = vld [vmem:[%s12040_s5] ss:$0 sm:$0xff] }
0x2801   :  { %10709 = vmatprep.subr.msk.bf16.mxu0 %vm12212_vm9, %v12284_v50 }
0x2808   :  { %10712 = vmatpush3.bf16.xpose.msk.msra.mxu0 %vm12212_vm9, %v12284_v50 }
0x280f   :  { %9849 = vmatmul.mubr.msk.f32.vlgmr.msra.gmra.mrb[36].mxu0 %vm863_vm8, %v13105_v22 }
0x2810   :  { %9874 = vmatprep.mubr.msk.f32.mxu0 %vm383_vm1, %v13235_v44 }
0x28c2   :  { %v9812_v57 = vpop.f32.mrb[34].mxu0 }
0x28c3   :  { %v4848_v5 = vadd.f32 %v9812_v57, %v8724_v47  ;;  %v4842_v12 = vpop.f32.mrb[35].mxu0 }
0x28c4   :  { %v4843_v19 = vadd.f32 %v8724_v47, %v4842_v12 }
0x28c5   :  { %v4852_v26 = vsel %vm2140_vm11, %v4848_v5, 0.0 }
0x28c6   :  { %v4851_v17 = vsel %vm863_vm8, %v4843_v19, 0.0 }
0x28c7   :  { %v13244_v50 = vadd.f32 %v4852_v26, %v4851_v17 }
0x28e2   :  { %v9850_v3 = vpop.f32.mrb[36].mxu0 }
0x28e3   :  { %v5024_v36 = vadd.f32 %v11561_v59, %v9850_v3  ;;  %v5018_v53 = vpop.f32.mrb[37].mxu0 }
0x28e4   :  { %v5019_v58 = vadd.f32 %v11561_v59, %v5018_v53 }
0x28e6   :  { %v10737_v4 = vpack.c.bf16 %v5024_v36, %v5019_v58  ;;  %v13247_v7 = vpack.i.bf16 %v5024_v36, %v5019_v58 }
0x28e8   :  { %10739 = vmatprep.subr.msk.bf16.mxu0 %vm12151_vm2, %v10737_v4 }
0x28e9   :  { %10742 = vmatpush3.bf16.xpose.msk.msra.mxu0 %vm12151_vm2, %v10737_v4 }
0x28f0   :  { %9875 = vmatmul.mubr.msk.f32.vlgmr.msra.gmra.mrb[38].mxu0 %vm383_vm1, %v13254_v30 }
0x29c3   :  { %v9876_v13 = vpop.f32.mrb[38].mxu0 }
0x29c4   :  { %v5190_v43 = vmul.f32 0.25, %v9876_v13  ;;  %v5180_v40 = vpop.f32.mrb[39].mxu0 }
0x29c5   :  { %v5189_v28 = vmul.f32 0.25, %v5180_v40 }
0x29c6   :  { %v5194_v41 = vsel %vm1272_vm14, %v5190_v43, -inf }
0x29c7   :  { %5195 = vmax.xlane.f32.xlu0 %v5194_v41  ;;  %v5191_v29 = vsel %vm1268_vm15, %v5189_v28, -inf }
0x29c8   :  { %5192 = vmax.xlane.f32.xlu1 %v5191_v29 }
0x29d9   :  { %11254 = vrot.lane.b32.xlu1 %v13247_v7, %s11879_s4 }
0x29dd   :  { %5299 = vrot.lane.b32.xlu1 %v13254_v30, %s11879_s4 }
0x2a54   :  { %v5196_v10 = vpop.xlane.xlu0 %5195 }
0x2a55   :  { %v5198_v48 = vsub.f32 %v5190_v43, %v5196_v10  ;;  %v5193_v0 = vpop.xlane.xlu1 %5192 }
0x2a56   :  { %v5197_v27 = vsub.f32 %v5189_v28, %v5193_v0 }
0x2a57   :  { %v5201_v47 = vmul.f32 1.442695, %v5198_v48 }
0x2a58   :  { %v5199_v57 = vmul.f32 1.442695, %v5197_v27 }
0x2a59   :  { %v11255_v5 = vpop.permute.xlu1 %11254 }
0x2a5a   :  { %11455 = vpow2.f32 %v5199_v57  ;;  %v11257_v12 = vunpack.i.h.bf16 %v11255_v5  ;;  %v11256_v19 = vunpack.i.l.bf16 %v11255_v5 }
0x2a5b   :  { %11457 = vpow2.f32 %v5201_v47 }
0x2a5c   :  { %v10749_v26 = vpack.c.bf16 %v11257_v12, %v11256_v19 }
0x2a5d   :  { %v5300_v41 = vpop.permute.xlu1 %5299 }
0x2a5e   :  { %10751 = vmatprep.subr.msk.bf16.mxu1 %vm12151_vm2, %v10749_v26 }
0x2a64   :  { %v11456_v17 = vpop.eup %11455 }
0x2a65   :  { %v5203_v3 = vsel %vm1268_vm15, %v11456_v17, 0.0  ;;  %v11458_v59 = vpop.eup %11457 }
0x2a66   :  { %5204 = vadd.xlane.f32.xlu0 %v5203_v3  ;;  %v5206_v36 = vsel %vm1272_vm14, %v11458_v59, 0.0 }
0x2a6a   :  { %5207 = vadd.xlane.f32.xlu0 %v5206_v36 }
0x2a80   :  { %5297 = vrot.lane.b32.xlu0 %v13235_v44, %s11879_s4 }
0x2af3   :  { %v5205_v53 = vpop.xlane.xlu0 %5204 }
0x2af4   :  { %11459 = vrcp.f32 %v5205_v53 }
0x2af7   :  { %v5208_v58 = vpop.xlane.xlu0 %5207 }
0x2af8   :  { %11461 = vrcp.f32 %v5208_v58 }
0x2afb   :  { %v5298_v28 = vpop.permute.xlu0 %5297 }
0x2afe   :  { %v11460_v4 = vpop.eup %11459 }
0x2aff   :  { %v5211_v13 = vmul.f32 %v11460_v4, %v11456_v17 }
0x2b01   :  { %9881 = vmatprep.mubr.msk.f32.mxu1 %vm1268_vm15, %v5211_v13 }
0x2b02   :  { %v11462_v43 = vpop.eup %11461 }
0x2b03   :  { %v5212_v40 = vmul.f32 %v11462_v43, %v11458_v59 }
0x2b05   :  { %9882 = vmatmul.mubr.msk.f32.vlgmr.msra.gmra.mrb[44].mxu1 %vm1268_vm15, %v5212_v40 }
0x2b06   :  { %10754 = vmatpush3.bf16.xpose.msk.msra.mxu1 %vm12151_vm2, %v10749_v26  ;;  %9888 = vmatprep.mubr.msk.f32.mxu1 %vm383_vm1, %v5298_v28 }
0x2b0d   :  { %9889 = vmatmul.mubr.msk.f32.vlgmr.msra.gmra.mrb[46].mxu1 %vm383_vm1, %v5300_v41 }
0x2bd8   :  { %v13276_v29 = vpop.f32.mrb[44].mxu1 }
0x2bd9   :  { %v13278_v10 = vpop.f32.mrb[45].mxu1 }
0x2be0   :  { %v9890_v48 = vpop.f32.mrb[46].mxu1 }
0x2be1   :  { %v5389_v0 = vmul.f32 0.25, %v9890_v48  ;;  %v5379_v27 = vpop.f32.mrb[47].mxu1 }
0x2be2   :  { %v5388_v47 = vmul.f32 0.25, %v5379_v27 }
0x2be3   :  { %v5393_v57 = vsel %vm1272_vm14, %v5389_v0, -inf }
0x2be4   :  { %5394 = vmax.xlane.f32.xlu0 %v5393_v57  ;;  %v5390_v5 = vsel %vm1268_vm15, %v5388_v47, -inf }
0x2be5   :  { %5391 = vmax.xlane.f32.xlu1 %v5390_v5 }
0x2c71   :  { %v5395_v12 = vpop.xlane.xlu0 %5394 }
0x2c72   :  { %v5397_v19 = vsub.f32 %v5389_v0, %v5395_v12  ;;  %v5392_v26 = vpop.xlane.xlu1 %5391 }
0x2c73   :  { %v5396_v17 = vsub.f32 %v5388_v47, %v5392_v26 }
0x2c74   :  { %v5400_v3 = vmul.f32 1.442695, %v5397_v19 }
0x2c75   :  { %v5398_v59 = vmul.f32 1.442695, %v5396_v17 }
0x2c76   :  { %11463 = vpow2.f32 %v5400_v3 }
0x2c77   :  { %11465 = vpow2.f32 %v5398_v59 }
0x2c80   :  { %v11464_v36 = vpop.eup %11463 }
0x2c81   :  { %v11466_v53 = vpop.eup %11465  ;;  %v5405_v58 = vsel %vm1272_vm14, %v11464_v36, 0.0 }
0x2c82   :  { %5406 = vadd.xlane.f32.xlu1 %v5405_v58  ;;  %v5402_v4 = vsel %vm1268_vm15, %v11466_v53, 0.0 }
0x2c83   :  { %5403 = vadd.xlane.f32.xlu0 %v5402_v4 }
0x2c93   :  { %11264 = vrot.lane.b32.xlu1 %v13247_v7, %s11880_s3 }
0x2c97   :  { %5501 = vrot.lane.b32.xlu1 %v13235_v44, %s11880_s3 }
0x2c99   :  { %11259 = vrot.lane.b32.xlu0 %v13146_v25, %s11879_s4 }
0x2c9b   :  { %5503 = vrot.lane.b32.xlu1 %v13254_v30, %s11880_s3 }
0x2d0f   :  { %v5407_v13 = vpop.xlane.xlu1 %5406 }
0x2d10   :  { %11467 = vrcp.f32 %v5407_v13  ;;  %v5404_v43 = vpop.xlane.xlu0 %5403 }
0x2d11   :  { %11469 = vrcp.f32 %v5404_v43 }
0x2d13   :  { %v11265_v40 = vpop.permute.xlu1 %11264 }
0x2d14   :  { %v11260_v28 = vpop.permute.xlu0 %11259  ;;  %v11267_v41 = vunpack.i.h.bf16 %v11265_v40  ;;  %v11266_v48 = vunpack.i.l.bf16 %v11265_v40 }
0x2d15   :  { %v11262_v0 = vunpack.i.h.bf16 %v11260_v28  ;;  %v11261_v27 = vunpack.i.l.bf16 %v11260_v28 }
0x2d16   :  { %v10761_v57 = vpack.c.bf16 %v11267_v41, %v11266_v48 }
0x2d17   :  { %v10755_v47 = vpack.c.bf16 %v11262_v0, %v11261_v27  ;;  %v5502_v17 = vpop.permute.xlu1 %5501 }
0x2d19   :  { %10757 = vmatprep.subr.msk.bf16.mxu0 %vm12365_vm13, %v10755_v47 }
0x2d1a   :  { %v11468_v5 = vpop.eup %11467  ;;  %10760 = vmatpush3.bf16.msk.msra.mxu0 %vm12365_vm13, %v10755_v47 }
0x2d1b   :  { %v11470_v12 = vpop.eup %11469  ;;  %10763 = vmatprep.subr.msk.bf16.mxu0 %vm12151_vm2, %v10761_v57  ;;  %v5411_v26 = vmul.f32 %v11468_v5, %v11464_v36  ;;  %v5504_v3 = vpop.permute.xlu1 %5503 }
0x2d1c   :  { %v5410_v19 = vmul.f32 %v11470_v12, %v11466_v53 }
0x2d1e   :  { %9895 = vmatprep.mubr.msk.f32.mxu0 %vm1268_vm15, %v5410_v19 }
0x2d1f   :  { %9896 = vmatmul.mubr.msk.f32.vlgmr.msra.gmra.mrb[40].mxu0 %vm1268_vm15, %v5411_v26 }
0x2d20   :  { %9902 = vmatprep.mubr.msk.f32.mxu0 %vm383_vm1, %v5502_v17 }
0x2d23   :  { %10766 = vmatpush3.bf16.xpose.msk.msra.mxu0 %vm12151_vm2, %v10761_v57 }
0x2d2a   :  { %9903 = vmatmul.mubr.msk.f32.vlgmr.msra.gmra.mrb[42].mxu0 %vm383_vm1, %v5504_v3 }
0x2df2   :  { %v13304_v59 = vpop.f32.mrb[40].mxu0 }
0x2df3   :  { %v13306_v58 = vpop.f32.mrb[41].mxu0 }
0x2dfd   :  { %v9904_v4 = vpop.f32.mrb[42].mxu0 }
0x2dfe   :  { %v5593_v53 = vmul.f32 0.25, %v9904_v4  ;;  %v5583_v36 = vpop.f32.mrb[43].mxu0 }
0x2dff   :  { %v5592_v13 = vmul.f32 0.25, %v5583_v36 }
0x2e00   :  { %v5597_v43 = vsel %vm1272_vm14, %v5593_v53, -inf }
0x2e01   :  { %5598 = vmax.xlane.f32.xlu1 %v5597_v43  ;;  %v5594_v40 = vsel %vm1268_vm15, %v5592_v13, -inf }
0x2e02   :  { %5595 = vmax.xlane.f32.xlu0 %v5594_v40 }
0x2e12   :  { %11274 = vrot.lane.b32.xlu1 %v13247_v7, %s11881_s23 }
0x2e16   :  { %5704 = vrot.lane.b32.xlu1 %v13235_v44, %s11881_s23 }
0x2e1a   :  { %5706 = vrot.lane.b32.xlu1 %v13254_v30, %s11881_s23 }
0x2e8e   :  { %v5599_v28 = vpop.xlane.xlu1 %5598 }
0x2e8f   :  { %v5601_v41 = vsub.f32 %v5593_v53, %v5599_v28  ;;  %v5596_v48 = vpop.xlane.xlu0 %5595 }
0x2e90   :  { %v5600_v0 = vsub.f32 %v5592_v13, %v5596_v48 }
0x2e91   :  { %v5604_v27 = vmul.f32 1.442695, %v5601_v41 }
0x2e92   :  { %v5602_v47 = vmul.f32 1.442695, %v5600_v0  ;;  %v11275_v19 = vpop.permute.xlu1 %11274 }
0x2e93   :  { %11471 = vpow2.f32 %v5604_v27  ;;  %v11277_v17 = vunpack.i.h.bf16 %v11275_v19  ;;  %v11276_v3 = vunpack.i.l.bf16 %v11275_v19 }
0x2e94   :  { %11473 = vpow2.f32 %v5602_v47 }
0x2e95   :  { %v10773_v13 = vpack.c.bf16 %v11277_v17, %v11276_v3 }
0x2e96   :  { %v5705_v48 = vpop.permute.xlu1 %5704 }
0x2e9a   :  { %v5707_v0 = vpop.permute.xlu1 %5706 }
0x2e9d   :  { %v11472_v57 = vpop.eup %11471 }
0x2e9e   :  { %v5609_v5 = vsel %vm1272_vm14, %v11472_v57, 0.0  ;;  %v11474_v12 = vpop.eup %11473 }
0x2e9f   :  { %5610 = vadd.xlane.f32.xlu0 %v5609_v5  ;;  %v5606_v7 = vsel %vm1268_vm15, %v11474_v12, 0.0 }
0x2ea3   :  { %5607 = vadd.xlane.f32.xlu0 %v5606_v7 }
0x2eb9   :  { %11269 = vrot.lane.b32.xlu0 %v13146_v25, %s11880_s3 }
0x2f2c   :  { %v5611_v44 = vpop.xlane.xlu0 %5610 }
0x2f2d   :  { %11475 = vrcp.f32 %v5611_v44 }
0x2f30   :  { %v5608_v30 = vpop.xlane.xlu0 %5607 }
0x2f31   :  { %11477 = vrcp.f32 %v5608_v30 }
0x2f34   :  { %v11270_v26 = vpop.permute.xlu0 %11269 }
0x2f35   :  { %v11272_v4 = vunpack.i.h.bf16 %v11270_v26  ;;  %v11271_v53 = vunpack.i.l.bf16 %v11270_v26 }
0x2f37   :  { %v10767_v36 = vpack.c.bf16 %v11272_v4, %v11271_v53  ;;  %v11476_v43 = vpop.eup %11475 }
0x2f38   :  { %v5615_v41 = vmul.f32 %v11476_v43, %v11472_v57 }
0x2f39   :  { %10769 = vmatprep.subr.msk.bf16.mxu1 %vm12365_vm13, %v10767_v36 }
0x2f3a   :  { %10772 = vmatpush3.bf16.msk.msra.mxu1 %vm12365_vm13, %v10767_v36 }
0x2f3b   :  { %v11478_v40 = vpop.eup %11477  ;;  %10775 = vmatprep.subr.msk.bf16.mxu1 %vm12151_vm2, %v10773_v13 }
0x2f3c   :  { %v5614_v28 = vmul.f32 %v11478_v40, %v11474_v12 }
0x2f3e   :  { %9909 = vmatprep.mubr.msk.f32.mxu1 %vm1268_vm15, %v5614_v28 }
0x2f3f   :  { %9910 = vmatmul.mubr.msk.f32.vlgmr.msra.gmra.mrb[48].mxu1 %vm1268_vm15, %v5615_v41 }
0x2f40   :  { %9916 = vmatprep.mubr.msk.f32.mxu1 %vm383_vm1, %v5705_v48 }
0x2f43   :  { %10778 = vmatpush3.bf16.xpose.msk.msra.mxu1 %vm12151_vm2, %v10773_v13 }
0x2f44   :  { %10811 = vmatprep.subr.msk.bf16.mxu1 %vm12212_vm9, %v12543_v45 }
0x2f4a   :  { %9917 = vmatmul.mubr.msk.f32.vlgmr.msra.gmra.mrb[50].mxu1 %vm383_vm1, %v5707_v0 }
0x2f4b   :  { %10814 = vmatpush3.bf16.xpose.msk.msra.mxu1 %vm12212_vm9, %v12543_v45 }
0x2f4c   :  { %10817 = vmatprep.subr.msk.bf16.mxu1 %vm12212_vm9, %v12564_v60 }
0x2f53   :  { %10820 = vmatpush3.bf16.xpose.msk.msra.mxu1 %vm12212_vm9, %v12564_v60 }
0x2f54   :  { %10823 = vmatprep.subr.msk.bf16.mxu1 %vm12212_vm9, %v12584_v6 }
0x2f5b   :  { %10826 = vmatpush3.bf16.xpose.msk.msra.mxu1 %vm12212_vm9, %v12584_v6 }
0x2f5c   :  { %10829 = vmatprep.subr.msk.bf16.mxu1 %vm12212_vm9, %v12604_v15 }
0x2f63   :  { %10832 = vmatpush3.bf16.xpose.msk.msra.mxu1 %vm12212_vm9, %v12604_v15 }
0x2f64   :  { %10859 = vmatprep.subr.msk.bf16.mxu1 %vm12212_vm9, %v12622_v35 }
0x3012   :  { %v9911_v45 = vpop.f32.mrb[48].mxu1 }
0x3013   :  { %v5695_v60 = vpop.f32.mrb[49].mxu1 }
0x301d   :  { %v9918_v27 = vpop.f32.mrb[50].mxu1 }
0x301e   :  { %v5796_v47 = vmul.f32 0.25, %v9918_v27  ;;  %v5786_v57 = vpop.f32.mrb[51].mxu1 }
0x301f   :  { %v5795_v5 = vmul.f32 0.25, %v5786_v57 }
0x3020   :  { %v5800_v6 = vsel %vm1272_vm14, %v5796_v47, -inf }
0x3021   :  { %5801 = vmax.xlane.f32.xlu1 %v5800_v6  ;;  %v5797_v12 = vsel %vm1268_vm15, %v5795_v5, -inf }
0x3022   :  { %5798 = vmax.xlane.f32.xlu0 %v5797_v12 }
0x3032   :  { %5909 = vrot.lane.b32.xlu1 %v13306_v58, %s11882_s10 }
0x3036   :  { %5911 = vrot.lane.b32.xlu1 %v13304_v59, %s11882_s10 }
0x303a   :  { %5917 = vrot.lane.b32.xlu1 %v5695_v60, %s11883_s27 }
0x30ae   :  { %v5802_v15 = vpop.xlane.xlu1 %5801 }
0x30af   :  { %v5804_v7 = vsub.f32 %v5796_v47, %v5802_v15  ;;  %v5799_v44 = vpop.xlane.xlu0 %5798 }
0x30b0   :  { %v5803_v30 = vsub.f32 %v5795_v5, %v5799_v44 }
0x30b1   :  { %v5807_v19 = vmul.f32 1.442695, %v5804_v7  ;;  %v6020_v7 = vstv %s11102_s28 }
0x30b2   :  { %v5805_v26 = vmul.f32 1.442695, %v5803_v30  ;;  %v5910_v0 = vpop.permute.xlu1 %5909 }
0x30b3   :  { %11479 = vpow2.f32 %v5807_v19  ;;  %v5931_v27 = vsel %vm383_vm1, %v13278_v10, %v5910_v0 }
0x30b4   :  { %11481 = vpow2.f32 %v5805_v26 }
0x30bd   :  { %v11480_v17 = vpop.eup %11479 }
0x30be   :  { %v5812_v3 = vsel %vm1272_vm14, %v11480_v17, 0.0  ;;  %v11482_v4 = vpop.eup %11481 }
0x30bf   :  { %5813 = vadd.xlane.f32.xlu0 %v5812_v3  ;;  %v5809_v58 = vsel %vm1268_vm15, %v11482_v4, 0.0 }
0x30c3   :  { %5810 = vadd.xlane.f32.xlu0 %v5809_v58 }
0x30d9   :  { %11279 = vrot.lane.b32.xlu0 %v13146_v25, %s11881_s23 }
0x30dd   :  { %5919 = vrot.lane.b32.xlu0 %v9911_v45, %s11883_s27 }
0x314c   :  { %v5814_v59 = vpop.xlane.xlu0 %5813 }
0x314d   :  { %11483 = vrcp.f32 %v5814_v59 }
0x3150   :  { %v5811_v53 = vpop.xlane.xlu0 %5810 }
0x3151   :  { %11485 = vrcp.f32 %v5811_v53 }
0x3154   :  { %v11280_v36 = vpop.permute.xlu0 %11279 }
0x3155   :  { %v11282_v13 = vunpack.i.h.bf16 %v11280_v36  ;;  %v11281_v43 = vunpack.i.l.bf16 %v11280_v36 }
0x3157   :  { %v10779_v40 = vpack.c.bf16 %v11282_v13, %v11281_v43  ;;  %v11484_v28 = vpop.eup %11483 }
0x3158   :  { %v5818_v48 = vmul.f32 %v11484_v28, %v11480_v17  ;;  %v5920_v45 = vpop.permute.xlu0 %5919 }
0x3159   :  { %10781 = vmatprep.subr.msk.bf16.mxu0 %vm12365_vm13, %v10779_v40 }
0x315a   :  { %10784 = vmatpush3.bf16.msk.msra.mxu0 %vm12365_vm13, %v10779_v40 }
0x315b   :  { %v11486_v41 = vpop.eup %11485  ;;  %10787 = vmatprep.subr.msk.bf16.mxu0 %vm12212_vm9, %v12479_v33 }
0x315c   :  { %v5817_v25 = vmul.f32 %v11486_v41, %v11482_v4 }
0x315e   :  { %9923 = vmatprep.mubr.msk.f32.mxu0 %vm1268_vm15, %v5817_v25 }
0x315f   :  { %9924 = vmatmul.mubr.msk.f32.vlgmr.msra.gmra.mrb[44].mxu0 %vm1268_vm15, %v5818_v48 }
0x3163   :  { %10790 = vmatpush3.bf16.xpose.msk.msra.mxu0 %vm12212_vm9, %v12479_v33 }
0x3164   :  { %10793 = vmatprep.subr.msk.bf16.mxu0 %vm12212_vm9, %v12481_v37 }
0x316b   :  { %10796 = vmatpush3.bf16.xpose.msk.msra.mxu0 %vm12212_vm9, %v12481_v37 }
0x316c   :  { %10799 = vmatprep.subr.msk.bf16.mxu0 %vm12212_vm9, %v12492_v42 }
0x3173   :  { %10802 = vmatpush3.bf16.xpose.msk.msra.mxu0 %vm12212_vm9, %v12492_v42  ;;  %v5912_v42 = vpop.permute.xlu1 %5911 }
0x3174   :  { %10805 = vmatprep.subr.msk.bf16.mxu0 %vm12212_vm9, %v12500_v46 }
0x3177   :  { %v5918_v60 = vpop.permute.xlu1 %5917 }
0x3178   :  { %v5933_v57 = vsel %vm484_vm5, %v5931_v27, %v5918_v60 }
0x317b   :  { %10808 = vmatpush3.bf16.xpose.msk.msra.mxu0 %vm12212_vm9, %v12500_v46  ;;  %v5932_v46 = vsel %vm383_vm1, %v13276_v29, %v5912_v42  ;;  %v11562_v29 = vld [vmem:[%s13939_s9] ss:$0 sm:$0xff] }
0x317c   :  { %10835 = vmatprep.subr.msk.bf16.mxu0 %vm12212_vm9, %v12546_v24  ;;  %v5934_v6 = vsel %vm484_vm5, %v5932_v46, %v5920_v45  ;;  %v11563_v42 = vld [vmem:[%s13940_s18] ss:$0 sm:$0xff] }
0x3232   :  { %v9925_v33 = vpop.f32.mrb[44].mxu0 }
0x3233   :  { %5927 = vrot.lane.b32.xlu0 %v9925_v33, %s11884_s17  ;;  %v5898_v37 = vpop.f32.mrb[45].mxu0 }
0x3234   :  { %5925 = vrot.lane.b32.xlu1 %v5898_v37, %s11884_s17 }
0x32a5   :  { %v5928_v47 = vpop.permute.xlu0 %5927 }
0x32a6   :  { %v5926_v5 = vpop.permute.xlu1 %5925  ;;  %v5936_v15 = vsel %vm2015_vm3, %v5934_v6, %v5928_v47  ;;  %v11564_v47 = vld [vmem:[%s13941_s8] ss:$0 sm:$0xff]  ;;  %v11565_v6 = vld [vmem:[%s13930_s21 + $0x1] ss:$0 sm:$0xff] }
0x32a7   :  { %v5935_v12 = vsel %vm2015_vm3, %v5933_v57, %v5926_v5 }
0x32a8   :  { %9942 = vmatprep.mubr.msk.f32.mxu0 %vm863_vm8, %v5935_v12 }
0x32a9   :  { %9943 = vmatmul.mubr.msk.f32.vlgmr.msra.gmra.mrb[46].mxu0 %vm863_vm8, %v5936_v15 }
0x32aa   :  { %10838 = vmatpush3.bf16.xpose.msk.msra.mxu0 %vm12212_vm9, %v12546_v24 }
0x32ab   :  { %10841 = vmatprep.subr.msk.bf16.mxu0 %vm12212_vm9, %v12568_v63 }
0x32b2   :  { %10844 = vmatpush3.bf16.xpose.msk.msra.mxu0 %vm12212_vm9, %v12568_v63 }
0x32b3   :  { %10847 = vmatprep.subr.msk.bf16.mxu0 %vm12212_vm9, %v12588_v11 }
0x32ba   :  { %10850 = vmatpush3.bf16.xpose.msk.msra.mxu0 %vm12212_vm9, %v12588_v11 }
0x32bb   :  { %10853 = vmatprep.subr.msk.bf16.mxu0 %vm12212_vm9, %v12608_v14 }
0x32c2   :  { %10856 = vmatpush3.bf16.xpose.msk.msra.mxu0 %vm12212_vm9, %v12608_v14 }
0x337c   :  { %v9944_v24 = vpop.f32.mrb[46].mxu0 }
0x337d   :  { %v6015_v63 = vadd.f32 %v11562_v29, %v9944_v24  ;;  %v6009_v10 = vpop.f32.mrb[47].mxu0 }
0x337e   :  { %v6010_v44 = vadd.f32 %v11562_v29, %v6009_v10  ;;  %v11566_v29 = vld [vmem:[%s13931_s29 + $0x1] ss:$0 sm:$0xff] }
0x337f   :  { %v6023_v30 = vmul.f32 %v6020_v7, %v6015_v63 }
0x3380   :  { %v6022_v19 = vmul.f32 %v6020_v7, %v6010_v44 }
0x3381   :  { %v6025_v26 = vadd.f32 %v6023_v30, %v13105_v22  ;;  %v11567_v30 = vld [vmem:[%s13932_s20 + $0x1] ss:$0 sm:$0xff] }
0x3382   :  { %v6024_v11 = vadd.f32 %v6022_v19, %v13075_v2 }
0x3383   :  { %v6029_v17 = vsel %vm2140_vm11, %v6025_v26, 0.0 }
0x3384   :  { %6030 = vadd.xlane.f32.xlu0 %v6029_v17  ;;  %v6026_v3 = vsel %vm863_vm8, %v6024_v11, 0.0 }
0x3385   :  { %6027 = vadd.xlane.f32.xlu1 %v6026_v3 }
0x3411   :  { %v6031_v14 = vpop.xlane.xlu0 %6030 }
0x3412   :  { %v6033_v4 = vmul.f32 0.015625, %v6031_v14  ;;  %v6028_v58 = vpop.xlane.xlu1 %6027 }
0x3413   :  { %v6032_v59 = vmul.f32 0.015625, %v6028_v58 }
0x3414   :  { %v6035_v53 = vsub.f32 %v6025_v26, %v6033_v4 }
0x3415   :  { %v6034_v36 = vsub.f32 %v6024_v11, %v6032_v59 }
0x3416   :  { %v6037_v40 = vmul.f32 %v6035_v53, %v6035_v53 }
0x3417   :  { %v6036_v13 = vmul.f32 %v6034_v36, %v6034_v36 }
0x3418   :  { %v6041_v2 = vsel %vm2140_vm11, %v6037_v40, 0.0 }
0x3419   :  { %v6038_v43 = vsel %vm863_vm8, %v6036_v13, 0.0 }
0x341a   :  { %6039 = vadd.xlane.f32.xlu0 %v6038_v43 }
0x341e   :  { %6042 = vadd.xlane.f32.xlu0 %v6041_v2 }
0x34a7   :  { %v6040_v22 = vpop.xlane.xlu0 %6039 }
0x34a8   :  { %v6044_v28 = vmul.f32 0.015625, %v6040_v22 }
0x34aa   :  { %v6046_v41 = vadd.f32 1e-05, %v6044_v28 }
0x34ab   :  { %v6043_v25 = vpop.xlane.xlu0 %6042 }
0x34ac   :  { %11487 = vrsqrt.f32 %v6046_v41  ;;  %v6045_v48 = vmul.f32 0.015625, %v6043_v25 }
0x34ae   :  { %v6047_v33 = vadd.f32 1e-05, %v6045_v48 }
0x34b0   :  { %11489 = vrsqrt.f32 %v6047_v33 }
0x34b6   :  { %v11488_v37 = vpop.eup %11487 }
0x34b7   :  { %v6050_v0 = vmul.f32 %v11488_v37, %v6034_v36 }
0x34b9   :  { %v6052_v45 = vmul.f32 %v11563_v42, %v6050_v0 }
0x34ba   :  { %v11490_v60 = vpop.eup %11489 }
0x34bb   :  { %v6051_v27 = vmul.f32 %v11490_v60, %v6035_v53  ;;  %v13446_v46 = vadd.f32 %v11564_v47, %v6052_v45 }
0x34bd   :  { %9961 = vmatprep.mubr.msk.f32.mxu1 %vm863_vm8, %v13446_v46  ;;  %9980 = vmatprep.mubr.msk.f32.mxu0 %vm863_vm8, %v13446_v46  ;;  %v6053_v57 = vmul.f32 %v11563_v42, %v6051_v27 }
0x34bf   :  { %v13452_v5 = vadd.f32 %v11564_v47, %v6053_v57 }
0x34c1   :  { %9962 = vmatmul.mubr.msk.f32.vlgmr.msra.gmra.mrb[52].mxu1 %vm863_vm8, %v13452_v5  ;;  %9981 = vmatmul.mubr.msk.f32.vlgmr.msra.gmra.mrb[48].mxu0 %vm863_vm8, %v13452_v5 }
0x34c2   :  { %10862 = vmatpush3.bf16.xpose.msk.msra.mxu1 %vm12212_vm9, %v12622_v35  ;;  %9999 = vmatprep.mubr.msk.f32.mxu1 %vm863_vm8, %v13446_v46 }
0x34c3   :  { %10865 = vmatprep.subr.msk.bf16.mxu1 %vm12212_vm9, %v12637_v8 }
0x34ca   :  { %10868 = vmatpush3.bf16.xpose.msk.msra.mxu1 %vm12212_vm9, %v12637_v8 }
0x34cb   :  { %10871 = vmatprep.subr.msk.bf16.mxu1 %vm12212_vm9, %v12651_v9 }
0x34d2   :  { %10874 = vmatpush3.bf16.xpose.msk.msra.mxu1 %vm12212_vm9, %v12651_v9 }
0x34d3   :  { %10877 = vmatprep.subr.msk.bf16.mxu1 %vm12212_vm9, %v12659_v16 }
0x34da   :  { %10880 = vmatpush3.bf16.xpose.msk.msra.mxu1 %vm12212_vm9, %v12659_v16 }
0x34e1   :  { %10000 = vmatmul.mubr.msk.f32.vlgmr.msra.gmra.mrb[54].mxu1 %vm863_vm8, %v13452_v5 }
0x3594   :  { %v9963_v35 = vpop.f32.mrb[52].mxu1  ;;  %v9982_v8 = vpop.f32.mrb[48].mxu0 }
0x3595   :  { %v6209_v12 = vadd.f32 %v11565_v6, %v9982_v8  ;;  %v6128_v15 = vpop.f32.mrb[53].mxu1  ;;  %v6203_v24 = vpop.f32.mrb[49].mxu0  ;;  %v13495_v16 = vadd.f32 %v11566_v29, %v9963_v35 }
0x3596   :  { %v13485_v9 = vadd.f32 %v11566_v29, %v6128_v15  ;;  %v6204_v63 = vadd.f32 %v11565_v6, %v6203_v24 }
0x3598   :  { %10006 = vmatprep.mubr.msk.f32.mxu0 %vm383_vm1, %v13485_v9  ;;  %v10881_v10 = vpack.c.bf16 %v6209_v12, %v6204_v63  ;;  %v13489_v7 = vpack.i.bf16 %v6209_v12, %v6204_v63 }
0x359a   :  { %10883 = vmatprep.subr.msk.bf16.mxu0 %vm12151_vm2, %v10881_v10 }
0x359b   :  { %10886 = vmatpush3.bf16.xpose.msk.msra.mxu0 %vm12151_vm2, %v10881_v10 }
0x35a2   :  { %10007 = vmatmul.mubr.msk.f32.vlgmr.msra.gmra.mrb[50].mxu0 %vm383_vm1, %v13495_v16 }
0x35b4   :  { %v10001_v44 = vpop.f32.mrb[54].mxu1 }
0x35b5   :  { %v6284_v19 = vadd.f32 %v11567_v30, %v10001_v44  ;;  %v6278_v26 = vpop.f32.mrb[55].mxu1 }
0x35b6   :  { %v6279_v11 = vadd.f32 %v11567_v30, %v6278_v26 }
0x35b8   :  { %v10887_v17 = vpack.c.bf16 %v6284_v19, %v6279_v11  ;;  %v13500_v3 = vpack.i.bf16 %v6284_v19, %v6279_v11 }
0x35ba   :  { %10889 = vmatprep.subr.msk.bf16.mxu1 %vm12365_vm13, %v10887_v17 }
0x35bb   :  { %10892 = vmatpush3.bf16.msk.msra.mxu1 %vm12365_vm13, %v10887_v17 }
0x3675   :  { %v10008_v14 = vpop.f32.mrb[50].mxu0 }
0x3676   :  { %v6375_v4 = vmul.f32 0.25, %v10008_v14  ;;  %v6365_v58 = vpop.f32.mrb[51].mxu0 }
0x3677   :  { %v6374_v59 = vmul.f32 0.25, %v6365_v58 }
0x3678   :  { %v6379_v53 = vsel %vm1272_vm14, %v6375_v4, -inf }
0x3679   :  { %6380 = vmax.xlane.f32.xlu0 %v6379_v53  ;;  %v6376_v36 = vsel %vm1268_vm15, %v6374_v59, -inf }
0x367a   :  { %6377 = vmax.xlane.f32.xlu1 %v6376_v36 }
0x368b   :  { %11284 = vrot.lane.b32.xlu1 %v13489_v7, %s11879_s4 }
0x3706   :  { %v6381_v13 = vpop.xlane.xlu0 %6380 }
0x3707   :  { %v6383_v43 = vsub.f32 %v6375_v4, %v6381_v13  ;;  %v6378_v40 = vpop.xlane.xlu1 %6377 }
0x3708   :  { %v6382_v2 = vsub.f32 %v6374_v59, %v6378_v40 }
0x3709   :  { %v6386_v22 = vmul.f32 1.442695, %v6383_v43 }
0x370a   :  { %v6384_v28 = vmul.f32 1.442695, %v6382_v2 }
0x370b   :  { %11491 = vpow2.f32 %v6386_v22  ;;  %v11285_v41 = vpop.permute.xlu1 %11284 }
0x370c   :  { %11493 = vpow2.f32 %v6384_v28  ;;  %v11287_v25 = vunpack.i.h.bf16 %v11285_v41  ;;  %v11286_v48 = vunpack.i.l.bf16 %v11285_v41 }
0x370e   :  { %v10893_v33 = vpack.c.bf16 %v11287_v25, %v11286_v48 }
0x3710   :  { %10895 = vmatprep.subr.msk.bf16.mxu1 %vm12151_vm2, %v10893_v33 }
0x3715   :  { %v11492_v37 = vpop.eup %11491 }
0x3716   :  { %v11494_v0 = vpop.eup %11493  ;;  %v6391_v42 = vsel %vm1272_vm14, %v11492_v37, 0.0 }
0x3717   :  { %6392 = vadd.xlane.f32.xlu0 %v6391_v42  ;;  %v6388_v45 = vsel %vm1268_vm15, %v11494_v0, 0.0 }
0x3718   :  { %6389 = vadd.xlane.f32.xlu1 %v6388_v45 }
0x3729   :  { %6484 = vrot.lane.b32.xlu1 %v13495_v16, %s11879_s4 }
0x372d   :  { %6482 = vrot.lane.b32.xlu0 %v13485_v9, %s11879_s4 }
0x37a4   :  { %v6393_v60 = vpop.xlane.xlu0 %6392 }
0x37a5   :  { %11495 = vrcp.f32 %v6393_v60  ;;  %v6390_v27 = vpop.xlane.xlu1 %6389 }
0x37a6   :  { %11497 = vrcp.f32 %v6390_v27 }
0x37a8   :  { %v6483_v6 = vpop.permute.xlu0 %6482 }
0x37a9   :  { %v6485_v12 = vpop.permute.xlu1 %6484 }
0x37af   :  { %v11496_v47 = vpop.eup %11495 }
0x37b0   :  { %v11498_v57 = vpop.eup %11497  ;;  %v6397_v8 = vmul.f32 %v11496_v47, %v11492_v37 }
0x37b1   :  { %v6396_v35 = vmul.f32 %v11498_v57, %v11494_v0 }
0x37b3   :  { %10013 = vmatprep.mubr.msk.f32.mxu1 %vm1268_vm15, %v6396_v35 }
0x37b4   :  { %10014 = vmatmul.mubr.msk.f32.vlgmr.msra.gmra.mrb[56].mxu1 %vm1268_vm15, %v6397_v8 }
0x37b5   :  { %10898 = vmatpush3.bf16.xpose.msk.msra.mxu1 %vm12151_vm2, %v10893_v33  ;;  %10020 = vmatprep.mubr.msk.f32.mxu1 %vm383_vm1, %v6483_v6 }
0x37bc   :  { %10021 = vmatmul.mubr.msk.f32.vlgmr.msra.gmra.mrb[58].mxu1 %vm383_vm1, %v6485_v12 }
0x3887   :  { %v13524_v15 = vpop.f32.mrb[56].mxu1 }
0x3888   :  { %v13526_v24 = vpop.f32.mrb[57].mxu1 }
0x388f   :  { %v10022_v29 = vpop.f32.mrb[58].mxu1 }
0x3890   :  { %v6574_v63 = vmul.f32 0.25, %v10022_v29  ;;  %v6564_v10 = vpop.f32.mrb[59].mxu1 }
0x3891   :  { %v6573_v44 = vmul.f32 0.25, %v6564_v10 }
0x3892   :  { %v6578_v30 = vsel %vm1272_vm14, %v6574_v63, -inf }
0x3893   :  { %6579 = vmax.xlane.f32.xlu0 %v6578_v30  ;;  %v6575_v19 = vsel %vm1268_vm15, %v6573_v44, -inf }
0x3894   :  { %6576 = vmax.xlane.f32.xlu1 %v6575_v19 }
0x3920   :  { %v6580_v26 = vpop.xlane.xlu0 %6579 }
0x3921   :  { %v6582_v11 = vsub.f32 %v6574_v63, %v6580_v26  ;;  %v6577_v17 = vpop.xlane.xlu1 %6576 }
0x3922   :  { %v6581_v14 = vsub.f32 %v6573_v44, %v6577_v17 }
0x3923   :  { %v6585_v4 = vmul.f32 1.442695, %v6582_v11 }
0x3924   :  { %v6583_v58 = vmul.f32 1.442695, %v6581_v14 }
0x3925   :  { %11499 = vpow2.f32 %v6585_v4 }
0x3926   :  { %11501 = vpow2.f32 %v6583_v58 }
0x392f   :  { %v11500_v59 = vpop.eup %11499 }
0x3930   :  { %v11502_v53 = vpop.eup %11501  ;;  %v6590_v36 = vsel %vm1272_vm14, %v11500_v59, 0.0 }
0x3931   :  { %6591 = vadd.xlane.f32.xlu1 %v6590_v36  ;;  %v6587_v13 = vsel %vm1268_vm15, %v11502_v53, 0.0 }
0x3932   :  { %6588 = vadd.xlane.f32.xlu0 %v6587_v13 }
0x3942   :  { %11294 = vrot.lane.b32.xlu1 %v13489_v7, %s11880_s3 }
0x3946   :  { %6686 = vrot.lane.b32.xlu1 %v13485_v9, %s11880_s3 }
0x3948   :  { %11289 = vrot.lane.b32.xlu0 %v13500_v3, %s11879_s4 }
0x394a   :  { %6688 = vrot.lane.b32.xlu1 %v13495_v16, %s11880_s3 }
0x39be   :  { %v6592_v43 = vpop.xlane.xlu1 %6591 }
0x39bf   :  { %11503 = vrcp.f32 %v6592_v43  ;;  %v6589_v40 = vpop.xlane.xlu0 %6588 }
0x39c0   :  { %11505 = vrcp.f32 %v6589_v40 }
0x39c2   :  { %v11295_v2 = vpop.permute.xlu1 %11294 }
0x39c3   :  { %v11290_v22 = vpop.permute.xlu0 %11289  ;;  %v11297_v28 = vunpack.i.h.bf16 %v11295_v2  ;;  %v11296_v41 = vunpack.i.l.bf16 %v11295_v2 }
0x39c4   :  { %v11292_v25 = vunpack.i.h.bf16 %v11290_v22  ;;  %v11291_v48 = vunpack.i.l.bf16 %v11290_v22 }
0x39c5   :  { %v10905_v37 = vpack.c.bf16 %v11297_v28, %v11296_v41 }
0x39c6   :  { %v10899_v33 = vpack.c.bf16 %v11292_v25, %v11291_v48  ;;  %v6687_v27 = vpop.permute.xlu1 %6686 }
0x39c8   :  { %10901 = vmatprep.subr.msk.bf16.mxu0 %vm12365_vm13, %v10899_v33 }
0x39c9   :  { %v11504_v0 = vpop.eup %11503  ;;  %10904 = vmatpush3.bf16.msk.msra.mxu0 %vm12365_vm13, %v10899_v33 }
0x39ca   :  { %v11506_v42 = vpop.eup %11505  ;;  %10907 = vmatprep.subr.msk.bf16.mxu0 %vm12151_vm2, %v10905_v37  ;;  %v6596_v60 = vmul.f32 %v11504_v0, %v11500_v59  ;;  %v6689_v47 = vpop.permute.xlu1 %6688 }
0x39cb   :  { %v6595_v45 = vmul.f32 %v11506_v42, %v11502_v53 }
0x39cd   :  { %10027 = vmatprep.mubr.msk.f32.mxu0 %vm1268_vm15, %v6595_v45 }
0x39ce   :  { %10028 = vmatmul.mubr.msk.f32.vlgmr.msra.gmra.mrb[52].mxu0 %vm1268_vm15, %v6596_v60 }
0x39cf   :  { %10034 = vmatprep.mubr.msk.f32.mxu0 %vm383_vm1, %v6687_v27 }
0x39d2   :  { %10910 = vmatpush3.bf16.xpose.msk.msra.mxu0 %vm12151_vm2, %v10905_v37 }
0x39d9   :  { %10035 = vmatmul.mubr.msk.f32.vlgmr.msra.gmra.mrb[54].mxu0 %vm383_vm1, %v6689_v47 }
0x3aa1   :  { %v13552_v57 = vpop.f32.mrb[52].mxu0 }
0x3aa2   :  { %v13554_v35 = vpop.f32.mrb[53].mxu0 }
0x3aac   :  { %v10036_v8 = vpop.f32.mrb[54].mxu0 }
0x3aad   :  { %v6778_v6 = vmul.f32 0.25, %v10036_v8  ;;  %v6768_v12 = vpop.f32.mrb[55].mxu0 }
0x3aae   :  { %v6777_v29 = vmul.f32 0.25, %v6768_v12 }
0x3aaf   :  { %v6782_v63 = vsel %vm1272_vm14, %v6778_v6, -inf }
0x3ab0   :  { %6783 = vmax.xlane.f32.xlu1 %v6782_v63  ;;  %v6779_v10 = vsel %vm1268_vm15, %v6777_v29, -inf }
0x3ab1   :  { %6780 = vmax.xlane.f32.xlu0 %v6779_v10 }
0x3ac1   :  { %11304 = vrot.lane.b32.xlu1 %v13489_v7, %s11881_s23 }
0x3ac5   :  { %6889 = vrot.lane.b32.xlu1 %v13485_v9, %s11881_s23 }
0x3ac9   :  { %6891 = vrot.lane.b32.xlu1 %v13495_v16, %s11881_s23 }
0x3b3d   :  { %v6784_v44 = vpop.xlane.xlu1 %6783 }
0x3b3e   :  { %v6786_v30 = vsub.f32 %v6778_v6, %v6784_v44  ;;  %v6781_v19 = vpop.xlane.xlu0 %6780 }
0x3b3f   :  { %v6785_v26 = vsub.f32 %v6777_v29, %v6781_v19 }
0x3b40   :  { %v6789_v11 = vmul.f32 1.442695, %v6786_v30 }
0x3b41   :  { %v6787_v17 = vmul.f32 1.442695, %v6785_v26  ;;  %v11305_v59 = vpop.permute.xlu1 %11304 }
0x3b42   :  { %11507 = vpow2.f32 %v6789_v11  ;;  %v11307_v36 = vunpack.i.h.bf16 %v11305_v59  ;;  %v11306_v13 = vunpack.i.l.bf16 %v11305_v59 }
0x3b43   :  { %11509 = vpow2.f32 %v6787_v17 }
0x3b44   :  { %v10917_v22 = vpack.c.bf16 %v11307_v36, %v11306_v13 }
0x3b45   :  { %v6890_v33 = vpop.permute.xlu1 %6889 }
0x3b49   :  { %v6892_v37 = vpop.permute.xlu1 %6891 }
0x3b4c   :  { %v11508_v14 = vpop.eup %11507 }
0x3b4d   :  { %v6794_v4 = vsel %vm1272_vm14, %v11508_v14, 0.0  ;;  %v11510_v58 = vpop.eup %11509 }
0x3b4e   :  { %6795 = vadd.xlane.f32.xlu0 %v6794_v4  ;;  %v6791_v7 = vsel %vm1268_vm15, %v11510_v58, 0.0 }
0x3b52   :  { %6792 = vadd.xlane.f32.xlu0 %v6791_v7  ;;  %v13951_v7 = vld [vmem:[#allocation41_spill] sm:$0xff] }
0x3b68   :  { %11299 = vrot.lane.b32.xlu0 %v13500_v3, %s11880_s3 }
0x3bdb   :  { %v6796_v9 = vpop.xlane.xlu0 %6795 }
0x3bdc   :  { %11511 = vrcp.f32 %v6796_v9 }
0x3bdf   :  { %v6793_v16 = vpop.xlane.xlu0 %6792 }
0x3be0   :  { %11513 = vrcp.f32 %v6793_v16 }
0x3be3   :  { %v11300_v53 = vpop.permute.xlu0 %11299 }
0x3be4   :  { %v11302_v43 = vunpack.i.h.bf16 %v11300_v53  ;;  %v11301_v40 = vunpack.i.l.bf16 %v11300_v53 }
0x3be6   :  { %v10911_v2 = vpack.c.bf16 %v11302_v43, %v11301_v40  ;;  %v11512_v28 = vpop.eup %11511 }
0x3be7   :  { %v6800_v48 = vmul.f32 %v11512_v28, %v11508_v14 }
0x3be8   :  { %10913 = vmatprep.subr.msk.bf16.mxu1 %vm12365_vm13, %v10911_v2 }
0x3be9   :  { %10916 = vmatpush3.bf16.msk.msra.mxu1 %vm12365_vm13, %v10911_v2 }
0x3bea   :  { %v11514_v41 = vpop.eup %11513  ;;  %10919 = vmatprep.subr.msk.bf16.mxu1 %vm12151_vm2, %v10917_v22 }
0x3beb   :  { %v6799_v25 = vmul.f32 %v11514_v41, %v11510_v58 }
0x3bed   :  { %10041 = vmatprep.mubr.msk.f32.mxu1 %vm1268_vm15, %v6799_v25  ;;  %v7205_v25 = vstv %s11104_s19 }
0x3bee   :  { %10042 = vmatmul.mubr.msk.f32.vlgmr.msra.gmra.mrb[60].mxu1 %vm1268_vm15, %v6800_v48 }
0x3bef   :  { %10048 = vmatprep.mubr.msk.f32.mxu1 %vm383_vm1, %v6890_v33 }
0x3bf2   :  { %10922 = vmatpush3.bf16.xpose.msk.msra.mxu1 %vm12151_vm2, %v10917_v22 }
0x3bf3   :  { %10955 = vmatprep.subr.msk.bf16.mxu1 %vm12212_vm9, %v12860_v61 }
0x3bf9   :  { %10049 = vmatmul.mubr.msk.f32.vlgmr.msra.gmra.mrb[62].mxu1 %vm383_vm1, %v6892_v37 }
0x3bfa   :  { %10958 = vmatpush3.bf16.xpose.msk.msra.mxu1 %vm12212_vm9, %v12860_v61 }
0x3bfb   :  { %10961 = vmatprep.subr.msk.bf16.mxu1 %vm12212_vm9, %v12880_v55 }
0x3c02   :  { %10964 = vmatpush3.bf16.xpose.msk.msra.mxu1 %vm12212_vm9, %v12880_v55 }
0x3c03   :  { %10967 = vmatprep.subr.msk.bf16.mxu1 %vm12212_vm9, %v12898_v20 }
0x3c0a   :  { %10970 = vmatpush3.bf16.xpose.msk.msra.mxu1 %vm12212_vm9, %v12898_v20 }
0x3c0b   :  { %10973 = vmatprep.subr.msk.bf16.mxu1 %vm12212_vm9, %v12916_v62 }
0x3c12   :  { %10976 = vmatpush3.bf16.xpose.msk.msra.mxu1 %vm12212_vm9, %v12916_v62 }
0x3c13   :  { %11003 = vmatprep.subr.msk.bf16.mxu1 %vm12212_vm9, %v12932_v18 }
0x3cc1   :  { %v10043_v61 = vpop.f32.mrb[60].mxu1 }
0x3cc2   :  { %v6880_v55 = vpop.f32.mrb[61].mxu1 }
0x3ccc   :  { %v10050_v0 = vpop.f32.mrb[62].mxu1 }
0x3ccd   :  { %v6981_v42 = vmul.f32 0.25, %v10050_v0  ;;  %v6971_v45 = vpop.f32.mrb[63].mxu1 }
0x3cce   :  { %v6980_v60 = vmul.f32 0.25, %v6971_v45 }
0x3ccf   :  { %v6985_v20 = vsel %vm1272_vm14, %v6981_v42, -inf }
0x3cd0   :  { %6986 = vmax.xlane.f32.xlu1 %v6985_v20  ;;  %v6982_v27 = vsel %vm1268_vm15, %v6980_v60, -inf }
0x3cd1   :  { %6983 = vmax.xlane.f32.xlu0 %v6982_v27 }
0x3ce1   :  { %7094 = vrot.lane.b32.xlu1 %v13554_v35, %s11882_s10 }
0x3ce5   :  { %7096 = vrot.lane.b32.xlu1 %v13552_v57, %s11882_s10 }
0x3ce9   :  { %7102 = vrot.lane.b32.xlu1 %v6880_v55, %s11883_s27 }
0x3d5d   :  { %v6987_v62 = vpop.xlane.xlu1 %6986 }
0x3d5e   :  { %v6989_v47 = vsub.f32 %v6981_v42, %v6987_v62  ;;  %v6984_v8 = vpop.xlane.xlu0 %6983 }
0x3d5f   :  { %v6988_v6 = vsub.f32 %v6980_v60, %v6984_v8 }
0x3d60   :  { %v6992_v12 = vmul.f32 1.442695, %v6989_v47 }
0x3d61   :  { %v6990_v29 = vmul.f32 1.442695, %v6988_v6  ;;  %v7095_v9 = vpop.permute.xlu1 %7094 }
0x3d62   :  { %11515 = vpow2.f32 %v6992_v12  ;;  %v7116_v53 = vsel %vm383_vm1, %v13526_v24, %v7095_v9  ;;  %v11568_v24 = vld [vmem:[%s13939_s9 + $0x1] ss:$0 sm:$0xff]  ;;  %v11571_v9 = vld [vmem:[%s13946_s26] ss:$0 sm:$0xff] }
0x3d63   :  { %11517 = vpow2.f32 %v6990_v29 }
0x3d6c   :  { %v11516_v63 = vpop.eup %11515 }
0x3d6d   :  { %v6997_v10 = vsel %vm1272_vm14, %v11516_v63, 0.0  ;;  %v11518_v44 = vpop.eup %11517 }
0x3d6e   :  { %6998 = vadd.xlane.f32.xlu0 %v6997_v10  ;;  %v6994_v35 = vsel %vm1268_vm15, %v11518_v44, 0.0 }
0x3d72   :  { %6995 = vadd.xlane.f32.xlu0 %v6994_v35 }
0x3d88   :  { %11309 = vrot.lane.b32.xlu0 %v13500_v3, %s11881_s23 }
0x3d8c   :  { %7104 = vrot.lane.b32.xlu0 %v10043_v61, %s11883_s27 }
0x3dfb   :  { %v6999_v57 = vpop.xlane.xlu0 %6998 }
0x3dfc   :  { %11519 = vrcp.f32 %v6999_v57 }
0x3dff   :  { %v6996_v30 = vpop.xlane.xlu0 %6995 }
0x3e00   :  { %11521 = vrcp.f32 %v6996_v30  ;;  %v11569_v30 = vld [vmem:[%s13940_s18 + $0x1] ss:$0 sm:$0xff] }
0x3e03   :  { %v11310_v19 = vpop.permute.xlu0 %11309 }
0x3e04   :  { %v11312_v26 = vunpack.i.h.bf16 %v11310_v19  ;;  %v11311_v11 = vunpack.i.l.bf16 %v11310_v19 }
0x3e06   :  { %v10923_v17 = vpack.c.bf16 %v11312_v26, %v11311_v11  ;;  %v11520_v14 = vpop.eup %11519 }
0x3e07   :  { %v7003_v58 = vmul.f32 %v11520_v14, %v11516_v63  ;;  %v7105_v16 = vpop.permute.xlu0 %7104 }
0x3e08   :  { %10925 = vmatprep.subr.msk.bf16.mxu0 %vm12365_vm13, %v10923_v17 }
0x3e09   :  { %10928 = vmatpush3.bf16.msk.msra.mxu0 %vm12365_vm13, %v10923_v17  ;;  %v11570_v17 = vld [vmem:[%s13941_s8 + $0x1] ss:$0 sm:$0xff] }
0x3e0a   :  { %v11522_v4 = vpop.eup %11521  ;;  %10931 = vmatprep.subr.msk.bf16.mxu0 %vm12212_vm9, %v12799_v21 }
0x3e0b   :  { %v7002_v3 = vmul.f32 %v11522_v4, %v11518_v44 }
0x3e0d   :  { %10055 = vmatprep.mubr.msk.f32.mxu0 %vm1268_vm15, %v7002_v3 }
0x3e0e   :  { %10056 = vmatmul.mubr.msk.f32.vlgmr.msra.gmra.mrb[56].mxu0 %vm1268_vm15, %v7003_v58  ;;  %v13953_v58 = vld [vmem:[#allocation43_spill] sm:$0xff] }
0x3e12   :  { %10934 = vmatpush3.bf16.xpose.msk.msra.mxu0 %vm12212_vm9, %v12799_v21 }
0x3e13   :  { %10937 = vmatprep.subr.msk.bf16.mxu0 %vm12212_vm9, %v12801_v1 }
0x3e1a   :  { %10940 = vmatpush3.bf16.xpose.msk.msra.mxu0 %vm12212_vm9, %v12801_v1 }
0x3e1b   :  { %10943 = vmatprep.subr.msk.bf16.mxu0 %vm12212_vm9, %v12812_v51 }
0x3e22   :  { %10946 = vmatpush3.bf16.xpose.msk.msra.mxu0 %vm12212_vm9, %v12812_v51  ;;  %v7097_v51 = vpop.permute.xlu1 %7096 }
0x3e23   :  { %10949 = vmatprep.subr.msk.bf16.mxu0 %vm12212_vm9, %v13951_v7  ;;  %v7117_v13 = vsel %vm383_vm1, %v13524_v15, %v7097_v51  ;;  %v13952_v15 = vld [vmem:[#allocation42_spill] sm:$0xff] }
0x3e24   :  { %v7119_v2 = vsel %vm484_vm5, %v7117_v13, %v7105_v16 }
0x3e26   :  { %v7103_v59 = vpop.permute.xlu1 %7102 }
0x3e27   :  { %v7118_v43 = vsel %vm484_vm5, %v7116_v53, %v7103_v59  ;;  %v11572_v53 = vld [vmem:[%s13947_s25] ss:$0 sm:$0xff] }
0x3e2a   :  { %10952 = vmatpush3.bf16.xpose.msk.msra.mxu0 %vm12212_vm9, %v13951_v7  ;;  %v13954_v7 = vld [vmem:[#allocation44_spill] sm:$0xff] }
0x3e2b   :  { %10979 = vmatprep.subr.msk.bf16.mxu0 %vm12212_vm9, %v12862_v49 }
0x3ee1   :  { %v10057_v21 = vpop.f32.mrb[56].mxu0 }
0x3ee2   :  { %7112 = vrot.lane.b32.xlu0 %v10057_v21, %s11884_s17  ;;  %v7083_v1 = vpop.f32.mrb[57].mxu0  ;;  %v13955_v21 = vld [vmem:[#allocation45_spill] sm:$0xff] }
0x3ee3   :  { %7110 = vrot.lane.b32.xlu1 %v7083_v1, %s11884_s17 }
0x3f54   :  { %v7113_v36 = vpop.permute.xlu0 %7112 }
0x3f55   :  { %v7111_v40 = vpop.permute.xlu1 %7110  ;;  %v7121_v28 = vsel %vm2015_vm3, %v7119_v2, %v7113_v36 }
0x3f56   :  { %v7120_v22 = vsel %vm2015_vm3, %v7118_v43, %v7111_v40 }
0x3f57   :  { %10074 = vmatprep.mubr.msk.f32.mxu0 %vm863_vm8, %v7120_v22 }
0x3f58   :  { %10075 = vmatmul.mubr.msk.f32.vlgmr.msra.gmra.mrb[58].mxu0 %vm863_vm8, %v7121_v28  ;;  %v11573_v28 = vld [vmem:[%s12035_s6] ss:$0 sm:$0xff]  ;;  %s11885_s6 = smov [#allocation18]  }
0x3f59   :  { %10982 = vmatpush3.bf16.xpose.msk.msra.mxu0 %vm12212_vm9, %v12862_v49  ;;  %s8417_s24 = sshll.u32 %s11885_s6, 4  ;;  %s8418_s24 = int_to_ptr.vmem [resolvable:$true] %s8417_s24 }
0x3f5a   :  { %10985 = vmatprep.subr.msk.bf16.mxu0 %vm12212_vm9, %v12882_v31  ;;  %s11773_s1 = scalar_lea.vmem %s8418_s24, 32  ;;  %p11778_p3 = scmp.lt.s32.totalorder %s8418_s24, %s8418_s24 }
0x3f5b   :  { %p11774_p2 = scmp.ne.s32.totalorder %s8418_s24, %s11773_s1  ;;  %p11779_p4 = scmp.lt.s32.totalorder %s11773_s1, %s11773_s1 }
0x3f5d   :  { %p11780_p5 = por %p11779_p4, %p11778_p3 }
0x3f5f   :  { %p11781_p6 = pnand %p11780_p5, %p11774_p2 }
0x3f61   :  { %10988 = vmatpush3.bf16.xpose.msk.msra.mxu0 %vm12212_vm9, %v12882_v31 }
0x3f62   :  { %10991 = vmatprep.subr.msk.bf16.mxu0 %vm12212_vm9, %v12900_v39 }
0x3f69   :  { %10994 = vmatpush3.bf16.xpose.msk.msra.mxu0 %vm12212_vm9, %v12900_v39 }
0x3f6a   :  { %10997 = vmatprep.subr.msk.bf16.mxu0 %vm12212_vm9, %v13952_v15 }
0x3f71   :  { %11000 = vmatpush3.bf16.xpose.msk.msra.mxu0 %vm12212_vm9, %v13952_v15 }
0x402b   :  { %v10076_v49 = vpop.f32.mrb[58].mxu0 }
0x402c   :  { %v7200_v31 = vadd.f32 %v11568_v24, %v10076_v49  ;;  %v7194_v41 = vpop.f32.mrb[59].mxu0 }
0x402d   :  { %v7195_v48 = vadd.f32 %v11568_v24, %v7194_v41 }
0x402e   :  { %v7208_v33 = vmul.f32 %v7205_v25, %v7200_v31 }
0x402f   :  { %v7207_v37 = vmul.f32 %v7205_v25, %v7195_v48 }
0x4030   :  { %v7210_v61 = vadd.f32 %v7208_v33, %v13452_v5 }
0x4031   :  { %v7209_v39 = vadd.f32 %v7207_v37, %v13446_v46 }
0x4032   :  { %v7214_v55 = vsel %vm2140_vm11, %v7210_v61, 0.0 }
0x4033   :  { %7215 = vadd.xlane.f32.xlu0 %v7214_v55  ;;  %v7211_v0 = vsel %vm863_vm8, %v7209_v39, 0.0 }
0x4034   :  { %7212 = vadd.xlane.f32.xlu1 %v7211_v0 }
0x40c0   :  { %v7216_v42 = vpop.xlane.xlu0 %7215 }
0x40c1   :  { %v7218_v45 = vmul.f32 0.015625, %v7216_v42  ;;  %v7213_v60 = vpop.xlane.xlu1 %7212 }
0x40c2   :  { %v7217_v20 = vmul.f32 0.015625, %v7213_v60 }
0x40c3   :  { %v7220_v27 = vsub.f32 %v7210_v61, %v7218_v45 }
0x40c4   :  { %v7219_v62 = vsub.f32 %v7209_v39, %v7217_v20 }
0x40c5   :  { %v7222_v6 = vmul.f32 %v7220_v27, %v7220_v27 }
0x40c6   :  { %v7221_v47 = vmul.f32 %v7219_v62, %v7219_v62 }
0x40c7   :  { %v7226_v46 = vsel %vm2140_vm11, %v7222_v6, 0.0 }
0x40c8   :  { %v7223_v8 = vsel %vm863_vm8, %v7221_v47, 0.0 }
0x40c9   :  { %7224 = vadd.xlane.f32.xlu0 %v7223_v8 }
0x40cd   :  { %7227 = vadd.xlane.f32.xlu0 %v7226_v46 }
0x4156   :  { %v7225_v5 = vpop.xlane.xlu0 %7224 }
0x4157   :  { %v7229_v12 = vmul.f32 0.015625, %v7225_v5 }
0x4159   :  { %v7231_v29 = vadd.f32 1e-05, %v7229_v12 }
0x415a   :  { %v7228_v63 = vpop.xlane.xlu0 %7227 }
0x415b   :  { %11523 = vrsqrt.f32 %v7231_v29  ;;  %v7230_v10 = vmul.f32 0.015625, %v7228_v63 }
0x415d   :  { %v7232_v44 = vadd.f32 1e-05, %v7230_v10 }
0x415f   :  { %11525 = vrsqrt.f32 %v7232_v44 }
0x4165   :  { %v11524_v35 = vpop.eup %11523 }
0x4166   :  { %v7235_v57 = vmul.f32 %v11524_v35, %v7219_v62 }
0x4168   :  { %v7237_v19 = vmul.f32 %v11569_v30, %v7235_v57 }
0x4169   :  { %v11526_v26 = vpop.eup %11525 }
0x416a   :  { %v7236_v11 = vmul.f32 %v11526_v26, %v7220_v27  ;;  %v7239_v14 = vadd.f32 %v11570_v17, %v7237_v19 }
0x416c   :  { %10093 = vmatprep.mubr.msk.f32.mxu1 %vm863_vm8, %v7239_v14  ;;  %10112 = vmatprep.mubr.msk.f32.mxu0 %vm863_vm8, %v7239_v14  ;;  %v7238_v4 = vmul.f32 %v11569_v30, %v7236_v11 }
0x416e   :  { %v7240_v3 = vadd.f32 %v11570_v17, %v7238_v4 }
0x4170   :  { %10094 = vmatmul.mubr.msk.f32.vlgmr.msra.gmra.mrb[64].mxu1 %vm863_vm8, %v7240_v3  ;;  %10113 = vmatmul.mubr.msk.f32.vlgmr.msra.gmra.mrb[60].mxu0 %vm863_vm8, %v7240_v3 }
0x4171   :  { %11006 = vmatpush3.bf16.xpose.msk.msra.mxu1 %vm12212_vm9, %v12932_v18  ;;  %10131 = vmatprep.mubr.msk.f32.mxu1 %vm863_vm8, %v7239_v14 }
0x4172   :  { %11009 = vmatprep.subr.msk.bf16.mxu1 %vm12212_vm9, %v13953_v58 }
0x4179   :  { %11012 = vmatpush3.bf16.xpose.msk.msra.mxu1 %vm12212_vm9, %v13953_v58 }
0x417a   :  { %11015 = vmatprep.subr.msk.bf16.mxu1 %vm12212_vm9, %v13954_v7 }
0x4181   :  { %11018 = vmatpush3.bf16.xpose.msk.msra.mxu1 %vm12212_vm9, %v13954_v7 }
0x4182   :  { %11021 = vmatprep.subr.msk.bf16.mxu1 %vm12212_vm9, %v13955_v21 }
0x4189   :  { %11024 = vmatpush3.bf16.xpose.msk.msra.mxu1 %vm12212_vm9, %v13955_v21 }
0x4190   :  { %10132 = vmatmul.mubr.msk.f32.vlgmr.msra.gmra.mrb[66].mxu1 %vm863_vm8, %v7240_v3 }
0x4243   :  { %v10095_v18 = vpop.f32.mrb[64].mxu1  ;;  %v10114_v1 = vpop.f32.mrb[60].mxu0 }
0x4244   :  { %v7394_v51 = vadd.f32 %v11571_v9, %v10114_v1  ;;  %v7313_v16 = vpop.f32.mrb[65].mxu1  ;;  %v7388_v59 = vpop.f32.mrb[61].mxu0  ;;  %v13733_v2 = vadd.f32 %v11572_v53, %v10095_v18 }
0x4245   :  { %v13723_v36 = vadd.f32 %v11572_v53, %v7313_v16  ;;  %v7389_v13 = vadd.f32 %v11571_v9, %v7388_v59 }
0x4247   :  { %10138 = vmatprep.mubr.msk.f32.mxu0 %vm383_vm1, %v13723_v36  ;;  %v11025_v43 = vpack.c.bf16 %v7394_v51, %v7389_v13  ;;  %v13727_v40 = vpack.i.bf16 %v7394_v51, %v7389_v13 }
0x4249   :  { %11027 = vmatprep.subr.msk.bf16.mxu0 %vm12151_vm2, %v11025_v43 }
0x424a   :  { %11030 = vmatpush3.bf16.xpose.msk.msra.mxu0 %vm12151_vm2, %v11025_v43 }
0x4251   :  { %10139 = vmatmul.mubr.msk.f32.vlgmr.msra.gmra.mrb[62].mxu0 %vm383_vm1, %v13733_v2 }
0x4263   :  { %v10133_v22 = vpop.f32.mrb[66].mxu1 }
0x4264   :  { %v7469_v15 = vadd.f32 %v11573_v28, %v10133_v22  ;;  %v7463_v49 = vpop.f32.mrb[67].mxu1 }
0x4265   :  { %v7464_v24 = vadd.f32 %v11573_v28, %v7463_v49 }
0x4267   :  { %v11031_v31 = vpack.c.bf16 %v7469_v15, %v7464_v24  ;;  %v13738_v41 = vpack.i.bf16 %v7469_v15, %v7464_v24 }
0x4269   :  { %11033 = vmatprep.subr.msk.bf16.mxu1 %vm12365_vm13, %v11031_v31 }
0x426a   :  { %11036 = vmatpush3.bf16.msk.msra.mxu1 %vm12365_vm13, %v11031_v31 }
0x4324   :  { %v10140_v25 = vpop.f32.mrb[62].mxu0 }
0x4325   :  { %v7560_v48 = vmul.f32 0.25, %v10140_v25  ;;  %v7550_v33 = vpop.f32.mrb[63].mxu0 }
0x4326   :  { %v7559_v37 = vmul.f32 0.25, %v7550_v33 }
0x4327   :  { %v7564_v61 = vsel %vm1272_vm14, %v7560_v48, -inf }
0x4328   :  { %7565 = vmax.xlane.f32.xlu0 %v7564_v61  ;;  %v7561_v39 = vsel %vm1268_vm15, %v7559_v37, -inf }
0x4329   :  { %7562 = vmax.xlane.f32.xlu1 %v7561_v39 }
0x433a   :  { %11314 = vrot.lane.b32.xlu1 %v13727_v40, %s11879_s4 }
0x43b5   :  { %v7566_v55 = vpop.xlane.xlu0 %7565 }
0x43b6   :  { %v7568_v0 = vsub.f32 %v7560_v48, %v7566_v55  ;;  %v7563_v42 = vpop.xlane.xlu1 %7562 }
0x43b7   :  { %v7567_v45 = vsub.f32 %v7559_v37, %v7563_v42 }
0x43b8   :  { %v7571_v60 = vmul.f32 1.442695, %v7568_v0 }
0x43b9   :  { %v7569_v20 = vmul.f32 1.442695, %v7567_v45 }
0x43ba   :  { %11527 = vpow2.f32 %v7571_v60  ;;  %v11315_v27 = vpop.permute.xlu1 %11314 }
0x43bb   :  { %11529 = vpow2.f32 %v7569_v20  ;;  %v11317_v62 = vunpack.i.h.bf16 %v11315_v27  ;;  %v11316_v47 = vunpack.i.l.bf16 %v11315_v27 }
0x43bd   :  { %v11037_v8 = vpack.c.bf16 %v11317_v62, %v11316_v47 }
0x43bf   :  { %11039 = vmatprep.subr.msk.bf16.mxu1 %vm12151_vm2, %v11037_v8 }
0x43c4   :  { %v11528_v6 = vpop.eup %11527 }
0x43c5   :  { %v11530_v46 = vpop.eup %11529  ;;  %v7576_v5 = vsel %vm1272_vm14, %v11528_v6, 0.0 }
0x43c6   :  { %7577 = vadd.xlane.f32.xlu0 %v7576_v5  ;;  %v7573_v12 = vsel %vm1268_vm15, %v11530_v46, 0.0 }
0x43c7   :  { %7574 = vadd.xlane.f32.xlu1 %v7573_v12 }
0x43d8   :  { %7669 = vrot.lane.b32.xlu1 %v13733_v2, %s11879_s4 }
0x43dc   :  { %7667 = vrot.lane.b32.xlu0 %v13723_v36, %s11879_s4 }
0x4453   :  { %v7578_v29 = vpop.xlane.xlu0 %7577 }
0x4454   :  { %11531 = vrcp.f32 %v7578_v29  ;;  %v7575_v63 = vpop.xlane.xlu1 %7574 }
0x4455   :  { %11533 = vrcp.f32 %v7575_v63 }
0x4457   :  { %v7668_v30 = vpop.permute.xlu0 %7667 }
0x4458   :  { %v7670_v19 = vpop.permute.xlu1 %7669 }
0x445e   :  { %v11532_v10 = vpop.eup %11531 }
0x445f   :  { %v11534_v44 = vpop.eup %11533  ;;  %v7582_v57 = vmul.f32 %v11532_v10, %v11528_v6 }
0x4460   :  { %v7581_v35 = vmul.f32 %v11534_v44, %v11530_v46 }
0x4462   :  { %10145 = vmatprep.mubr.msk.f32.mxu1 %vm1268_vm15, %v7581_v35 }
0x4463   :  { %10146 = vmatmul.mubr.msk.f32.vlgmr.msra.gmra.mrb[68].mxu1 %vm1268_vm15, %v7582_v57 }
0x4464   :  { %11042 = vmatpush3.bf16.xpose.msk.msra.mxu1 %vm12151_vm2, %v11037_v8  ;;  %10152 = vmatprep.mubr.msk.f32.mxu1 %vm383_vm1, %v7668_v30 }
0x446b   :  { %10153 = vmatmul.mubr.msk.f32.vlgmr.msra.gmra.mrb[70].mxu1 %vm383_vm1, %v7670_v19 }
0x4536   :  { %v13762_v26 = vpop.f32.mrb[68].mxu1 }
0x4537   :  { %v13764_v11 = vpop.f32.mrb[69].mxu1 }
0x453e   :  { %v10154_v17 = vpop.f32.mrb[70].mxu1 }
0x453f   :  { %v7759_v14 = vmul.f32 0.25, %v10154_v17  ;;  %v7749_v4 = vpop.f32.mrb[71].mxu1 }
0x4540   :  { %v7758_v3 = vmul.f32 0.25, %v7749_v4 }
0x4541   :  { %v7763_v58 = vsel %vm1272_vm14, %v7759_v14, -inf }
0x4542   :  { %7764 = vmax.xlane.f32.xlu0 %v7763_v58  ;;  %v7760_v7 = vsel %vm1268_vm15, %v7758_v3, -inf }
0x4543   :  { %7761 = vmax.xlane.f32.xlu1 %v7760_v7 }
0x45cf   :  { %v7765_v21 = vpop.xlane.xlu0 %7764 }
0x45d0   :  { %v7767_v18 = vsub.f32 %v7759_v14, %v7765_v21  ;;  %v7762_v1 = vpop.xlane.xlu1 %7761 }
0x45d1   :  { %v7766_v9 = vsub.f32 %v7758_v3, %v7762_v1 }
0x45d2   :  { %v7770_v51 = vmul.f32 1.442695, %v7767_v18 }
0x45d3   :  { %v7768_v16 = vmul.f32 1.442695, %v7766_v9 }
0x45d4   :  { %11535 = vpow2.f32 %v7770_v51 }
0x45d5   :  { %11537 = vpow2.f32 %v7768_v16 }
0x45de   :  { %v11536_v59 = vpop.eup %11535 }
0x45df   :  { %v11538_v53 = vpop.eup %11537  ;;  %v7775_v13 = vsel %vm1272_vm14, %v11536_v59, 0.0 }
0x45e0   :  { %7776 = vadd.xlane.f32.xlu1 %v7775_v13  ;;  %v7772_v43 = vsel %vm1268_vm15, %v11538_v53, 0.0 }
0x45e1   :  { %7773 = vadd.xlane.f32.xlu0 %v7772_v43 }
0x45f1   :  { %11324 = vrot.lane.b32.xlu1 %v13727_v40, %s11880_s3 }
0x45f5   :  { %7871 = vrot.lane.b32.xlu1 %v13723_v36, %s11880_s3 }
0x45f7   :  { %11319 = vrot.lane.b32.xlu0 %v13738_v41, %s11879_s4 }
0x45f9   :  { %7873 = vrot.lane.b32.xlu1 %v13733_v2, %s11880_s3 }
0x466d   :  { %v7777_v22 = vpop.xlane.xlu1 %7776 }
0x466e   :  { %11539 = vrcp.f32 %v7777_v22  ;;  %v7774_v28 = vpop.xlane.xlu0 %7773 }
0x466f   :  { %11541 = vrcp.f32 %v7774_v28 }
0x4671   :  { %v11325_v15 = vpop.permute.xlu1 %11324 }
0x4672   :  { %v11320_v49 = vpop.permute.xlu0 %11319  ;;  %v11327_v24 = vunpack.i.h.bf16 %v11325_v15  ;;  %v11326_v31 = vunpack.i.l.bf16 %v11325_v15 }
0x4673   :  { %v11322_v25 = vunpack.i.h.bf16 %v11320_v49  ;;  %v11321_v48 = vunpack.i.l.bf16 %v11320_v49 }
0x4674   :  { %v11049_v37 = vpack.c.bf16 %v11327_v24, %v11326_v31 }
0x4675   :  { %v11043_v33 = vpack.c.bf16 %v11322_v25, %v11321_v48  ;;  %v7872_v42 = vpop.permute.xlu1 %7871 }
0x4677   :  { %11045 = vmatprep.subr.msk.bf16.mxu0 %vm12365_vm13, %v11043_v33 }
0x4678   :  { %v11540_v61 = vpop.eup %11539  ;;  %11048 = vmatpush3.bf16.msk.msra.mxu0 %vm12365_vm13, %v11043_v33 }
0x4679   :  { %v11542_v39 = vpop.eup %11541  ;;  %11051 = vmatprep.subr.msk.bf16.mxu0 %vm12151_vm2, %v11049_v37  ;;  %v7781_v0 = vmul.f32 %v11540_v61, %v11536_v59  ;;  %v7874_v45 = vpop.permute.xlu1 %7873 }
0x467a   :  { %v7780_v55 = vmul.f32 %v11542_v39, %v11538_v53 }
0x467c   :  { %10159 = vmatprep.mubr.msk.f32.mxu0 %vm1268_vm15, %v7780_v55 }
0x467d   :  { %10160 = vmatmul.mubr.msk.f32.vlgmr.msra.gmra.mrb[64].mxu0 %vm1268_vm15, %v7781_v0 }
0x467e   :  { %10166 = vmatprep.mubr.msk.f32.mxu0 %vm383_vm1, %v7872_v42 }
0x4681   :  { %11054 = vmatpush3.bf16.xpose.msk.msra.mxu0 %vm12151_vm2, %v11049_v37 }
0x4688   :  { %10167 = vmatmul.mubr.msk.f32.vlgmr.msra.gmra.mrb[66].mxu0 %vm383_vm1, %v7874_v45 }
0x4750   :  { %v13790_v60 = vpop.f32.mrb[64].mxu0 }
0x4751   :  { %v7862_v20 = vpop.f32.mrb[65].mxu0 }
0x475b   :  { %v10168_v27 = vpop.f32.mrb[66].mxu0 }
0x475c   :  { %v7963_v62 = vmul.f32 0.25, %v10168_v27  ;;  %v7953_v47 = vpop.f32.mrb[67].mxu0 }
0x475d   :  { %v7962_v8 = vmul.f32 0.25, %v7953_v47 }
0x475e   :  { %v7967_v6 = vsel %vm1272_vm14, %v7963_v62, -inf }
0x475f   :  { %7968 = vmax.xlane.f32.xlu1 %v7967_v6  ;;  %v7964_v46 = vsel %vm1268_vm15, %v7962_v8, -inf }
0x4760   :  { %7965 = vmax.xlane.f32.xlu0 %v7964_v46 }
0x4770   :  { %11334 = vrot.lane.b32.xlu1 %v13727_v40, %s11881_s23 }
0x4774   :  { %8074 = vrot.lane.b32.xlu1 %v13723_v36, %s11881_s23 }
0x4778   :  { %8076 = vrot.lane.b32.xlu1 %v13733_v2, %s11881_s23 }
0x47ec   :  { %v7969_v5 = vpop.xlane.xlu1 %7968 }
0x47ed   :  { %v7971_v12 = vsub.f32 %v7963_v62, %v7969_v5  ;;  %v7966_v29 = vpop.xlane.xlu0 %7965 }
0x47ee   :  { %v7970_v63 = vsub.f32 %v7962_v8, %v7966_v29 }
0x47ef   :  { %v7974_v10 = vmul.f32 1.442695, %v7971_v12 }
0x47f0   :  { %v7972_v44 = vmul.f32 1.442695, %v7970_v63  ;;  %v11335_v19 = vpop.permute.xlu1 %11334 }
0x47f1   :  { %11543 = vpow2.f32 %v7974_v10  ;;  %v11337_v14 = vunpack.i.h.bf16 %v11335_v19  ;;  %v11336_v4 = vunpack.i.l.bf16 %v11335_v19 }
0x47f2   :  { %11545 = vpow2.f32 %v7972_v44 }
0x47f3   :  { %v11061_v21 = vpack.c.bf16 %v11337_v14, %v11336_v4 }
0x47f4   :  { %v8075_v16 = vpop.permute.xlu1 %8074 }
0x47f8   :  { %v8077_v59 = vpop.permute.xlu1 %8076 }
0x47fb   :  { %v11544_v35 = vpop.eup %11543 }
0x47fc   :  { %v7979_v57 = vsel %vm1272_vm14, %v11544_v35, 0.0  ;;  %v11546_v30 = vpop.eup %11545 }
0x47fd   :  { %7980 = vadd.xlane.f32.xlu0 %v7979_v57  ;;  %v7976_v40 = vsel %vm1268_vm15, %v11546_v30, 0.0 }
0x4801   :  { %7977 = vadd.xlane.f32.xlu0 %v7976_v40 }
0x4817   :  { %11329 = vrot.lane.b32.xlu0 %v13738_v41, %s11880_s3 }
0x488a   :  { %v7981_v36 = vpop.xlane.xlu0 %7980 }
0x488b   :  { %11547 = vrcp.f32 %v7981_v36 }
0x488e   :  { %v7978_v2 = vpop.xlane.xlu0 %7977 }
0x488f   :  { %11549 = vrcp.f32 %v7978_v2 }
0x4892   :  { %v11330_v17 = vpop.permute.xlu0 %11329 }
0x4893   :  { %v11332_v3 = vunpack.i.h.bf16 %v11330_v17  ;;  %v11331_v58 = vunpack.i.l.bf16 %v11330_v17 }
0x4895   :  { %v11055_v7 = vpack.c.bf16 %v11332_v3, %v11331_v58  ;;  %v11548_v18 = vpop.eup %11547 }
0x4896   :  { %v7985_v51 = vmul.f32 %v11548_v18, %v11544_v35 }
0x4897   :  { %11057 = vmatprep.subr.msk.bf16.mxu1 %vm12365_vm13, %v11055_v7 }
0x4898   :  { %11060 = vmatpush3.bf16.msk.msra.mxu1 %vm12365_vm13, %v11055_v7 }
0x4899   :  { %v11550_v1 = vpop.eup %11549  ;;  %11063 = vmatprep.subr.msk.bf16.mxu1 %vm12151_vm2, %v11061_v21 }
0x489a   :  { %v7984_v9 = vmul.f32 %v11550_v1, %v11546_v30 }
0x489c   :  { %10173 = vmatprep.mubr.msk.f32.mxu1 %vm1268_vm15, %v7984_v9 }
0x489d   :  { %10174 = vmatmul.mubr.msk.f32.vlgmr.msra.gmra.mrb[72].mxu1 %vm1268_vm15, %v7985_v51 }
0x489e   :  { %10180 = vmatprep.mubr.msk.f32.mxu1 %vm383_vm1, %v8075_v16 }
0x48a1   :  { %11066 = vmatpush3.bf16.xpose.msk.msra.mxu1 %vm12151_vm2, %v11061_v21 }
0x48a8   :  { %10181 = vmatmul.mubr.msk.f32.vlgmr.msra.gmra.mrb[74].mxu1 %vm383_vm1, %v8077_v59 }
0x4970   :  { %v10175_v53 = vpop.f32.mrb[72].mxu1 }
0x4971   :  { %v8065_v13 = vpop.f32.mrb[73].mxu1 }
0x497b   :  { %v10182_v43 = vpop.f32.mrb[74].mxu1 }
0x497c   :  { %v8166_v22 = vmul.f32 0.25, %v10182_v43  ;;  %v8156_v28 = vpop.f32.mrb[75].mxu1 }
0x497d   :  { %v8165_v15 = vmul.f32 0.25, %v8156_v28 }
0x497e   :  { %v8170_v49 = vsel %vm1272_vm14, %v8166_v22, -inf }
0x497f   :  { %8171 = vmax.xlane.f32.xlu1 %v8170_v49  ;;  %v8167_v24 = vsel %vm1268_vm15, %v8165_v15, -inf }
0x4980   :  { %8168 = vmax.xlane.f32.xlu0 %v8167_v24 }
0x4990   :  { %8279 = vrot.lane.b32.xlu1 %v7862_v20, %s11882_s10 }
0x4994   :  { %8281 = vrot.lane.b32.xlu1 %v13790_v60, %s11882_s10 }
0x4998   :  { %8287 = vrot.lane.b32.xlu1 %v8065_v13, %s11883_s27 }
0x4a0c   :  { %v8172_v34 = vpop.xlane.xlu1 %8171 }
0x4a0d   :  { %v8174_v31 = vsub.f32 %v8166_v22, %v8172_v34  ;;  %v8169_v25 = vpop.xlane.xlu0 %8168 }
0x4a0e   :  { %v8173_v48 = vsub.f32 %v8165_v15, %v8169_v25 }
0x4a0f   :  { %v8177_v33 = vmul.f32 1.442695, %v8174_v31 }
0x4a10   :  { %v8175_v37 = vmul.f32 1.442695, %v8173_v48 }
0x4a11   :  { %11551 = vpow2.f32 %v8177_v33 }
0x4a12   :  { %11553 = vpow2.f32 %v8175_v37 }
0x4a1b   :  { %v11552_v61 = vpop.eup %11551 }
0x4a1c   :  { %v8182_v39 = vsel %vm1272_vm14, %v11552_v61, 0.0  ;;  %v11554_v55 = vpop.eup %11553 }
0x4a1d   :  { %8183 = vadd.xlane.f32.xlu0 %v8182_v39  ;;  %v8179_v0 = vsel %vm1268_vm15, %v11554_v55, 0.0 }
0x4a21   :  { %8180 = vadd.xlane.f32.xlu0 %v8179_v0 }
0x4a37   :  { %11339 = vrot.lane.b32.xlu0 %v13738_v41, %s11881_s23 }
0x4a3b   :  { %8289 = vrot.lane.b32.xlu0 %v10175_v53, %s11883_s27 }
0x4aaa   :  { %v8184_v42 = vpop.xlane.xlu0 %8183 }
0x4aab   :  { %11555 = vrcp.f32 %v8184_v42 }
0x4aae   :  { %v8181_v45 = vpop.xlane.xlu0 %8180 }
0x4aaf   :  { %11557 = vrcp.f32 %v8181_v45 }
0x4ab2   :  { %v11340_v60 = vpop.permute.xlu0 %11339 }
0x4ab3   :  { %v11342_v20 = vunpack.i.h.bf16 %v11340_v60  ;;  %v11341_v27 = vunpack.i.l.bf16 %v11340_v60 }
0x4ab5   :  { %v11067_v62 = vpack.c.bf16 %v11342_v20, %v11341_v27  ;;  %v11556_v47 = vpop.eup %11555 }
0x4ab6   :  { %v8188_v6 = vmul.f32 %v11556_v47, %v11552_v61  ;;  %v8290_v5 = vpop.permute.xlu0 %8289 }
0x4ab7   :  { %11069 = vmatprep.subr.msk.bf16.mxu0 %vm12365_vm13, %v11067_v62 }
0x4ab8   :  { %11072 = vmatpush3.bf16.msk.msra.mxu0 %vm12365_vm13, %v11067_v62 }
0x4ab9   :  { %v11558_v8 = vpop.eup %11557  ;;  %11075 = vmatprep.subr.msk.bf16.mxu0 %vm12212_vm9, %v13163_v52 }
0x4aba   :  { %v8187_v41 = vmul.f32 %v11558_v8, %v11554_v55 }
0x4abc   :  { %10187 = vmatprep.mubr.msk.f32.mxu0 %vm1268_vm15, %v8187_v41 }
0x4abd   :  { %10188 = vmatmul.mubr.msk.f32.vlgmr.msra.gmra.mrb[68].mxu0 %vm1268_vm15, %v8188_v6 }
0x4ac1   :  { %11078 = vmatpush3.bf16.xpose.msk.msra.mxu0 %vm12212_vm9, %v13163_v52 }
0x4ac2   :  { %11081 = vmatprep.subr.msk.bf16.mxu0 %vm12212_vm9, %v13165_v56 }
0x4ac9   :  { %11084 = vmatpush3.bf16.xpose.msk.msra.mxu0 %vm12212_vm9, %v13165_v56  ;;  %v8280_v56 = vpop.permute.xlu1 %8279 }
0x4aca   :  { %11087 = vmatprep.subr.msk.bf16.mxu0 %vm12212_vm9, %v13176_v54 }
0x4acd   :  { %v8282_v46 = vpop.permute.xlu1 %8281 }
0x4ace   :  { %v8302_v63 = vsel %vm383_vm1, %v13762_v26, %v8282_v46 }
0x4acf   :  { %v8304_v10 = vsel %vm484_vm5, %v8302_v63, %v8290_v5 }
0x4ad1   :  { %11090 = vmatpush3.bf16.xpose.msk.msra.mxu0 %vm12212_vm9, %v13176_v54  ;;  %v8288_v12 = vpop.permute.xlu1 %8287  ;;  %v8301_v54 = vsel %vm383_vm1, %v13764_v11, %v8280_v56 }
0x4ad2   :  { %11093 = vmatprep.subr.msk.bf16.mxu0 %vm12212_vm9, %v13184_v32  ;;  %v8303_v23 = vsel %vm484_vm5, %v8301_v54, %v8288_v12 }
0x4ad9   :  { %11096 = vmatpush3.bf16.xpose.msk.msra.mxu0 %vm12212_vm9, %v13184_v32 }
0x4b90   :  { %v10189_v38 = vpop.f32.mrb[68].mxu0 }
0x4b91   :  { %8297 = vrot.lane.b32.xlu0 %v10189_v38, %s11884_s17  ;;  %v8268_v52 = vpop.f32.mrb[69].mxu0 }
0x4b92   :  { %8295 = vrot.lane.b32.xlu1 %v8268_v52, %s11884_s17 }
0x4c03   :  { %v8298_v29 = vpop.permute.xlu0 %8297 }
0x4c04   :  { %v8296_v32 = vpop.permute.xlu1 %8295  ;;  %v8306_v35 = vsel %vm2015_vm3, %v8304_v10, %v8298_v29 }
0x4c05   :  { %v8305_v44 = vsel %vm2015_vm3, %v8303_v23, %v8296_v32 }
0x4c06   :  { %10206 = vmatprep.mubr.msk.f32.mxu0 %vm863_vm8, %v8305_v44 }
0x4c07   :  { %10207 = vmatmul.mubr.msk.f32.vlgmr.msra.gmra.mrb[70].mxu0 %vm863_vm8, %v8306_v35 }
0x4c08   :  { %11784 = shalt.err (!%p11781_p6)
}
0x4c09   :  { %s11785_s0 = scalar_lea.hbm %s12050_s30, 32 }
0x4c0a   :  { %p11786_p7 = scmp.ne.s32.totalorder %s12050_s30, %s11785_s0  ;;  %p11789_p8 = scmp.lt.u32.totalorder %s11785_s0, %s12050_s30 }
0x4c0c   :  { %p11791_p9 = pnand %p11789_p8, %p11786_p7 }
0x4c0e   :  { %11794 = shalt.err (!%p11791_p9)
}
0x4c0f   :  { %8420 = dma.vmem_to_hbm [thread:$0]  %s8418_s24, 32, %s12050_s30, [#allocation19]   ;;  %v4854_v26 = vrot.slane %v13244_v50, 4  ;;  %v11574_v30 = vld [vmem:[%s12040_s5] ss:$0 sm:$0xff]  ;;  %vm8398_vm0 = vcmask 1040384  }
0x4c10   :  { %s11886_s30 = smov [#allocation17]  }
0x4c11   :  { %v4855_v11 = vadd.f32 %v4854_v26, %v13244_v50  ;;  %s8407_s5 = sshll.u32 %s11886_s30, 4  ;;  %s8408_s5 = int_to_ptr.vmem [resolvable:$true] %s8407_s5 }
0x4c12   :  { %s11795_s13 = scalar_lea.vmem %s8408_s5, 32  ;;  %p11800_p11 = scmp.lt.s32.totalorder %s8408_s5, %s8408_s5 }
0x4c13   :  { %v4856_v19 = vrot.slane %v4855_v11, 2  ;;  %p11796_p10 = scmp.ne.s32.totalorder %s8408_s5, %s11795_s13  ;;  %p11801_p12 = scmp.lt.s32.totalorder %s11795_s13, %s11795_s13 }
0x4c15   :  { %v4857_v3 = vadd.f32 %v4856_v19, %v4855_v11  ;;  %p11802_p13 = por %p11801_p12, %p11800_p11 }
0x4c17   :  { %v4858_v21 = vrot.slane %v4857_v3, 1  ;;  %p11803_p0 = pnand %p11802_p13, %p11796_p10 }
0x4c19   :  { %v4859_v51 = vadd.f32 %v4858_v21, %v4857_v3 }
0x4c1b   :  { %v4861_v16 = vmul.f32 0.083333336, %v4859_v51 }
0x4cda   :  { %v10208_v57 = vpop.f32.mrb[70].mxu0 }
0x4cdb   :  { %v8385_v40 = vadd.f32 %v11574_v30, %v10208_v57  ;;  %v8379_v36 = vpop.f32.mrb[71].mxu0 }
0x4cdc   :  { %v8380_v2 = vadd.f32 %v11574_v30, %v8379_v36 }
0x4cdd   :  { %v8389_v17 = vsel %vm2140_vm11, %v8385_v40, 0.0 }
0x4cde   :  { %v8388_v14 = vsel %vm863_vm8, %v8380_v2, 0.0 }
0x4cdf   :  { %v8390_v4 = vadd.f32 %v8389_v17, %v8388_v14 }
0x4ce1   :  { %v8391_v58 = vrot.slane %v8390_v4, 4 }
0x4ce3   :  { %v8392_v7 = vadd.f32 %v8391_v58, %v8390_v4 }
0x4ce5   :  { %v8393_v18 = vrot.slane %v8392_v7, 2 }
0x4ce7   :  { %v8394_v1 = vadd.f32 %v8393_v18, %v8392_v7 }
0x4ce9   :  { %v8395_v9 = vrot.slane %v8394_v1, 1 }
0x4ceb   :  { %v8396_v50 = vadd.f32 %v8395_v9, %v8394_v1 }
0x4ced   :  { %v8397_v59 = vmul.f32 0.083333336, %v8396_v50 }
0x4cef   :  { %v8399_v53 = vsel %vm8398_vm0, %v4861_v16, %v8397_v59 }
0x4cf0   :  { %8400 = vst.msk [vmem:[#allocation17] sm:$0x3] %vm582_vm10, %v8399_v53 }
0x4cf1   :  { %11806 = shalt.err (!%p11803_p0)
}
0x4cf2   :  { %s11807_s21 = scalar_lea.hbm %s12045_s12, 32 }
0x4cf3   :  { %p11808_p1 = scmp.ne.s32.totalorder %s12045_s12, %s11807_s21  ;;  %p11811_p2 = scmp.lt.u32.totalorder %s11807_s21, %s12045_s12 }
0x4cf5   :  { %p11813_p3 = pnand %p11811_p2, %p11808_p1 }
0x4cf7   :  { %11816 = shalt.err (!%p11813_p3)
}
0x4cf8   :  { %8410 = dma.vmem_to_hbm [thread:$0]  %s8408_s5, 32, %s12045_s12, [#allocation4]  }
0x4cf9   :  { %11827 = dma.done.wait [#allocation4], 32  }
0x4cfa   :  { %11828 = vsyncadd [#allocation4], 4294967264 }
0x4cfb   :  { %11829 = dma.done.wait [#allocation19], 32  }
0x4cfc   :  { %11830 = vsyncadd [#allocation19], 4294967264 }
0x4cfd   :  { %8427 = vsyncpa [#allocation3], 1 }
0x4cfe   :  { %8428 = vsyncpa [#allocation6], 1 }
0x4cff   :  { %8429 = vsyncpa [#allocation9], 1 }
0x4d00   :  { %8430 = vsyncpa [#allocation12], 1 }
0x4d01   :  { %8431 = vsyncpa [#allocation15], 1 }
0x4d02   :  { %8432 = vsyncpa [#allocation4], 1 }
0x4d03   :  { %8433 = vsyncpa [#allocation19], 1 }

</bundles_post_ra>
